<compile_context>
chip_gen: v6e
topology: v6e:2x2x1
jax: 0.10.0
libtpu: 0.0.40
codegen_flags: <defaults>
</compile_context>

<pallas_src>
import functools

import jax
import jax.numpy as jnp
import numpy as np
from jax.experimental import pallas as pl
from jax.experimental.pallas import tpu as pltpu


def _round_up(x, m):
    return (x + m - 1) // m * m


# ---------------------------------------------------------------------------
# Tiled matmul + bias + (optional) ReLU kernel:  y = act(x @ w + b)
# ---------------------------------------------------------------------------
def _matmul_bias_act_kernel(x_ref, w_ref, b_ref, o_ref, acc_ref, *, apply_relu):
    @pl.when(pl.program_id(2) == 0)
    def _():
        acc_ref[...] = jnp.zeros_like(acc_ref)

    acc_ref[...] += jnp.dot(x_ref[...], w_ref[...],
                            preferred_element_type=jnp.float32)

    @pl.when(pl.program_id(2) == pl.num_programs(2) - 1)
    def _():
        r = acc_ref[...] + b_ref[...]
        if apply_relu:
            r = jnp.maximum(r, 0.0)
        o_ref[...] = r.astype(o_ref.dtype)


def matmul_bias_act(x, w, b, *, relu):
    """y = relu?(x @ w + b) on the MXU.  x:(M,K), w:(K,N), b:(N,)."""
    M, K = x.shape
    K2, N = w.shape
    assert K == K2 and b.shape == (N,)

    TN = 128                       # lane-dense output tiles
    TK = 256
    Np = _round_up(N, TN)
    Kp = _round_up(K, TK)
    if M >= 256:
        TM = 256
        Mp = _round_up(M, TM)
    else:
        TM = _round_up(M, 8)
        Mp = TM

    xp = jnp.pad(x, ((0, Mp - M), (0, Kp - K)))
    wp = jnp.pad(w, ((0, Kp - K), (0, Np - N)))
    bp = jnp.pad(b.reshape(1, N), ((0, 0), (0, Np - N)))

    grid = (Mp // TM, Np // TN, Kp // TK)
    kernel = functools.partial(_matmul_bias_act_kernel, apply_relu=relu)

    out = pl.pallas_call(
        kernel,
        out_shape=jax.ShapeDtypeStruct((Mp, Np), x.dtype),
        grid_spec=pltpu.PrefetchScalarGridSpec(
            num_scalar_prefetch=0,
            grid=grid,
            in_specs=[
                pl.BlockSpec((TM, TK), lambda i, j, k: (i, k)),
                pl.BlockSpec((TK, TN), lambda i, j, k: (k, j)),
                pl.BlockSpec((1, TN), lambda i, j, k: (0, j)),
            ],
            out_specs=pl.BlockSpec((TM, TN), lambda i, j, k: (i, j)),
            scratch_shapes=[pltpu.VMEM((TM, TN), jnp.float32)],
        ),
        compiler_params=pltpu.CompilerParams(
            dimension_semantics=("parallel", "parallel", "arbitrary"),
            vmem_limit_bytes=32 * 1024 * 1024,   # safe on v5e/v6e/v7x
        ),
    )(xp, wp, bp)
    return out[:M, :N]


# ---------------------------------------------------------------------------
# im2col (PyTorch weight ordering: C_in slowest, then kD, kH, kW)
# ---------------------------------------------------------------------------
def _im2col_3d(x, ksize, strides, padding):
    """x:(B,C,D,H,W) -> (patches (B*Do*Ho*Wo, C*kd*kh*kw), (B,Do,Ho,Wo))."""
    B, C, D, H, W = x.shape
    kd, kh, kw = ksize
    sd, sh, sw = strides
    pd, ph, pw = padding
    xp = jnp.pad(x, ((0, 0), (0, 0), (pd, pd), (ph, ph), (pw, pw)))
    Dp, Hp, Wp = D + 2 * pd, H + 2 * ph, W + 2 * pw
    Do = (Dp - kd) // sd + 1
    Ho = (Hp - kh) // sh + 1
    Wo = (Wp - kw) // sw + 1
    cols = []
    for dk in range(kd):
        for hk in range(kh):
            for wk in range(kw):
                sl = jax.lax.slice(
                    xp,
                    (0, 0, dk, hk, wk),
                    (B, C,
                     dk + (Do - 1) * sd + 1,
                     hk + (Ho - 1) * sh + 1,
                     wk + (Wo - 1) * sw + 1),
                    (1, 1, sd, sh, sw),
                )
                cols.append(sl)                      # (B, C, Do, Ho, Wo)
    patches = jnp.stack(cols, axis=0)                # (Kflat, B, C, Do, Ho, Wo)
    patches = patches.transpose(1, 3, 4, 5, 2, 0)    # (B, Do, Ho, Wo, C, Kflat)
    return patches.reshape(B * Do * Ho * Wo, C * kd * kh * kw), (B, Do, Ho, Wo)


def conv3d_relu(x, w, b, strides, padding):
    """Conv3d + ReLU via im2col + Pallas matmul. x:(B,C,D,H,W), w:(O,I,kd,kh,kw)."""
    O = w.shape[0]
    patches, (B, Do, Ho, Wo) = _im2col_3d(x, w.shape[2:], strides, padding)
    wmat = w.reshape(O, -1).T                        # (C_in*kd*kh*kw, O)
    y = matmul_bias_act(patches, wmat, b, relu=True)  # (B*Do*Ho*Wo, O)
    return y.reshape(B, Do, Ho, Wo, O).transpose(0, 4, 1, 2, 3)


def conv2d_relu(x, w, b, strides, padding):
    y = conv3d_relu(x[:, :, None], w[:, :, None], b,
                    (1,) + tuple(strides), (0,) + tuple(padding))
    return y[:, :, 0]


# ---------------------------------------------------------------------------
# Fused head kernel: concat + feature Linear + ReLU + actor/critic
# ---------------------------------------------------------------------------
def _head_kernel(f3_ref, f2_ref, wa_ref, wb_ref, bf_ref,
                 wact_ref, bact_ref, wcrit_ref, bcrit_ref,
                 logits_ref, value_ref):
    # Fused concat: cat([f3, f2], -1) @ W == f3 @ W[:H] + f2 @ W[H:]
    feat = jnp.dot(f3_ref[...], wa_ref[...], preferred_element_type=jnp.float32)
    feat = feat + jnp.dot(f2_ref[...], wb_ref[...],
                          preferred_element_type=jnp.float32)
    feat = jnp.maximum(feat + bf_ref[...], 0.0)
    logits_ref[...] = (jnp.dot(feat, wact_ref[...],
                               preferred_element_type=jnp.float32)
                       + bact_ref[...]).astype(logits_ref.dtype)
    value_ref[...] = (jnp.dot(feat, wcrit_ref[...],
                              preferred_element_type=jnp.float32)
                      + bcrit_ref[...]).astype(value_ref.dtype)


def fused_head(f3, f2, wfeat, bfeat, wact, bact, wcrit, bcrit):
    B, H = f3.shape
    Bp = _round_up(B, 8)
    NA, NC = wact.shape[1], wcrit.shape[1]
    NAp, NCp = _round_up(NA, 128), _round_up(NC, 128)

    f3p = jnp.pad(f3, ((0, Bp - B), (0, 0)))
    f2p = jnp.pad(f2, ((0, Bp - B), (0, 0)))
    wa, wb = wfeat[:H], wfeat[H:]
    bf = bfeat.reshape(1, H)
    wactp = jnp.pad(wact, ((0, 0), (0, NAp - NA)))
    bactp = jnp.pad(bact.reshape(1, NA), ((0, 0), (0, NAp - NA)))
    wcritp = jnp.pad(wcrit, ((0, 0), (0, NCp - NC)))
    bcritp = jnp.pad(bcrit.reshape(1, NC), ((0, 0), (0, NCp - NC)))

    vmem = pl.BlockSpec(memory_space=pltpu.MemorySpace.VMEM)
    logits, value = pl.pallas_call(
        _head_kernel,
        out_shape=(jax.ShapeDtypeStruct((Bp, NAp), f3.dtype),
                   jax.ShapeDtypeStruct((Bp, NCp), f3.dtype)),
        in_specs=[vmem] * 9,
        out_specs=(vmem, vmem),
        compiler_params=pltpu.CompilerParams(
            vmem_limit_bytes=32 * 1024 * 1024),
    )(f3p, f2p, wa, wb, bf, wactp, bactp, wcritp, bcritp)
    return logits[:B, :NA], value[:B, :NC]


# ---------------------------------------------------------------------------
# Full forward pass (Pallas path)
# ---------------------------------------------------------------------------
def forward_pallas(x, params):
    """x: (B, D, 1, H, W)  ->  (logits, value)."""
    xc = jnp.transpose(x, (0, 2, 1, 3, 4))                  # (B,1,D,H,W)
    B = x.shape[0]

    # 3-D feature branch
    h = conv3d_relu(xc, params["w3d1"], params["b3d1"], (2, 4, 4), (0, 2, 2))
    h = conv3d_relu(h, params["w3d2"], params["b3d2"], (2, 2, 2), (0, 1, 1))
    f3 = matmul_bias_act(h.reshape(B, -1), params["w3lin"], params["b3lin"],
                         relu=True)

    # 2-D feature branch (last frame)
    x2 = xc[:, :, -1]                                       # (B,1,H,W)
    g = conv2d_relu(x2, params["w2d1"], params["b2d1"], (4, 4), (2, 2))
    g = conv2d_relu(g, params["w2d2"], params["b2d2"], (2, 2), (1, 1))
    f2 = matmul_bias_act(g.reshape(B, -1), params["w2lin"], params["b2lin"],
                         relu=True)

    # fused concat + feature linear + actor/critic heads
    return fused_head(f3, f2, params["wfeat"], params["bfeat"],
                      params["wact"], params["bact"],
                      params["wcrit"], params["bcrit"])


# ---------------------------------------------------------------------------
# Pure-JAX reference (lax.conv path) for correctness checking
# ---------------------------------------------------------------------------
def forward_ref(x, params):
    xc = jnp.transpose(x, (0, 2, 1, 3, 4))
    dn3 = ("NCDHW", "OIDHW", "NCDHW")
    dn2 = ("NCHW", "OIHW", "NCHW")

    h = jax.lax.conv_general_dilated(xc, params["w3d1"], (2, 4, 4),
                                     [(0, 0), (2, 2), (2, 2)],
                                     dimension_numbers=dn3)
    h = jax.nn.relu(h + params["b3d1"].reshape(1, -1, 1, 1, 1))
    h = jax.lax.conv_general_dilated(h, params["w3d2"], (2, 2, 2),
                                     [(0, 0), (1, 1), (1, 1)],
                                     dimension_numbers=dn3)
    h = jax.nn.relu(h + params["b3d2"].reshape(1, -1, 1, 1, 1))
    f3 = jax.nn.relu(h.reshape(h.shape[0], -1) @ params["w3lin"]
                     + params["b3lin"])

    x2 = xc[:, :, -1]
    g = jax.lax.conv_general_dilated(x2, params["w2d1"], (4, 4),
                                     [(2, 2), (2, 2)], dimension_numbers=dn2)
    g = jax.nn.relu(g + params["b2d1"].reshape(1, -1, 1, 1))
    g = jax.lax.conv_general_dilated(g, params["w2d2"], (2, 2),
                                     [(1, 1), (1, 1)], dimension_numbers=dn2)
    g = jax.nn.relu(g + params["b2d2"].reshape(1, -1, 1, 1))
    f2 = jax.nn.relu(g.reshape(g.shape[0], -1) @ params["w2lin"]
                     + params["b2lin"])

    feat = jax.nn.relu(jnp.concatenate([f3, f2], axis=-1) @ params["wfeat"]
                       + params["bfeat"])
    logits = feat @ params["wact"] + params["bact"]
    value = feat @ params["wcrit"] + params["bcrit"]
    return logits, value


# ---------------------------------------------------------------------------
# Deterministic parameter init (PyTorch-like uniform(-1/sqrt(fan_in), ...))
# ---------------------------------------------------------------------------
def _uniform(key, shape, fan_in):
    bound = 1.0 / float(np.sqrt(fan_in))
    return jax.random.uniform(key, shape, jnp.float32, -bound, bound)


def init_params(key, hidden_dim, num_outputs):
    ks = jax.random.split(key, 18)
    p = {}
    p["w3d1"] = _uniform(ks[0], (16, 1, 3, 8, 8), 1 * 3 * 8 * 8)
    p["b3d1"] = _uniform(ks[1], (16,), 1 * 3 * 8 * 8)
    p["w3d2"] = _uniform(ks[2], (32, 16, 3, 4, 4), 16 * 3 * 4 * 4)
    p["b3d2"] = _uniform(ks[3], (32,), 16 * 3 * 4 * 4)
    p["w3lin"] = _uniform(ks[4], (32 * 2 * 10 * 10, hidden_dim), 32 * 2 * 10 * 10)
    p["b3lin"] = _uniform(ks[5], (hidden_dim,), 32 * 2 * 10 * 10)
    p["w2d1"] = _uniform(ks[6], (16, 1, 8, 8), 1 * 8 * 8)
    p["b2d1"] = _uniform(ks[7], (16,), 1 * 8 * 8)
    p["w2d2"] = _uniform(ks[8], (32, 16, 4, 4), 16 * 4 * 4)
    p["b2d2"] = _uniform(ks[9], (32,), 16 * 4 * 4)
    p["w2lin"] = _uniform(ks[10], (32 * 10 * 10, hidden_dim), 32 * 10 * 10)
    p["b2lin"] = _uniform(ks[11], (hidden_dim,), 32 * 10 * 10)
    p["wfeat"] = _uniform(ks[12], (2 * hidden_dim, hidden_dim), 2 * hidden_dim)
    p["bfeat"] = _uniform(ks[13], (hidden_dim,), 2 * hidden_dim)
    p["wact"] = _uniform(ks[14], (hidden_dim, num_outputs), hidden_dim)
    p["bact"] = _uniform(ks[15], (num_outputs,), hidden_dim)
    p["wcrit"] = _uniform(ks[16], (hidden_dim, 1), hidden_dim)
    p["bcrit"] = _uniform(ks[17], (1,), hidden_dim)
    return p


if __name__ == "__main__":
    HIDDEN = 128        # cfg.hidden_dim (chosen lane-dense)
    NUM_OUTPUTS = 6
    # D/H/W are constrained by the hard-coded Linear in_features
    # (32*2*10*10 and 32*10*10) -> H = W = 80, D = 12 frames.
    B, D, H, W = 2, 12, 80, 80

    key = jax.random.PRNGKey(0)
    k_x, k_p = jax.random.split(key)
    x = jax.random.normal(k_x, (B, D, 1, H, W), dtype=jnp.float32)
    params = init_params(k_p, HIDDEN, NUM_OUTPUTS)

    logits, value = jax.jit(forward_pallas)(x, params)
    logits, value = jax.block_until_ready((logits, value))

    ref_logits, ref_value = jax.jit(forward_ref)(x, params)
    ref_logits, ref_value = jax.block_until_ready((ref_logits, ref_value))

    assert logits.shape == (B, NUM_OUTPUTS) and value.shape == (B, 1)
    assert jnp.allclose(logits, ref_logits, atol=5e-3, rtol=5e-3), (
        "logits mismatch, max err "
        f"{float(jnp.max(jnp.abs(logits - ref_logits)))}")
    assert jnp.allclose(value, ref_value, atol=5e-3, rtol=5e-3), (
        "value mismatch, max err "
        f"{float(jnp.max(jnp.abs(value - ref_value)))}")

    print("KERNEL_OK")
</pallas_src>

<mosaic_0001>
module attributes {stable_mosaic.version = 11 : i64} {
  func.func @_matmul_bias_act_kernel(%arg0: i32, %arg1: i32, %arg2: i32, %arg3: memref<256x256xf32, #tpu.memory_space<vmem>>, %arg4: memref<256x128xf32, #tpu.memory_space<vmem>>, %arg5: memref<1x128xf32, #tpu.memory_space<vmem>>, %arg6: memref<256x128xf32, #tpu.memory_space<vmem>>, %arg7: memref<256x128xf32, #tpu.memory_space<vmem>>) attributes {dimension_semantics = [#tpu.dimension_semantics<parallel>, #tpu.dimension_semantics<parallel>, #tpu.dimension_semantics<arbitrary>], iteration_bounds = array<i64: 16, 1, 1>, scalar_prefetch = 0 : i64, scratch_operands = 1 : i64, tpu.core_type = #tpu.core_type<tc>, window_params = [{transform_indices = @transform_0, window_bounds = array<i64: 256, 256>}, {transform_indices = @transform_1, window_bounds = array<i64: 256, 128>}, {transform_indices = @transform_2, window_bounds = array<i64: 1, 128>}, {transform_indices = @transform_3, window_bounds = array<i64: 256, 128>}]} {
    %c0_i32 = arith.constant 0 : i32
    %0 = arith.cmpi eq, %arg2, %c0_i32 : i32
    %1 = arith.extui %0 : i1 to i32
    %c0_i32_0 = arith.constant 0 : i32
    %2 = arith.cmpi ne, %1, %c0_i32_0 : i32
    scf.if %2 {
      %cst_10 = arith.constant 0.000000e+00 : f32
      %12 = vector.broadcast %cst_10 : f32 to vector<256x128xf32>
      %c0_11 = arith.constant 0 : index
      %c0_12 = arith.constant 0 : index
      %13 = vector.load %arg7[%c0_11, %c0_12] : memref<256x128xf32, #tpu.memory_space<vmem>>, vector<256x128xf32>
      tpu.vector_store %arg7[%c0_11, %c0_12], %12 {strides = array<i32>} : memref<256x128xf32, #tpu.memory_space<vmem>>, vector<256x128xf32>,
    } else {
    }
    %c0 = arith.constant 0 : index
    %c0_1 = arith.constant 0 : index
    %3 = vector.load %arg7[%c0, %c0_1] : memref<256x128xf32, #tpu.memory_space<vmem>>, vector<256x128xf32>
    %c0_2 = arith.constant 0 : index
    %c0_3 = arith.constant 0 : index
    %4 = vector.load %arg3[%c0_2, %c0_3] : memref<256x256xf32, #tpu.memory_space<vmem>>, vector<256x256xf32>
    %c0_4 = arith.constant 0 : index
    %c0_5 = arith.constant 0 : index
    %5 = vector.load %arg4[%c0_4, %c0_5] : memref<256x128xf32, #tpu.memory_space<vmem>>, vector<256x128xf32>
    %cst = arith.constant dense<0.000000e+00> : vector<256x128xf32>
    %6 = tpu.matmul %4, %5, %cst {dimension_numbers = #tpu.dot_dimension_numbers<[1], [0], [0], [1], [0, 0, 1, 1], [], []>} : vector<256x256xf32>, vector<256x128xf32>, vector<256x128xf32> -> vector<256x128xf32>
    %7 = arith.addf %3, %6 : vector<256x128xf32>
    %c0_6 = arith.constant 0 : index
    %c0_7 = arith.constant 0 : index
    %8 = vector.load %arg7[%c0_6, %c0_7] : memref<256x128xf32, #tpu.memory_space<vmem>>, vector<256x128xf32>
    tpu.vector_store %arg7[%c0_6, %c0_7], %7 {strides = array<i32>} : memref<256x128xf32, #tpu.memory_space<vmem>>, vector<256x128xf32>,
    %c0_i32_8 = arith.constant 0 : i32
    %9 = arith.cmpi eq, %arg2, %c0_i32_8 : i32
    %10 = arith.extui %9 : i1 to i32
    %c0_i32_9 = arith.constant 0 : i32
    %11 = arith.cmpi ne, %10, %c0_i32_9 : i32
    scf.if %11 {
      %c0_10 = arith.constant 0 : index
      %c0_11 = arith.constant 0 : index
      %12 = vector.load %arg7[%c0_10, %c0_11] : memref<256x128xf32, #tpu.memory_space<vmem>>, vector<256x128xf32>
      %c0_12 = arith.constant 0 : index
      %c0_13 = arith.constant 0 : index
      %13 = vector.load %arg5[%c0_12, %c0_13] : memref<1x128xf32, #tpu.memory_space<vmem>>, vector<1x128xf32>
      %14 = vector.broadcast %13 : vector<1x128xf32> to vector<256x128xf32>
      %15 = arith.addf %12, %14 : vector<256x128xf32>
      %cst_14 = arith.constant 0.000000e+00 : f32
      %16 = vector.broadcast %cst_14 : f32 to vector<256x128xf32>
      %17 = arith.maximumf %15, %16 : vector<256x128xf32>
      %c0_15 = arith.constant 0 : index
      %c0_16 = arith.constant 0 : index
      %18 = vector.load %arg6[%c0_15, %c0_16] : memref<256x128xf32, #tpu.memory_space<vmem>>, vector<256x128xf32>
      tpu.vector_store %arg6[%c0_15, %c0_16], %17 {strides = array<i32>} : memref<256x128xf32, #tpu.memory_space<vmem>>, vector<256x128xf32>,
    } else {
    }
    return
  }
  func.func @transform_0(%arg0: i32, %arg1: i32, %arg2: i32) -> (i32, i32) {
    %c0_i32 = arith.constant 0 : i32
    return %arg0, %arg2 : i32, i32
  }
  func.func @transform_1(%arg0: i32, %arg1: i32, %arg2: i32) -> (i32, i32) {
    %c0_i32 = arith.constant 0 : i32
    return %arg2, %arg1 : i32, i32
  }
  func.func @transform_2(%arg0: i32, %arg1: i32, %arg2: i32) -> (i32, i32) {
    %c0_i32 = arith.constant 0 : i32
    %c0_i32_0 = arith.constant 0 : i32
    return %c0_i32, %arg1 : i32, i32
  }
  func.func @transform_3(%arg0: i32, %arg1: i32, %arg2: i32) -> (i32, i32) {
    %c0_i32 = arith.constant 0 : i32
    return %arg0, %arg1 : i32, i32
  }
}

module attributes {stable_mosaic.version = 11 : i64} {
  func.func @_matmul_bias_act_kernel(%arg0: i32, %arg1: i32, %arg2: i32, %arg3: memref<256x256xf32, #tpu.memory_space<vmem>>, %arg4: memref<256x128xf32, #tpu.memory_space<vmem>>, %arg5: memref<1x128xf32, #tpu.memory_space<vmem>>, %arg6: memref<256x128xf32, #tpu.memory_space<vmem>>, %arg7: memref<256x128xf32, #tpu.memory_space<vmem>>) attributes {dimension_semantics = [#tpu.dimension_semantics<parallel>, #tpu.dimension_semantics<parallel>, #tpu.dimension_semantics<arbitrary>], iteration_bounds = array<i64: 2, 1, 3>, scalar_prefetch = 0 : i64, scratch_operands = 1 : i64, tpu.core_type = #tpu.core_type<tc>, window_params = [{transform_indices = @transform_0, window_bounds = array<i64: 256, 256>}, {transform_indices = @transform_1, window_bounds = array<i64: 256, 128>}, {transform_indices = @transform_2, window_bounds = array<i64: 1, 128>}, {transform_indices = @transform_3, window_bounds = array<i64: 256, 128>}]} {
    %c0_i32 = arith.constant 0 : i32
    %0 = arith.cmpi eq, %arg2, %c0_i32 : i32
    %1 = arith.extui %0 : i1 to i32
    %c0_i32_0 = arith.constant 0 : i32
    %2 = arith.cmpi ne, %1, %c0_i32_0 : i32
    scf.if %2 {
      %cst_9 = arith.constant 0.000000e+00 : f32
      %12 = vector.broadcast %cst_9 : f32 to vector<256x128xf32>
      %c0_10 = arith.constant 0 : index
      %c0_11 = arith.constant 0 : index
      %13 = vector.load %arg7[%c0_10, %c0_11] : memref<256x128xf32, #tpu.memory_space<vmem>>, vector<256x128xf32>
      tpu.vector_store %arg7[%c0_10, %c0_11], %12 {strides = array<i32>} : memref<256x128xf32, #tpu.memory_space<vmem>>, vector<256x128xf32>,
    } else {
    }
    %c0 = arith.constant 0 : index
    %c0_1 = arith.constant 0 : index
    %3 = vector.load %arg7[%c0, %c0_1] : memref<256x128xf32, #tpu.memory_space<vmem>>, vector<256x128xf32>
    %c0_2 = arith.constant 0 : index
    %c0_3 = arith.constant 0 : index
    %4 = vector.load %arg3[%c0_2, %c0_3] : memref<256x256xf32, #tpu.memory_space<vmem>>, vector<256x256xf32>
    %c0_4 = arith.constant 0 : index
    %c0_5 = arith.constant 0 : index
    %5 = vector.load %arg4[%c0_4, %c0_5] : memref<256x128xf32, #tpu.memory_space<vmem>>, vector<256x128xf32>
    %cst = arith.constant dense<0.000000e+00> : vector<256x128xf32>
    %6 = tpu.matmul %4, %5, %cst {dimension_numbers = #tpu.dot_dimension_numbers<[1], [0], [0], [1], [0, 0, 1, 1], [], []>} : vector<256x256xf32>, vector<256x128xf32>, vector<256x128xf32> -> vector<256x128xf32>
    %7 = arith.addf %3, %6 : vector<256x128xf32>
    %c0_6 = arith.constant 0 : index
    %c0_7 = arith.constant 0 : index
    %8 = vector.load %arg7[%c0_6, %c0_7] : memref<256x128xf32, #tpu.memory_space<vmem>>, vector<256x128xf32>
    tpu.vector_store %arg7[%c0_6, %c0_7], %7 {strides = array<i32>} : memref<256x128xf32, #tpu.memory_space<vmem>>, vector<256x128xf32>,
    %c2_i32 = arith.constant 2 : i32
    %9 = arith.cmpi eq, %arg2, %c2_i32 : i32
    %10 = arith.extui %9 : i1 to i32
    %c0_i32_8 = arith.constant 0 : i32
    %11 = arith.cmpi ne, %10, %c0_i32_8 : i32
    scf.if %11 {
      %c0_9 = arith.constant 0 : index
      %c0_10 = arith.constant 0 : index
      %12 = vector.load %arg7[%c0_9, %c0_10] : memref<256x128xf32, #tpu.memory_space<vmem>>, vector<256x128xf32>
      %c0_11 = arith.constant 0 : index
      %c0_12 = arith.constant 0 : index
      %13 = vector.load %arg5[%c0_11, %c0_12] : memref<1x128xf32, #tpu.memory_space<vmem>>, vector<1x128xf32>
      %14 = vector.broadcast %13 : vector<1x128xf32> to vector<256x128xf32>
      %15 = arith.addf %12, %14 : vector<256x128xf32>
      %cst_13 = arith.constant 0.000000e+00 : f32
      %16 = vector.broadcast %cst_13 : f32 to vector<256x128xf32>
      %17 = arith.maximumf %15, %16 : vector<256x128xf32>
      %c0_14 = arith.constant 0 : index
      %c0_15 = arith.constant 0 : index
      %18 = vector.load %arg6[%c0_14, %c0_15] : memref<256x128xf32, #tpu.memory_space<vmem>>, vector<256x128xf32>
      tpu.vector_store %arg6[%c0_14, %c0_15], %17 {strides = array<i32>} : memref<256x128xf32, #tpu.memory_space<vmem>>, vector<256x128xf32>,
    } else {
    }
    return
  }
  func.func @transform_0(%arg0: i32, %arg1: i32, %arg2: i32) -> (i32, i32) {
    %c0_i32 = arith.constant 0 : i32
    return %arg0, %arg2 : i32, i32
  }
  func.func @transform_1(%arg0: i32, %arg1: i32, %arg2: i32) -> (i32, i32) {
    %c0_i32 = arith.constant 0 : i32
    return %arg2, %arg1 : i32, i32
  }
  func.func @transform_2(%arg0: i32, %arg1: i32, %arg2: i32) -> (i32, i32) {
    %c0_i32 = arith.constant 0 : i32
    %c0_i32_0 = arith.constant 0 : i32
    return %c0_i32, %arg1 : i32, i32
  }
  func.func @transform_3(%arg0: i32, %arg1: i32, %arg2: i32) -> (i32, i32) {
    %c0_i32 = arith.constant 0 : i32
    return %arg0, %arg1 : i32, i32
  }
}

module attributes {stable_mosaic.version = 11 : i64} {
  func.func @_matmul_bias_act_kernel(%arg0: i32, %arg1: i32, %arg2: i32, %arg3: memref<8x256xf32, #tpu.memory_space<vmem>>, %arg4: memref<256x128xf32, #tpu.memory_space<vmem>>, %arg5: memref<1x128xf32, #tpu.memory_space<vmem>>, %arg6: memref<8x128xf32, #tpu.memory_space<vmem>>, %arg7: memref<8x128xf32, #tpu.memory_space<vmem>>) attributes {dimension_semantics = [#tpu.dimension_semantics<parallel>, #tpu.dimension_semantics<parallel>, #tpu.dimension_semantics<arbitrary>], iteration_bounds = array<i64: 1, 1, 25>, scalar_prefetch = 0 : i64, scratch_operands = 1 : i64, tpu.core_type = #tpu.core_type<tc>, window_params = [{transform_indices = @transform_0, window_bounds = array<i64: 8, 256>}, {transform_indices = @transform_1, window_bounds = array<i64: 256, 128>}, {transform_indices = @transform_2, window_bounds = array<i64: 1, 128>}, {transform_indices = @transform_3, window_bounds = array<i64: 8, 128>}]} {
    %c0_i32 = arith.constant 0 : i32
    %0 = arith.cmpi eq, %arg2, %c0_i32 : i32
    %1 = arith.extui %0 : i1 to i32
    %c0_i32_0 = arith.constant 0 : i32
    %2 = arith.cmpi ne, %1, %c0_i32_0 : i32
    scf.if %2 {
      %cst_9 = arith.constant 0.000000e+00 : f32
      %12 = vector.broadcast %cst_9 : f32 to vector<8x128xf32>
      %c0_10 = arith.constant 0 : index
      %c0_11 = arith.constant 0 : index
      %13 = vector.load %arg7[%c0_10, %c0_11] : memref<8x128xf32, #tpu.memory_space<vmem>>, vector<8x128xf32>
      tpu.vector_store %arg7[%c0_10, %c0_11], %12 {strides = array<i32>} : memref<8x128xf32, #tpu.memory_space<vmem>>, vector<8x128xf32>,
    } else {
    }
    %c0 = arith.constant 0 : index
    %c0_1 = arith.constant 0 : index
    %3 = vector.load %arg7[%c0, %c0_1] : memref<8x128xf32, #tpu.memory_space<vmem>>, vector<8x128xf32>
    %c0_2 = arith.constant 0 : index
    %c0_3 = arith.constant 0 : index
    %4 = vector.load %arg3[%c0_2, %c0_3] : memref<8x256xf32, #tpu.memory_space<vmem>>, vector<8x256xf32>
    %c0_4 = arith.constant 0 : index
    %c0_5 = arith.constant 0 : index
    %5 = vector.load %arg4[%c0_4, %c0_5] : memref<256x128xf32, #tpu.memory_space<vmem>>, vector<256x128xf32>
    %cst = arith.constant dense<0.000000e+00> : vector<8x128xf32>
    %6 = tpu.matmul %4, %5, %cst {dimension_numbers = #tpu.dot_dimension_numbers<[1], [0], [0], [1], [0, 0, 1, 1], [], []>} : vector<8x256xf32>, vector<256x128xf32>, vector<8x128xf32> -> vector<8x128xf32>
    %7 = arith.addf %3, %6 : vector<8x128xf32>
    %c0_6 = arith.constant 0 : index
    %c0_7 = arith.constant 0 : index
    %8 = vector.load %arg7[%c0_6, %c0_7] : memref<8x128xf32, #tpu.memory_space<vmem>>, vector<8x128xf32>
    tpu.vector_store %arg7[%c0_6, %c0_7], %7 {strides = array<i32>} : memref<8x128xf32, #tpu.memory_space<vmem>>, vector<8x128xf32>,
    %c24_i32 = arith.constant 24 : i32
    %9 = arith.cmpi eq, %arg2, %c24_i32 : i32
    %10 = arith.extui %9 : i1 to i32
    %c0_i32_8 = arith.constant 0 : i32
    %11 = arith.cmpi ne, %10, %c0_i32_8 : i32
    scf.if %11 {
      %c0_9 = arith.constant 0 : index
      %c0_10 = arith.constant 0 : index
      %12 = vector.load %arg7[%c0_9, %c0_10] : memref<8x128xf32, #tpu.memory_space<vmem>>, vector<8x128xf32>
      %c0_11 = arith.constant 0 : index
      %c0_12 = arith.constant 0 : index
      %13 = vector.load %arg5[%c0_11, %c0_12] : memref<1x128xf32, #tpu.memory_space<vmem>>, vector<1x128xf32>
      %14 = vector.broadcast %13 : vector<1x128xf32> to vector<8x128xf32>
      %15 = arith.addf %12, %14 : vector<8x128xf32>
      %cst_13 = arith.constant 0.000000e+00 : f32
      %16 = vector.broadcast %cst_13 : f32 to vector<8x128xf32>
      %17 = arith.maximumf %15, %16 : vector<8x128xf32>
      %c0_14 = arith.constant 0 : index
      %c0_15 = arith.constant 0 : index
      %18 = vector.load %arg6[%c0_14, %c0_15] : memref<8x128xf32, #tpu.memory_space<vmem>>, vector<8x128xf32>
      tpu.vector_store %arg6[%c0_14, %c0_15], %17 {strides = array<i32>} : memref<8x128xf32, #tpu.memory_space<vmem>>, vector<8x128xf32>,
    } else {
    }
    return
  }
  func.func @transform_0(%arg0: i32, %arg1: i32, %arg2: i32) -> (i32, i32) {
    %c0_i32 = arith.constant 0 : i32
    return %arg0, %arg2 : i32, i32
  }
  func.func @transform_1(%arg0: i32, %arg1: i32, %arg2: i32) -> (i32, i32) {
    %c0_i32 = arith.constant 0 : i32
    return %arg2, %arg1 : i32, i32
  }
  func.func @transform_2(%arg0: i32, %arg1: i32, %arg2: i32) -> (i32, i32) {
    %c0_i32 = arith.constant 0 : i32
    %c0_i32_0 = arith.constant 0 : i32
    return %c0_i32, %arg1 : i32, i32
  }
  func.func @transform_3(%arg0: i32, %arg1: i32, %arg2: i32) -> (i32, i32) {
    %c0_i32 = arith.constant 0 : i32
    return %arg0, %arg1 : i32, i32
  }
}

module attributes {stable_mosaic.version = 11 : i64} {
  func.func @_matmul_bias_act_kernel(%arg0: i32, %arg1: i32, %arg2: i32, %arg3: memref<256x256xf32, #tpu.memory_space<vmem>>, %arg4: memref<256x128xf32, #tpu.memory_space<vmem>>, %arg5: memref<1x128xf32, #tpu.memory_space<vmem>>, %arg6: memref<256x128xf32, #tpu.memory_space<vmem>>, %arg7: memref<256x128xf32, #tpu.memory_space<vmem>>) attributes {dimension_semantics = [#tpu.dimension_semantics<parallel>, #tpu.dimension_semantics<parallel>, #tpu.dimension_semantics<arbitrary>], iteration_bounds = array<i64: 4, 1, 1>, scalar_prefetch = 0 : i64, scratch_operands = 1 : i64, tpu.core_type = #tpu.core_type<tc>, window_params = [{transform_indices = @transform_0, window_bounds = array<i64: 256, 256>}, {transform_indices = @transform_1, window_bounds = array<i64: 256, 128>}, {transform_indices = @transform_2, window_bounds = array<i64: 1, 128>}, {transform_indices = @transform_3, window_bounds = array<i64: 256, 128>}]} {
    %c0_i32 = arith.constant 0 : i32
    %0 = arith.cmpi eq, %arg2, %c0_i32 : i32
    %1 = arith.extui %0 : i1 to i32
    %c0_i32_0 = arith.constant 0 : i32
    %2 = arith.cmpi ne, %1, %c0_i32_0 : i32
    scf.if %2 {
      %cst_10 = arith.constant 0.000000e+00 : f32
      %12 = vector.broadcast %cst_10 : f32 to vector<256x128xf32>
      %c0_11 = arith.constant 0 : index
      %c0_12 = arith.constant 0 : index
      %13 = vector.load %arg7[%c0_11, %c0_12] : memref<256x128xf32, #tpu.memory_space<vmem>>, vector<256x128xf32>
      tpu.vector_store %arg7[%c0_11, %c0_12], %12 {strides = array<i32>} : memref<256x128xf32, #tpu.memory_space<vmem>>, vector<256x128xf32>,
    } else {
    }
    %c0 = arith.constant 0 : index
    %c0_1 = arith.constant 0 : index
    %3 = vector.load %arg7[%c0, %c0_1] : memref<256x128xf32, #tpu.memory_space<vmem>>, vector<256x128xf32>
    %c0_2 = arith.constant 0 : index
    %c0_3 = arith.constant 0 : index
    %4 = vector.load %arg3[%c0_2, %c0_3] : memref<256x256xf32, #tpu.memory_space<vmem>>, vector<256x256xf32>
    %c0_4 = arith.constant 0 : index
    %c0_5 = arith.constant 0 : index
    %5 = vector.load %arg4[%c0_4, %c0_5] : memref<256x128xf32, #tpu.memory_space<vmem>>, vector<256x128xf32>
    %cst = arith.constant dense<0.000000e+00> : vector<256x128xf32>
    %6 = tpu.matmul %4, %5, %cst {dimension_numbers = #tpu.dot_dimension_numbers<[1], [0], [0], [1], [0, 0, 1, 1], [], []>} : vector<256x256xf32>, vector<256x128xf32>, vector<256x128xf32> -> vector<256x128xf32>
    %7 = arith.addf %3, %6 : vector<256x128xf32>
    %c0_6 = arith.constant 0 : index
    %c0_7 = arith.constant 0 : index
    %8 = vector.load %arg7[%c0_6, %c0_7] : memref<256x128xf32, #tpu.memory_space<vmem>>, vector<256x128xf32>
    tpu.vector_store %arg7[%c0_6, %c0_7], %7 {strides = array<i32>} : memref<256x128xf32, #tpu.memory_space<vmem>>, vector<256x128xf32>,
    %c0_i32_8 = arith.constant 0 : i32
    %9 = arith.cmpi eq, %arg2, %c0_i32_8 : i32
    %10 = arith.extui %9 : i1 to i32
    %c0_i32_9 = arith.constant 0 : i32
    %11 = arith.cmpi ne, %10, %c0_i32_9 : i32
    scf.if %11 {
      %c0_10 = arith.constant 0 : index
      %c0_11 = arith.constant 0 : index
      %12 = vector.load %arg7[%c0_10, %c0_11] : memref<256x128xf32, #tpu.memory_space<vmem>>, vector<256x128xf32>
      %c0_12 = arith.constant 0 : index
      %c0_13 = arith.constant 0 : index
      %13 = vector.load %arg5[%c0_12, %c0_13] : memref<1x128xf32, #tpu.memory_space<vmem>>, vector<1x128xf32>
      %14 = vector.broadcast %13 : vector<1x128xf32> to vector<256x128xf32>
      %15 = arith.addf %12, %14 : vector<256x128xf32>
      %cst_14 = arith.constant 0.000000e+00 : f32
      %16 = vector.broadcast %cst_14 : f32 to vector<256x128xf32>
      %17 = arith.maximumf %15, %16 : vector<256x128xf32>
      %c0_15 = arith.constant 0 : index
      %c0_16 = arith.constant 0 : index
      %18 = vector.load %arg6[%c0_15, %c0_16] : memref<256x128xf32, #tpu.memory_space<vmem>>, vector<256x128xf32>
      tpu.vector_store %arg6[%c0_15, %c0_16], %17 {strides = array<i32>} : memref<256x128xf32, #tpu.memory_space<vmem>>, vector<256x128xf32>,
    } else {
    }
    return
  }
  func.func @transform_0(%arg0: i32, %arg1: i32, %arg2: i32) -> (i32, i32) {
    %c0_i32 = arith.constant 0 : i32
    return %arg0, %arg2 : i32, i32
  }
  func.func @transform_1(%arg0: i32, %arg1: i32, %arg2: i32) -> (i32, i32) {
    %c0_i32 = arith.constant 0 : i32
    return %arg2, %arg1 : i32, i32
  }
  func.func @transform_2(%arg0: i32, %arg1: i32, %arg2: i32) -> (i32, i32) {
    %c0_i32 = arith.constant 0 : i32
    %c0_i32_0 = arith.constant 0 : i32
    return %c0_i32, %arg1 : i32, i32
  }
  func.func @transform_3(%arg0: i32, %arg1: i32, %arg2: i32) -> (i32, i32) {
    %c0_i32 = arith.constant 0 : i32
    return %arg0, %arg1 : i32, i32
  }
}

module attributes {stable_mosaic.version = 11 : i64} {
  func.func @_matmul_bias_act_kernel(%arg0: i32, %arg1: i32, %arg2: i32, %arg3: memref<200x256xf32, #tpu.memory_space<vmem>>, %arg4: memref<256x128xf32, #tpu.memory_space<vmem>>, %arg5: memref<1x128xf32, #tpu.memory_space<vmem>>, %arg6: memref<200x128xf32, #tpu.memory_space<vmem>>, %arg7: memref<200x128xf32, #tpu.memory_space<vmem>>) attributes {dimension_semantics = [#tpu.dimension_semantics<parallel>, #tpu.dimension_semantics<parallel>, #tpu.dimension_semantics<arbitrary>], iteration_bounds = array<i64: 1, 1, 1>, scalar_prefetch = 0 : i64, scratch_operands = 1 : i64, tpu.core_type = #tpu.core_type<tc>, window_params = [{transform_indices = @transform_0, window_bounds = array<i64: 200, 256>}, {transform_indices = @transform_1, window_bounds = array<i64: 256, 128>}, {transform_indices = @transform_2, window_bounds = array<i64: 1, 128>}, {transform_indices = @transform_3, window_bounds = array<i64: 200, 128>}]} {
    %c0_i32 = arith.constant 0 : i32
    %0 = arith.cmpi eq, %arg2, %c0_i32 : i32
    %1 = arith.extui %0 : i1 to i32
    %c0_i32_0 = arith.constant 0 : i32
    %2 = arith.cmpi ne, %1, %c0_i32_0 : i32
    scf.if %2 {
      %cst_10 = arith.constant 0.000000e+00 : f32
      %12 = vector.broadcast %cst_10 : f32 to vector<200x128xf32>
      %c0_11 = arith.constant 0 : index
      %c0_12 = arith.constant 0 : index
      %13 = vector.load %arg7[%c0_11, %c0_12] : memref<200x128xf32, #tpu.memory_space<vmem>>, vector<200x128xf32>
      tpu.vector_store %arg7[%c0_11, %c0_12], %12 {strides = array<i32>} : memref<200x128xf32, #tpu.memory_space<vmem>>, vector<200x128xf32>,
    } else {
    }
    %c0 = arith.constant 0 : index
    %c0_1 = arith.constant 0 : index
    %3 = vector.load %arg7[%c0, %c0_1] : memref<200x128xf32, #tpu.memory_space<vmem>>, vector<200x128xf32>
    %c0_2 = arith.constant 0 : index
    %c0_3 = arith.constant 0 : index
    %4 = vector.load %arg3[%c0_2, %c0_3] : memref<200x256xf32, #tpu.memory_space<vmem>>, vector<200x256xf32>
    %c0_4 = arith.constant 0 : index
    %c0_5 = arith.constant 0 : index
    %5 = vector.load %arg4[%c0_4, %c0_5] : memref<256x128xf32, #tpu.memory_space<vmem>>, vector<256x128xf32>
    %cst = arith.constant dense<0.000000e+00> : vector<200x128xf32>
    %6 = tpu.matmul %4, %5, %cst {dimension_numbers = #tpu.dot_dimension_numbers<[1], [0], [0], [1], [0, 0, 1, 1], [], []>} : vector<200x256xf32>, vector<256x128xf32>, vector<200x128xf32> -> vector<200x128xf32>
    %7 = arith.addf %3, %6 : vector<200x128xf32>
    %c0_6 = arith.constant 0 : index
    %c0_7 = arith.constant 0 : index
    %8 = vector.load %arg7[%c0_6, %c0_7] : memref<200x128xf32, #tpu.memory_space<vmem>>, vector<200x128xf32>
    tpu.vector_store %arg7[%c0_6, %c0_7], %7 {strides = array<i32>} : memref<200x128xf32, #tpu.memory_space<vmem>>, vector<200x128xf32>,
    %c0_i32_8 = arith.constant 0 : i32
    %9 = arith.cmpi eq, %arg2, %c0_i32_8 : i32
    %10 = arith.extui %9 : i1 to i32
    %c0_i32_9 = arith.constant 0 : i32
    %11 = arith.cmpi ne, %10, %c0_i32_9 : i32
    scf.if %11 {
      %c0_10 = arith.constant 0 : index
      %c0_11 = arith.constant 0 : index
      %12 = vector.load %arg7[%c0_10, %c0_11] : memref<200x128xf32, #tpu.memory_space<vmem>>, vector<200x128xf32>
      %c0_12 = arith.constant 0 : index
      %c0_13 = arith.constant 0 : index
      %13 = vector.load %arg5[%c0_12, %c0_13] : memref<1x128xf32, #tpu.memory_space<vmem>>, vector<1x128xf32>
      %14 = vector.broadcast %13 : vector<1x128xf32> to vector<200x128xf32>
      %15 = arith.addf %12, %14 : vector<200x128xf32>
      %cst_14 = arith.constant 0.000000e+00 : f32
      %16 = vector.broadcast %cst_14 : f32 to vector<200x128xf32>
      %17 = arith.maximumf %15, %16 : vector<200x128xf32>
      %c0_15 = arith.constant 0 : index
      %c0_16 = arith.constant 0 : index
      %18 = vector.load %arg6[%c0_15, %c0_16] : memref<200x128xf32, #tpu.memory_space<vmem>>, vector<200x128xf32>
      tpu.vector_store %arg6[%c0_15, %c0_16], %17 {strides = array<i32>} : memref<200x128xf32, #tpu.memory_space<vmem>>, vector<200x128xf32>,
    } else {
    }
    return
  }
  func.func @transform_0(%arg0: i32, %arg1: i32, %arg2: i32) -> (i32, i32) {
    %c0_i32 = arith.constant 0 : i32
    return %arg0, %arg2 : i32, i32
  }
  func.func @transform_1(%arg0: i32, %arg1: i32, %arg2: i32) -> (i32, i32) {
    %c0_i32 = arith.constant 0 : i32
    return %arg2, %arg1 : i32, i32
  }
  func.func @transform_2(%arg0: i32, %arg1: i32, %arg2: i32) -> (i32, i32) {
    %c0_i32 = arith.constant 0 : i32
    %c0_i32_0 = arith.constant 0 : i32
    return %c0_i32, %arg1 : i32, i32
  }
  func.func @transform_3(%arg0: i32, %arg1: i32, %arg2: i32) -> (i32, i32) {
    %c0_i32 = arith.constant 0 : i32
    return %arg0, %arg1 : i32, i32
  }
}

module attributes {stable_mosaic.version = 11 : i64} {
  func.func @_matmul_bias_act_kernel(%arg0: i32, %arg1: i32, %arg2: i32, %arg3: memref<8x256xf32, #tpu.memory_space<vmem>>, %arg4: memref<256x128xf32, #tpu.memory_space<vmem>>, %arg5: memref<1x128xf32, #tpu.memory_space<vmem>>, %arg6: memref<8x128xf32, #tpu.memory_space<vmem>>, %arg7: memref<8x128xf32, #tpu.memory_space<vmem>>) attributes {dimension_semantics = [#tpu.dimension_semantics<parallel>, #tpu.dimension_semantics<parallel>, #tpu.dimension_semantics<arbitrary>], iteration_bounds = array<i64: 1, 1, 13>, scalar_prefetch = 0 : i64, scratch_operands = 1 : i64, tpu.core_type = #tpu.core_type<tc>, window_params = [{transform_indices = @transform_0, window_bounds = array<i64: 8, 256>}, {transform_indices = @transform_1, window_bounds = array<i64: 256, 128>}, {transform_indices = @transform_2, window_bounds = array<i64: 1, 128>}, {transform_indices = @transform_3, window_bounds = array<i64: 8, 128>}]} {
    %c0_i32 = arith.constant 0 : i32
    %0 = arith.cmpi eq, %arg2, %c0_i32 : i32
    %1 = arith.extui %0 : i1 to i32
    %c0_i32_0 = arith.constant 0 : i32
    %2 = arith.cmpi ne, %1, %c0_i32_0 : i32
    scf.if %2 {
      %cst_9 = arith.constant 0.000000e+00 : f32
      %12 = vector.broadcast %cst_9 : f32 to vector<8x128xf32>
      %c0_10 = arith.constant 0 : index
      %c0_11 = arith.constant 0 : index
      %13 = vector.load %arg7[%c0_10, %c0_11] : memref<8x128xf32, #tpu.memory_space<vmem>>, vector<8x128xf32>
      tpu.vector_store %arg7[%c0_10, %c0_11], %12 {strides = array<i32>} : memref<8x128xf32, #tpu.memory_space<vmem>>, vector<8x128xf32>,
    } else {
    }
    %c0 = arith.constant 0 : index
    %c0_1 = arith.constant 0 : index
    %3 = vector.load %arg7[%c0, %c0_1] : memref<8x128xf32, #tpu.memory_space<vmem>>, vector<8x128xf32>
    %c0_2 = arith.constant 0 : index
    %c0_3 = arith.constant 0 : index
    %4 = vector.load %arg3[%c0_2, %c0_3] : memref<8x256xf32, #tpu.memory_space<vmem>>, vector<8x256xf32>
    %c0_4 = arith.constant 0 : index
    %c0_5 = arith.constant 0 : index
    %5 = vector.load %arg4[%c0_4, %c0_5] : memref<256x128xf32, #tpu.memory_space<vmem>>, vector<256x128xf32>
    %cst = arith.constant dense<0.000000e+00> : vector<8x128xf32>
    %6 = tpu.matmul %4, %5, %cst {dimension_numbers = #tpu.dot_dimension_numbers<[1], [0], [0], [1], [0, 0, 1, 1], [], []>} : vector<8x256xf32>, vector<256x128xf32>, vector<8x128xf32> -> vector<8x128xf32>
    %7 = arith.addf %3, %6 : vector<8x128xf32>
    %c0_6 = arith.constant 0 : index
    %c0_7 = arith.constant 0 : index
    %8 = vector.load %arg7[%c0_6, %c0_7] : memref<8x128xf32, #tpu.memory_space<vmem>>, vector<8x128xf32>
    tpu.vector_store %arg7[%c0_6, %c0_7], %7 {strides = array<i32>} : memref<8x128xf32, #tpu.memory_space<vmem>>, vector<8x128xf32>,
    %c12_i32 = arith.constant 12 : i32
    %9 = arith.cmpi eq, %arg2, %c12_i32 : i32
    %10 = arith.extui %9 : i1 to i32
    %c0_i32_8 = arith.constant 0 : i32
    %11 = arith.cmpi ne, %10, %c0_i32_8 : i32
    scf.if %11 {
      %c0_9 = arith.constant 0 : index
      %c0_10 = arith.constant 0 : index
      %12 = vector.load %arg7[%c0_9, %c0_10] : memref<8x128xf32, #tpu.memory_space<vmem>>, vector<8x128xf32>
      %c0_11 = arith.constant 0 : index
      %c0_12 = arith.constant 0 : index
      %13 = vector.load %arg5[%c0_11, %c0_12] : memref<1x128xf32, #tpu.memory_space<vmem>>, vector<1x128xf32>
      %14 = vector.broadcast %13 : vector<1x128xf32> to vector<8x128xf32>
      %15 = arith.addf %12, %14 : vector<8x128xf32>
      %cst_13 = arith.constant 0.000000e+00 : f32
      %16 = vector.broadcast %cst_13 : f32 to vector<8x128xf32>
      %17 = arith.maximumf %15, %16 : vector<8x128xf32>
      %c0_14 = arith.constant 0 : index
      %c0_15 = arith.constant 0 : index
      %18 = vector.load %arg6[%c0_14, %c0_15] : memref<8x128xf32, #tpu.memory_space<vmem>>, vector<8x128xf32>
      tpu.vector_store %arg6[%c0_14, %c0_15], %17 {strides = array<i32>} : memref<8x128xf32, #tpu.memory_space<vmem>>, vector<8x128xf32>,
    } else {
    }
    return
  }
  func.func @transform_0(%arg0: i32, %arg1: i32, %arg2: i32) -> (i32, i32) {
    %c0_i32 = arith.constant 0 : i32
    return %arg0, %arg2 : i32, i32
  }
  func.func @transform_1(%arg0: i32, %arg1: i32, %arg2: i32) -> (i32, i32) {
    %c0_i32 = arith.constant 0 : i32
    return %arg2, %arg1 : i32, i32
  }
  func.func @transform_2(%arg0: i32, %arg1: i32, %arg2: i32) -> (i32, i32) {
    %c0_i32 = arith.constant 0 : i32
    %c0_i32_0 = arith.constant 0 : i32
    return %c0_i32, %arg1 : i32, i32
  }
  func.func @transform_3(%arg0: i32, %arg1: i32, %arg2: i32) -> (i32, i32) {
    %c0_i32 = arith.constant 0 : i32
    return %arg0, %arg1 : i32, i32
  }
}

module attributes {stable_mosaic.version = 11 : i64} {
  func.func @_head_kernel(%arg0: memref<8x128xf32, #tpu.memory_space<vmem>>, %arg1: memref<8x128xf32, #tpu.memory_space<vmem>>, %arg2: memref<128x128xf32, #tpu.memory_space<vmem>>, %arg3: memref<128x128xf32, #tpu.memory_space<vmem>>, %arg4: memref<1x128xf32, #tpu.memory_space<vmem>>, %arg5: memref<128x128xf32, #tpu.memory_space<vmem>>, %arg6: memref<1x128xf32, #tpu.memory_space<vmem>>, %arg7: memref<128x128xf32, #tpu.memory_space<vmem>>, %arg8: memref<1x128xf32, #tpu.memory_space<vmem>>, %arg9: memref<8x128xf32, #tpu.memory_space<vmem>>, %arg10: memref<8x128xf32, #tpu.memory_space<vmem>>) attributes {dimension_semantics = [], scalar_prefetch = 0 : i64, scratch_operands = 0 : i64, tpu.core_type = #tpu.core_type<tc>} {
    %c0 = arith.constant 0 : index
    %c0_0 = arith.constant 0 : index
    %0 = vector.load %arg0[%c0, %c0_0] : memref<8x128xf32, #tpu.memory_space<vmem>>, vector<8x128xf32>
    %c0_1 = arith.constant 0 : index
    %c0_2 = arith.constant 0 : index
    %1 = vector.load %arg2[%c0_1, %c0_2] : memref<128x128xf32, #tpu.memory_space<vmem>>, vector<128x128xf32>
    %cst = arith.constant dense<0.000000e+00> : vector<8x128xf32>
    %2 = tpu.matmul %0, %1, %cst {dimension_numbers = #tpu.dot_dimension_numbers<[1], [0], [0], [1], [0, 0, 1, 1], [], []>} : vector<8x128xf32>, vector<128x128xf32>, vector<8x128xf32> -> vector<8x128xf32>
    %c0_3 = arith.constant 0 : index
    %c0_4 = arith.constant 0 : index
    %3 = vector.load %arg1[%c0_3, %c0_4] : memref<8x128xf32, #tpu.memory_space<vmem>>, vector<8x128xf32>
    %c0_5 = arith.constant 0 : index
    %c0_6 = arith.constant 0 : index
    %4 = vector.load %arg3[%c0_5, %c0_6] : memref<128x128xf32, #tpu.memory_space<vmem>>, vector<128x128xf32>
    %cst_7 = arith.constant dense<0.000000e+00> : vector<8x128xf32>
    %5 = tpu.matmul %3, %4, %cst_7 {dimension_numbers = #tpu.dot_dimension_numbers<[1], [0], [0], [1], [0, 0, 1, 1], [], []>} : vector<8x128xf32>, vector<128x128xf32>, vector<8x128xf32> -> vector<8x128xf32>
    %6 = arith.addf %2, %5 : vector<8x128xf32>
    %c0_8 = arith.constant 0 : index
    %c0_9 = arith.constant 0 : index
    %7 = vector.load %arg4[%c0_8, %c0_9] : memref<1x128xf32, #tpu.memory_space<vmem>>, vector<1x128xf32>
    %8 = vector.broadcast %7 : vector<1x128xf32> to vector<8x128xf32>
    %9 = arith.addf %6, %8 : vector<8x128xf32>
    %cst_10 = arith.constant 0.000000e+00 : f32
    %10 = vector.broadcast %cst_10 : f32 to vector<8x128xf32>
    %11 = arith.maximumf %9, %10 : vector<8x128xf32>
    %c0_11 = arith.constant 0 : index
    %c0_12 = arith.constant 0 : index
    %12 = vector.load %arg5[%c0_11, %c0_12] : memref<128x128xf32, #tpu.memory_space<vmem>>, vector<128x128xf32>
    %cst_13 = arith.constant dense<0.000000e+00> : vector<8x128xf32>
    %13 = tpu.matmul %11, %12, %cst_13 {dimension_numbers = #tpu.dot_dimension_numbers<[1], [0], [0], [1], [0, 0, 1, 1], [], []>} : vector<8x128xf32>, vector<128x128xf32>, vector<8x128xf32> -> vector<8x128xf32>
    %c0_14 = arith.constant 0 : index
    %c0_15 = arith.constant 0 : index
    %14 = vector.load %arg6[%c0_14, %c0_15] : memref<1x128xf32, #tpu.memory_space<vmem>>, vector<1x128xf32>
    %15 = vector.broadcast %14 : vector<1x128xf32> to vector<8x128xf32>
    %16 = arith.addf %13, %15 : vector<8x128xf32>
    %c0_16 = arith.constant 0 : index
    %c0_17 = arith.constant 0 : index
    %17 = vector.load %arg9[%c0_16, %c0_17] : memref<8x128xf32, #tpu.memory_space<vmem>>, vector<8x128xf32>
    tpu.vector_store %arg9[%c0_16, %c0_17], %16 {strides = array<i32>} : memref<8x128xf32, #tpu.memory_space<vmem>>, vector<8x128xf32>,
    %c0_18 = arith.constant 0 : index
    %c0_19 = arith.constant 0 : index
    %18 = vector.load %arg7[%c0_18, %c0_19] : memref<128x128xf32, #tpu.memory_space<vmem>>, vector<128x128xf32>
    %cst_20 = arith.constant dense<0.000000e+00> : vector<8x128xf32>
    %19 = tpu.matmul %11, %18, %cst_20 {dimension_numbers = #tpu.dot_dimension_numbers<[1], [0], [0], [1], [0, 0, 1, 1], [], []>} : vector<8x128xf32>, vector<128x128xf32>, vector<8x128xf32> -> vector<8x128xf32>
    %c0_21 = arith.constant 0 : index
    %c0_22 = arith.constant 0 : index
    %20 = vector.load %arg8[%c0_21, %c0_22] : memref<1x128xf32, #tpu.memory_space<vmem>>, vector<1x128xf32>
    %21 = vector.broadcast %20 : vector<1x128xf32> to vector<8x128xf32>
    %22 = arith.addf %19, %21 : vector<8x128xf32>
    %c0_23 = arith.constant 0 : index
    %c0_24 = arith.constant 0 : index
    %23 = vector.load %arg10[%c0_23, %c0_24] : memref<8x128xf32, #tpu.memory_space<vmem>>, vector<8x128xf32>
    tpu.vector_store %arg10[%c0_23, %c0_24], %22 {strides = array<i32>} : memref<8x128xf32, #tpu.memory_space<vmem>>, vector<8x128xf32>,
    return
  }
}

</mosaic_0001>

<bundles_post_ra>
// kernel: forward_pallas.7
= control target key start
LH: loop header
LB: loop body
LE: loop exit
PB: predicated region body
PF: predicated region fallthrough
CT: control target
= control target key end

     0   :  { %s1122_s12 = smov 0   ;;  %s1124_s13 = smov 0   ;;  %s1459_s0 = inlined_call_operand.vmem [shape: f32[4096,256], index: 0, kind: input, shape index: {}]   ;;  %s1460_s1 = inlined_call_operand.vmem [shape: f32[256,128], index: 1, kind: input, shape index: {}]   ;;  %s1461_s2 = inlined_call_operand.vmem [shape: f32[1,128], index: 2, kind: input, shape index: {}]   ;;  %s1462_s3 = inlined_call_operand.vmem [shape: f32[4096,128], index: 3, kind: output, shape index: {}]  }
   0x1   :  { %s1126_s14 = smov 0  }
   0x2 LB: > { %s32_s15 = sadd.s32 1, %s1095_s13  ;;  %p978_p0 = scmp.ge.s32.totalorder %s1099_s14, 1  ;;  %s1099_s14 = sphi %s1126_s14, %s13_s14   ;;  %s1095_s13 = sphi %s1124_s13, %s1464_s13   ;;  %s1091_s12 = sphi %s1122_s12, %s1463_s12  }
   0x3   : > { %p34_p1 = scmp.ge.s32.totalorder %s32_s15, 16  ;;  %p191_p2 = scmp.lt.s32.totalorder %s1099_s14, 17 }
   0x5   : > { %s1466_s15 = smov (%p34_p1, %s32_s15), 0  ;;  %p192_p3 = pnand %p978_p0, %p191_p2 }
   0x6   : > { %s979_s18 = sshll.u32 (!%p192_p3), %s1091_s12, 5 }
   0x7   : > { %195 = sbr.rel (%p192_p3) target bundleno = 336 (0x150), region = 32  ;;  %p236_p4 = scmp.lt.s32.totalorder (!%p192_p3), %s979_s18, 511 }
   0xc   : > { %v414_v0 = vld [vmem:[%s1460_s1 + $0x78] sm:$0xff]  ;;  %v1101_v1 = vmov 0.0   ;;  %v413_v2 = vld [vmem:[%s1460_s1 + $0x70] sm:$0xff]  ;;  %v412_v3 = vld [vmem:[%s1460_s1 + $0x68] sm:$0xff]  ;;  %s1468_s18 = smov (!%p236_p4, %s979_s18), 511 }
   0xd   : > { %431 = vmatprep.subr.mxu0 %v1101_v1  ;;  %988 = vmatprep.subr.mxu1 %v1101_v1  ;;  %v411_v4 = vld [vmem:[%s1460_s1 + $0x60] sm:$0xff]  ;;  %v410_v5 = vld [vmem:[%s1460_s1 + $0x58] sm:$0xff]  ;;  %v409_v6 = vld [vmem:[%s1460_s1 + $0x50] sm:$0xff]  ;;  %s987_s28 = sshll.u32 %s1468_s18, 4  ;;  %s983_s17 = sshll.u32 %s1468_s18, 3 }
   0xe   : > { %432 = vmatpush1.msra.mxu0 %v414_v0  ;;  %1020 = vmatpush1.msra.mxu1 %v414_v0  ;;  %v408_v7 = vld [vmem:[%s1460_s1 + $0x48] sm:$0xff]  ;;  %v407_v8 = vld [vmem:[%s1460_s1 + $0x40] sm:$0xff]  ;;  %v406_v9 = vld [vmem:[%s1460_s1 + $0x38] sm:$0xff]  ;;  %s1302_s8 = scalar_lea.vmem %s1459_s0, %s987_s28  ;;  %s1386_s21 = scalar_lea.vmem %s1462_s3, %s983_s17 }
   0xf   : > { %433 = vmatprep.subr.mxu0 %v1101_v1  ;;  %989 = vmatprep.subr.mxu1 %v1101_v1  ;;  %v405_v10 = vld [vmem:[%s1460_s1 + $0x30] sm:$0xff]  ;;  %v404_v11 = vld [vmem:[%s1460_s1 + $0x28] sm:$0xff]  ;;  %v403_v12 = vld [vmem:[%s1460_s1 + $0x20] sm:$0xff] }
  0x10   : > { %434 = vmatpush1.msra.mxu0 %v413_v2  ;;  %1021 = vmatpush1.msra.mxu1 %v413_v2  ;;  %v402_v13 = vld [vmem:[%s1460_s1 + $0x18] sm:$0xff]  ;;  %v401_v14 = vld [vmem:[%s1460_s1 + $0x10] sm:$0xff]  ;;  %v400_v15 = vld [vmem:[%s1460_s1 + $0x8] sm:$0xff] }
  0x11   : > { %435 = vmatprep.subr.mxu0 %v1101_v1  ;;  %990 = vmatprep.subr.mxu1 %v1101_v1  ;;  %v399_v16 = vld [vmem:[%s1460_s1] sm:$0xff]  ;;  %v430_v17 = vld [vmem:[%s1460_s1 + $0xf8] sm:$0xff]  ;;  %v429_v18 = vld [vmem:[%s1460_s1 + $0xf0] sm:$0xff] }
  0x12   : > { %436 = vmatpush1.msra.mxu0 %v412_v3  ;;  %1022 = vmatpush1.msra.mxu1 %v412_v3  ;;  %v428_v19 = vld [vmem:[%s1460_s1 + $0xe8] sm:$0xff]  ;;  %v427_v20 = vld [vmem:[%s1460_s1 + $0xe0] sm:$0xff]  ;;  %v426_v21 = vld [vmem:[%s1460_s1 + $0xd8] sm:$0xff] }
  0x13   : > { %437 = vmatprep.subr.mxu0 %v1101_v1  ;;  %991 = vmatprep.subr.mxu1 %v1101_v1  ;;  %v425_v22 = vld [vmem:[%s1460_s1 + $0xd0] sm:$0xff]  ;;  %v424_v23 = vld [vmem:[%s1460_s1 + $0xc8] sm:$0xff]  ;;  %v423_v24 = vld [vmem:[%s1460_s1 + $0xc0] sm:$0xff] }
  0x14   : > { %438 = vmatpush1.msra.mxu0 %v411_v4  ;;  %1023 = vmatpush1.msra.mxu1 %v411_v4  ;;  %v422_v25 = vld [vmem:[%s1460_s1 + $0xb8] sm:$0xff]  ;;  %v421_v26 = vld [vmem:[%s1460_s1 + $0xb0] sm:$0xff]  ;;  %v420_v27 = vld [vmem:[%s1460_s1 + $0xa8] sm:$0xff] }
  0x15   : > { %439 = vmatprep.subr.mxu0 %v1101_v1  ;;  %992 = vmatprep.subr.mxu1 %v1101_v1  ;;  %v419_v28 = vld [vmem:[%s1460_s1 + $0xa0] sm:$0xff]  ;;  %v418_v29 = vld [vmem:[%s1460_s1 + $0x98] sm:$0xff]  ;;  %v417_v30 = vld [vmem:[%s1460_s1 + $0x90] sm:$0xff] }
  0x16   : > { %440 = vmatpush1.msra.mxu0 %v410_v5  ;;  %1024 = vmatpush1.msra.mxu1 %v410_v5  ;;  %v416_v31 = vld [vmem:[%s1460_s1 + $0x88] sm:$0xff]  ;;  %v415_v32 = vld [vmem:[%s1460_s1 + $0x80] sm:$0xff]  ;;  %v338_v37 = vld [vmem:[%s1302_s8 + $0x18] sm:$0xff] }
  0x17   : > { %441 = vmatprep.subr.mxu0 %v1101_v1  ;;  %993 = vmatprep.subr.mxu1 %v1101_v1  ;;  %v336_v33 = vld [vmem:[%s1302_s8 + $0x8] sm:$0xff]  ;;  %v335_v35 = vld [vmem:[%s1302_s8] sm:$0xff]  ;;  %v370_v38 = vld [vmem:[%s1302_s8 + $0x118] sm:$0xff] }
  0x18   : > { %442 = vmatpush1.msra.mxu0 %v409_v6  ;;  %1025 = vmatpush1.msra.mxu1 %v409_v6  ;;  %v368_v34 = vld [vmem:[%s1302_s8 + $0x108] sm:$0xff]  ;;  %v367_v36 = vld [vmem:[%s1302_s8 + $0x100] sm:$0xff]  ;;  %v337_v39 = vld [vmem:[%s1302_s8 + $0x10] sm:$0xff] }
  0x19   : > { %443 = vmatprep.subr.mxu0 %v1101_v1  ;;  %994 = vmatprep.subr.mxu1 %v1101_v1  ;;  %v369_v40 = vld [vmem:[%s1302_s8 + $0x110] sm:$0xff]  ;;  %v340_v41 = vld [vmem:[%s1302_s8 + $0x28] sm:$0xff]  ;;  %v339_v43 = vld [vmem:[%s1302_s8 + $0x20] sm:$0xff] }
  0x1a   : > { %444 = vmatpush1.msra.mxu0 %v408_v7  ;;  %1026 = vmatpush1.msra.mxu1 %v408_v7  ;;  %v372_v42 = vld [vmem:[%s1302_s8 + $0x128] sm:$0xff]  ;;  %v371_v44 = vld [vmem:[%s1302_s8 + $0x120] sm:$0xff]  ;;  %v342_v45 = vld [vmem:[%s1302_s8 + $0x38] sm:$0xff] }
  0x1b   : > { %445 = vmatprep.subr.mxu0 %v1101_v1  ;;  %995 = vmatprep.subr.mxu1 %v1101_v1  ;;  %v374_v46 = vld [vmem:[%s1302_s8 + $0x138] sm:$0xff]  ;;  %v341_v47 = vld [vmem:[%s1302_s8 + $0x30] sm:$0xff]  ;;  %v344_v49 = vld [vmem:[%s1302_s8 + $0x48] sm:$0xff] }
  0x1c   : > { %446 = vmatpush1.msra.mxu0 %v407_v8  ;;  %1027 = vmatpush1.msra.mxu1 %v407_v8  ;;  %v373_v48 = vld [vmem:[%s1302_s8 + $0x130] sm:$0xff]  ;;  %v376_v50 = vld [vmem:[%s1302_s8 + $0x148] sm:$0xff]  ;;  %v343_v51 = vld [vmem:[%s1302_s8 + $0x40] sm:$0xff] }
  0x1d   : > { %447 = vmatprep.subr.mxu0 %v1101_v1  ;;  %996 = vmatprep.subr.mxu1 %v1101_v1  ;;  %v375_v52 = vld [vmem:[%s1302_s8 + $0x140] sm:$0xff]  ;;  %v346_v53 = vld [vmem:[%s1302_s8 + $0x58] sm:$0xff]  ;;  %v345_v55 = vld [vmem:[%s1302_s8 + $0x50] sm:$0xff] }
  0x1e   : > { %448 = vmatpush1.msra.mxu0 %v406_v9  ;;  %1028 = vmatpush1.msra.mxu1 %v406_v9  ;;  %v378_v54 = vld [vmem:[%s1302_s8 + $0x158] sm:$0xff]  ;;  %v377_v56 = vld [vmem:[%s1302_s8 + $0x150] sm:$0xff]  ;;  %v348_v57 = vld [vmem:[%s1302_s8 + $0x68] sm:$0xff] }
  0x1f   : > { %449 = vmatprep.subr.mxu0 %v1101_v1  ;;  %997 = vmatprep.subr.mxu1 %v1101_v1  ;;  %v380_v58 = vld [vmem:[%s1302_s8 + $0x168] sm:$0xff]  ;;  %v347_v59 = vld [vmem:[%s1302_s8 + $0x60] sm:$0xff]  ;;  %v350_v61 = vld [vmem:[%s1302_s8 + $0x78] sm:$0xff] }
  0x20   : > { %450 = vmatpush1.msra.mxu0 %v405_v10  ;;  %1029 = vmatpush1.msra.mxu1 %v405_v10  ;;  %v379_v60 = vld [vmem:[%s1302_s8 + $0x160] sm:$0xff]  ;;  %v382_v62 = vld [vmem:[%s1302_s8 + $0x178] sm:$0xff]  ;;  %v349_v63 = vld [vmem:[%s1302_s8 + $0x70] sm:$0xff] }
  0x21   : > { %451 = vmatprep.subr.mxu0 %v1101_v1  ;;  %998 = vmatprep.subr.mxu1 %v1101_v1  ;;  %v381_v0 = vld [vmem:[%s1302_s8 + $0x170] sm:$0xff]  ;;  %v384_v2 = vld [vmem:[%s1302_s8 + $0x188] sm:$0xff]  ;;  %v351_v3 = vld [vmem:[%s1302_s8 + $0x80] sm:$0xff] }
  0x22   : > { %452 = vmatpush1.msra.mxu0 %v404_v11  ;;  %1030 = vmatpush1.msra.mxu1 %v404_v11  ;;  %v383_v4 = vld [vmem:[%s1302_s8 + $0x180] sm:$0xff]  ;;  %v354_v5 = vld [vmem:[%s1302_s8 + $0x98] sm:$0xff]  ;;  %v353_v7 = vld [vmem:[%s1302_s8 + $0x90] sm:$0xff] }
  0x23   : > { %453 = vmatprep.subr.mxu0 %v1101_v1  ;;  %999 = vmatprep.subr.mxu1 %v1101_v1  ;;  %v386_v6 = vld [vmem:[%s1302_s8 + $0x198] sm:$0xff]  ;;  %v385_v8 = vld [vmem:[%s1302_s8 + $0x190] sm:$0xff]  ;;  %v356_v9 = vld [vmem:[%s1302_s8 + $0xa8] sm:$0xff] }
  0x24   : > { %454 = vmatpush1.msra.mxu0 %v403_v12  ;;  %1031 = vmatpush1.msra.mxu1 %v403_v12  ;;  %v388_v10 = vld [vmem:[%s1302_s8 + $0x1a8] sm:$0xff]  ;;  %v355_v11 = vld [vmem:[%s1302_s8 + $0xa0] sm:$0xff] }
  0x25   : > { %455 = vmatprep.subr.mxu0 %v1101_v1  ;;  %1000 = vmatprep.subr.mxu1 %v1101_v1  ;;  %v387_v12 = vld [vmem:[%s1302_s8 + $0x1a0] sm:$0xff] }
  0x26   : > { %456 = vmatpush1.msra.mxu0 %v402_v13  ;;  %1032 = vmatpush1.msra.mxu1 %v402_v13  ;;  %v358_v13 = vld [vmem:[%s1302_s8 + $0xb8] sm:$0xff] }
  0x27   : > { %457 = vmatprep.subr.mxu0 %v1101_v1  ;;  %1001 = vmatprep.subr.mxu1 %v1101_v1 }
  0x28   : > { %458 = vmatpush1.msra.mxu0 %v401_v14  ;;  %1033 = vmatpush1.msra.mxu1 %v401_v14  ;;  %v390_v14 = vld [vmem:[%s1302_s8 + $0x1b8] sm:$0xff] }
  0x29   : > { %459 = vmatprep.subr.mxu0 %v1101_v1  ;;  %1002 = vmatprep.subr.mxu1 %v1101_v1 }
  0x2a   : > { %460 = vmatpush1.msra.mxu0 %v400_v15  ;;  %1034 = vmatpush1.msra.mxu1 %v400_v15  ;;  %v357_v15 = vld [vmem:[%s1302_s8 + $0xb0] sm:$0xff] }
  0x2b   : > { %461 = vmatprep.subr.mxu0 %v1101_v1  ;;  %1003 = vmatprep.subr.mxu1 %v1101_v1 }
  0x2c   : > { %462 = vmatpush1.msra.mxu0 %v399_v16  ;;  %1035 = vmatpush1.msra.mxu1 %v399_v16  ;;  %v389_v16 = vld [vmem:[%s1302_s8 + $0x1b0] sm:$0xff] }
  0x2d   : > { %463 = vmatprep.subr.mxu0 %v1101_v1  ;;  %1004 = vmatprep.subr.mxu1 %v1101_v1 }
  0x2e   : > { %464 = vmatpush2.msra.mxu0 %v430_v17  ;;  %1036 = vmatpush2.msra.mxu1 %v430_v17  ;;  %v360_v17 = vld [vmem:[%s1302_s8 + $0xc8] sm:$0xff] }
  0x2f   : > { %465 = vmatprep.subr.mxu0 %v1101_v1  ;;  %1005 = vmatprep.subr.mxu1 %v1101_v1 }
  0x30   : > { %466 = vmatpush2.msra.mxu0 %v429_v18  ;;  %1037 = vmatpush2.msra.mxu1 %v429_v18  ;;  %v392_v18 = vld [vmem:[%s1302_s8 + $0x1c8] sm:$0xff] }
  0x31   : > { %467 = vmatprep.subr.mxu0 %v1101_v1  ;;  %1006 = vmatprep.subr.mxu1 %v1101_v1 }
  0x32   : > { %468 = vmatpush2.msra.mxu0 %v428_v19  ;;  %1038 = vmatpush2.msra.mxu1 %v428_v19  ;;  %v359_v19 = vld [vmem:[%s1302_s8 + $0xc0] sm:$0xff] }
  0x33   : > { %469 = vmatprep.subr.mxu0 %v1101_v1  ;;  %1007 = vmatprep.subr.mxu1 %v1101_v1 }
  0x34   : > { %470 = vmatpush2.msra.mxu0 %v427_v20  ;;  %1039 = vmatpush2.msra.mxu1 %v427_v20  ;;  %v391_v20 = vld [vmem:[%s1302_s8 + $0x1c0] sm:$0xff] }
  0x35   : > { %471 = vmatprep.subr.mxu0 %v1101_v1  ;;  %1008 = vmatprep.subr.mxu1 %v1101_v1 }
  0x36   : > { %472 = vmatpush2.msra.mxu0 %v426_v21  ;;  %1040 = vmatpush2.msra.mxu1 %v426_v21  ;;  %v362_v21 = vld [vmem:[%s1302_s8 + $0xd8] sm:$0xff] }
  0x37   : > { %473 = vmatprep.subr.mxu0 %v1101_v1  ;;  %1009 = vmatprep.subr.mxu1 %v1101_v1 }
  0x38   : > { %474 = vmatpush2.msra.mxu0 %v425_v22  ;;  %1041 = vmatpush2.msra.mxu1 %v425_v22  ;;  %v394_v22 = vld [vmem:[%s1302_s8 + $0x1d8] sm:$0xff] }
  0x39   : > { %475 = vmatprep.subr.mxu0 %v1101_v1  ;;  %1010 = vmatprep.subr.mxu1 %v1101_v1 }
  0x3a   : > { %476 = vmatpush2.msra.mxu0 %v424_v23  ;;  %1042 = vmatpush2.msra.mxu1 %v424_v23  ;;  %v361_v23 = vld [vmem:[%s1302_s8 + $0xd0] sm:$0xff] }
  0x3b   : > { %477 = vmatprep.subr.mxu0 %v1101_v1  ;;  %1011 = vmatprep.subr.mxu1 %v1101_v1 }
  0x3c   : > { %478 = vmatpush2.msra.mxu0 %v423_v24  ;;  %1043 = vmatpush2.msra.mxu1 %v423_v24  ;;  %v393_v24 = vld [vmem:[%s1302_s8 + $0x1d0] sm:$0xff] }
  0x3d   : > { %479 = vmatprep.subr.mxu0 %v1101_v1  ;;  %1012 = vmatprep.subr.mxu1 %v1101_v1 }
  0x3e   : > { %480 = vmatpush2.msra.mxu0 %v422_v25  ;;  %1044 = vmatpush2.msra.mxu1 %v422_v25  ;;  %v364_v25 = vld [vmem:[%s1302_s8 + $0xe8] sm:$0xff] }
  0x3f   : > { %481 = vmatprep.subr.mxu0 %v1101_v1  ;;  %1013 = vmatprep.subr.mxu1 %v1101_v1 }
  0x40   : > { %482 = vmatpush2.msra.mxu0 %v421_v26  ;;  %1045 = vmatpush2.msra.mxu1 %v421_v26  ;;  %v396_v26 = vld [vmem:[%s1302_s8 + $0x1e8] sm:$0xff] }
  0x41   : > { %483 = vmatprep.subr.mxu0 %v1101_v1  ;;  %1014 = vmatprep.subr.mxu1 %v1101_v1 }
  0x42   : > { %484 = vmatpush2.msra.mxu0 %v420_v27  ;;  %1046 = vmatpush2.msra.mxu1 %v420_v27  ;;  %v363_v27 = vld [vmem:[%s1302_s8 + $0xe0] sm:$0xff] }
  0x43   : > { %485 = vmatprep.subr.mxu0 %v1101_v1  ;;  %1015 = vmatprep.subr.mxu1 %v1101_v1 }
  0x44   : > { %486 = vmatpush2.msra.mxu0 %v419_v28  ;;  %1047 = vmatpush2.msra.mxu1 %v419_v28  ;;  %v395_v28 = vld [vmem:[%s1302_s8 + $0x1e0] sm:$0xff] }
  0x45   : > { %487 = vmatprep.subr.mxu0 %v1101_v1  ;;  %1016 = vmatprep.subr.mxu1 %v1101_v1 }
  0x46   : > { %488 = vmatpush2.msra.mxu0 %v418_v29  ;;  %1048 = vmatpush2.msra.mxu1 %v418_v29  ;;  %v366_v29 = vld [vmem:[%s1302_s8 + $0xf8] sm:$0xff] }
  0x47   : > { %489 = vmatprep.subr.mxu0 %v1101_v1  ;;  %1017 = vmatprep.subr.mxu1 %v1101_v1 }
  0x48   : > { %490 = vmatpush2.msra.mxu0 %v417_v30  ;;  %1049 = vmatpush2.msra.mxu1 %v417_v30  ;;  %v398_v30 = vld [vmem:[%s1302_s8 + $0x1f8] sm:$0xff] }
  0x49   : > { %491 = vmatprep.subr.mxu0 %v1101_v1  ;;  %1018 = vmatprep.subr.mxu1 %v1101_v1 }
  0x4a   : > { %492 = vmatpush2.msra.mxu0 %v416_v31  ;;  %1050 = vmatpush2.msra.mxu1 %v416_v31  ;;  %v365_v31 = vld [vmem:[%s1302_s8 + $0xf0] sm:$0xff] }
  0x4b   : > { %493 = vmatprep.subr.mxu0 %v1101_v1  ;;  %1019 = vmatprep.subr.mxu1 %v1101_v1  ;;  %v352_v1 = vld [vmem:[%s1302_s8 + $0x88] sm:$0xff] }
  0x4c   : > { %494 = vmatpush2.msra.mxu0 %v415_v32  ;;  %1051 = vmatpush2.msra.mxu1 %v415_v32  ;;  %v397_v32 = vld [vmem:[%s1302_s8 + $0x1f0] sm:$0xff] }
  0x4d   : > { %495 = vmatprep.mubr.f32.mxu0 %v336_v33  ;;  %575 = vmatprep.mubr.f32.mxu1 %v368_v34  ;;  %v1378_v33 = vld [vmem:[%s1461_s2] ss:$0 sm:$0xff] }
  0x4e   : > { %496 = vmatmul.mubr.f32.vlgmr.msra.gmra.mxu0 %v335_v35  ;;  %576 = vmatmul.mubr.f32.vlgmr.msra.gmra.mxu1 %v367_v36 }
  0x4f   : > { %500 = vmatprep.mubr.f32.mxu0 %v338_v37  ;;  %580 = vmatprep.mubr.f32.mxu1 %v370_v38 }
  0x52   : > { %501 = vmatmul.mubr.f32.gmra.mxu0 %v337_v39  ;;  %581 = vmatmul.mubr.f32.gmra.mxu1 %v369_v40 }
  0x53   : > { %505 = vmatprep.mubr.f32.mxu0 %v340_v41  ;;  %585 = vmatprep.mubr.f32.mxu1 %v372_v42 }
  0x56   : > { %506 = vmatmul.mubr.f32.gmra.mxu0 %v339_v43  ;;  %586 = vmatmul.mubr.f32.gmra.mxu1 %v371_v44 }
  0x57   : > { %510 = vmatprep.mubr.f32.mxu0 %v342_v45  ;;  %590 = vmatprep.mubr.f32.mxu1 %v374_v46 }
  0x5a   : > { %511 = vmatmul.mubr.f32.gmra.mxu0 %v341_v47  ;;  %591 = vmatmul.mubr.f32.gmra.mxu1 %v373_v48 }
  0x5b   : > { %515 = vmatprep.mubr.f32.mxu0 %v344_v49  ;;  %595 = vmatprep.mubr.f32.mxu1 %v376_v50 }
  0x5e   : > { %516 = vmatmul.mubr.f32.gmra.mxu0 %v343_v51  ;;  %596 = vmatmul.mubr.f32.gmra.mxu1 %v375_v52 }
  0x5f   : > { %520 = vmatprep.mubr.f32.mxu0 %v346_v53  ;;  %600 = vmatprep.mubr.f32.mxu1 %v378_v54 }
  0x62   : > { %521 = vmatmul.mubr.f32.gmra.mxu0 %v345_v55  ;;  %601 = vmatmul.mubr.f32.gmra.mxu1 %v377_v56 }
  0x63   : > { %525 = vmatprep.mubr.f32.mxu0 %v348_v57  ;;  %605 = vmatprep.mubr.f32.mxu1 %v380_v58 }
  0x66   : > { %526 = vmatmul.mubr.f32.gmra.mxu0 %v347_v59  ;;  %606 = vmatmul.mubr.f32.gmra.mxu1 %v379_v60 }
  0x67   : > { %530 = vmatprep.mubr.f32.mxu0 %v350_v61  ;;  %610 = vmatprep.mubr.f32.mxu1 %v382_v62 }
  0x6a   : > { %531 = vmatmul.mubr.f32.gmra.mxu0 %v349_v63  ;;  %611 = vmatmul.mubr.f32.gmra.mxu1 %v381_v0 }
  0x6b   : > { %535 = vmatprep.mubr.f32.mxu0 %v352_v1  ;;  %615 = vmatprep.mubr.f32.mxu1 %v384_v2 }
  0x6e   : > { %536 = vmatmul.mubr.f32.gmra.mxu0 %v351_v3  ;;  %616 = vmatmul.mubr.f32.gmra.mxu1 %v383_v4 }
  0x6f   : > { %540 = vmatprep.mubr.f32.mxu0 %v354_v5  ;;  %620 = vmatprep.mubr.f32.mxu1 %v386_v6 }
  0x72   : > { %541 = vmatmul.mubr.f32.gmra.mxu0 %v353_v7  ;;  %621 = vmatmul.mubr.f32.gmra.mxu1 %v385_v8 }
  0x73   : > { %545 = vmatprep.mubr.f32.mxu0 %v356_v9  ;;  %625 = vmatprep.mubr.f32.mxu1 %v388_v10 }
  0x76   : > { %546 = vmatmul.mubr.f32.gmra.mxu0 %v355_v11  ;;  %626 = vmatmul.mubr.f32.gmra.mxu1 %v387_v12 }
  0x77   : > { %550 = vmatprep.mubr.f32.mxu0 %v358_v13  ;;  %630 = vmatprep.mubr.f32.mxu1 %v390_v14 }
  0x7a   : > { %551 = vmatmul.mubr.f32.gmra.mxu0 %v357_v15  ;;  %631 = vmatmul.mubr.f32.gmra.mxu1 %v389_v16 }
  0x7b   : > { %555 = vmatprep.mubr.f32.mxu0 %v360_v17  ;;  %635 = vmatprep.mubr.f32.mxu1 %v392_v18 }
  0x7e   : > { %556 = vmatmul.mubr.f32.gmra.mxu0 %v359_v19  ;;  %636 = vmatmul.mubr.f32.gmra.mxu1 %v391_v20 }
  0x7f   : > { %560 = vmatprep.mubr.f32.mxu0 %v362_v21  ;;  %640 = vmatprep.mubr.f32.mxu1 %v394_v22 }
  0x82   : > { %561 = vmatmul.mubr.f32.gmra.mxu0 %v361_v23  ;;  %641 = vmatmul.mubr.f32.gmra.mxu1 %v393_v24 }
  0x83   : > { %565 = vmatprep.mubr.f32.mxu0 %v364_v25  ;;  %645 = vmatprep.mubr.f32.mxu1 %v396_v26 }
  0x86   : > { %566 = vmatmul.mubr.f32.gmra.mxu0 %v363_v27  ;;  %646 = vmatmul.mubr.f32.gmra.mxu1 %v395_v28 }
  0x87   : > { %570 = vmatprep.mubr.f32.mxu0 %v366_v29  ;;  %650 = vmatprep.mubr.f32.mxu1 %v398_v30 }
  0x8a   : > { %571 = vmatmul.mubr.f32.gmra.mxu0 %v365_v31  ;;  %651 = vmatmul.mubr.f32.gmra.mxu1 %v397_v32 }
 0x10e   : > { %v497_v34 = vpop.f32.mrf.mxu0  ;;  %v577_v35 = vpop.f32.mrf.mxu1 }
 0x10f   : > { %v762_v36 = vadd.f32 %v1378_v33, %v497_v34  ;;  %v778_v37 = vadd.f32 %v1378_v33, %v577_v35 }
 0x110   : > { %v499_v38 = vpop.f32.mrf.mxu0  ;;  %v579_v39 = vpop.f32.mrf.mxu1 }
 0x111   : > { %v794_v40 = vmax.f32 %v762_v36, 0.0  ;;  %v810_v41 = vmax.f32 %v778_v37, 0.0 }
 0x112   : > { %v502_v42 = vpop.f32.mrf.mxu0  ;;  %v582_v43 = vpop.f32.mrf.mxu1 }
 0x113   : > { %826 = vst [vmem:[%s1386_s21] sm:$0xff] %v794_v40  ;;  %842 = vst [vmem:[%s1386_s21 + $0x80] sm:$0xff] %v810_v41  ;;  %v763_v44 = vadd.f32 %v1378_v33, %v502_v42  ;;  %v779_v45 = vadd.f32 %v1378_v33, %v582_v43 }
 0x114   : > { %v504_v46 = vpop.f32.mrf.mxu0  ;;  %v584_v47 = vpop.f32.mrf.mxu1 }
 0x115   : > { %v795_v48 = vmax.f32 %v763_v44, 0.0  ;;  %v811_v49 = vmax.f32 %v779_v45, 0.0 }
 0x116   : > { %v507_v50 = vpop.f32.mrf.mxu0  ;;  %v587_v51 = vpop.f32.mrf.mxu1 }
 0x117   : > { %827 = vst [vmem:[%s1386_s21 + $0x8] sm:$0xff] %v795_v48  ;;  %843 = vst [vmem:[%s1386_s21 + $0x88] sm:$0xff] %v811_v49  ;;  %v764_v52 = vadd.f32 %v1378_v33, %v507_v50  ;;  %v780_v53 = vadd.f32 %v1378_v33, %v587_v51 }
 0x118   : > { %v509_v54 = vpop.f32.mrf.mxu0  ;;  %v589_v55 = vpop.f32.mrf.mxu1 }
 0x119   : > { %v796_v56 = vmax.f32 %v764_v52, 0.0  ;;  %v812_v57 = vmax.f32 %v780_v53, 0.0 }
 0x11a   : > { %v512_v58 = vpop.f32.mrf.mxu0  ;;  %v592_v59 = vpop.f32.mrf.mxu1 }
 0x11b   : > { %828 = vst [vmem:[%s1386_s21 + $0x10] sm:$0xff] %v796_v56  ;;  %844 = vst [vmem:[%s1386_s21 + $0x90] sm:$0xff] %v812_v57  ;;  %v765_v60 = vadd.f32 %v1378_v33, %v512_v58  ;;  %v781_v61 = vadd.f32 %v1378_v33, %v592_v59 }
 0x11c   : > { %v514_v62 = vpop.f32.mrf.mxu0  ;;  %v594_v63 = vpop.f32.mrf.mxu1 }
 0x11d   : > { %v797_v0 = vmax.f32 %v765_v60, 0.0  ;;  %v813_v1 = vmax.f32 %v781_v61, 0.0 }
 0x11e   : > { %v517_v2 = vpop.f32.mrf.mxu0  ;;  %v597_v3 = vpop.f32.mrf.mxu1 }
 0x11f   : > { %829 = vst [vmem:[%s1386_s21 + $0x18] sm:$0xff] %v797_v0  ;;  %845 = vst [vmem:[%s1386_s21 + $0x98] sm:$0xff] %v813_v1  ;;  %v766_v4 = vadd.f32 %v1378_v33, %v517_v2  ;;  %v782_v5 = vadd.f32 %v1378_v33, %v597_v3 }
 0x120   : > { %v519_v6 = vpop.f32.mrf.mxu0  ;;  %v599_v7 = vpop.f32.mrf.mxu1 }
 0x121   : > { %v798_v8 = vmax.f32 %v766_v4, 0.0  ;;  %v814_v9 = vmax.f32 %v782_v5, 0.0 }
 0x122   : > { %v522_v10 = vpop.f32.mrf.mxu0  ;;  %v602_v11 = vpop.f32.mrf.mxu1 }
 0x123   : > { %830 = vst [vmem:[%s1386_s21 + $0x20] sm:$0xff] %v798_v8  ;;  %846 = vst [vmem:[%s1386_s21 + $0xa0] sm:$0xff] %v814_v9  ;;  %v767_v12 = vadd.f32 %v1378_v33, %v522_v10  ;;  %v783_v13 = vadd.f32 %v1378_v33, %v602_v11 }
 0x124   : > { %v524_v14 = vpop.f32.mrf.mxu0  ;;  %v604_v15 = vpop.f32.mrf.mxu1 }
 0x125   : > { %v799_v16 = vmax.f32 %v767_v12, 0.0  ;;  %v815_v17 = vmax.f32 %v783_v13, 0.0 }
 0x126   : > { %v527_v18 = vpop.f32.mrf.mxu0  ;;  %v607_v19 = vpop.f32.mrf.mxu1 }
 0x127   : > { %831 = vst [vmem:[%s1386_s21 + $0x28] sm:$0xff] %v799_v16  ;;  %847 = vst [vmem:[%s1386_s21 + $0xa8] sm:$0xff] %v815_v17  ;;  %v768_v20 = vadd.f32 %v1378_v33, %v527_v18  ;;  %v784_v21 = vadd.f32 %v1378_v33, %v607_v19 }
 0x128   : > { %v529_v22 = vpop.f32.mrf.mxu0  ;;  %v609_v23 = vpop.f32.mrf.mxu1 }
 0x129   : > { %v800_v24 = vmax.f32 %v768_v20, 0.0  ;;  %v816_v25 = vmax.f32 %v784_v21, 0.0 }
 0x12a   : > { %v532_v26 = vpop.f32.mrf.mxu0  ;;  %v612_v27 = vpop.f32.mrf.mxu1 }
 0x12b   : > { %832 = vst [vmem:[%s1386_s21 + $0x30] sm:$0xff] %v800_v24  ;;  %848 = vst [vmem:[%s1386_s21 + $0xb0] sm:$0xff] %v816_v25  ;;  %v769_v28 = vadd.f32 %v1378_v33, %v532_v26  ;;  %v785_v29 = vadd.f32 %v1378_v33, %v612_v27 }
 0x12c   : > { %v534_v30 = vpop.f32.mrf.mxu0  ;;  %v614_v31 = vpop.f32.mrf.mxu1 }
 0x12d   : > { %v801_v32 = vmax.f32 %v769_v28, 0.0  ;;  %v817_v34 = vmax.f32 %v785_v29, 0.0 }
 0x12e   : > { %v537_v35 = vpop.f32.mrf.mxu0  ;;  %v617_v36 = vpop.f32.mrf.mxu1 }
 0x12f   : > { %833 = vst [vmem:[%s1386_s21 + $0x38] sm:$0xff] %v801_v32  ;;  %849 = vst [vmem:[%s1386_s21 + $0xb8] sm:$0xff] %v817_v34  ;;  %v770_v37 = vadd.f32 %v1378_v33, %v537_v35  ;;  %v786_v38 = vadd.f32 %v1378_v33, %v617_v36 }
 0x130   : > { %v539_v39 = vpop.f32.mrf.mxu0  ;;  %v619_v40 = vpop.f32.mrf.mxu1 }
 0x131   : > { %v802_v41 = vmax.f32 %v770_v37, 0.0  ;;  %v818_v42 = vmax.f32 %v786_v38, 0.0 }
 0x132   : > { %v542_v43 = vpop.f32.mrf.mxu0  ;;  %v622_v44 = vpop.f32.mrf.mxu1 }
 0x133   : > { %834 = vst [vmem:[%s1386_s21 + $0x40] sm:$0xff] %v802_v41  ;;  %850 = vst [vmem:[%s1386_s21 + $0xc0] sm:$0xff] %v818_v42  ;;  %v771_v45 = vadd.f32 %v1378_v33, %v542_v43  ;;  %v787_v46 = vadd.f32 %v1378_v33, %v622_v44 }
 0x134   : > { %v544_v47 = vpop.f32.mrf.mxu0  ;;  %v624_v48 = vpop.f32.mrf.mxu1 }
 0x135   : > { %v803_v49 = vmax.f32 %v771_v45, 0.0  ;;  %v819_v50 = vmax.f32 %v787_v46, 0.0 }
 0x136   : > { %v547_v51 = vpop.f32.mrf.mxu0  ;;  %v627_v52 = vpop.f32.mrf.mxu1 }
 0x137   : > { %835 = vst [vmem:[%s1386_s21 + $0x48] sm:$0xff] %v803_v49  ;;  %851 = vst [vmem:[%s1386_s21 + $0xc8] sm:$0xff] %v819_v50  ;;  %v772_v53 = vadd.f32 %v1378_v33, %v547_v51  ;;  %v788_v54 = vadd.f32 %v1378_v33, %v627_v52 }
 0x138   : > { %v549_v55 = vpop.f32.mrf.mxu0  ;;  %v629_v56 = vpop.f32.mrf.mxu1 }
 0x139   : > { %v804_v57 = vmax.f32 %v772_v53, 0.0  ;;  %v820_v58 = vmax.f32 %v788_v54, 0.0 }
 0x13a   : > { %v552_v59 = vpop.f32.mrf.mxu0  ;;  %v632_v60 = vpop.f32.mrf.mxu1 }
 0x13b   : > { %836 = vst [vmem:[%s1386_s21 + $0x50] sm:$0xff] %v804_v57  ;;  %852 = vst [vmem:[%s1386_s21 + $0xd0] sm:$0xff] %v820_v58  ;;  %v773_v61 = vadd.f32 %v1378_v33, %v552_v59  ;;  %v789_v62 = vadd.f32 %v1378_v33, %v632_v60 }
 0x13c   : > { %v554_v63 = vpop.f32.mrf.mxu0  ;;  %v634_v0 = vpop.f32.mrf.mxu1 }
 0x13d   : > { %v805_v1 = vmax.f32 %v773_v61, 0.0  ;;  %v821_v2 = vmax.f32 %v789_v62, 0.0 }
 0x13e   : > { %v557_v3 = vpop.f32.mrf.mxu0  ;;  %v637_v4 = vpop.f32.mrf.mxu1 }
 0x13f   : > { %837 = vst [vmem:[%s1386_s21 + $0x58] sm:$0xff] %v805_v1  ;;  %853 = vst [vmem:[%s1386_s21 + $0xd8] sm:$0xff] %v821_v2  ;;  %v774_v5 = vadd.f32 %v1378_v33, %v557_v3  ;;  %v790_v6 = vadd.f32 %v1378_v33, %v637_v4 }
 0x140   : > { %v559_v7 = vpop.f32.mrf.mxu0  ;;  %v639_v8 = vpop.f32.mrf.mxu1 }
 0x141   : > { %v806_v9 = vmax.f32 %v774_v5, 0.0  ;;  %v822_v10 = vmax.f32 %v790_v6, 0.0 }
 0x142   : > { %v562_v11 = vpop.f32.mrf.mxu0  ;;  %v642_v12 = vpop.f32.mrf.mxu1 }
 0x143   : > { %838 = vst [vmem:[%s1386_s21 + $0x60] sm:$0xff] %v806_v9  ;;  %854 = vst [vmem:[%s1386_s21 + $0xe0] sm:$0xff] %v822_v10  ;;  %v775_v13 = vadd.f32 %v1378_v33, %v562_v11  ;;  %v791_v14 = vadd.f32 %v1378_v33, %v642_v12 }
 0x144   : > { %v564_v15 = vpop.f32.mrf.mxu0  ;;  %v644_v16 = vpop.f32.mrf.mxu1 }
 0x145   : > { %v807_v17 = vmax.f32 %v775_v13, 0.0  ;;  %v823_v18 = vmax.f32 %v791_v14, 0.0 }
 0x146   : > { %v567_v19 = vpop.f32.mrf.mxu0  ;;  %v647_v20 = vpop.f32.mrf.mxu1 }
 0x147   : > { %839 = vst [vmem:[%s1386_s21 + $0x68] sm:$0xff] %v807_v17  ;;  %855 = vst [vmem:[%s1386_s21 + $0xe8] sm:$0xff] %v823_v18  ;;  %v776_v21 = vadd.f32 %v1378_v33, %v567_v19  ;;  %v792_v22 = vadd.f32 %v1378_v33, %v647_v20 }
 0x148   : > { %v569_v23 = vpop.f32.mrf.mxu0  ;;  %v649_v24 = vpop.f32.mrf.mxu1 }
 0x149   : > { %v808_v25 = vmax.f32 %v776_v21, 0.0  ;;  %v824_v26 = vmax.f32 %v792_v22, 0.0 }
 0x14a   : > { %v572_v27 = vpop.f32.mrf.mxu0  ;;  %v652_v28 = vpop.f32.mrf.mxu1 }
 0x14b   : > { %840 = vst [vmem:[%s1386_s21 + $0x70] sm:$0xff] %v808_v25  ;;  %856 = vst [vmem:[%s1386_s21 + $0xf0] sm:$0xff] %v824_v26  ;;  %v777_v29 = vadd.f32 %v1378_v33, %v572_v27  ;;  %v793_v30 = vadd.f32 %v1378_v33, %v652_v28 }
 0x14c   : > { %v574_v31 = vpop.f32.mrf.mxu0  ;;  %v654_v32 = vpop.f32.mrf.mxu1 }
 0x14d   : > { %v809_v34 = vmax.f32 %v777_v29, 0.0  ;;  %v825_v35 = vmax.f32 %v793_v30, 0.0 }
 0x14f   : > { %841 = vst [vmem:[%s1386_s21 + $0x78] sm:$0xff] %v809_v34  ;;  %857 = vst [vmem:[%s1386_s21 + $0xf8] sm:$0xff] %v825_v35 }
 0x150 PF: > { %s13_s14 = sadd.s32 1, %s1099_s14   ;;  %s1463_s12 = smov %s1095_s13 }
 0x151   : > { %p10_p5 = scmp.ge.s32.totalorder %s13_s14, 18   ;;  %s1464_s13 = smov %s1466_s15 }
 0x153   :  { %12 = sbr.rel (!%p10_p5) target bundleno = 2 (0x2), region = 76 }

// kernel: forward_pallas.8
= control target key start
LH: loop header
LB: loop body
LE: loop exit
PB: predicated region body
PF: predicated region fallthrough
CT: control target
= control target key end

     0   :  { %s1330_s12 = smov 0   ;;  %s1332_s13 = smov 0   ;;  %s1791_s0 = inlined_call_operand.vmem [shape: f32[512,768], index: 0, kind: input, shape index: {}]   ;;  %s1792_s1 = inlined_call_operand.vmem [shape: f32[768,128], index: 1, kind: input, shape index: {}]   ;;  %s1793_s2 = inlined_call_operand.vmem [shape: f32[1,128], index: 2, kind: input, shape index: {}]   ;;  %s1794_s3 = inlined_call_operand.vmem [shape: f32[512,128], index: 3, kind: output, shape index: {}]  }
   0x1   :  { %s1334_s14 = smov 0   ;;  %s1336_s15 = smov 0  }
   0x2   :  { %s1338_s16 = smov 0   ;;  %s1340_s17 = smov 0  }
   0x3   :  { %s1342_s18 = smov 0  }
   0x4 LB: > { %s25_s19 = sadd.s32 1, %s1298_s16  ;;  %s32_s20 = sadd.s32 1, %s1302_s17  ;;  %s1306_s18 = sphi %s1342_s18, %s13_s18   ;;  %s1302_s17 = sphi %s1340_s17, %s1800_s17   ;;  %s1298_s16 = sphi %s1338_s16, %s1799_s16   ;;  %s1294_s15 = sphi %s1336_s15, %s1798_s15   ;;  %s1290_s14 = sphi %s1334_s14, %s1797_s14   ;;  %s1286_s13 = sphi %s1332_s13, %s1796_s13   ;;  %s1282_s12 = sphi %s1330_s12, %s1795_s12  }
   0x5   : > { %p26_p0 = scmp.ge.s32.totalorder %s25_s19, 3  ;;  %p48_p1 = scmp.ne.s32.totalorder %s1286_s13, %s1282_s12 }
   0x6   : > { %p49_p2 = scmp.eq.s32.totalorder %s1306_s18, 0  ;;  %s41_s24 = sadd.s32 1, %s1286_s13 }
   0x7   : > { %s1802_s19 = smov (%p26_p0, %s25_s19), 0  ;;  %s1804_s20 = smov (!%p26_p0, %s32_s20), %s1302_s17 }
   0x8   : > { %p50_p3 = por %p49_p2, %p48_p1  ;;  %p34_p4 = scmp.ge.s32.totalorder %s1804_s20, 2 }
   0x9   : > { %s37_s21 = ssub.s32 %s1298_s16, %s1802_s19  ;;  %p1112_p6 = scmp.ge.s32.totalorder %s1306_s18, 6 }
   0xa   : > { %s1806_s20 = smov (%p34_p4, %s1804_s20), 0 }
   0xb   : > { %s36_s22 = ssub.s32 %s1302_s17, %s1806_s20  ;;  %162 = sbr.rel (%p1112_p6) target bundleno = 56 (0x38), region = 20 }
   0xc   : > { %s38_s23 = sor.u32 %s37_s21, %s36_s22 }
   0xd   : > { %p39_p5 = scmp.eq.s32.totalorder %s38_s23, 0 }
   0xf   : > { %s1381_s25 = scalar_select %p39_p5, %s1286_s13, %s41_s24  }
  0x10   : > { %165 = sbr.rel (!%p50_p3) target bundleno = 56 (0x38), region = 24  ;;  %s167_s26 = sand.u32 (%p50_p3), 1, %s1286_s13  }
  0x11   : > { %s1115_s27 = sshll.u32 (%p50_p3), %s1298_s16, 1  ;;  %s1113_s28 = sshll.u32 (%p50_p3), %s167_s26, 9 }
  0x12   : > { %s1193_s29 = smul.u32 (%p50_p3), 192, %s1302_s17  ;;  %s1395_s8 = scalar_lea.vmem (%p50_p3), [#allocation3], %s1113_s28 }
  0x14   : > { %s173_s30 = sadd.s32 (%p50_p3), %s1193_s29, %s1115_s27 }
  0x15   : > { %s1117_s4 = sshll.u32 %s173_s30, 3 }
  0x16   : > { %s1390_s7 = scalar_lea.vmem %s1791_s0, %s1117_s4 }
  0x17   : > { %v188_v0 = vld [vmem:[%s1390_s7] sm:$0xff]  ;;  %v190_v1 = vld [vmem:[%s1390_s7 + $0x8] sm:$0xff]  ;;  %v192_v2 = vld [vmem:[%s1390_s7 + $0x30] sm:$0xff] }
  0x18   : > { %189 = vst [vmem:[%s1395_s8] sm:$0xff] %v188_v0  ;;  %191 = vst [vmem:[%s1395_s8 + $0x8] sm:$0xff] %v190_v1  ;;  %v194_v3 = vld [vmem:[%s1390_s7 + $0x38] sm:$0xff]  ;;  %v196_v4 = vld [vmem:[%s1390_s7 + $0x60] sm:$0xff] }
  0x19   : > { %193 = vst [vmem:[%s1395_s8 + $0x10] sm:$0xff] %v192_v2  ;;  %v198_v5 = vld [vmem:[%s1390_s7 + $0x68] sm:$0xff]  ;;  %195 = vst [vmem:[%s1395_s8 + $0x18] sm:$0xff] %v194_v3  ;;  %v200_v6 = vld [vmem:[%s1390_s7 + $0x90] sm:$0xff] }
  0x1a   : > { %197 = vst [vmem:[%s1395_s8 + $0x20] sm:$0xff] %v196_v4  ;;  %199 = vst [vmem:[%s1395_s8 + $0x28] sm:$0xff] %v198_v5  ;;  %v202_v7 = vld [vmem:[%s1390_s7 + $0x98] sm:$0xff]  ;;  %v204_v8 = vld [vmem:[%s1390_s7 + $0xc0] sm:$0xff] }
  0x1b   : > { %201 = vst [vmem:[%s1395_s8 + $0x30] sm:$0xff] %v200_v6  ;;  %203 = vst [vmem:[%s1395_s8 + $0x38] sm:$0xff] %v202_v7  ;;  %v206_v9 = vld [vmem:[%s1390_s7 + $0xc8] sm:$0xff]  ;;  %v208_v10 = vld [vmem:[%s1390_s7 + $0xf0] sm:$0xff] }
  0x1c   : > { %205 = vst [vmem:[%s1395_s8 + $0x40] sm:$0xff] %v204_v8  ;;  %v210_v11 = vld [vmem:[%s1390_s7 + $0xf8] sm:$0xff]  ;;  %207 = vst [vmem:[%s1395_s8 + $0x48] sm:$0xff] %v206_v9  ;;  %v212_v12 = vld [vmem:[%s1390_s7 + $0x120] sm:$0xff] }
  0x1d   : > { %209 = vst [vmem:[%s1395_s8 + $0x50] sm:$0xff] %v208_v10  ;;  %211 = vst [vmem:[%s1395_s8 + $0x58] sm:$0xff] %v210_v11  ;;  %v214_v13 = vld [vmem:[%s1390_s7 + $0x128] sm:$0xff]  ;;  %v216_v14 = vld [vmem:[%s1390_s7 + $0x150] sm:$0xff] }
  0x1e   : > { %213 = vst [vmem:[%s1395_s8 + $0x60] sm:$0xff] %v212_v12  ;;  %215 = vst [vmem:[%s1395_s8 + $0x68] sm:$0xff] %v214_v13  ;;  %v218_v15 = vld [vmem:[%s1390_s7 + $0x158] sm:$0xff]  ;;  %v220_v16 = vld [vmem:[%s1390_s7 + $0x180] sm:$0xff] }
  0x1f   : > { %217 = vst [vmem:[%s1395_s8 + $0x70] sm:$0xff] %v216_v14  ;;  %v222_v17 = vld [vmem:[%s1390_s7 + $0x188] sm:$0xff]  ;;  %219 = vst [vmem:[%s1395_s8 + $0x78] sm:$0xff] %v218_v15  ;;  %v224_v18 = vld [vmem:[%s1390_s7 + $0x1b0] sm:$0xff] }
  0x20   : > { %221 = vst [vmem:[%s1395_s8 + $0x80] sm:$0xff] %v220_v16  ;;  %223 = vst [vmem:[%s1395_s8 + $0x88] sm:$0xff] %v222_v17  ;;  %v226_v19 = vld [vmem:[%s1390_s7 + $0x1b8] sm:$0xff]  ;;  %v228_v20 = vld [vmem:[%s1390_s7 + $0x1e0] sm:$0xff] }
  0x21   : > { %225 = vst [vmem:[%s1395_s8 + $0x90] sm:$0xff] %v224_v18  ;;  %227 = vst [vmem:[%s1395_s8 + $0x98] sm:$0xff] %v226_v19  ;;  %v230_v21 = vld [vmem:[%s1390_s7 + $0x1e8] sm:$0xff]  ;;  %v232_v22 = vld [vmem:[%s1390_s7 + $0x210] sm:$0xff] }
  0x22   : > { %229 = vst [vmem:[%s1395_s8 + $0xa0] sm:$0xff] %v228_v20  ;;  %v234_v23 = vld [vmem:[%s1390_s7 + $0x218] sm:$0xff]  ;;  %231 = vst [vmem:[%s1395_s8 + $0xa8] sm:$0xff] %v230_v21  ;;  %v236_v24 = vld [vmem:[%s1390_s7 + $0x240] sm:$0xff] }
  0x23   : > { %233 = vst [vmem:[%s1395_s8 + $0xb0] sm:$0xff] %v232_v22  ;;  %235 = vst [vmem:[%s1395_s8 + $0xb8] sm:$0xff] %v234_v23  ;;  %v238_v25 = vld [vmem:[%s1390_s7 + $0x248] sm:$0xff]  ;;  %v240_v26 = vld [vmem:[%s1390_s7 + $0x270] sm:$0xff] }
  0x24   : > { %237 = vst [vmem:[%s1395_s8 + $0xc0] sm:$0xff] %v236_v24  ;;  %239 = vst [vmem:[%s1395_s8 + $0xc8] sm:$0xff] %v238_v25  ;;  %v242_v27 = vld [vmem:[%s1390_s7 + $0x278] sm:$0xff]  ;;  %v244_v28 = vld [vmem:[%s1390_s7 + $0x2a0] sm:$0xff] }
  0x25   : > { %241 = vst [vmem:[%s1395_s8 + $0xd0] sm:$0xff] %v240_v26  ;;  %v246_v29 = vld [vmem:[%s1390_s7 + $0x2a8] sm:$0xff]  ;;  %243 = vst [vmem:[%s1395_s8 + $0xd8] sm:$0xff] %v242_v27  ;;  %v248_v30 = vld [vmem:[%s1390_s7 + $0x2d0] sm:$0xff] }
  0x26   : > { %245 = vst [vmem:[%s1395_s8 + $0xe0] sm:$0xff] %v244_v28  ;;  %247 = vst [vmem:[%s1395_s8 + $0xe8] sm:$0xff] %v246_v29  ;;  %v250_v31 = vld [vmem:[%s1390_s7 + $0x2d8] sm:$0xff]  ;;  %v252_v32 = vld [vmem:[%s1390_s7 + $0x300] sm:$0xff] }
  0x27   : > { %249 = vst [vmem:[%s1395_s8 + $0xf0] sm:$0xff] %v248_v30  ;;  %251 = vst [vmem:[%s1395_s8 + $0xf8] sm:$0xff] %v250_v31  ;;  %v254_v33 = vld [vmem:[%s1390_s7 + $0x308] sm:$0xff]  ;;  %v256_v34 = vld [vmem:[%s1390_s7 + $0x330] sm:$0xff] }
  0x28   : > { %253 = vst [vmem:[%s1395_s8 + $0x100] sm:$0xff] %v252_v32  ;;  %v258_v35 = vld [vmem:[%s1390_s7 + $0x338] sm:$0xff]  ;;  %255 = vst [vmem:[%s1395_s8 + $0x108] sm:$0xff] %v254_v33  ;;  %v260_v36 = vld [vmem:[%s1390_s7 + $0x360] sm:$0xff] }
  0x29   : > { %257 = vst [vmem:[%s1395_s8 + $0x110] sm:$0xff] %v256_v34  ;;  %259 = vst [vmem:[%s1395_s8 + $0x118] sm:$0xff] %v258_v35  ;;  %v262_v37 = vld [vmem:[%s1390_s7 + $0x368] sm:$0xff]  ;;  %v264_v38 = vld [vmem:[%s1390_s7 + $0x390] sm:$0xff] }
  0x2a   : > { %261 = vst [vmem:[%s1395_s8 + $0x120] sm:$0xff] %v260_v36  ;;  %263 = vst [vmem:[%s1395_s8 + $0x128] sm:$0xff] %v262_v37  ;;  %v266_v39 = vld [vmem:[%s1390_s7 + $0x398] sm:$0xff]  ;;  %v268_v40 = vld [vmem:[%s1390_s7 + $0x3c0] sm:$0xff] }
  0x2b   : > { %265 = vst [vmem:[%s1395_s8 + $0x130] sm:$0xff] %v264_v38  ;;  %v270_v41 = vld [vmem:[%s1390_s7 + $0x3c8] sm:$0xff]  ;;  %267 = vst [vmem:[%s1395_s8 + $0x138] sm:$0xff] %v266_v39  ;;  %v272_v42 = vld [vmem:[%s1390_s7 + $0x3f0] sm:$0xff] }
  0x2c   : > { %269 = vst [vmem:[%s1395_s8 + $0x140] sm:$0xff] %v268_v40  ;;  %271 = vst [vmem:[%s1395_s8 + $0x148] sm:$0xff] %v270_v41  ;;  %v274_v43 = vld [vmem:[%s1390_s7 + $0x3f8] sm:$0xff]  ;;  %v276_v44 = vld [vmem:[%s1390_s7 + $0x420] sm:$0xff] }
  0x2d   : > { %273 = vst [vmem:[%s1395_s8 + $0x150] sm:$0xff] %v272_v42  ;;  %275 = vst [vmem:[%s1395_s8 + $0x158] sm:$0xff] %v274_v43  ;;  %v278_v45 = vld [vmem:[%s1390_s7 + $0x428] sm:$0xff]  ;;  %v280_v46 = vld [vmem:[%s1390_s7 + $0x450] sm:$0xff] }
  0x2e   : > { %277 = vst [vmem:[%s1395_s8 + $0x160] sm:$0xff] %v276_v44  ;;  %v282_v47 = vld [vmem:[%s1390_s7 + $0x458] sm:$0xff]  ;;  %279 = vst [vmem:[%s1395_s8 + $0x168] sm:$0xff] %v278_v45  ;;  %v284_v48 = vld [vmem:[%s1390_s7 + $0x480] sm:$0xff] }
  0x2f   : > { %281 = vst [vmem:[%s1395_s8 + $0x170] sm:$0xff] %v280_v46  ;;  %283 = vst [vmem:[%s1395_s8 + $0x178] sm:$0xff] %v282_v47  ;;  %v286_v49 = vld [vmem:[%s1390_s7 + $0x488] sm:$0xff]  ;;  %v288_v50 = vld [vmem:[%s1390_s7 + $0x4b0] sm:$0xff] }
  0x30   : > { %285 = vst [vmem:[%s1395_s8 + $0x180] sm:$0xff] %v284_v48  ;;  %287 = vst [vmem:[%s1395_s8 + $0x188] sm:$0xff] %v286_v49  ;;  %v290_v51 = vld [vmem:[%s1390_s7 + $0x4b8] sm:$0xff]  ;;  %v292_v52 = vld [vmem:[%s1390_s7 + $0x4e0] sm:$0xff] }
  0x31   : > { %289 = vst [vmem:[%s1395_s8 + $0x190] sm:$0xff] %v288_v50  ;;  %v294_v53 = vld [vmem:[%s1390_s7 + $0x4e8] sm:$0xff]  ;;  %291 = vst [vmem:[%s1395_s8 + $0x198] sm:$0xff] %v290_v51  ;;  %v296_v54 = vld [vmem:[%s1390_s7 + $0x510] sm:$0xff] }
  0x32   : > { %293 = vst [vmem:[%s1395_s8 + $0x1a0] sm:$0xff] %v292_v52  ;;  %295 = vst [vmem:[%s1395_s8 + $0x1a8] sm:$0xff] %v294_v53  ;;  %v298_v55 = vld [vmem:[%s1390_s7 + $0x518] sm:$0xff]  ;;  %v300_v56 = vld [vmem:[%s1390_s7 + $0x540] sm:$0xff] }
  0x33   : > { %297 = vst [vmem:[%s1395_s8 + $0x1b0] sm:$0xff] %v296_v54  ;;  %299 = vst [vmem:[%s1395_s8 + $0x1b8] sm:$0xff] %v298_v55  ;;  %v302_v57 = vld [vmem:[%s1390_s7 + $0x548] sm:$0xff]  ;;  %v304_v58 = vld [vmem:[%s1390_s7 + $0x570] sm:$0xff] }
  0x34   : > { %301 = vst [vmem:[%s1395_s8 + $0x1c0] sm:$0xff] %v300_v56  ;;  %v306_v59 = vld [vmem:[%s1390_s7 + $0x578] sm:$0xff]  ;;  %303 = vst [vmem:[%s1395_s8 + $0x1c8] sm:$0xff] %v302_v57  ;;  %v308_v60 = vld [vmem:[%s1390_s7 + $0x5a0] sm:$0xff] }
  0x35   : > { %305 = vst [vmem:[%s1395_s8 + $0x1d0] sm:$0xff] %v304_v58  ;;  %307 = vst [vmem:[%s1395_s8 + $0x1d8] sm:$0xff] %v306_v59  ;;  %v310_v61 = vld [vmem:[%s1390_s7 + $0x5a8] sm:$0xff]  ;;  %v312_v62 = vld [vmem:[%s1390_s7 + $0x5d0] sm:$0xff] }
  0x36   : > { %309 = vst [vmem:[%s1395_s8 + $0x1e0] sm:$0xff] %v308_v60  ;;  %311 = vst [vmem:[%s1395_s8 + $0x1e8] sm:$0xff] %v310_v61  ;;  %v314_v63 = vld [vmem:[%s1390_s7 + $0x5d8] sm:$0xff] }
  0x37   : > { %313 = vst [vmem:[%s1395_s8 + $0x1f0] sm:$0xff] %v312_v62  ;;  %315 = vst [vmem:[%s1395_s8 + $0x1f8] sm:$0xff] %v314_v63 }
  0x38 PF: > { %p1118_p7 = scmp.ge.s32.totalorder %s1306_s18, 1  ;;  %p332_p8 = scmp.lt.s32.totalorder %s1306_s18, 7 }
  0x3a   : > { %p333_p9 = pnand %p1118_p7, %p332_p8 }
  0x3b   : > { %s339_s9 = sand.u32 (!%p333_p9), 1, %s1282_s12   ;;  %s1120_s10 = sshll.u32 (!%p333_p9), %s1290_s14, 5 }
  0x3c   : > { %336 = sbr.rel (%p333_p9) target bundleno = 433 (0x1b1), region = 51  ;;  %s1119_s11 = sshll.u32 (!%p333_p9), %s339_s9, 9 }
  0x3d   : > { %p379_p10 = scmp.lt.s32.totalorder (!%p333_p9), %s1120_s10, 95  ;;  %s1122_s21 = sshll.u32 (!%p333_p9), %s1294_s15, 5 }
  0x3e   : > { %p391_p11 = scmp.lt.s32.totalorder (!%p333_p9), %s1122_s21, 63  ;;  %s1537_s12 = scalar_lea.vmem (!%p333_p9), [#allocation3], %s1119_s11 }
  0x3f   : > { %p1124_p12 = scmp.ne.s32.totalorder (!%p333_p9), %s1290_s14, 0 }
  0x41   : > { %s1808_s10 = smov (!%p379_p10, %s1120_s10), 95  ;;  %s1810_s21 = smov (!%p391_p11, %s1122_s21), 63 }
  0x42   : > { %s1121_s22 = sshll.u32 %s1808_s10, 3  ;;  %s1123_s27 = sshll.u32 %s1810_s21, 3 }
  0x43   : > { %s1530_s26 = scalar_lea.vmem %s1792_s1, %s1121_s22  ;;  %s1535_s30 = scalar_lea.vmem %s1794_s3, %s1123_s27 }
  0x44   : > { %402 = sbr.rel (%p1124_p12) target bundleno = 90 (0x5a), region = 59 }
  0x49   : > { %v1308_v0 = vmov 0.0  }
  0x4a   : > { %403 = vst [vmem:[#allocation2 + $0xb0] sm:$0xff] %v1308_v0  ;;  %404 = vst [vmem:[#allocation2] sm:$0xff] %v1308_v0 }
  0x4b   : > { %405 = vst [vmem:[#allocation2 + $0xd8] sm:$0xff] %v1308_v0  ;;  %406 = vst [vmem:[#allocation2 + $0x18] sm:$0xff] %v1308_v0 }
  0x4c   : > { %407 = vst [vmem:[#allocation2 + $0x50] sm:$0xff] %v1308_v0  ;;  %408 = vst [vmem:[#allocation2 + $0x68] sm:$0xff] %v1308_v0 }
  0x4d   : > { %409 = vst [vmem:[#allocation2 + $0x30] sm:$0xff] %v1308_v0  ;;  %410 = vst [vmem:[#allocation2 + $0x48] sm:$0xff] %v1308_v0 }
  0x4e   : > { %411 = vst [vmem:[#allocation2 + $0x80] sm:$0xff] %v1308_v0  ;;  %412 = vst [vmem:[#allocation2 + $0x88] sm:$0xff] %v1308_v0 }
  0x4f   : > { %413 = vst [vmem:[#allocation2 + $0xe8] sm:$0xff] %v1308_v0  ;;  %414 = vst [vmem:[#allocation2 + $0xb8] sm:$0xff] %v1308_v0 }
  0x50   : > { %415 = vst [vmem:[#allocation2 + $0x60] sm:$0xff] %v1308_v0  ;;  %416 = vst [vmem:[#allocation2 + $0xf0] sm:$0xff] %v1308_v0 }
  0x51   : > { %417 = vst [vmem:[#allocation2 + $0x8] sm:$0xff] %v1308_v0  ;;  %418 = vst [vmem:[#allocation2 + $0x78] sm:$0xff] %v1308_v0 }
  0x52   : > { %419 = vst [vmem:[#allocation2 + $0x38] sm:$0xff] %v1308_v0  ;;  %420 = vst [vmem:[#allocation2 + $0x58] sm:$0xff] %v1308_v0 }
  0x53   : > { %421 = vst [vmem:[#allocation2 + $0x40] sm:$0xff] %v1308_v0  ;;  %422 = vst [vmem:[#allocation2 + $0xc8] sm:$0xff] %v1308_v0 }
  0x54   : > { %423 = vst [vmem:[#allocation2 + $0xe0] sm:$0xff] %v1308_v0  ;;  %424 = vst [vmem:[#allocation2 + $0x90] sm:$0xff] %v1308_v0 }
  0x55   : > { %425 = vst [vmem:[#allocation2 + $0x70] sm:$0xff] %v1308_v0  ;;  %426 = vst [vmem:[#allocation2 + $0xc0] sm:$0xff] %v1308_v0 }
  0x56   : > { %427 = vst [vmem:[#allocation2 + $0xa8] sm:$0xff] %v1308_v0  ;;  %428 = vst [vmem:[#allocation2 + $0xd0] sm:$0xff] %v1308_v0 }
  0x57   : > { %429 = vst [vmem:[#allocation2 + $0x10] sm:$0xff] %v1308_v0  ;;  %430 = vst [vmem:[#allocation2 + $0x28] sm:$0xff] %v1308_v0 }
  0x58   : > { %431 = vst [vmem:[#allocation2 + $0xa0] sm:$0xff] %v1308_v0  ;;  %432 = vst [vmem:[#allocation2 + $0xf8] sm:$0xff] %v1308_v0 }
  0x59   : > { %433 = vst [vmem:[#allocation2 + $0x20] sm:$0xff] %v1308_v0  ;;  %434 = vst [vmem:[#allocation2 + $0x98] sm:$0xff] %v1308_v0 }
  0x5a PF: > { %v546_v1 = vld [vmem:[%s1530_s26 + $0x78] sm:$0xff]  ;;  %v1309_v2 = vmov 0.0   ;;  %v545_v3 = vld [vmem:[%s1530_s26 + $0x70] sm:$0xff]  ;;  %v544_v4 = vld [vmem:[%s1530_s26 + $0x68] sm:$0xff]  ;;  %p1125_p13 = scmp.ne.s32.totalorder %s1290_s14, 2 }
  0x5b   : > { %563 = vmatprep.subr.mxu0 %v1309_v2  ;;  %1129 = vmatprep.subr.mxu1 %v1309_v2  ;;  %v543_v5 = vld [vmem:[%s1530_s26 + $0x60] sm:$0xff]  ;;  %v542_v6 = vld [vmem:[%s1530_s26 + $0x58] sm:$0xff]  ;;  %v541_v7 = vld [vmem:[%s1530_s26 + $0x50] sm:$0xff] }
  0x5c   : > { %564 = vmatpush1.msra.mxu0 %v546_v1  ;;  %1161 = vmatpush1.msra.mxu1 %v546_v1  ;;  %v540_v8 = vld [vmem:[%s1530_s26 + $0x48] sm:$0xff]  ;;  %v539_v9 = vld [vmem:[%s1530_s26 + $0x40] sm:$0xff]  ;;  %v538_v10 = vld [vmem:[%s1530_s26 + $0x38] sm:$0xff] }
  0x5d   : > { %565 = vmatprep.subr.mxu0 %v1309_v2  ;;  %1130 = vmatprep.subr.mxu1 %v1309_v2  ;;  %v537_v11 = vld [vmem:[%s1530_s26 + $0x30] sm:$0xff]  ;;  %v536_v12 = vld [vmem:[%s1530_s26 + $0x28] sm:$0xff]  ;;  %v535_v13 = vld [vmem:[%s1530_s26 + $0x20] sm:$0xff] }
  0x5e   : > { %566 = vmatpush1.msra.mxu0 %v545_v3  ;;  %1162 = vmatpush1.msra.mxu1 %v545_v3  ;;  %v534_v14 = vld [vmem:[%s1530_s26 + $0x18] sm:$0xff]  ;;  %v533_v15 = vld [vmem:[%s1530_s26 + $0x10] sm:$0xff]  ;;  %v532_v16 = vld [vmem:[%s1530_s26 + $0x8] sm:$0xff] }
  0x5f   : > { %567 = vmatprep.subr.mxu0 %v1309_v2  ;;  %1131 = vmatprep.subr.mxu1 %v1309_v2  ;;  %v531_v17 = vld [vmem:[%s1530_s26] sm:$0xff]  ;;  %v562_v18 = vld [vmem:[%s1530_s26 + $0xf8] sm:$0xff]  ;;  %v561_v19 = vld [vmem:[%s1530_s26 + $0xf0] sm:$0xff] }
  0x60   : > { %568 = vmatpush1.msra.mxu0 %v544_v4  ;;  %1163 = vmatpush1.msra.mxu1 %v544_v4  ;;  %v560_v20 = vld [vmem:[%s1530_s26 + $0xe8] sm:$0xff]  ;;  %v559_v21 = vld [vmem:[%s1530_s26 + $0xe0] sm:$0xff]  ;;  %v558_v22 = vld [vmem:[%s1530_s26 + $0xd8] sm:$0xff] }
  0x61   : > { %569 = vmatprep.subr.mxu0 %v1309_v2  ;;  %1132 = vmatprep.subr.mxu1 %v1309_v2  ;;  %v557_v23 = vld [vmem:[%s1530_s26 + $0xd0] sm:$0xff]  ;;  %v556_v24 = vld [vmem:[%s1530_s26 + $0xc8] sm:$0xff]  ;;  %v555_v25 = vld [vmem:[%s1530_s26 + $0xc0] sm:$0xff] }
  0x62   : > { %570 = vmatpush1.msra.mxu0 %v543_v5  ;;  %1164 = vmatpush1.msra.mxu1 %v543_v5  ;;  %v554_v26 = vld [vmem:[%s1530_s26 + $0xb8] sm:$0xff]  ;;  %v553_v27 = vld [vmem:[%s1530_s26 + $0xb0] sm:$0xff]  ;;  %v552_v28 = vld [vmem:[%s1530_s26 + $0xa8] sm:$0xff] }
  0x63   : > { %571 = vmatprep.subr.mxu0 %v1309_v2  ;;  %1133 = vmatprep.subr.mxu1 %v1309_v2  ;;  %v551_v29 = vld [vmem:[%s1530_s26 + $0xa0] sm:$0xff]  ;;  %v550_v30 = vld [vmem:[%s1530_s26 + $0x98] sm:$0xff]  ;;  %v549_v31 = vld [vmem:[%s1530_s26 + $0x90] sm:$0xff] }
  0x64   : > { %572 = vmatpush1.msra.mxu0 %v542_v6  ;;  %1165 = vmatpush1.msra.mxu1 %v542_v6  ;;  %v548_v32 = vld [vmem:[%s1530_s26 + $0x88] sm:$0xff]  ;;  %v547_v33 = vld [vmem:[%s1530_s26 + $0x80] sm:$0xff]  ;;  %v470_v38 = vld [vmem:[%s1537_s12 + $0x18] sm:$0xff] }
  0x65   : > { %573 = vmatprep.subr.mxu0 %v1309_v2  ;;  %1134 = vmatprep.subr.mxu1 %v1309_v2  ;;  %v468_v34 = vld [vmem:[%s1537_s12 + $0x8] sm:$0xff]  ;;  %v467_v36 = vld [vmem:[%s1537_s12] sm:$0xff]  ;;  %v502_v39 = vld [vmem:[%s1537_s12 + $0x118] sm:$0xff] }
  0x66   : > { %574 = vmatpush1.msra.mxu0 %v541_v7  ;;  %1166 = vmatpush1.msra.mxu1 %v541_v7  ;;  %v500_v35 = vld [vmem:[%s1537_s12 + $0x108] sm:$0xff]  ;;  %v499_v37 = vld [vmem:[%s1537_s12 + $0x100] sm:$0xff]  ;;  %v469_v40 = vld [vmem:[%s1537_s12 + $0x10] sm:$0xff] }
  0x67   : > { %575 = vmatprep.subr.mxu0 %v1309_v2  ;;  %1135 = vmatprep.subr.mxu1 %v1309_v2  ;;  %v501_v41 = vld [vmem:[%s1537_s12 + $0x110] sm:$0xff]  ;;  %v472_v42 = vld [vmem:[%s1537_s12 + $0x28] sm:$0xff]  ;;  %v471_v44 = vld [vmem:[%s1537_s12 + $0x20] sm:$0xff] }
  0x68   : > { %576 = vmatpush1.msra.mxu0 %v540_v8  ;;  %1167 = vmatpush1.msra.mxu1 %v540_v8  ;;  %v504_v43 = vld [vmem:[%s1537_s12 + $0x128] sm:$0xff]  ;;  %v503_v45 = vld [vmem:[%s1537_s12 + $0x120] sm:$0xff]  ;;  %v474_v46 = vld [vmem:[%s1537_s12 + $0x38] sm:$0xff] }
  0x69   : > { %577 = vmatprep.subr.mxu0 %v1309_v2  ;;  %1136 = vmatprep.subr.mxu1 %v1309_v2  ;;  %v506_v47 = vld [vmem:[%s1537_s12 + $0x138] sm:$0xff]  ;;  %v473_v48 = vld [vmem:[%s1537_s12 + $0x30] sm:$0xff]  ;;  %v476_v50 = vld [vmem:[%s1537_s12 + $0x48] sm:$0xff] }
  0x6a   : > { %578 = vmatpush1.msra.mxu0 %v539_v9  ;;  %1168 = vmatpush1.msra.mxu1 %v539_v9  ;;  %v505_v49 = vld [vmem:[%s1537_s12 + $0x130] sm:$0xff]  ;;  %v508_v51 = vld [vmem:[%s1537_s12 + $0x148] sm:$0xff]  ;;  %v475_v52 = vld [vmem:[%s1537_s12 + $0x40] sm:$0xff] }
  0x6b   : > { %579 = vmatprep.subr.mxu0 %v1309_v2  ;;  %1137 = vmatprep.subr.mxu1 %v1309_v2  ;;  %v507_v53 = vld [vmem:[%s1537_s12 + $0x140] sm:$0xff]  ;;  %v478_v54 = vld [vmem:[%s1537_s12 + $0x58] sm:$0xff]  ;;  %v477_v56 = vld [vmem:[%s1537_s12 + $0x50] sm:$0xff] }
  0x6c   : > { %580 = vmatpush1.msra.mxu0 %v538_v10  ;;  %1169 = vmatpush1.msra.mxu1 %v538_v10  ;;  %v510_v55 = vld [vmem:[%s1537_s12 + $0x158] sm:$0xff]  ;;  %v509_v57 = vld [vmem:[%s1537_s12 + $0x150] sm:$0xff]  ;;  %v480_v58 = vld [vmem:[%s1537_s12 + $0x68] sm:$0xff] }
  0x6d   : > { %581 = vmatprep.subr.mxu0 %v1309_v2  ;;  %1138 = vmatprep.subr.mxu1 %v1309_v2  ;;  %v512_v59 = vld [vmem:[%s1537_s12 + $0x168] sm:$0xff]  ;;  %v479_v60 = vld [vmem:[%s1537_s12 + $0x60] sm:$0xff]  ;;  %v482_v62 = vld [vmem:[%s1537_s12 + $0x78] sm:$0xff] }
  0x6e   : > { %582 = vmatpush1.msra.mxu0 %v537_v11  ;;  %1170 = vmatpush1.msra.mxu1 %v537_v11  ;;  %v511_v61 = vld [vmem:[%s1537_s12 + $0x160] sm:$0xff]  ;;  %v514_v63 = vld [vmem:[%s1537_s12 + $0x178] sm:$0xff]  ;;  %v481_v0 = vld [vmem:[%s1537_s12 + $0x70] sm:$0xff] }
  0x6f   : > { %583 = vmatprep.subr.mxu0 %v1309_v2  ;;  %1139 = vmatprep.subr.mxu1 %v1309_v2  ;;  %v513_v1 = vld [vmem:[%s1537_s12 + $0x170] sm:$0xff]  ;;  %v516_v3 = vld [vmem:[%s1537_s12 + $0x188] sm:$0xff]  ;;  %v483_v4 = vld [vmem:[%s1537_s12 + $0x80] sm:$0xff] }
  0x70   : > { %584 = vmatpush1.msra.mxu0 %v536_v12  ;;  %1171 = vmatpush1.msra.mxu1 %v536_v12  ;;  %v515_v5 = vld [vmem:[%s1537_s12 + $0x180] sm:$0xff]  ;;  %v486_v6 = vld [vmem:[%s1537_s12 + $0x98] sm:$0xff]  ;;  %v485_v8 = vld [vmem:[%s1537_s12 + $0x90] sm:$0xff] }
  0x71   : > { %585 = vmatprep.subr.mxu0 %v1309_v2  ;;  %1140 = vmatprep.subr.mxu1 %v1309_v2  ;;  %v518_v7 = vld [vmem:[%s1537_s12 + $0x198] sm:$0xff]  ;;  %v517_v9 = vld [vmem:[%s1537_s12 + $0x190] sm:$0xff]  ;;  %v488_v10 = vld [vmem:[%s1537_s12 + $0xa8] sm:$0xff] }
  0x72   : > { %586 = vmatpush1.msra.mxu0 %v535_v13  ;;  %1172 = vmatpush1.msra.mxu1 %v535_v13  ;;  %v520_v11 = vld [vmem:[%s1537_s12 + $0x1a8] sm:$0xff]  ;;  %v487_v12 = vld [vmem:[%s1537_s12 + $0xa0] sm:$0xff] }
  0x73   : > { %587 = vmatprep.subr.mxu0 %v1309_v2  ;;  %1141 = vmatprep.subr.mxu1 %v1309_v2  ;;  %v519_v13 = vld [vmem:[%s1537_s12 + $0x1a0] sm:$0xff] }
  0x74   : > { %588 = vmatpush1.msra.mxu0 %v534_v14  ;;  %1173 = vmatpush1.msra.mxu1 %v534_v14  ;;  %v490_v14 = vld [vmem:[%s1537_s12 + $0xb8] sm:$0xff] }
  0x75   : > { %589 = vmatprep.subr.mxu0 %v1309_v2  ;;  %1142 = vmatprep.subr.mxu1 %v1309_v2 }
  0x76   : > { %590 = vmatpush1.msra.mxu0 %v533_v15  ;;  %1174 = vmatpush1.msra.mxu1 %v533_v15  ;;  %v522_v15 = vld [vmem:[%s1537_s12 + $0x1b8] sm:$0xff] }
  0x77   : > { %591 = vmatprep.subr.mxu0 %v1309_v2  ;;  %1143 = vmatprep.subr.mxu1 %v1309_v2 }
  0x78   : > { %592 = vmatpush1.msra.mxu0 %v532_v16  ;;  %1175 = vmatpush1.msra.mxu1 %v532_v16  ;;  %v489_v16 = vld [vmem:[%s1537_s12 + $0xb0] sm:$0xff] }
  0x79   : > { %593 = vmatprep.subr.mxu0 %v1309_v2  ;;  %1144 = vmatprep.subr.mxu1 %v1309_v2 }
  0x7a   : > { %594 = vmatpush1.msra.mxu0 %v531_v17  ;;  %1176 = vmatpush1.msra.mxu1 %v531_v17  ;;  %v521_v17 = vld [vmem:[%s1537_s12 + $0x1b0] sm:$0xff] }
  0x7b   : > { %595 = vmatprep.subr.mxu0 %v1309_v2  ;;  %1145 = vmatprep.subr.mxu1 %v1309_v2 }
  0x7c   : > { %596 = vmatpush2.msra.mxu0 %v562_v18  ;;  %1177 = vmatpush2.msra.mxu1 %v562_v18  ;;  %v492_v18 = vld [vmem:[%s1537_s12 + $0xc8] sm:$0xff] }
  0x7d   : > { %597 = vmatprep.subr.mxu0 %v1309_v2  ;;  %1146 = vmatprep.subr.mxu1 %v1309_v2 }
  0x7e   : > { %598 = vmatpush2.msra.mxu0 %v561_v19  ;;  %1178 = vmatpush2.msra.mxu1 %v561_v19  ;;  %v524_v19 = vld [vmem:[%s1537_s12 + $0x1c8] sm:$0xff] }
  0x7f   : > { %599 = vmatprep.subr.mxu0 %v1309_v2  ;;  %1147 = vmatprep.subr.mxu1 %v1309_v2 }
  0x80   : > { %600 = vmatpush2.msra.mxu0 %v560_v20  ;;  %1179 = vmatpush2.msra.mxu1 %v560_v20  ;;  %v491_v20 = vld [vmem:[%s1537_s12 + $0xc0] sm:$0xff] }
  0x81   : > { %601 = vmatprep.subr.mxu0 %v1309_v2  ;;  %1148 = vmatprep.subr.mxu1 %v1309_v2 }
  0x82   : > { %602 = vmatpush2.msra.mxu0 %v559_v21  ;;  %1180 = vmatpush2.msra.mxu1 %v559_v21  ;;  %v523_v21 = vld [vmem:[%s1537_s12 + $0x1c0] sm:$0xff] }
  0x83   : > { %603 = vmatprep.subr.mxu0 %v1309_v2  ;;  %1149 = vmatprep.subr.mxu1 %v1309_v2 }
  0x84   : > { %604 = vmatpush2.msra.mxu0 %v558_v22  ;;  %1181 = vmatpush2.msra.mxu1 %v558_v22  ;;  %v494_v22 = vld [vmem:[%s1537_s12 + $0xd8] sm:$0xff] }
  0x85   : > { %605 = vmatprep.subr.mxu0 %v1309_v2  ;;  %1150 = vmatprep.subr.mxu1 %v1309_v2 }
  0x86   : > { %606 = vmatpush2.msra.mxu0 %v557_v23  ;;  %1182 = vmatpush2.msra.mxu1 %v557_v23  ;;  %v526_v23 = vld [vmem:[%s1537_s12 + $0x1d8] sm:$0xff] }
  0x87   : > { %607 = vmatprep.subr.mxu0 %v1309_v2  ;;  %1151 = vmatprep.subr.mxu1 %v1309_v2 }
  0x88   : > { %608 = vmatpush2.msra.mxu0 %v556_v24  ;;  %1183 = vmatpush2.msra.mxu1 %v556_v24  ;;  %v493_v24 = vld [vmem:[%s1537_s12 + $0xd0] sm:$0xff] }
  0x89   : > { %609 = vmatprep.subr.mxu0 %v1309_v2  ;;  %1152 = vmatprep.subr.mxu1 %v1309_v2 }
  0x8a   : > { %610 = vmatpush2.msra.mxu0 %v555_v25  ;;  %1184 = vmatpush2.msra.mxu1 %v555_v25  ;;  %v525_v25 = vld [vmem:[%s1537_s12 + $0x1d0] sm:$0xff] }
  0x8b   : > { %611 = vmatprep.subr.mxu0 %v1309_v2  ;;  %1153 = vmatprep.subr.mxu1 %v1309_v2 }
  0x8c   : > { %612 = vmatpush2.msra.mxu0 %v554_v26  ;;  %1185 = vmatpush2.msra.mxu1 %v554_v26  ;;  %v496_v26 = vld [vmem:[%s1537_s12 + $0xe8] sm:$0xff] }
  0x8d   : > { %613 = vmatprep.subr.mxu0 %v1309_v2  ;;  %1154 = vmatprep.subr.mxu1 %v1309_v2 }
  0x8e   : > { %614 = vmatpush2.msra.mxu0 %v553_v27  ;;  %1186 = vmatpush2.msra.mxu1 %v553_v27  ;;  %v528_v27 = vld [vmem:[%s1537_s12 + $0x1e8] sm:$0xff] }
  0x8f   : > { %615 = vmatprep.subr.mxu0 %v1309_v2  ;;  %1155 = vmatprep.subr.mxu1 %v1309_v2 }
  0x90   : > { %616 = vmatpush2.msra.mxu0 %v552_v28  ;;  %1187 = vmatpush2.msra.mxu1 %v552_v28  ;;  %v495_v28 = vld [vmem:[%s1537_s12 + $0xe0] sm:$0xff] }
  0x91   : > { %617 = vmatprep.subr.mxu0 %v1309_v2  ;;  %1156 = vmatprep.subr.mxu1 %v1309_v2 }
  0x92   : > { %618 = vmatpush2.msra.mxu0 %v551_v29  ;;  %1188 = vmatpush2.msra.mxu1 %v551_v29  ;;  %v527_v29 = vld [vmem:[%s1537_s12 + $0x1e0] sm:$0xff] }
  0x93   : > { %619 = vmatprep.subr.mxu0 %v1309_v2  ;;  %1157 = vmatprep.subr.mxu1 %v1309_v2 }
  0x94   : > { %620 = vmatpush2.msra.mxu0 %v550_v30  ;;  %1189 = vmatpush2.msra.mxu1 %v550_v30  ;;  %v498_v30 = vld [vmem:[%s1537_s12 + $0xf8] sm:$0xff] }
  0x95   : > { %621 = vmatprep.subr.mxu0 %v1309_v2  ;;  %1158 = vmatprep.subr.mxu1 %v1309_v2 }
  0x96   : > { %622 = vmatpush2.msra.mxu0 %v549_v31  ;;  %1190 = vmatpush2.msra.mxu1 %v549_v31  ;;  %v530_v31 = vld [vmem:[%s1537_s12 + $0x1f8] sm:$0xff] }
  0x97   : > { %623 = vmatprep.subr.mxu0 %v1309_v2  ;;  %1159 = vmatprep.subr.mxu1 %v1309_v2 }
  0x98   : > { %624 = vmatpush2.msra.mxu0 %v548_v32  ;;  %1191 = vmatpush2.msra.mxu1 %v548_v32  ;;  %v497_v32 = vld [vmem:[%s1537_s12 + $0xf0] sm:$0xff] }
  0x99   : > { %625 = vmatprep.subr.mxu0 %v1309_v2  ;;  %1160 = vmatprep.subr.mxu1 %v1309_v2  ;;  %v484_v2 = vld [vmem:[%s1537_s12 + $0x88] sm:$0xff] }
  0x9a   : > { %626 = vmatpush2.msra.mxu0 %v547_v33  ;;  %1192 = vmatpush2.msra.mxu1 %v547_v33  ;;  %v529_v33 = vld [vmem:[%s1537_s12 + $0x1f0] sm:$0xff] }
  0x9b   : > { %627 = vmatprep.mubr.f32.mxu0 %v468_v34  ;;  %707 = vmatprep.mubr.f32.mxu1 %v500_v35  ;;  %v435_v34 = vld [vmem:[#allocation2 + $0xb0] sm:$0xff]  ;;  %v451_v35 = vld [vmem:[#allocation2 + $0x38] sm:$0xff] }
  0x9c   : > { %628 = vmatmul.mubr.f32.vlgmr.msra.gmra.mxu0 %v467_v36  ;;  %708 = vmatmul.mubr.f32.vlgmr.msra.gmra.mxu1 %v499_v37 }
  0x9d   : > { %632 = vmatprep.mubr.f32.mxu0 %v470_v38  ;;  %712 = vmatprep.mubr.f32.mxu1 %v502_v39 }
  0xa0   : > { %633 = vmatmul.mubr.f32.gmra.mxu0 %v469_v40  ;;  %713 = vmatmul.mubr.f32.gmra.mxu1 %v501_v41 }
  0xa1   : > { %637 = vmatprep.mubr.f32.mxu0 %v472_v42  ;;  %717 = vmatprep.mubr.f32.mxu1 %v504_v43  ;;  %v436_v42 = vld [vmem:[#allocation2] sm:$0xff]  ;;  %v452_v43 = vld [vmem:[#allocation2 + $0x58] sm:$0xff] }
  0xa4   : > { %638 = vmatmul.mubr.f32.gmra.mxu0 %v471_v44  ;;  %718 = vmatmul.mubr.f32.gmra.mxu1 %v503_v45 }
  0xa5   : > { %642 = vmatprep.mubr.f32.mxu0 %v474_v46  ;;  %722 = vmatprep.mubr.f32.mxu1 %v506_v47 }
  0xa8   : > { %643 = vmatmul.mubr.f32.gmra.mxu0 %v473_v48  ;;  %723 = vmatmul.mubr.f32.gmra.mxu1 %v505_v49 }
  0xa9   : > { %647 = vmatprep.mubr.f32.mxu0 %v476_v50  ;;  %727 = vmatprep.mubr.f32.mxu1 %v508_v51  ;;  %v437_v50 = vld [vmem:[#allocation2 + $0xd8] sm:$0xff]  ;;  %v453_v51 = vld [vmem:[#allocation2 + $0x40] sm:$0xff] }
  0xac   : > { %648 = vmatmul.mubr.f32.gmra.mxu0 %v475_v52  ;;  %728 = vmatmul.mubr.f32.gmra.mxu1 %v507_v53 }
  0xad   : > { %652 = vmatprep.mubr.f32.mxu0 %v478_v54  ;;  %732 = vmatprep.mubr.f32.mxu1 %v510_v55 }
  0xb0   : > { %653 = vmatmul.mubr.f32.gmra.mxu0 %v477_v56  ;;  %733 = vmatmul.mubr.f32.gmra.mxu1 %v509_v57 }
  0xb1   : > { %657 = vmatprep.mubr.f32.mxu0 %v480_v58  ;;  %737 = vmatprep.mubr.f32.mxu1 %v512_v59  ;;  %v438_v58 = vld [vmem:[#allocation2 + $0x18] sm:$0xff]  ;;  %v454_v59 = vld [vmem:[#allocation2 + $0xc8] sm:$0xff] }
  0xb4   : > { %658 = vmatmul.mubr.f32.gmra.mxu0 %v479_v60  ;;  %738 = vmatmul.mubr.f32.gmra.mxu1 %v511_v61 }
  0xb5   : > { %662 = vmatprep.mubr.f32.mxu0 %v482_v62  ;;  %742 = vmatprep.mubr.f32.mxu1 %v514_v63 }
  0xb8   : > { %663 = vmatmul.mubr.f32.gmra.mxu0 %v481_v0  ;;  %743 = vmatmul.mubr.f32.gmra.mxu1 %v513_v1 }
  0xb9   : > { %667 = vmatprep.mubr.f32.mxu0 %v484_v2  ;;  %747 = vmatprep.mubr.f32.mxu1 %v516_v3  ;;  %v439_v2 = vld [vmem:[#allocation2 + $0x50] sm:$0xff]  ;;  %v455_v3 = vld [vmem:[#allocation2 + $0xe0] sm:$0xff] }
  0xbc   : > { %668 = vmatmul.mubr.f32.gmra.mxu0 %v483_v4  ;;  %748 = vmatmul.mubr.f32.gmra.mxu1 %v515_v5 }
  0xbd   : > { %672 = vmatprep.mubr.f32.mxu0 %v486_v6  ;;  %752 = vmatprep.mubr.f32.mxu1 %v518_v7 }
  0xc0   : > { %673 = vmatmul.mubr.f32.gmra.mxu0 %v485_v8  ;;  %753 = vmatmul.mubr.f32.gmra.mxu1 %v517_v9 }
  0xc1   : > { %677 = vmatprep.mubr.f32.mxu0 %v488_v10  ;;  %757 = vmatprep.mubr.f32.mxu1 %v520_v11  ;;  %v440_v10 = vld [vmem:[#allocation2 + $0x68] sm:$0xff]  ;;  %v456_v11 = vld [vmem:[#allocation2 + $0x90] sm:$0xff] }
  0xc4   : > { %678 = vmatmul.mubr.f32.gmra.mxu0 %v487_v12  ;;  %758 = vmatmul.mubr.f32.gmra.mxu1 %v519_v13 }
  0xc5   : > { %682 = vmatprep.mubr.f32.mxu0 %v490_v14  ;;  %762 = vmatprep.mubr.f32.mxu1 %v522_v15 }
  0xc8   : > { %683 = vmatmul.mubr.f32.gmra.mxu0 %v489_v16  ;;  %763 = vmatmul.mubr.f32.gmra.mxu1 %v521_v17 }
  0xc9   : > { %687 = vmatprep.mubr.f32.mxu0 %v492_v18  ;;  %767 = vmatprep.mubr.f32.mxu1 %v524_v19  ;;  %v441_v18 = vld [vmem:[#allocation2 + $0x30] sm:$0xff] }
  0xca   : > { %v457_v19 = vld [vmem:[#allocation2 + $0x70] sm:$0xff] }
  0xcc   : > { %688 = vmatmul.mubr.f32.gmra.mxu0 %v491_v20  ;;  %768 = vmatmul.mubr.f32.gmra.mxu1 %v523_v21 }
  0xcd   : > { %692 = vmatprep.mubr.f32.mxu0 %v494_v22  ;;  %772 = vmatprep.mubr.f32.mxu1 %v526_v23 }
  0xd0   : > { %693 = vmatmul.mubr.f32.gmra.mxu0 %v493_v24  ;;  %773 = vmatmul.mubr.f32.gmra.mxu1 %v525_v25 }
  0xd1   : > { %697 = vmatprep.mubr.f32.mxu0 %v496_v26  ;;  %777 = vmatprep.mubr.f32.mxu1 %v528_v27  ;;  %v442_v26 = vld [vmem:[#allocation2 + $0x48] sm:$0xff]  ;;  %v458_v27 = vld [vmem:[#allocation2 + $0xc0] sm:$0xff] }
  0xd4   : > { %698 = vmatmul.mubr.f32.gmra.mxu0 %v495_v28  ;;  %778 = vmatmul.mubr.f32.gmra.mxu1 %v527_v29 }
  0xd5   : > { %702 = vmatprep.mubr.f32.mxu0 %v498_v30  ;;  %782 = vmatprep.mubr.f32.mxu1 %v530_v31 }
  0xd8   : > { %703 = vmatmul.mubr.f32.gmra.mxu0 %v497_v32  ;;  %783 = vmatmul.mubr.f32.gmra.mxu1 %v529_v33 }
 0x15c   : > { %v629_v36 = vpop.f32.mrf.mxu0  ;;  %v709_v37 = vpop.f32.mrf.mxu1 }
 0x15d   : > { %v788_v38 = vadd.f32 %v629_v36, %v435_v34  ;;  %v804_v39 = vadd.f32 %v709_v37, %v451_v35  ;;  %v443_v34 = vld [vmem:[#allocation2 + $0x80] sm:$0xff]  ;;  %v459_v35 = vld [vmem:[#allocation2 + $0xa8] sm:$0xff] }
 0x15e   : > { %v631_v40 = vpop.f32.mrf.mxu0  ;;  %v711_v41 = vpop.f32.mrf.mxu1 }
 0x15f   : > { %820 = vst [vmem:[#allocation2 + $0xb0] sm:$0xff] %v788_v38  ;;  %836 = vst [vmem:[#allocation2 + $0x38] sm:$0xff] %v804_v39 }
 0x160   : > { %v634_v44 = vpop.f32.mrf.mxu0  ;;  %v714_v45 = vpop.f32.mrf.mxu1 }
 0x161   : > { %v789_v46 = vadd.f32 %v634_v44, %v436_v42  ;;  %v805_v47 = vadd.f32 %v714_v45, %v452_v43  ;;  %v444_v42 = vld [vmem:[#allocation2 + $0x88] sm:$0xff]  ;;  %v460_v43 = vld [vmem:[#allocation2 + $0xd0] sm:$0xff] }
 0x162   : > { %v636_v48 = vpop.f32.mrf.mxu0  ;;  %v716_v49 = vpop.f32.mrf.mxu1 }
 0x163   : > { %821 = vst [vmem:[#allocation2] sm:$0xff] %v789_v46  ;;  %837 = vst [vmem:[#allocation2 + $0x58] sm:$0xff] %v805_v47 }
 0x164   : > { %v639_v52 = vpop.f32.mrf.mxu0  ;;  %v719_v53 = vpop.f32.mrf.mxu1 }
 0x165   : > { %v790_v54 = vadd.f32 %v639_v52, %v437_v50  ;;  %v806_v55 = vadd.f32 %v719_v53, %v453_v51  ;;  %v445_v50 = vld [vmem:[#allocation2 + $0xe8] sm:$0xff]  ;;  %v461_v51 = vld [vmem:[#allocation2 + $0x10] sm:$0xff] }
 0x166   : > { %v641_v56 = vpop.f32.mrf.mxu0  ;;  %v721_v57 = vpop.f32.mrf.mxu1 }
 0x167   : > { %822 = vst [vmem:[#allocation2 + $0xd8] sm:$0xff] %v790_v54  ;;  %838 = vst [vmem:[#allocation2 + $0x40] sm:$0xff] %v806_v55 }
 0x168   : > { %v644_v60 = vpop.f32.mrf.mxu0  ;;  %v724_v61 = vpop.f32.mrf.mxu1 }
 0x169   : > { %v791_v62 = vadd.f32 %v644_v60, %v438_v58  ;;  %v807_v63 = vadd.f32 %v724_v61, %v454_v59  ;;  %v446_v58 = vld [vmem:[#allocation2 + $0xb8] sm:$0xff]  ;;  %v462_v59 = vld [vmem:[#allocation2 + $0x28] sm:$0xff] }
 0x16a   : > { %v646_v0 = vpop.f32.mrf.mxu0  ;;  %v726_v1 = vpop.f32.mrf.mxu1 }
 0x16b   : > { %823 = vst [vmem:[#allocation2 + $0x18] sm:$0xff] %v791_v62  ;;  %839 = vst [vmem:[#allocation2 + $0xc8] sm:$0xff] %v807_v63 }
 0x16c   : > { %v649_v4 = vpop.f32.mrf.mxu0  ;;  %v729_v5 = vpop.f32.mrf.mxu1 }
 0x16d   : > { %v792_v6 = vadd.f32 %v649_v4, %v439_v2  ;;  %v808_v7 = vadd.f32 %v729_v5, %v455_v3  ;;  %v447_v2 = vld [vmem:[#allocation2 + $0x60] sm:$0xff] }
 0x16e   : > { %v651_v8 = vpop.f32.mrf.mxu0  ;;  %v731_v9 = vpop.f32.mrf.mxu1  ;;  %v463_v3 = vld [vmem:[#allocation2 + $0xa0] sm:$0xff] }
 0x16f   : > { %824 = vst [vmem:[#allocation2 + $0x50] sm:$0xff] %v792_v6  ;;  %840 = vst [vmem:[#allocation2 + $0xe0] sm:$0xff] %v808_v7 }
 0x170   : > { %v654_v12 = vpop.f32.mrf.mxu0  ;;  %v734_v13 = vpop.f32.mrf.mxu1 }
 0x171   : > { %v793_v14 = vadd.f32 %v654_v12, %v440_v10  ;;  %v809_v15 = vadd.f32 %v734_v13, %v456_v11  ;;  %v448_v10 = vld [vmem:[#allocation2 + $0xf0] sm:$0xff]  ;;  %v464_v11 = vld [vmem:[#allocation2 + $0xf8] sm:$0xff] }
 0x172   : > { %v656_v16 = vpop.f32.mrf.mxu0  ;;  %v736_v17 = vpop.f32.mrf.mxu1 }
 0x173   : > { %825 = vst [vmem:[#allocation2 + $0x68] sm:$0xff] %v793_v14  ;;  %841 = vst [vmem:[#allocation2 + $0x90] sm:$0xff] %v809_v15 }
 0x174   : > { %v659_v20 = vpop.f32.mrf.mxu0  ;;  %v739_v21 = vpop.f32.mrf.mxu1 }
 0x175   : > { %v794_v22 = vadd.f32 %v659_v20, %v441_v18  ;;  %v810_v23 = vadd.f32 %v739_v21, %v457_v19  ;;  %v449_v18 = vld [vmem:[#allocation2 + $0x8] sm:$0xff]  ;;  %v465_v19 = vld [vmem:[#allocation2 + $0x20] sm:$0xff] }
 0x176   : > { %v661_v24 = vpop.f32.mrf.mxu0  ;;  %v741_v25 = vpop.f32.mrf.mxu1 }
 0x177   : > { %826 = vst [vmem:[#allocation2 + $0x30] sm:$0xff] %v794_v22  ;;  %842 = vst [vmem:[#allocation2 + $0x70] sm:$0xff] %v810_v23 }
 0x178   : > { %v664_v28 = vpop.f32.mrf.mxu0  ;;  %v744_v29 = vpop.f32.mrf.mxu1 }
 0x179   : > { %v795_v30 = vadd.f32 %v664_v28, %v442_v26  ;;  %v811_v31 = vadd.f32 %v744_v29, %v458_v27  ;;  %v450_v26 = vld [vmem:[#allocation2 + $0x78] sm:$0xff] }
 0x17a   : > { %v666_v32 = vpop.f32.mrf.mxu0  ;;  %v746_v33 = vpop.f32.mrf.mxu1  ;;  %v466_v27 = vld [vmem:[#allocation2 + $0x98] sm:$0xff] }
 0x17b   : > { %827 = vst [vmem:[#allocation2 + $0x48] sm:$0xff] %v795_v30  ;;  %843 = vst [vmem:[#allocation2 + $0xc0] sm:$0xff] %v811_v31 }
 0x17c   : > { %v669_v36 = vpop.f32.mrf.mxu0  ;;  %v749_v37 = vpop.f32.mrf.mxu1 }
 0x17d   : > { %v796_v38 = vadd.f32 %v669_v36, %v443_v34  ;;  %v812_v39 = vadd.f32 %v749_v37, %v459_v35 }
 0x17e   : > { %v671_v40 = vpop.f32.mrf.mxu0  ;;  %v751_v41 = vpop.f32.mrf.mxu1 }
 0x17f   : > { %828 = vst [vmem:[#allocation2 + $0x80] sm:$0xff] %v796_v38  ;;  %844 = vst [vmem:[#allocation2 + $0xa8] sm:$0xff] %v812_v39 }
 0x180   : > { %v674_v44 = vpop.f32.mrf.mxu0  ;;  %v754_v45 = vpop.f32.mrf.mxu1 }
 0x181   : > { %v797_v46 = vadd.f32 %v674_v44, %v444_v42  ;;  %v813_v47 = vadd.f32 %v754_v45, %v460_v43 }
 0x182   : > { %v676_v48 = vpop.f32.mrf.mxu0  ;;  %v756_v49 = vpop.f32.mrf.mxu1 }
 0x183   : > { %829 = vst [vmem:[#allocation2 + $0x88] sm:$0xff] %v797_v46  ;;  %845 = vst [vmem:[#allocation2 + $0xd0] sm:$0xff] %v813_v47 }
 0x184   : > { %v679_v52 = vpop.f32.mrf.mxu0  ;;  %v759_v53 = vpop.f32.mrf.mxu1 }
 0x185   : > { %v798_v54 = vadd.f32 %v679_v52, %v445_v50  ;;  %v814_v55 = vadd.f32 %v759_v53, %v461_v51 }
 0x186   : > { %v681_v56 = vpop.f32.mrf.mxu0  ;;  %v761_v57 = vpop.f32.mrf.mxu1 }
 0x187   : > { %830 = vst [vmem:[#allocation2 + $0xe8] sm:$0xff] %v798_v54  ;;  %846 = vst [vmem:[#allocation2 + $0x10] sm:$0xff] %v814_v55 }
 0x188   : > { %v684_v60 = vpop.f32.mrf.mxu0  ;;  %v764_v61 = vpop.f32.mrf.mxu1 }
 0x189   : > { %v799_v62 = vadd.f32 %v684_v60, %v446_v58  ;;  %v815_v63 = vadd.f32 %v764_v61, %v462_v59 }
 0x18a   : > { %v686_v0 = vpop.f32.mrf.mxu0  ;;  %v766_v1 = vpop.f32.mrf.mxu1 }
 0x18b   : > { %831 = vst [vmem:[#allocation2 + $0xb8] sm:$0xff] %v799_v62  ;;  %847 = vst [vmem:[#allocation2 + $0x28] sm:$0xff] %v815_v63 }
 0x18c   : > { %v689_v4 = vpop.f32.mrf.mxu0  ;;  %v769_v5 = vpop.f32.mrf.mxu1 }
 0x18d   : > { %v800_v6 = vadd.f32 %v689_v4, %v447_v2  ;;  %v816_v7 = vadd.f32 %v769_v5, %v463_v3 }
 0x18e   : > { %v691_v8 = vpop.f32.mrf.mxu0  ;;  %v771_v9 = vpop.f32.mrf.mxu1 }
 0x18f   : > { %832 = vst [vmem:[#allocation2 + $0x60] sm:$0xff] %v800_v6  ;;  %848 = vst [vmem:[#allocation2 + $0xa0] sm:$0xff] %v816_v7 }
 0x190   : > { %v694_v12 = vpop.f32.mrf.mxu0  ;;  %v774_v13 = vpop.f32.mrf.mxu1 }
 0x191   : > { %v801_v14 = vadd.f32 %v694_v12, %v448_v10  ;;  %v817_v15 = vadd.f32 %v774_v13, %v464_v11 }
 0x192   : > { %v696_v16 = vpop.f32.mrf.mxu0  ;;  %v776_v17 = vpop.f32.mrf.mxu1 }
 0x193   : > { %833 = vst [vmem:[#allocation2 + $0xf0] sm:$0xff] %v801_v14  ;;  %849 = vst [vmem:[#allocation2 + $0xf8] sm:$0xff] %v817_v15 }
 0x194   : > { %v699_v20 = vpop.f32.mrf.mxu0  ;;  %v779_v21 = vpop.f32.mrf.mxu1 }
 0x195   : > { %v802_v22 = vadd.f32 %v699_v20, %v449_v18  ;;  %v818_v23 = vadd.f32 %v779_v21, %v465_v19 }
 0x196   : > { %v701_v24 = vpop.f32.mrf.mxu0  ;;  %v781_v25 = vpop.f32.mrf.mxu1 }
 0x197   : > { %834 = vst [vmem:[#allocation2 + $0x8] sm:$0xff] %v802_v22  ;;  %850 = vst [vmem:[#allocation2 + $0x20] sm:$0xff] %v818_v23  ;;  %855 = sbr.rel (%p1125_p13) target bundleno = 433 (0x1b1), region = 63 }
 0x198   : > { %v704_v28 = vpop.f32.mrf.mxu0  ;;  %v784_v29 = vpop.f32.mrf.mxu1 }
 0x199   : > { %v803_v30 = vadd.f32 %v704_v28, %v450_v26  ;;  %v819_v31 = vadd.f32 %v784_v29, %v466_v27 }
 0x19a   : > { %v706_v32 = vpop.f32.mrf.mxu0  ;;  %v786_v33 = vpop.f32.mrf.mxu1 }
 0x19b   : > { %835 = vst [vmem:[#allocation2 + $0x78] sm:$0xff] %v803_v30  ;;  %851 = vst [vmem:[#allocation2 + $0x98] sm:$0xff] %v819_v31 }
 0x19c   : > { %v856_v34 = vld [vmem:[#allocation2 + $0xb0] sm:$0xff]  ;;  %v1704_v35 = vld [vmem:[%s1793_s2] ss:$0 sm:$0xff]  ;;  %v858_v39 = vld [vmem:[#allocation2 + $0xd8] sm:$0xff] }
 0x19d   : > { %v857_v36 = vld [vmem:[#allocation2] sm:$0xff]  ;;  %v895_v37 = vadd.f32 %v1704_v35, %v856_v34  ;;  %v859_v40 = vld [vmem:[#allocation2 + $0x18] sm:$0xff]  ;;  %v860_v41 = vld [vmem:[#allocation2 + $0x50] sm:$0xff]  ;;  %v897_v42 = vadd.f32 %v1704_v35, %v858_v39 }
 0x19e   : > { %v896_v38 = vadd.f32 %v1704_v35, %v857_v36  ;;  %v898_v43 = vadd.f32 %v1704_v35, %v859_v40  ;;  %v899_v44 = vadd.f32 %v1704_v35, %v860_v41  ;;  %v861_v45 = vld [vmem:[#allocation2 + $0x68] sm:$0xff]  ;;  %v862_v46 = vld [vmem:[#allocation2 + $0x30] sm:$0xff]  ;;  %v864_v52 = vld [vmem:[#allocation2 + $0x80] sm:$0xff] }
 0x19f   : > { %v863_v47 = vld [vmem:[#allocation2 + $0x48] sm:$0xff]  ;;  %v927_v48 = vmax.f32 %v895_v37, 0.0  ;;  %v900_v50 = vadd.f32 %v1704_v35, %v861_v45  ;;  %v901_v51 = vadd.f32 %v1704_v35, %v862_v46  ;;  %v929_v55 = vmax.f32 %v897_v42, 0.0  ;;  %v867_v59 = vld [vmem:[#allocation2 + $0xb8] sm:$0xff]  ;;  %v868_v60 = vld [vmem:[#allocation2 + $0x60] sm:$0xff] }
 0x1a0   : > { %v928_v49 = vmax.f32 %v896_v38, 0.0  ;;  %v865_v53 = vld [vmem:[#allocation2 + $0x88] sm:$0xff]  ;;  %v930_v56 = vmax.f32 %v898_v43, 0.0  ;;  %v931_v57 = vmax.f32 %v899_v44, 0.0  ;;  %v902_v58 = vadd.f32 %v1704_v35, %v863_v47  ;;  %v869_v61 = vld [vmem:[#allocation2 + $0xf0] sm:$0xff]  ;;  %v872_v8 = vld [vmem:[#allocation2 + $0x38] sm:$0xff] }
 0x1a1   : > { %v866_v54 = vld [vmem:[#allocation2 + $0xe8] sm:$0xff]  ;;  %959 = vst [vmem:[%s1535_s30] sm:$0xff] %v927_v48  ;;  %v932_v62 = vmax.f32 %v900_v50, 0.0  ;;  %v933_v63 = vmax.f32 %v901_v51, 0.0  ;;  %v903_v0 = vadd.f32 %v1704_v35, %v864_v52  ;;  %v904_v1 = vadd.f32 %v1704_v35, %v865_v53  ;;  %961 = vst [vmem:[%s1535_s30 + $0x10] sm:$0xff] %v929_v55  ;;  %v873_v9 = vld [vmem:[#allocation2 + $0x58] sm:$0xff] }
 0x1a2   : > { %960 = vst [vmem:[%s1535_s30 + $0x8] sm:$0xff] %v928_v49  ;;  %v870_v2 = vld [vmem:[#allocation2 + $0x8] sm:$0xff]  ;;  %v871_v3 = vld [vmem:[#allocation2 + $0x78] sm:$0xff]  ;;  %962 = vst [vmem:[%s1535_s30 + $0x18] sm:$0xff] %v930_v56  ;;  %v934_v4 = vmax.f32 %v902_v58, 0.0  ;;  %v905_v5 = vadd.f32 %v1704_v35, %v866_v54  ;;  %v906_v6 = vadd.f32 %v1704_v35, %v867_v59  ;;  %v907_v7 = vadd.f32 %v1704_v35, %v868_v60 }
 0x1a3   : > { %963 = vst [vmem:[%s1535_s30 + $0x20] sm:$0xff] %v931_v57  ;;  %964 = vst [vmem:[%s1535_s30 + $0x28] sm:$0xff] %v932_v62  ;;  %v935_v10 = vmax.f32 %v903_v0, 0.0  ;;  %v936_v11 = vmax.f32 %v904_v1, 0.0  ;;  %v908_v12 = vadd.f32 %v1704_v35, %v869_v61  ;;  %v909_v13 = vadd.f32 %v1704_v35, %v870_v2  ;;  %v874_v14 = vld [vmem:[#allocation2 + $0x40] sm:$0xff]  ;;  %v875_v15 = vld [vmem:[#allocation2 + $0xc8] sm:$0xff] }
 0x1a4   : > { %965 = vst [vmem:[%s1535_s30 + $0x30] sm:$0xff] %v933_v63  ;;  %v876_v16 = vld [vmem:[#allocation2 + $0xe0] sm:$0xff]  ;;  %966 = vst [vmem:[%s1535_s30 + $0x38] sm:$0xff] %v934_v4  ;;  %v937_v17 = vmax.f32 %v905_v5, 0.0  ;;  %v938_v18 = vmax.f32 %v906_v6, 0.0  ;;  %v939_v19 = vmax.f32 %v907_v7, 0.0  ;;  %v910_v20 = vadd.f32 %v1704_v35, %v871_v3 }
 0x1a5   : > { %v877_v21 = vld [vmem:[#allocation2 + $0x90] sm:$0xff]  ;;  %967 = vst [vmem:[%s1535_s30 + $0x40] sm:$0xff] %v935_v10  ;;  %968 = vst [vmem:[%s1535_s30 + $0x48] sm:$0xff] %v936_v11  ;;  %v940_v23 = vmax.f32 %v908_v12, 0.0  ;;  %v941_v24 = vmax.f32 %v909_v13, 0.0  ;;  %v911_v25 = vadd.f32 %v1704_v35, %v872_v8  ;;  %v912_v26 = vadd.f32 %v1704_v35, %v873_v9  ;;  %v879_v27 = vld [vmem:[#allocation2 + $0xc0] sm:$0xff] }
 0x1a6   : > { %v878_v22 = vld [vmem:[#allocation2 + $0x70] sm:$0xff]  ;;  %969 = vst [vmem:[%s1535_s30 + $0x50] sm:$0xff] %v937_v17  ;;  %970 = vst [vmem:[%s1535_s30 + $0x58] sm:$0xff] %v938_v18  ;;  %v942_v28 = vmax.f32 %v910_v20, 0.0  ;;  %v913_v29 = vadd.f32 %v1704_v35, %v874_v14  ;;  %v914_v30 = vadd.f32 %v1704_v35, %v875_v15  ;;  %v915_v31 = vadd.f32 %v1704_v35, %v876_v16  ;;  %v880_v32 = vld [vmem:[#allocation2 + $0xa8] sm:$0xff] }
 0x1a7   : > { %971 = vst [vmem:[%s1535_s30 + $0x60] sm:$0xff] %v939_v19  ;;  %v881_v33 = vld [vmem:[#allocation2 + $0xd0] sm:$0xff]  ;;  %972 = vst [vmem:[%s1535_s30 + $0x68] sm:$0xff] %v940_v23  ;;  %v943_v34 = vmax.f32 %v911_v25, 0.0  ;;  %v944_v36 = vmax.f32 %v912_v26, 0.0  ;;  %v916_v37 = vadd.f32 %v1704_v35, %v877_v21  ;;  %v917_v38 = vadd.f32 %v1704_v35, %v878_v22  ;;  %v883_v40 = vld [vmem:[#allocation2 + $0x28] sm:$0xff] }
 0x1a8   : > { %973 = vst [vmem:[%s1535_s30 + $0x70] sm:$0xff] %v941_v24  ;;  %v882_v39 = vld [vmem:[#allocation2 + $0x10] sm:$0xff]  ;;  %v884_v41 = vld [vmem:[#allocation2 + $0xa0] sm:$0xff]  ;;  %974 = vst [vmem:[%s1535_s30 + $0x78] sm:$0xff] %v942_v28  ;;  %v945_v42 = vmax.f32 %v913_v29, 0.0  ;;  %v946_v43 = vmax.f32 %v914_v30, 0.0  ;;  %v918_v45 = vadd.f32 %v1704_v35, %v879_v27  ;;  %v919_v50 = vadd.f32 %v1704_v35, %v880_v32 }
 0x1a9   : > { %v947_v44 = vmax.f32 %v915_v31, 0.0  ;;  %v885_v46 = vld [vmem:[#allocation2 + $0xf8] sm:$0xff]  ;;  %v886_v47 = vld [vmem:[#allocation2 + $0x20] sm:$0xff]  ;;  %975 = vst [vmem:[%s1535_s30 + $0x80] sm:$0xff] %v943_v34  ;;  %976 = vst [vmem:[%s1535_s30 + $0x88] sm:$0xff] %v944_v36  ;;  %v948_v48 = vmax.f32 %v916_v37, 0.0  ;;  %v920_v51 = vadd.f32 %v1704_v35, %v881_v33  ;;  %v921_v54 = vadd.f32 %v1704_v35, %v882_v39 }
 0x1aa   : > { %v949_v49 = vmax.f32 %v917_v38, 0.0  ;;  %v887_v52 = vld [vmem:[#allocation2 + $0x98] sm:$0xff]  ;;  %977 = vst [vmem:[%s1535_s30 + $0x90] sm:$0xff] %v945_v42  ;;  %978 = vst [vmem:[%s1535_s30 + $0x98] sm:$0xff] %v946_v43  ;;  %v950_v53 = vmax.f32 %v918_v45, 0.0  ;;  %v922_v55 = vadd.f32 %v1704_v35, %v883_v40  ;;  %v923_v56 = vadd.f32 %v1704_v35, %v884_v41 }
 0x1ab   : > { %979 = vst [vmem:[%s1535_s30 + $0xa0] sm:$0xff] %v947_v44  ;;  %980 = vst [vmem:[%s1535_s30 + $0xa8] sm:$0xff] %v948_v48  ;;  %v951_v57 = vmax.f32 %v919_v50, 0.0  ;;  %v952_v58 = vmax.f32 %v920_v51, 0.0  ;;  %v924_v59 = vadd.f32 %v1704_v35, %v885_v46  ;;  %v925_v60 = vadd.f32 %v1704_v35, %v886_v47 }
 0x1ac   : > { %981 = vst [vmem:[%s1535_s30 + $0xb0] sm:$0xff] %v949_v49  ;;  %982 = vst [vmem:[%s1535_s30 + $0xb8] sm:$0xff] %v950_v53  ;;  %v953_v61 = vmax.f32 %v921_v54, 0.0  ;;  %v954_v62 = vmax.f32 %v922_v55, 0.0  ;;  %v955_v63 = vmax.f32 %v923_v56, 0.0  ;;  %v926_v0 = vadd.f32 %v1704_v35, %v887_v52 }
 0x1ad   : > { %983 = vst [vmem:[%s1535_s30 + $0xc0] sm:$0xff] %v951_v57  ;;  %984 = vst [vmem:[%s1535_s30 + $0xc8] sm:$0xff] %v952_v58  ;;  %v956_v1 = vmax.f32 %v924_v59, 0.0  ;;  %v957_v2 = vmax.f32 %v925_v60, 0.0 }
 0x1ae   : > { %985 = vst [vmem:[%s1535_s30 + $0xd0] sm:$0xff] %v953_v61  ;;  %986 = vst [vmem:[%s1535_s30 + $0xd8] sm:$0xff] %v954_v62  ;;  %v958_v3 = vmax.f32 %v926_v0, 0.0 }
 0x1af   : > { %987 = vst [vmem:[%s1535_s30 + $0xe0] sm:$0xff] %v955_v63  ;;  %988 = vst [vmem:[%s1535_s30 + $0xe8] sm:$0xff] %v956_v1 }
 0x1b0   : > { %989 = vst [vmem:[%s1535_s30 + $0xf0] sm:$0xff] %v957_v2  ;;  %990 = vst [vmem:[%s1535_s30 + $0xf8] sm:$0xff] %v958_v3 }
 0x1b1 PF: > { %s13_s18 = sadd.s32 1, %s1306_s18   ;;  %s1795_s12 = smov %s1286_s13 }
 0x1b2   : > { %p10_p0 = scmp.ge.s32.totalorder %s13_s18, 8   ;;  %s1796_s13 = smov %s1381_s25 }
 0x1b3   : > { %s1797_s14 = smov %s1298_s16  ;;  %s1798_s15 = smov %s1302_s17 }
 0x1b4   : > { %s1799_s16 = smov %s1802_s19  ;;  %s1800_s17 = smov %s1806_s20 }
 0x1b5   :  { %12 = sbr.rel (!%p10_p0) target bundleno = 4 (0x4), region = 104 }

// kernel: forward_pallas.9
= control target key start
LH: loop header
LB: loop body
LE: loop exit
PB: predicated region body
PF: predicated region fallthrough
CT: control target
= control target key end

     0   :  { %s611_s12 = smov 0   ;;  %s613_s13 = smov 0   ;;  %s694_s0 = inlined_call_operand.vmem [shape: f32[8,6400], index: 0, kind: input, shape index: {}]   ;;  %s695_s1 = inlined_call_operand.vmem [shape: f32[6400,128], index: 1, kind: input, shape index: {}]   ;;  %s696_s2 = inlined_call_operand.vmem [shape: f32[1,128], index: 2, kind: input, shape index: {}]   ;;  %s697_s3 = inlined_call_operand.vmem [shape: f32[8,128], index: 3, kind: output, shape index: {}]  }
   0x1   :  { %s615_s14 = smov 0  }
   0x2 LB: > { %s25_s15 = sadd.s32 1, %s584_s13  ;;  %p495_p0 = scmp.ge.s32.totalorder %s588_s14, 1  ;;  %s588_s14 = sphi %s615_s14, %s13_s14   ;;  %s584_s13 = sphi %s613_s13, %s699_s13   ;;  %s580_s12 = sphi %s611_s12, %s698_s12  }
   0x3   : > { %p26_p1 = scmp.ge.s32.totalorder %s25_s15, 25  ;;  %p189_p2 = scmp.lt.s32.totalorder %s588_s14, 26 }
   0x5   : > { %s701_s15 = smov (%p26_p1, %s25_s15), 0  ;;  %p190_p3 = pnand %p495_p0, %p189_p2 }
   0x6   : > { %s496_s16 = sshll.u32 (!%p190_p3), %s580_s12, 1  ;;  %s498_s17 = sshll.u32 (!%p190_p3), %s580_s12, 5 }
   0x7   : > { %193 = sbr.rel (%p190_p3) target bundleno = 267 (0x10b), region = 32  ;;  %p233_p4 = scmp.lt.s32.totalorder (!%p190_p3), %s496_s16, 49 }
   0x8   : > { %p241_p5 = scmp.lt.s32.totalorder (!%p190_p3), %s498_s17, 799  ;;  %p500_p6 = scmp.ne.s32.totalorder (!%p190_p3), %s580_s12, 0 }
   0xc   : > { %s703_s16 = smov (!%p233_p4, %s496_s16), 49  ;;  %s705_s17 = smov (!%p241_p5, %s498_s17), 799 }
   0xd   : > { %s497_s18 = sshll.u32 %s703_s16, 3  ;;  %s499_s22 = sshll.u32 %s705_s17, 3 }
   0xe   : > { %s636_s21 = scalar_lea.vmem %s694_s0, %s497_s18  ;;  %s641_s25 = scalar_lea.vmem %s695_s1, %s499_s22 }
   0xf   : > { %262 = sbr.rel (%p500_p6) target bundleno = 22 (0x16), region = 36 }
  0x14   : > { %v590_v0 = vmov 0.0  }
  0x15   : > { %263 = vst [vmem:[#allocation2] sm:$0xff] %v590_v0 }
  0x16 PF: > { %v298_v1 = vld [vmem:[%s641_s25 + $0xf8] sm:$0xff]  ;;  %v297_v3 = vld [vmem:[%s641_s25 + $0xf0] sm:$0xff]  ;;  %v296_v5 = vld [vmem:[%s641_s25 + $0xe8] sm:$0xff]  ;;  %p501_p7 = scmp.ne.s32.totalorder %s580_s12, 24 }
  0x17   : > { %v282_v2 = vld [vmem:[%s641_s25 + $0x78] sm:$0xff]  ;;  %506 = vmatprep.subr.mxu0 %v298_v1  ;;  %v281_v4 = vld [vmem:[%s641_s25 + $0x70] sm:$0xff]  ;;  %v280_v6 = vld [vmem:[%s641_s25 + $0x68] sm:$0xff] }
  0x18   : > { %507 = vmatpush3.msra.mxu0 %v282_v2  ;;  %v295_v7 = vld [vmem:[%s641_s25 + $0xe0] sm:$0xff]  ;;  %v294_v9 = vld [vmem:[%s641_s25 + $0xd8] sm:$0xff]  ;;  %v293_v11 = vld [vmem:[%s641_s25 + $0xd0] sm:$0xff] }
  0x19   : > { %508 = vmatprep.subr.mxu0 %v297_v3  ;;  %v279_v8 = vld [vmem:[%s641_s25 + $0x60] sm:$0xff]  ;;  %v278_v10 = vld [vmem:[%s641_s25 + $0x58] sm:$0xff]  ;;  %v277_v12 = vld [vmem:[%s641_s25 + $0x50] sm:$0xff] }
  0x1a   : > { %509 = vmatpush3.msra.mxu0 %v281_v4  ;;  %v292_v13 = vld [vmem:[%s641_s25 + $0xc8] sm:$0xff]  ;;  %v291_v16 = vld [vmem:[%s641_s25 + $0xc0] sm:$0xff]  ;;  %v290_v18 = vld [vmem:[%s641_s25 + $0xb8] sm:$0xff] }
  0x1b   : > { %510 = vmatprep.subr.mxu0 %v296_v5  ;;  %v266_v14 = vld [vmem:[%s636_s21 + $0x8] sm:$0xff]  ;;  %v275_v17 = vld [vmem:[%s641_s25 + $0x40] sm:$0xff]  ;;  %v274_v19 = vld [vmem:[%s641_s25 + $0x38] sm:$0xff] }
  0x1c   : > { %511 = vmatpush3.msra.mxu0 %v280_v6  ;;  %v276_v15 = vld [vmem:[%s641_s25 + $0x48] sm:$0xff]  ;;  %363 = vmatprep.mubr.f32.mxu0 %v266_v14  ;;  %v289_v20 = vld [vmem:[%s641_s25 + $0xb0] sm:$0xff]  ;;  %v287_v24 = vld [vmem:[%s641_s25 + $0xa0] sm:$0xff] }
  0x1d   : > { %512 = vmatprep.subr.mxu0 %v295_v7  ;;  %v273_v21 = vld [vmem:[%s641_s25 + $0x30] sm:$0xff]  ;;  %v288_v22 = vld [vmem:[%s641_s25 + $0xa8] sm:$0xff]  ;;  %v271_v25 = vld [vmem:[%s641_s25 + $0x20] sm:$0xff] }
  0x1e   : > { %513 = vmatpush3.msra.mxu0 %v279_v8  ;;  %v272_v23 = vld [vmem:[%s641_s25 + $0x28] sm:$0xff]  ;;  %v286_v26 = vld [vmem:[%s641_s25 + $0x98] sm:$0xff]  ;;  %v285_v28 = vld [vmem:[%s641_s25 + $0x90] sm:$0xff] }
  0x1f   : > { %514 = vmatprep.subr.mxu0 %v294_v9  ;;  %v270_v27 = vld [vmem:[%s641_s25 + $0x18] sm:$0xff]  ;;  %v269_v29 = vld [vmem:[%s641_s25 + $0x10] sm:$0xff]  ;;  %v284_v30 = vld [vmem:[%s641_s25 + $0x88] sm:$0xff] }
  0x20   : > { %515 = vmatpush3.msra.mxu0 %v278_v10  ;;  %v268_v31 = vld [vmem:[%s641_s25 + $0x8] sm:$0xff]  ;;  %v283_v32 = vld [vmem:[%s641_s25 + $0x80] sm:$0xff] }
  0x21   : > { %516 = vmatprep.subr.mxu0 %v293_v11  ;;  %v267_v33 = vld [vmem:[%s641_s25] sm:$0xff] }
  0x22   : > { %517 = vmatpush3.msra.mxu0 %v277_v12  ;;  %v265_v34 = vld [vmem:[%s636_s21] sm:$0xff] }
  0x23   : > { %518 = vmatprep.subr.mxu0 %v292_v13  ;;  %v264_v36 = vld [vmem:[#allocation2] sm:$0xff] }
  0x24   : > { %519 = vmatpush3.msra.mxu0 %v276_v15 }
  0x25   : > { %520 = vmatprep.subr.mxu0 %v291_v16 }
  0x26   : > { %521 = vmatpush3.msra.mxu0 %v275_v17 }
  0x27   : > { %522 = vmatprep.subr.mxu0 %v290_v18 }
  0x28   : > { %523 = vmatpush3.msra.mxu0 %v274_v19 }
  0x29   : > { %524 = vmatprep.subr.mxu0 %v289_v20 }
  0x2a   : > { %525 = vmatpush3.msra.mxu0 %v273_v21 }
  0x2b   : > { %526 = vmatprep.subr.mxu0 %v288_v22 }
  0x2c   : > { %527 = vmatpush3.msra.mxu0 %v272_v23 }
  0x2d   : > { %528 = vmatprep.subr.mxu0 %v287_v24 }
  0x2e   : > { %529 = vmatpush3.msra.mxu0 %v271_v25 }
  0x2f   : > { %530 = vmatprep.subr.mxu0 %v286_v26 }
  0x30   : > { %531 = vmatpush3.msra.mxu0 %v270_v27 }
  0x31   : > { %532 = vmatprep.subr.mxu0 %v285_v28 }
  0x32   : > { %533 = vmatpush3.msra.mxu0 %v269_v29 }
  0x33   : > { %534 = vmatprep.subr.mxu0 %v284_v30 }
  0x34   : > { %535 = vmatpush3.msra.mxu0 %v268_v31 }
  0x35   : > { %536 = vmatprep.subr.mxu0 %v283_v32 }
  0x36   : > { %537 = vmatpush3.msra.mxu0 %v267_v33 }
  0x37   : > { %364 = vmatmul.mubr.f32.vlgmr.msra.gmra.mxu0 %v265_v34 }
  0xf7   : > { %v538_v35 = vpop.f32.mrf.mxu0 }
  0xf9   : > { %v539_v37 = vpop.f32.mrf.mxu0 }
  0xfa   : > { %v540_v38 = vadd.f32 %v539_v37, %v538_v35  ;;  %374 = sbr.rel (%p501_p7) target bundleno = 267 (0x10b), region = 40 }
  0xfc   : > { %v369_v39 = vadd.f32 %v540_v38, %v264_v36 }
  0xfe   : > { %370 = vst [vmem:[#allocation2] sm:$0xff] %v369_v39 }
  0xff   : > { %v502_v41 = vld [vmem:[%s696_s2] ss:$0 sm:$0xff] }
 0x105   : > { %v375_v40 = vld [vmem:[#allocation2] sm:$0xff] }
 0x106   : > { %v383_v42 = vadd.f32 %v502_v41, %v375_v40 }
 0x108   : > { %v384_v43 = vmax.f32 %v383_v42, 0.0 }
 0x10a   : > { %385 = vst [vmem:[%s697_s3] sm:$0xff] %v384_v43 }
 0x10b PF: > { %s13_s14 = sadd.s32 1, %s588_s14   ;;  %s698_s12 = smov %s584_s13 }
 0x10c   : > { %p10_p8 = scmp.ge.s32.totalorder %s13_s14, 27   ;;  %s699_s13 = smov %s701_s15 }
 0x10e   :  { %12 = sbr.rel (!%p10_p8) target bundleno = 2 (0x2), region = 76 }

// kernel: forward_pallas.10
= control target key start
LH: loop header
LB: loop body
LE: loop exit
PB: predicated region body
PF: predicated region fallthrough
CT: control target
= control target key end

     0   :  { %s1122_s12 = smov 0   ;;  %s1124_s13 = smov 0   ;;  %s1459_s0 = inlined_call_operand.vmem [shape: f32[1024,256], index: 0, kind: input, shape index: {}]   ;;  %s1460_s1 = inlined_call_operand.vmem [shape: f32[256,128], index: 1, kind: input, shape index: {}]   ;;  %s1461_s2 = inlined_call_operand.vmem [shape: f32[1,128], index: 2, kind: input, shape index: {}]   ;;  %s1462_s3 = inlined_call_operand.vmem [shape: f32[1024,128], index: 3, kind: output, shape index: {}]  }
   0x1   :  { %s1126_s14 = smov 0  }
   0x2 LB: > { %s32_s15 = sadd.s32 1, %s1095_s13  ;;  %p978_p0 = scmp.ge.s32.totalorder %s1099_s14, 1  ;;  %s1099_s14 = sphi %s1126_s14, %s13_s14   ;;  %s1095_s13 = sphi %s1124_s13, %s1464_s13   ;;  %s1091_s12 = sphi %s1122_s12, %s1463_s12  }
   0x3   : > { %p34_p1 = scmp.ge.s32.totalorder %s32_s15, 4  ;;  %p191_p2 = scmp.lt.s32.totalorder %s1099_s14, 5 }
   0x5   : > { %s1466_s15 = smov (%p34_p1, %s32_s15), 0  ;;  %p192_p3 = pnand %p978_p0, %p191_p2 }
   0x6   : > { %s979_s18 = sshll.u32 (!%p192_p3), %s1091_s12, 5 }
   0x7   : > { %195 = sbr.rel (%p192_p3) target bundleno = 336 (0x150), region = 32  ;;  %p236_p4 = scmp.lt.s32.totalorder (!%p192_p3), %s979_s18, 127 }
   0xc   : > { %v414_v0 = vld [vmem:[%s1460_s1 + $0x78] sm:$0xff]  ;;  %v1101_v1 = vmov 0.0   ;;  %v413_v2 = vld [vmem:[%s1460_s1 + $0x70] sm:$0xff]  ;;  %v412_v3 = vld [vmem:[%s1460_s1 + $0x68] sm:$0xff]  ;;  %s1468_s18 = smov (!%p236_p4, %s979_s18), 127 }
   0xd   : > { %431 = vmatprep.subr.mxu0 %v1101_v1  ;;  %988 = vmatprep.subr.mxu1 %v1101_v1  ;;  %v411_v4 = vld [vmem:[%s1460_s1 + $0x60] sm:$0xff]  ;;  %v410_v5 = vld [vmem:[%s1460_s1 + $0x58] sm:$0xff]  ;;  %v409_v6 = vld [vmem:[%s1460_s1 + $0x50] sm:$0xff]  ;;  %s987_s28 = sshll.u32 %s1468_s18, 4  ;;  %s983_s17 = sshll.u32 %s1468_s18, 3 }
   0xe   : > { %432 = vmatpush1.msra.mxu0 %v414_v0  ;;  %1020 = vmatpush1.msra.mxu1 %v414_v0  ;;  %v408_v7 = vld [vmem:[%s1460_s1 + $0x48] sm:$0xff]  ;;  %v407_v8 = vld [vmem:[%s1460_s1 + $0x40] sm:$0xff]  ;;  %v406_v9 = vld [vmem:[%s1460_s1 + $0x38] sm:$0xff]  ;;  %s1302_s8 = scalar_lea.vmem %s1459_s0, %s987_s28  ;;  %s1386_s21 = scalar_lea.vmem %s1462_s3, %s983_s17 }
   0xf   : > { %433 = vmatprep.subr.mxu0 %v1101_v1  ;;  %989 = vmatprep.subr.mxu1 %v1101_v1  ;;  %v405_v10 = vld [vmem:[%s1460_s1 + $0x30] sm:$0xff]  ;;  %v404_v11 = vld [vmem:[%s1460_s1 + $0x28] sm:$0xff]  ;;  %v403_v12 = vld [vmem:[%s1460_s1 + $0x20] sm:$0xff] }
  0x10   : > { %434 = vmatpush1.msra.mxu0 %v413_v2  ;;  %1021 = vmatpush1.msra.mxu1 %v413_v2  ;;  %v402_v13 = vld [vmem:[%s1460_s1 + $0x18] sm:$0xff]  ;;  %v401_v14 = vld [vmem:[%s1460_s1 + $0x10] sm:$0xff]  ;;  %v400_v15 = vld [vmem:[%s1460_s1 + $0x8] sm:$0xff] }
  0x11   : > { %435 = vmatprep.subr.mxu0 %v1101_v1  ;;  %990 = vmatprep.subr.mxu1 %v1101_v1  ;;  %v399_v16 = vld [vmem:[%s1460_s1] sm:$0xff]  ;;  %v430_v17 = vld [vmem:[%s1460_s1 + $0xf8] sm:$0xff]  ;;  %v429_v18 = vld [vmem:[%s1460_s1 + $0xf0] sm:$0xff] }
  0x12   : > { %436 = vmatpush1.msra.mxu0 %v412_v3  ;;  %1022 = vmatpush1.msra.mxu1 %v412_v3  ;;  %v428_v19 = vld [vmem:[%s1460_s1 + $0xe8] sm:$0xff]  ;;  %v427_v20 = vld [vmem:[%s1460_s1 + $0xe0] sm:$0xff]  ;;  %v426_v21 = vld [vmem:[%s1460_s1 + $0xd8] sm:$0xff] }
  0x13   : > { %437 = vmatprep.subr.mxu0 %v1101_v1  ;;  %991 = vmatprep.subr.mxu1 %v1101_v1  ;;  %v425_v22 = vld [vmem:[%s1460_s1 + $0xd0] sm:$0xff]  ;;  %v424_v23 = vld [vmem:[%s1460_s1 + $0xc8] sm:$0xff]  ;;  %v423_v24 = vld [vmem:[%s1460_s1 + $0xc0] sm:$0xff] }
  0x14   : > { %438 = vmatpush1.msra.mxu0 %v411_v4  ;;  %1023 = vmatpush1.msra.mxu1 %v411_v4  ;;  %v422_v25 = vld [vmem:[%s1460_s1 + $0xb8] sm:$0xff]  ;;  %v421_v26 = vld [vmem:[%s1460_s1 + $0xb0] sm:$0xff]  ;;  %v420_v27 = vld [vmem:[%s1460_s1 + $0xa8] sm:$0xff] }
  0x15   : > { %439 = vmatprep.subr.mxu0 %v1101_v1  ;;  %992 = vmatprep.subr.mxu1 %v1101_v1  ;;  %v419_v28 = vld [vmem:[%s1460_s1 + $0xa0] sm:$0xff]  ;;  %v418_v29 = vld [vmem:[%s1460_s1 + $0x98] sm:$0xff]  ;;  %v417_v30 = vld [vmem:[%s1460_s1 + $0x90] sm:$0xff] }
  0x16   : > { %440 = vmatpush1.msra.mxu0 %v410_v5  ;;  %1024 = vmatpush1.msra.mxu1 %v410_v5  ;;  %v416_v31 = vld [vmem:[%s1460_s1 + $0x88] sm:$0xff]  ;;  %v415_v32 = vld [vmem:[%s1460_s1 + $0x80] sm:$0xff]  ;;  %v338_v37 = vld [vmem:[%s1302_s8 + $0x18] sm:$0xff] }
  0x17   : > { %441 = vmatprep.subr.mxu0 %v1101_v1  ;;  %993 = vmatprep.subr.mxu1 %v1101_v1  ;;  %v336_v33 = vld [vmem:[%s1302_s8 + $0x8] sm:$0xff]  ;;  %v335_v35 = vld [vmem:[%s1302_s8] sm:$0xff]  ;;  %v370_v38 = vld [vmem:[%s1302_s8 + $0x118] sm:$0xff] }
  0x18   : > { %442 = vmatpush1.msra.mxu0 %v409_v6  ;;  %1025 = vmatpush1.msra.mxu1 %v409_v6  ;;  %v368_v34 = vld [vmem:[%s1302_s8 + $0x108] sm:$0xff]  ;;  %v367_v36 = vld [vmem:[%s1302_s8 + $0x100] sm:$0xff]  ;;  %v337_v39 = vld [vmem:[%s1302_s8 + $0x10] sm:$0xff] }
  0x19   : > { %443 = vmatprep.subr.mxu0 %v1101_v1  ;;  %994 = vmatprep.subr.mxu1 %v1101_v1  ;;  %v369_v40 = vld [vmem:[%s1302_s8 + $0x110] sm:$0xff]  ;;  %v340_v41 = vld [vmem:[%s1302_s8 + $0x28] sm:$0xff]  ;;  %v339_v43 = vld [vmem:[%s1302_s8 + $0x20] sm:$0xff] }
  0x1a   : > { %444 = vmatpush1.msra.mxu0 %v408_v7  ;;  %1026 = vmatpush1.msra.mxu1 %v408_v7  ;;  %v372_v42 = vld [vmem:[%s1302_s8 + $0x128] sm:$0xff]  ;;  %v371_v44 = vld [vmem:[%s1302_s8 + $0x120] sm:$0xff]  ;;  %v342_v45 = vld [vmem:[%s1302_s8 + $0x38] sm:$0xff] }
  0x1b   : > { %445 = vmatprep.subr.mxu0 %v1101_v1  ;;  %995 = vmatprep.subr.mxu1 %v1101_v1  ;;  %v374_v46 = vld [vmem:[%s1302_s8 + $0x138] sm:$0xff]  ;;  %v341_v47 = vld [vmem:[%s1302_s8 + $0x30] sm:$0xff]  ;;  %v344_v49 = vld [vmem:[%s1302_s8 + $0x48] sm:$0xff] }
  0x1c   : > { %446 = vmatpush1.msra.mxu0 %v407_v8  ;;  %1027 = vmatpush1.msra.mxu1 %v407_v8  ;;  %v373_v48 = vld [vmem:[%s1302_s8 + $0x130] sm:$0xff]  ;;  %v376_v50 = vld [vmem:[%s1302_s8 + $0x148] sm:$0xff]  ;;  %v343_v51 = vld [vmem:[%s1302_s8 + $0x40] sm:$0xff] }
  0x1d   : > { %447 = vmatprep.subr.mxu0 %v1101_v1  ;;  %996 = vmatprep.subr.mxu1 %v1101_v1  ;;  %v375_v52 = vld [vmem:[%s1302_s8 + $0x140] sm:$0xff]  ;;  %v346_v53 = vld [vmem:[%s1302_s8 + $0x58] sm:$0xff]  ;;  %v345_v55 = vld [vmem:[%s1302_s8 + $0x50] sm:$0xff] }
  0x1e   : > { %448 = vmatpush1.msra.mxu0 %v406_v9  ;;  %1028 = vmatpush1.msra.mxu1 %v406_v9  ;;  %v378_v54 = vld [vmem:[%s1302_s8 + $0x158] sm:$0xff]  ;;  %v377_v56 = vld [vmem:[%s1302_s8 + $0x150] sm:$0xff]  ;;  %v348_v57 = vld [vmem:[%s1302_s8 + $0x68] sm:$0xff] }
  0x1f   : > { %449 = vmatprep.subr.mxu0 %v1101_v1  ;;  %997 = vmatprep.subr.mxu1 %v1101_v1  ;;  %v380_v58 = vld [vmem:[%s1302_s8 + $0x168] sm:$0xff]  ;;  %v347_v59 = vld [vmem:[%s1302_s8 + $0x60] sm:$0xff]  ;;  %v350_v61 = vld [vmem:[%s1302_s8 + $0x78] sm:$0xff] }
  0x20   : > { %450 = vmatpush1.msra.mxu0 %v405_v10  ;;  %1029 = vmatpush1.msra.mxu1 %v405_v10  ;;  %v379_v60 = vld [vmem:[%s1302_s8 + $0x160] sm:$0xff]  ;;  %v382_v62 = vld [vmem:[%s1302_s8 + $0x178] sm:$0xff]  ;;  %v349_v63 = vld [vmem:[%s1302_s8 + $0x70] sm:$0xff] }
  0x21   : > { %451 = vmatprep.subr.mxu0 %v1101_v1  ;;  %998 = vmatprep.subr.mxu1 %v1101_v1  ;;  %v381_v0 = vld [vmem:[%s1302_s8 + $0x170] sm:$0xff]  ;;  %v384_v2 = vld [vmem:[%s1302_s8 + $0x188] sm:$0xff]  ;;  %v351_v3 = vld [vmem:[%s1302_s8 + $0x80] sm:$0xff] }
  0x22   : > { %452 = vmatpush1.msra.mxu0 %v404_v11  ;;  %1030 = vmatpush1.msra.mxu1 %v404_v11  ;;  %v383_v4 = vld [vmem:[%s1302_s8 + $0x180] sm:$0xff]  ;;  %v354_v5 = vld [vmem:[%s1302_s8 + $0x98] sm:$0xff]  ;;  %v353_v7 = vld [vmem:[%s1302_s8 + $0x90] sm:$0xff] }
  0x23   : > { %453 = vmatprep.subr.mxu0 %v1101_v1  ;;  %999 = vmatprep.subr.mxu1 %v1101_v1  ;;  %v386_v6 = vld [vmem:[%s1302_s8 + $0x198] sm:$0xff]  ;;  %v385_v8 = vld [vmem:[%s1302_s8 + $0x190] sm:$0xff]  ;;  %v356_v9 = vld [vmem:[%s1302_s8 + $0xa8] sm:$0xff] }
  0x24   : > { %454 = vmatpush1.msra.mxu0 %v403_v12  ;;  %1031 = vmatpush1.msra.mxu1 %v403_v12  ;;  %v388_v10 = vld [vmem:[%s1302_s8 + $0x1a8] sm:$0xff]  ;;  %v355_v11 = vld [vmem:[%s1302_s8 + $0xa0] sm:$0xff] }
  0x25   : > { %455 = vmatprep.subr.mxu0 %v1101_v1  ;;  %1000 = vmatprep.subr.mxu1 %v1101_v1  ;;  %v387_v12 = vld [vmem:[%s1302_s8 + $0x1a0] sm:$0xff] }
  0x26   : > { %456 = vmatpush1.msra.mxu0 %v402_v13  ;;  %1032 = vmatpush1.msra.mxu1 %v402_v13  ;;  %v358_v13 = vld [vmem:[%s1302_s8 + $0xb8] sm:$0xff] }
  0x27   : > { %457 = vmatprep.subr.mxu0 %v1101_v1  ;;  %1001 = vmatprep.subr.mxu1 %v1101_v1 }
  0x28   : > { %458 = vmatpush1.msra.mxu0 %v401_v14  ;;  %1033 = vmatpush1.msra.mxu1 %v401_v14  ;;  %v390_v14 = vld [vmem:[%s1302_s8 + $0x1b8] sm:$0xff] }
  0x29   : > { %459 = vmatprep.subr.mxu0 %v1101_v1  ;;  %1002 = vmatprep.subr.mxu1 %v1101_v1 }
  0x2a   : > { %460 = vmatpush1.msra.mxu0 %v400_v15  ;;  %1034 = vmatpush1.msra.mxu1 %v400_v15  ;;  %v357_v15 = vld [vmem:[%s1302_s8 + $0xb0] sm:$0xff] }
  0x2b   : > { %461 = vmatprep.subr.mxu0 %v1101_v1  ;;  %1003 = vmatprep.subr.mxu1 %v1101_v1 }
  0x2c   : > { %462 = vmatpush1.msra.mxu0 %v399_v16  ;;  %1035 = vmatpush1.msra.mxu1 %v399_v16  ;;  %v389_v16 = vld [vmem:[%s1302_s8 + $0x1b0] sm:$0xff] }
  0x2d   : > { %463 = vmatprep.subr.mxu0 %v1101_v1  ;;  %1004 = vmatprep.subr.mxu1 %v1101_v1 }
  0x2e   : > { %464 = vmatpush2.msra.mxu0 %v430_v17  ;;  %1036 = vmatpush2.msra.mxu1 %v430_v17  ;;  %v360_v17 = vld [vmem:[%s1302_s8 + $0xc8] sm:$0xff] }
  0x2f   : > { %465 = vmatprep.subr.mxu0 %v1101_v1  ;;  %1005 = vmatprep.subr.mxu1 %v1101_v1 }
  0x30   : > { %466 = vmatpush2.msra.mxu0 %v429_v18  ;;  %1037 = vmatpush2.msra.mxu1 %v429_v18  ;;  %v392_v18 = vld [vmem:[%s1302_s8 + $0x1c8] sm:$0xff] }
  0x31   : > { %467 = vmatprep.subr.mxu0 %v1101_v1  ;;  %1006 = vmatprep.subr.mxu1 %v1101_v1 }
  0x32   : > { %468 = vmatpush2.msra.mxu0 %v428_v19  ;;  %1038 = vmatpush2.msra.mxu1 %v428_v19  ;;  %v359_v19 = vld [vmem:[%s1302_s8 + $0xc0] sm:$0xff] }
  0x33   : > { %469 = vmatprep.subr.mxu0 %v1101_v1  ;;  %1007 = vmatprep.subr.mxu1 %v1101_v1 }
  0x34   : > { %470 = vmatpush2.msra.mxu0 %v427_v20  ;;  %1039 = vmatpush2.msra.mxu1 %v427_v20  ;;  %v391_v20 = vld [vmem:[%s1302_s8 + $0x1c0] sm:$0xff] }
  0x35   : > { %471 = vmatprep.subr.mxu0 %v1101_v1  ;;  %1008 = vmatprep.subr.mxu1 %v1101_v1 }
  0x36   : > { %472 = vmatpush2.msra.mxu0 %v426_v21  ;;  %1040 = vmatpush2.msra.mxu1 %v426_v21  ;;  %v362_v21 = vld [vmem:[%s1302_s8 + $0xd8] sm:$0xff] }
  0x37   : > { %473 = vmatprep.subr.mxu0 %v1101_v1  ;;  %1009 = vmatprep.subr.mxu1 %v1101_v1 }
  0x38   : > { %474 = vmatpush2.msra.mxu0 %v425_v22  ;;  %1041 = vmatpush2.msra.mxu1 %v425_v22  ;;  %v394_v22 = vld [vmem:[%s1302_s8 + $0x1d8] sm:$0xff] }
  0x39   : > { %475 = vmatprep.subr.mxu0 %v1101_v1  ;;  %1010 = vmatprep.subr.mxu1 %v1101_v1 }
  0x3a   : > { %476 = vmatpush2.msra.mxu0 %v424_v23  ;;  %1042 = vmatpush2.msra.mxu1 %v424_v23  ;;  %v361_v23 = vld [vmem:[%s1302_s8 + $0xd0] sm:$0xff] }
  0x3b   : > { %477 = vmatprep.subr.mxu0 %v1101_v1  ;;  %1011 = vmatprep.subr.mxu1 %v1101_v1 }
  0x3c   : > { %478 = vmatpush2.msra.mxu0 %v423_v24  ;;  %1043 = vmatpush2.msra.mxu1 %v423_v24  ;;  %v393_v24 = vld [vmem:[%s1302_s8 + $0x1d0] sm:$0xff] }
  0x3d   : > { %479 = vmatprep.subr.mxu0 %v1101_v1  ;;  %1012 = vmatprep.subr.mxu1 %v1101_v1 }
  0x3e   : > { %480 = vmatpush2.msra.mxu0 %v422_v25  ;;  %1044 = vmatpush2.msra.mxu1 %v422_v25  ;;  %v364_v25 = vld [vmem:[%s1302_s8 + $0xe8] sm:$0xff] }
  0x3f   : > { %481 = vmatprep.subr.mxu0 %v1101_v1  ;;  %1013 = vmatprep.subr.mxu1 %v1101_v1 }
  0x40   : > { %482 = vmatpush2.msra.mxu0 %v421_v26  ;;  %1045 = vmatpush2.msra.mxu1 %v421_v26  ;;  %v396_v26 = vld [vmem:[%s1302_s8 + $0x1e8] sm:$0xff] }
  0x41   : > { %483 = vmatprep.subr.mxu0 %v1101_v1  ;;  %1014 = vmatprep.subr.mxu1 %v1101_v1 }
  0x42   : > { %484 = vmatpush2.msra.mxu0 %v420_v27  ;;  %1046 = vmatpush2.msra.mxu1 %v420_v27  ;;  %v363_v27 = vld [vmem:[%s1302_s8 + $0xe0] sm:$0xff] }
  0x43   : > { %485 = vmatprep.subr.mxu0 %v1101_v1  ;;  %1015 = vmatprep.subr.mxu1 %v1101_v1 }
  0x44   : > { %486 = vmatpush2.msra.mxu0 %v419_v28  ;;  %1047 = vmatpush2.msra.mxu1 %v419_v28  ;;  %v395_v28 = vld [vmem:[%s1302_s8 + $0x1e0] sm:$0xff] }
  0x45   : > { %487 = vmatprep.subr.mxu0 %v1101_v1  ;;  %1016 = vmatprep.subr.mxu1 %v1101_v1 }
  0x46   : > { %488 = vmatpush2.msra.mxu0 %v418_v29  ;;  %1048 = vmatpush2.msra.mxu1 %v418_v29  ;;  %v366_v29 = vld [vmem:[%s1302_s8 + $0xf8] sm:$0xff] }
  0x47   : > { %489 = vmatprep.subr.mxu0 %v1101_v1  ;;  %1017 = vmatprep.subr.mxu1 %v1101_v1 }
  0x48   : > { %490 = vmatpush2.msra.mxu0 %v417_v30  ;;  %1049 = vmatpush2.msra.mxu1 %v417_v30  ;;  %v398_v30 = vld [vmem:[%s1302_s8 + $0x1f8] sm:$0xff] }
  0x49   : > { %491 = vmatprep.subr.mxu0 %v1101_v1  ;;  %1018 = vmatprep.subr.mxu1 %v1101_v1 }
  0x4a   : > { %492 = vmatpush2.msra.mxu0 %v416_v31  ;;  %1050 = vmatpush2.msra.mxu1 %v416_v31  ;;  %v365_v31 = vld [vmem:[%s1302_s8 + $0xf0] sm:$0xff] }
  0x4b   : > { %493 = vmatprep.subr.mxu0 %v1101_v1  ;;  %1019 = vmatprep.subr.mxu1 %v1101_v1  ;;  %v352_v1 = vld [vmem:[%s1302_s8 + $0x88] sm:$0xff] }
  0x4c   : > { %494 = vmatpush2.msra.mxu0 %v415_v32  ;;  %1051 = vmatpush2.msra.mxu1 %v415_v32  ;;  %v397_v32 = vld [vmem:[%s1302_s8 + $0x1f0] sm:$0xff] }
  0x4d   : > { %495 = vmatprep.mubr.f32.mxu0 %v336_v33  ;;  %575 = vmatprep.mubr.f32.mxu1 %v368_v34  ;;  %v1378_v33 = vld [vmem:[%s1461_s2] ss:$0 sm:$0xff] }
  0x4e   : > { %496 = vmatmul.mubr.f32.vlgmr.msra.gmra.mxu0 %v335_v35  ;;  %576 = vmatmul.mubr.f32.vlgmr.msra.gmra.mxu1 %v367_v36 }
  0x4f   : > { %500 = vmatprep.mubr.f32.mxu0 %v338_v37  ;;  %580 = vmatprep.mubr.f32.mxu1 %v370_v38 }
  0x52   : > { %501 = vmatmul.mubr.f32.gmra.mxu0 %v337_v39  ;;  %581 = vmatmul.mubr.f32.gmra.mxu1 %v369_v40 }
  0x53   : > { %505 = vmatprep.mubr.f32.mxu0 %v340_v41  ;;  %585 = vmatprep.mubr.f32.mxu1 %v372_v42 }
  0x56   : > { %506 = vmatmul.mubr.f32.gmra.mxu0 %v339_v43  ;;  %586 = vmatmul.mubr.f32.gmra.mxu1 %v371_v44 }
  0x57   : > { %510 = vmatprep.mubr.f32.mxu0 %v342_v45  ;;  %590 = vmatprep.mubr.f32.mxu1 %v374_v46 }
  0x5a   : > { %511 = vmatmul.mubr.f32.gmra.mxu0 %v341_v47  ;;  %591 = vmatmul.mubr.f32.gmra.mxu1 %v373_v48 }
  0x5b   : > { %515 = vmatprep.mubr.f32.mxu0 %v344_v49  ;;  %595 = vmatprep.mubr.f32.mxu1 %v376_v50 }
  0x5e   : > { %516 = vmatmul.mubr.f32.gmra.mxu0 %v343_v51  ;;  %596 = vmatmul.mubr.f32.gmra.mxu1 %v375_v52 }
  0x5f   : > { %520 = vmatprep.mubr.f32.mxu0 %v346_v53  ;;  %600 = vmatprep.mubr.f32.mxu1 %v378_v54 }
  0x62   : > { %521 = vmatmul.mubr.f32.gmra.mxu0 %v345_v55  ;;  %601 = vmatmul.mubr.f32.gmra.mxu1 %v377_v56 }
  0x63   : > { %525 = vmatprep.mubr.f32.mxu0 %v348_v57  ;;  %605 = vmatprep.mubr.f32.mxu1 %v380_v58 }
  0x66   : > { %526 = vmatmul.mubr.f32.gmra.mxu0 %v347_v59  ;;  %606 = vmatmul.mubr.f32.gmra.mxu1 %v379_v60 }
  0x67   : > { %530 = vmatprep.mubr.f32.mxu0 %v350_v61  ;;  %610 = vmatprep.mubr.f32.mxu1 %v382_v62 }
  0x6a   : > { %531 = vmatmul.mubr.f32.gmra.mxu0 %v349_v63  ;;  %611 = vmatmul.mubr.f32.gmra.mxu1 %v381_v0 }
  0x6b   : > { %535 = vmatprep.mubr.f32.mxu0 %v352_v1  ;;  %615 = vmatprep.mubr.f32.mxu1 %v384_v2 }
  0x6e   : > { %536 = vmatmul.mubr.f32.gmra.mxu0 %v351_v3  ;;  %616 = vmatmul.mubr.f32.gmra.mxu1 %v383_v4 }
  0x6f   : > { %540 = vmatprep.mubr.f32.mxu0 %v354_v5  ;;  %620 = vmatprep.mubr.f32.mxu1 %v386_v6 }
  0x72   : > { %541 = vmatmul.mubr.f32.gmra.mxu0 %v353_v7  ;;  %621 = vmatmul.mubr.f32.gmra.mxu1 %v385_v8 }
  0x73   : > { %545 = vmatprep.mubr.f32.mxu0 %v356_v9  ;;  %625 = vmatprep.mubr.f32.mxu1 %v388_v10 }
  0x76   : > { %546 = vmatmul.mubr.f32.gmra.mxu0 %v355_v11  ;;  %626 = vmatmul.mubr.f32.gmra.mxu1 %v387_v12 }
  0x77   : > { %550 = vmatprep.mubr.f32.mxu0 %v358_v13  ;;  %630 = vmatprep.mubr.f32.mxu1 %v390_v14 }
  0x7a   : > { %551 = vmatmul.mubr.f32.gmra.mxu0 %v357_v15  ;;  %631 = vmatmul.mubr.f32.gmra.mxu1 %v389_v16 }
  0x7b   : > { %555 = vmatprep.mubr.f32.mxu0 %v360_v17  ;;  %635 = vmatprep.mubr.f32.mxu1 %v392_v18 }
  0x7e   : > { %556 = vmatmul.mubr.f32.gmra.mxu0 %v359_v19  ;;  %636 = vmatmul.mubr.f32.gmra.mxu1 %v391_v20 }
  0x7f   : > { %560 = vmatprep.mubr.f32.mxu0 %v362_v21  ;;  %640 = vmatprep.mubr.f32.mxu1 %v394_v22 }
  0x82   : > { %561 = vmatmul.mubr.f32.gmra.mxu0 %v361_v23  ;;  %641 = vmatmul.mubr.f32.gmra.mxu1 %v393_v24 }
  0x83   : > { %565 = vmatprep.mubr.f32.mxu0 %v364_v25  ;;  %645 = vmatprep.mubr.f32.mxu1 %v396_v26 }
  0x86   : > { %566 = vmatmul.mubr.f32.gmra.mxu0 %v363_v27  ;;  %646 = vmatmul.mubr.f32.gmra.mxu1 %v395_v28 }
  0x87   : > { %570 = vmatprep.mubr.f32.mxu0 %v366_v29  ;;  %650 = vmatprep.mubr.f32.mxu1 %v398_v30 }
  0x8a   : > { %571 = vmatmul.mubr.f32.gmra.mxu0 %v365_v31  ;;  %651 = vmatmul.mubr.f32.gmra.mxu1 %v397_v32 }
 0x10e   : > { %v497_v34 = vpop.f32.mrf.mxu0  ;;  %v577_v35 = vpop.f32.mrf.mxu1 }
 0x10f   : > { %v762_v36 = vadd.f32 %v1378_v33, %v497_v34  ;;  %v778_v37 = vadd.f32 %v1378_v33, %v577_v35 }
 0x110   : > { %v499_v38 = vpop.f32.mrf.mxu0  ;;  %v579_v39 = vpop.f32.mrf.mxu1 }
 0x111   : > { %v794_v40 = vmax.f32 %v762_v36, 0.0  ;;  %v810_v41 = vmax.f32 %v778_v37, 0.0 }
 0x112   : > { %v502_v42 = vpop.f32.mrf.mxu0  ;;  %v582_v43 = vpop.f32.mrf.mxu1 }
 0x113   : > { %826 = vst [vmem:[%s1386_s21] sm:$0xff] %v794_v40  ;;  %842 = vst [vmem:[%s1386_s21 + $0x80] sm:$0xff] %v810_v41  ;;  %v763_v44 = vadd.f32 %v1378_v33, %v502_v42  ;;  %v779_v45 = vadd.f32 %v1378_v33, %v582_v43 }
 0x114   : > { %v504_v46 = vpop.f32.mrf.mxu0  ;;  %v584_v47 = vpop.f32.mrf.mxu1 }
 0x115   : > { %v795_v48 = vmax.f32 %v763_v44, 0.0  ;;  %v811_v49 = vmax.f32 %v779_v45, 0.0 }
 0x116   : > { %v507_v50 = vpop.f32.mrf.mxu0  ;;  %v587_v51 = vpop.f32.mrf.mxu1 }
 0x117   : > { %827 = vst [vmem:[%s1386_s21 + $0x8] sm:$0xff] %v795_v48  ;;  %843 = vst [vmem:[%s1386_s21 + $0x88] sm:$0xff] %v811_v49  ;;  %v764_v52 = vadd.f32 %v1378_v33, %v507_v50  ;;  %v780_v53 = vadd.f32 %v1378_v33, %v587_v51 }
 0x118   : > { %v509_v54 = vpop.f32.mrf.mxu0  ;;  %v589_v55 = vpop.f32.mrf.mxu1 }
 0x119   : > { %v796_v56 = vmax.f32 %v764_v52, 0.0  ;;  %v812_v57 = vmax.f32 %v780_v53, 0.0 }
 0x11a   : > { %v512_v58 = vpop.f32.mrf.mxu0  ;;  %v592_v59 = vpop.f32.mrf.mxu1 }
 0x11b   : > { %828 = vst [vmem:[%s1386_s21 + $0x10] sm:$0xff] %v796_v56  ;;  %844 = vst [vmem:[%s1386_s21 + $0x90] sm:$0xff] %v812_v57  ;;  %v765_v60 = vadd.f32 %v1378_v33, %v512_v58  ;;  %v781_v61 = vadd.f32 %v1378_v33, %v592_v59 }
 0x11c   : > { %v514_v62 = vpop.f32.mrf.mxu0  ;;  %v594_v63 = vpop.f32.mrf.mxu1 }
 0x11d   : > { %v797_v0 = vmax.f32 %v765_v60, 0.0  ;;  %v813_v1 = vmax.f32 %v781_v61, 0.0 }
 0x11e   : > { %v517_v2 = vpop.f32.mrf.mxu0  ;;  %v597_v3 = vpop.f32.mrf.mxu1 }
 0x11f   : > { %829 = vst [vmem:[%s1386_s21 + $0x18] sm:$0xff] %v797_v0  ;;  %845 = vst [vmem:[%s1386_s21 + $0x98] sm:$0xff] %v813_v1  ;;  %v766_v4 = vadd.f32 %v1378_v33, %v517_v2  ;;  %v782_v5 = vadd.f32 %v1378_v33, %v597_v3 }
 0x120   : > { %v519_v6 = vpop.f32.mrf.mxu0  ;;  %v599_v7 = vpop.f32.mrf.mxu1 }
 0x121   : > { %v798_v8 = vmax.f32 %v766_v4, 0.0  ;;  %v814_v9 = vmax.f32 %v782_v5, 0.0 }
 0x122   : > { %v522_v10 = vpop.f32.mrf.mxu0  ;;  %v602_v11 = vpop.f32.mrf.mxu1 }
 0x123   : > { %830 = vst [vmem:[%s1386_s21 + $0x20] sm:$0xff] %v798_v8  ;;  %846 = vst [vmem:[%s1386_s21 + $0xa0] sm:$0xff] %v814_v9  ;;  %v767_v12 = vadd.f32 %v1378_v33, %v522_v10  ;;  %v783_v13 = vadd.f32 %v1378_v33, %v602_v11 }
 0x124   : > { %v524_v14 = vpop.f32.mrf.mxu0  ;;  %v604_v15 = vpop.f32.mrf.mxu1 }
 0x125   : > { %v799_v16 = vmax.f32 %v767_v12, 0.0  ;;  %v815_v17 = vmax.f32 %v783_v13, 0.0 }
 0x126   : > { %v527_v18 = vpop.f32.mrf.mxu0  ;;  %v607_v19 = vpop.f32.mrf.mxu1 }
 0x127   : > { %831 = vst [vmem:[%s1386_s21 + $0x28] sm:$0xff] %v799_v16  ;;  %847 = vst [vmem:[%s1386_s21 + $0xa8] sm:$0xff] %v815_v17  ;;  %v768_v20 = vadd.f32 %v1378_v33, %v527_v18  ;;  %v784_v21 = vadd.f32 %v1378_v33, %v607_v19 }
 0x128   : > { %v529_v22 = vpop.f32.mrf.mxu0  ;;  %v609_v23 = vpop.f32.mrf.mxu1 }
 0x129   : > { %v800_v24 = vmax.f32 %v768_v20, 0.0  ;;  %v816_v25 = vmax.f32 %v784_v21, 0.0 }
 0x12a   : > { %v532_v26 = vpop.f32.mrf.mxu0  ;;  %v612_v27 = vpop.f32.mrf.mxu1 }
 0x12b   : > { %832 = vst [vmem:[%s1386_s21 + $0x30] sm:$0xff] %v800_v24  ;;  %848 = vst [vmem:[%s1386_s21 + $0xb0] sm:$0xff] %v816_v25  ;;  %v769_v28 = vadd.f32 %v1378_v33, %v532_v26  ;;  %v785_v29 = vadd.f32 %v1378_v33, %v612_v27 }
 0x12c   : > { %v534_v30 = vpop.f32.mrf.mxu0  ;;  %v614_v31 = vpop.f32.mrf.mxu1 }
 0x12d   : > { %v801_v32 = vmax.f32 %v769_v28, 0.0  ;;  %v817_v34 = vmax.f32 %v785_v29, 0.0 }
 0x12e   : > { %v537_v35 = vpop.f32.mrf.mxu0  ;;  %v617_v36 = vpop.f32.mrf.mxu1 }
 0x12f   : > { %833 = vst [vmem:[%s1386_s21 + $0x38] sm:$0xff] %v801_v32  ;;  %849 = vst [vmem:[%s1386_s21 + $0xb8] sm:$0xff] %v817_v34  ;;  %v770_v37 = vadd.f32 %v1378_v33, %v537_v35  ;;  %v786_v38 = vadd.f32 %v1378_v33, %v617_v36 }
 0x130   : > { %v539_v39 = vpop.f32.mrf.mxu0  ;;  %v619_v40 = vpop.f32.mrf.mxu1 }
 0x131   : > { %v802_v41 = vmax.f32 %v770_v37, 0.0  ;;  %v818_v42 = vmax.f32 %v786_v38, 0.0 }
 0x132   : > { %v542_v43 = vpop.f32.mrf.mxu0  ;;  %v622_v44 = vpop.f32.mrf.mxu1 }
 0x133   : > { %834 = vst [vmem:[%s1386_s21 + $0x40] sm:$0xff] %v802_v41  ;;  %850 = vst [vmem:[%s1386_s21 + $0xc0] sm:$0xff] %v818_v42  ;;  %v771_v45 = vadd.f32 %v1378_v33, %v542_v43  ;;  %v787_v46 = vadd.f32 %v1378_v33, %v622_v44 }
 0x134   : > { %v544_v47 = vpop.f32.mrf.mxu0  ;;  %v624_v48 = vpop.f32.mrf.mxu1 }
 0x135   : > { %v803_v49 = vmax.f32 %v771_v45, 0.0  ;;  %v819_v50 = vmax.f32 %v787_v46, 0.0 }
 0x136   : > { %v547_v51 = vpop.f32.mrf.mxu0  ;;  %v627_v52 = vpop.f32.mrf.mxu1 }
 0x137   : > { %835 = vst [vmem:[%s1386_s21 + $0x48] sm:$0xff] %v803_v49  ;;  %851 = vst [vmem:[%s1386_s21 + $0xc8] sm:$0xff] %v819_v50  ;;  %v772_v53 = vadd.f32 %v1378_v33, %v547_v51  ;;  %v788_v54 = vadd.f32 %v1378_v33, %v627_v52 }
 0x138   : > { %v549_v55 = vpop.f32.mrf.mxu0  ;;  %v629_v56 = vpop.f32.mrf.mxu1 }
 0x139   : > { %v804_v57 = vmax.f32 %v772_v53, 0.0  ;;  %v820_v58 = vmax.f32 %v788_v54, 0.0 }
 0x13a   : > { %v552_v59 = vpop.f32.mrf.mxu0  ;;  %v632_v60 = vpop.f32.mrf.mxu1 }
 0x13b   : > { %836 = vst [vmem:[%s1386_s21 + $0x50] sm:$0xff] %v804_v57  ;;  %852 = vst [vmem:[%s1386_s21 + $0xd0] sm:$0xff] %v820_v58  ;;  %v773_v61 = vadd.f32 %v1378_v33, %v552_v59  ;;  %v789_v62 = vadd.f32 %v1378_v33, %v632_v60 }
 0x13c   : > { %v554_v63 = vpop.f32.mrf.mxu0  ;;  %v634_v0 = vpop.f32.mrf.mxu1 }
 0x13d   : > { %v805_v1 = vmax.f32 %v773_v61, 0.0  ;;  %v821_v2 = vmax.f32 %v789_v62, 0.0 }
 0x13e   : > { %v557_v3 = vpop.f32.mrf.mxu0  ;;  %v637_v4 = vpop.f32.mrf.mxu1 }
 0x13f   : > { %837 = vst [vmem:[%s1386_s21 + $0x58] sm:$0xff] %v805_v1  ;;  %853 = vst [vmem:[%s1386_s21 + $0xd8] sm:$0xff] %v821_v2  ;;  %v774_v5 = vadd.f32 %v1378_v33, %v557_v3  ;;  %v790_v6 = vadd.f32 %v1378_v33, %v637_v4 }
 0x140   : > { %v559_v7 = vpop.f32.mrf.mxu0  ;;  %v639_v8 = vpop.f32.mrf.mxu1 }
 0x141   : > { %v806_v9 = vmax.f32 %v774_v5, 0.0  ;;  %v822_v10 = vmax.f32 %v790_v6, 0.0 }
 0x142   : > { %v562_v11 = vpop.f32.mrf.mxu0  ;;  %v642_v12 = vpop.f32.mrf.mxu1 }
 0x143   : > { %838 = vst [vmem:[%s1386_s21 + $0x60] sm:$0xff] %v806_v9  ;;  %854 = vst [vmem:[%s1386_s21 + $0xe0] sm:$0xff] %v822_v10  ;;  %v775_v13 = vadd.f32 %v1378_v33, %v562_v11  ;;  %v791_v14 = vadd.f32 %v1378_v33, %v642_v12 }
 0x144   : > { %v564_v15 = vpop.f32.mrf.mxu0  ;;  %v644_v16 = vpop.f32.mrf.mxu1 }
 0x145   : > { %v807_v17 = vmax.f32 %v775_v13, 0.0  ;;  %v823_v18 = vmax.f32 %v791_v14, 0.0 }
 0x146   : > { %v567_v19 = vpop.f32.mrf.mxu0  ;;  %v647_v20 = vpop.f32.mrf.mxu1 }
 0x147   : > { %839 = vst [vmem:[%s1386_s21 + $0x68] sm:$0xff] %v807_v17  ;;  %855 = vst [vmem:[%s1386_s21 + $0xe8] sm:$0xff] %v823_v18  ;;  %v776_v21 = vadd.f32 %v1378_v33, %v567_v19  ;;  %v792_v22 = vadd.f32 %v1378_v33, %v647_v20 }
 0x148   : > { %v569_v23 = vpop.f32.mrf.mxu0  ;;  %v649_v24 = vpop.f32.mrf.mxu1 }
 0x149   : > { %v808_v25 = vmax.f32 %v776_v21, 0.0  ;;  %v824_v26 = vmax.f32 %v792_v22, 0.0 }
 0x14a   : > { %v572_v27 = vpop.f32.mrf.mxu0  ;;  %v652_v28 = vpop.f32.mrf.mxu1 }
 0x14b   : > { %840 = vst [vmem:[%s1386_s21 + $0x70] sm:$0xff] %v808_v25  ;;  %856 = vst [vmem:[%s1386_s21 + $0xf0] sm:$0xff] %v824_v26  ;;  %v777_v29 = vadd.f32 %v1378_v33, %v572_v27  ;;  %v793_v30 = vadd.f32 %v1378_v33, %v652_v28 }
 0x14c   : > { %v574_v31 = vpop.f32.mrf.mxu0  ;;  %v654_v32 = vpop.f32.mrf.mxu1 }
 0x14d   : > { %v809_v34 = vmax.f32 %v777_v29, 0.0  ;;  %v825_v35 = vmax.f32 %v793_v30, 0.0 }
 0x14f   : > { %841 = vst [vmem:[%s1386_s21 + $0x78] sm:$0xff] %v809_v34  ;;  %857 = vst [vmem:[%s1386_s21 + $0xf8] sm:$0xff] %v825_v35 }
 0x150 PF: > { %s13_s14 = sadd.s32 1, %s1099_s14   ;;  %s1463_s12 = smov %s1095_s13 }
 0x151   : > { %p10_p5 = scmp.ge.s32.totalorder %s13_s14, 6   ;;  %s1464_s13 = smov %s1466_s15 }
 0x153   :  { %12 = sbr.rel (!%p10_p5) target bundleno = 2 (0x2), region = 76 }

// kernel: forward_pallas.11
= control target key start
LH: loop header
LB: loop body
LE: loop exit
PB: predicated region body
PF: predicated region fallthrough
CT: control target
= control target key end

     0   :  { %v570_v0 = vmov 0.0   ;;  %s1006_s1 = inlined_call_operand.vmem [shape: f32[256,128], index: 1, kind: input, shape index: {}]   ;;  %s1007_s0 = inlined_call_operand.vmem [shape: f32[200,256], index: 0, kind: input, shape index: {}]   ;;  %s1008_s2 = inlined_call_operand.vmem [shape: f32[1,128], index: 2, kind: input, shape index: {}]   ;;  %s1009_s3 = inlined_call_operand.vmem [shape: f32[200,128], index: 3, kind: output, shape index: {}]  }
   0x1   :  { %150 = vmatprep.subr.mxu0 %v570_v0  ;;  %v133_v1 = vld [vmem:[%s1006_s1 + $0x78] sm:$0xff]  ;;  %505 = vmatprep.subr.mxu1 %v570_v0  ;;  %v132_v2 = vld [vmem:[%s1006_s1 + $0x70] sm:$0xff]  ;;  %v131_v3 = vld [vmem:[%s1006_s1 + $0x68] sm:$0xff] }
   0x2   :  { %151 = vmatpush1.msra.mxu0 %v133_v1  ;;  %537 = vmatpush1.msra.mxu1 %v133_v1  ;;  %v130_v4 = vld [vmem:[%s1006_s1 + $0x60] sm:$0xff]  ;;  %v129_v5 = vld [vmem:[%s1006_s1 + $0x58] sm:$0xff]  ;;  %v128_v6 = vld [vmem:[%s1006_s1 + $0x50] sm:$0xff] }
   0x3   :  { %152 = vmatprep.subr.mxu0 %v570_v0  ;;  %506 = vmatprep.subr.mxu1 %v570_v0  ;;  %v127_v7 = vld [vmem:[%s1006_s1 + $0x48] sm:$0xff]  ;;  %v126_v8 = vld [vmem:[%s1006_s1 + $0x40] sm:$0xff]  ;;  %v125_v9 = vld [vmem:[%s1006_s1 + $0x38] sm:$0xff] }
   0x4   :  { %153 = vmatpush1.msra.mxu0 %v132_v2  ;;  %538 = vmatpush1.msra.mxu1 %v132_v2  ;;  %v124_v10 = vld [vmem:[%s1006_s1 + $0x30] sm:$0xff]  ;;  %v123_v11 = vld [vmem:[%s1006_s1 + $0x28] sm:$0xff]  ;;  %v122_v12 = vld [vmem:[%s1006_s1 + $0x20] sm:$0xff] }
   0x5   :  { %154 = vmatprep.subr.mxu0 %v570_v0  ;;  %507 = vmatprep.subr.mxu1 %v570_v0  ;;  %v121_v13 = vld [vmem:[%s1006_s1 + $0x18] sm:$0xff]  ;;  %v120_v14 = vld [vmem:[%s1006_s1 + $0x10] sm:$0xff]  ;;  %v119_v15 = vld [vmem:[%s1006_s1 + $0x8] sm:$0xff] }
   0x6   :  { %155 = vmatpush1.msra.mxu0 %v131_v3  ;;  %539 = vmatpush1.msra.mxu1 %v131_v3  ;;  %v118_v16 = vld [vmem:[%s1006_s1] sm:$0xff]  ;;  %v149_v17 = vld [vmem:[%s1006_s1 + $0xf8] sm:$0xff]  ;;  %v148_v18 = vld [vmem:[%s1006_s1 + $0xf0] sm:$0xff] }
   0x7   :  { %156 = vmatprep.subr.mxu0 %v570_v0  ;;  %508 = vmatprep.subr.mxu1 %v570_v0  ;;  %v147_v19 = vld [vmem:[%s1006_s1 + $0xe8] sm:$0xff]  ;;  %v146_v20 = vld [vmem:[%s1006_s1 + $0xe0] sm:$0xff]  ;;  %v145_v21 = vld [vmem:[%s1006_s1 + $0xd8] sm:$0xff] }
   0x8   :  { %157 = vmatpush1.msra.mxu0 %v130_v4  ;;  %540 = vmatpush1.msra.mxu1 %v130_v4  ;;  %v144_v22 = vld [vmem:[%s1006_s1 + $0xd0] sm:$0xff]  ;;  %v143_v23 = vld [vmem:[%s1006_s1 + $0xc8] sm:$0xff]  ;;  %v142_v24 = vld [vmem:[%s1006_s1 + $0xc0] sm:$0xff] }
   0x9   :  { %158 = vmatprep.subr.mxu0 %v570_v0  ;;  %509 = vmatprep.subr.mxu1 %v570_v0  ;;  %v141_v25 = vld [vmem:[%s1006_s1 + $0xb8] sm:$0xff]  ;;  %v140_v26 = vld [vmem:[%s1006_s1 + $0xb0] sm:$0xff]  ;;  %v139_v27 = vld [vmem:[%s1006_s1 + $0xa8] sm:$0xff] }
   0xa   :  { %159 = vmatpush1.msra.mxu0 %v129_v5  ;;  %541 = vmatpush1.msra.mxu1 %v129_v5  ;;  %v138_v28 = vld [vmem:[%s1006_s1 + $0xa0] sm:$0xff]  ;;  %v137_v29 = vld [vmem:[%s1006_s1 + $0x98] sm:$0xff]  ;;  %v136_v30 = vld [vmem:[%s1006_s1 + $0x90] sm:$0xff] }
   0xb   :  { %160 = vmatprep.subr.mxu0 %v570_v0  ;;  %510 = vmatprep.subr.mxu1 %v570_v0  ;;  %v135_v31 = vld [vmem:[%s1006_s1 + $0x88] sm:$0xff]  ;;  %v134_v33 = vld [vmem:[%s1006_s1 + $0x80] sm:$0xff]  ;;  %v95_v35 = vld [vmem:[%s1007_s0 + $0xd8] sm:$0xff] }
   0xc   :  { %161 = vmatpush1.msra.mxu0 %v128_v6  ;;  %542 = vmatpush1.msra.mxu1 %v128_v6  ;;  %v69_v32 = vld [vmem:[%s1007_s0 + $0x8] sm:$0xff]  ;;  %v68_v34 = vld [vmem:[%s1007_s0] sm:$0xff]  ;;  %v71_v36 = vld [vmem:[%s1007_s0 + $0x18] sm:$0xff] }
   0xd   :  { %162 = vmatprep.subr.mxu0 %v570_v0  ;;  %511 = vmatprep.subr.mxu1 %v570_v0  ;;  %v94_v37 = vld [vmem:[%s1007_s0 + $0xd0] sm:$0xff]  ;;  %v97_v38 = vld [vmem:[%s1007_s0 + $0xe8] sm:$0xff]  ;;  %v96_v41 = vld [vmem:[%s1007_s0 + $0xe0] sm:$0xff] }
   0xe   :  { %163 = vmatpush1.msra.mxu0 %v127_v7  ;;  %543 = vmatpush1.msra.mxu1 %v127_v7  ;;  %v70_v39 = vld [vmem:[%s1007_s0 + $0x10] sm:$0xff]  ;;  %v73_v40 = vld [vmem:[%s1007_s0 + $0x28] sm:$0xff]  ;;  %v99_v42 = vld [vmem:[%s1007_s0 + $0xf8] sm:$0xff] }
   0xf   :  { %164 = vmatprep.subr.mxu0 %v570_v0  ;;  %512 = vmatprep.subr.mxu1 %v570_v0  ;;  %v72_v43 = vld [vmem:[%s1007_s0 + $0x20] sm:$0xff]  ;;  %v75_v44 = vld [vmem:[%s1007_s0 + $0x38] sm:$0xff]  ;;  %v98_v45 = vld [vmem:[%s1007_s0 + $0xf0] sm:$0xff] }
  0x10   :  { %165 = vmatpush1.msra.mxu0 %v126_v8  ;;  %544 = vmatpush1.msra.mxu1 %v126_v8  ;;  %v101_v46 = vld [vmem:[%s1007_s0 + $0x108] sm:$0xff]  ;;  %v74_v47 = vld [vmem:[%s1007_s0 + $0x30] sm:$0xff]  ;;  %v100_v49 = vld [vmem:[%s1007_s0 + $0x100] sm:$0xff] }
  0x11   :  { %166 = vmatprep.subr.mxu0 %v570_v0  ;;  %513 = vmatprep.subr.mxu1 %v570_v0  ;;  %v77_v48 = vld [vmem:[%s1007_s0 + $0x48] sm:$0xff]  ;;  %v103_v50 = vld [vmem:[%s1007_s0 + $0x118] sm:$0xff]  ;;  %v76_v51 = vld [vmem:[%s1007_s0 + $0x40] sm:$0xff] }
  0x12   :  { %167 = vmatpush1.msra.mxu0 %v125_v9  ;;  %545 = vmatpush1.msra.mxu1 %v125_v9  ;;  %v79_v52 = vld [vmem:[%s1007_s0 + $0x58] sm:$0xff]  ;;  %v102_v53 = vld [vmem:[%s1007_s0 + $0x110] sm:$0xff]  ;;  %v105_v54 = vld [vmem:[%s1007_s0 + $0x128] sm:$0xff] }
  0x13   :  { %168 = vmatprep.subr.mxu0 %v570_v0  ;;  %514 = vmatprep.subr.mxu1 %v570_v0  ;;  %v78_v55 = vld [vmem:[%s1007_s0 + $0x50] sm:$0xff]  ;;  %v81_v56 = vld [vmem:[%s1007_s0 + $0x68] sm:$0xff]  ;;  %v104_v57 = vld [vmem:[%s1007_s0 + $0x120] sm:$0xff] }
  0x14   :  { %169 = vmatpush1.msra.mxu0 %v124_v10  ;;  %546 = vmatpush1.msra.mxu1 %v124_v10  ;;  %v107_v58 = vld [vmem:[%s1007_s0 + $0x138] sm:$0xff]  ;;  %v80_v59 = vld [vmem:[%s1007_s0 + $0x60] sm:$0xff]  ;;  %v106_v61 = vld [vmem:[%s1007_s0 + $0x130] sm:$0xff] }
  0x15   :  { %170 = vmatprep.subr.mxu0 %v570_v0  ;;  %515 = vmatprep.subr.mxu1 %v570_v0  ;;  %v83_v60 = vld [vmem:[%s1007_s0 + $0x78] sm:$0xff]  ;;  %v109_v62 = vld [vmem:[%s1007_s0 + $0x148] sm:$0xff]  ;;  %v82_v63 = vld [vmem:[%s1007_s0 + $0x70] sm:$0xff] }
  0x16   :  { %171 = vmatpush1.msra.mxu0 %v123_v11  ;;  %547 = vmatpush1.msra.mxu1 %v123_v11  ;;  %v108_v1 = vld [vmem:[%s1007_s0 + $0x140] sm:$0xff]  ;;  %v111_v2 = vld [vmem:[%s1007_s0 + $0x158] sm:$0xff]  ;;  %v110_v5 = vld [vmem:[%s1007_s0 + $0x150] sm:$0xff] }
  0x17   :  { %172 = vmatprep.subr.mxu0 %v570_v0  ;;  %516 = vmatprep.subr.mxu1 %v570_v0  ;;  %v84_v3 = vld [vmem:[%s1007_s0 + $0x80] sm:$0xff]  ;;  %v87_v4 = vld [vmem:[%s1007_s0 + $0x98] sm:$0xff]  ;;  %v113_v6 = vld [vmem:[%s1007_s0 + $0x168] sm:$0xff] }
  0x18   :  { %173 = vmatpush1.msra.mxu0 %v122_v12  ;;  %548 = vmatpush1.msra.mxu1 %v122_v12  ;;  %v86_v7 = vld [vmem:[%s1007_s0 + $0x90] sm:$0xff]  ;;  %v89_v8 = vld [vmem:[%s1007_s0 + $0xa8] sm:$0xff]  ;;  %v112_v9 = vld [vmem:[%s1007_s0 + $0x160] sm:$0xff] }
  0x19   :  { %174 = vmatprep.subr.mxu0 %v570_v0  ;;  %517 = vmatprep.subr.mxu1 %v570_v0  ;;  %v115_v10 = vld [vmem:[%s1007_s0 + $0x178] sm:$0xff]  ;;  %v88_v11 = vld [vmem:[%s1007_s0 + $0xa0] sm:$0xff] }
  0x1a   :  { %175 = vmatpush1.msra.mxu0 %v121_v13  ;;  %549 = vmatpush1.msra.mxu1 %v121_v13  ;;  %v91_v12 = vld [vmem:[%s1007_s0 + $0xb8] sm:$0xff]  ;;  %v114_v13 = vld [vmem:[%s1007_s0 + $0x170] sm:$0xff] }
  0x1b   :  { %176 = vmatprep.subr.mxu0 %v570_v0  ;;  %518 = vmatprep.subr.mxu1 %v570_v0 }
  0x1c   :  { %177 = vmatpush1.msra.mxu0 %v120_v14  ;;  %550 = vmatpush1.msra.mxu1 %v120_v14  ;;  %v117_v14 = vld [vmem:[%s1007_s0 + $0x188] sm:$0xff] }
  0x1d   :  { %178 = vmatprep.subr.mxu0 %v570_v0  ;;  %519 = vmatprep.subr.mxu1 %v570_v0 }
  0x1e   :  { %179 = vmatpush1.msra.mxu0 %v119_v15  ;;  %551 = vmatpush1.msra.mxu1 %v119_v15  ;;  %v90_v15 = vld [vmem:[%s1007_s0 + $0xb0] sm:$0xff] }
  0x1f   :  { %180 = vmatprep.subr.mxu0 %v570_v0  ;;  %520 = vmatprep.subr.mxu1 %v570_v0 }
  0x20   :  { %181 = vmatpush1.msra.mxu0 %v118_v16  ;;  %552 = vmatpush1.msra.mxu1 %v118_v16  ;;  %v93_v16 = vld [vmem:[%s1007_s0 + $0xc8] sm:$0xff] }
  0x21   :  { %182 = vmatprep.subr.mxu0 %v570_v0  ;;  %521 = vmatprep.subr.mxu1 %v570_v0 }
  0x22   :  { %183 = vmatpush2.msra.mxu0 %v149_v17  ;;  %553 = vmatpush2.msra.mxu1 %v149_v17  ;;  %v116_v17 = vld [vmem:[%s1007_s0 + $0x180] sm:$0xff] }
  0x23   :  { %184 = vmatprep.subr.mxu0 %v570_v0  ;;  %522 = vmatprep.subr.mxu1 %v570_v0 }
  0x24   :  { %185 = vmatpush2.msra.mxu0 %v148_v18  ;;  %554 = vmatpush2.msra.mxu1 %v148_v18  ;;  %v92_v18 = vld [vmem:[%s1007_s0 + $0xc0] sm:$0xff] }
  0x25   :  { %186 = vmatprep.subr.mxu0 %v570_v0  ;;  %523 = vmatprep.subr.mxu1 %v570_v0 }
  0x26   :  { %187 = vmatpush2.msra.mxu0 %v147_v19  ;;  %555 = vmatpush2.msra.mxu1 %v147_v19  ;;  %v904_v19 = vld [vmem:[%s1008_s2] ss:$0 sm:$0xff] }
  0x27   :  { %188 = vmatprep.subr.mxu0 %v570_v0  ;;  %524 = vmatprep.subr.mxu1 %v570_v0 }
  0x28   :  { %189 = vmatpush2.msra.mxu0 %v146_v20  ;;  %556 = vmatpush2.msra.mxu1 %v146_v20 }
  0x29   :  { %190 = vmatprep.subr.mxu0 %v570_v0  ;;  %525 = vmatprep.subr.mxu1 %v570_v0 }
  0x2a   :  { %191 = vmatpush2.msra.mxu0 %v145_v21  ;;  %557 = vmatpush2.msra.mxu1 %v145_v21 }
  0x2b   :  { %192 = vmatprep.subr.mxu0 %v570_v0  ;;  %526 = vmatprep.subr.mxu1 %v570_v0 }
  0x2c   :  { %193 = vmatpush2.msra.mxu0 %v144_v22  ;;  %558 = vmatpush2.msra.mxu1 %v144_v22 }
  0x2d   :  { %194 = vmatprep.subr.mxu0 %v570_v0  ;;  %527 = vmatprep.subr.mxu1 %v570_v0 }
  0x2e   :  { %195 = vmatpush2.msra.mxu0 %v143_v23  ;;  %559 = vmatpush2.msra.mxu1 %v143_v23 }
  0x2f   :  { %196 = vmatprep.subr.mxu0 %v570_v0  ;;  %528 = vmatprep.subr.mxu1 %v570_v0 }
  0x30   :  { %197 = vmatpush2.msra.mxu0 %v142_v24  ;;  %560 = vmatpush2.msra.mxu1 %v142_v24 }
  0x31   :  { %198 = vmatprep.subr.mxu0 %v570_v0  ;;  %529 = vmatprep.subr.mxu1 %v570_v0 }
  0x32   :  { %199 = vmatpush2.msra.mxu0 %v141_v25  ;;  %561 = vmatpush2.msra.mxu1 %v141_v25 }
  0x33   :  { %200 = vmatprep.subr.mxu0 %v570_v0  ;;  %530 = vmatprep.subr.mxu1 %v570_v0 }
  0x34   :  { %201 = vmatpush2.msra.mxu0 %v140_v26  ;;  %562 = vmatpush2.msra.mxu1 %v140_v26 }
  0x35   :  { %202 = vmatprep.subr.mxu0 %v570_v0  ;;  %531 = vmatprep.subr.mxu1 %v570_v0 }
  0x36   :  { %203 = vmatpush2.msra.mxu0 %v139_v27  ;;  %563 = vmatpush2.msra.mxu1 %v139_v27 }
  0x37   :  { %204 = vmatprep.subr.mxu0 %v570_v0  ;;  %532 = vmatprep.subr.mxu1 %v570_v0 }
  0x38   :  { %205 = vmatpush2.msra.mxu0 %v138_v28  ;;  %564 = vmatpush2.msra.mxu1 %v138_v28 }
  0x39   :  { %206 = vmatprep.subr.mxu0 %v570_v0  ;;  %533 = vmatprep.subr.mxu1 %v570_v0 }
  0x3a   :  { %207 = vmatpush2.msra.mxu0 %v137_v29  ;;  %565 = vmatpush2.msra.mxu1 %v137_v29 }
  0x3b   :  { %208 = vmatprep.subr.mxu0 %v570_v0  ;;  %534 = vmatprep.subr.mxu1 %v570_v0 }
  0x3c   :  { %209 = vmatpush2.msra.mxu0 %v136_v30  ;;  %566 = vmatpush2.msra.mxu1 %v136_v30 }
  0x3d   :  { %210 = vmatprep.subr.mxu0 %v570_v0  ;;  %535 = vmatprep.subr.mxu1 %v570_v0 }
  0x3e   :  { %211 = vmatpush2.msra.mxu0 %v135_v31  ;;  %567 = vmatpush2.msra.mxu1 %v135_v31 }
  0x3f   :  { %212 = vmatprep.subr.mxu0 %v570_v0  ;;  %214 = vmatprep.mubr.f32.mxu0 %v69_v32 }
  0x40   :  { %213 = vmatpush2.msra.mxu0 %v134_v33  ;;  %536 = vmatprep.subr.mxu1 %v570_v0  ;;  %v85_v0 = vld [vmem:[%s1007_s0 + $0x88] sm:$0xff] }
  0x41   :  { %215 = vmatmul.mubr.f32.vlgmr.msra.gmra.mxu0 %v68_v34  ;;  %568 = vmatpush2.msra.mxu1 %v134_v33 }
  0x42   :  { %279 = vmatprep.mubr.f32.mxu1 %v95_v35  ;;  %219 = vmatprep.mubr.f32.mxu0 %v71_v36 }
  0x43   :  { %280 = vmatmul.mubr.f32.vlgmr.msra.gmra.mxu1 %v94_v37 }
  0x44   :  { %284 = vmatprep.mubr.f32.mxu1 %v97_v38 }
  0x45   :  { %220 = vmatmul.mubr.f32.gmra.mxu0 %v70_v39 }
  0x46   :  { %224 = vmatprep.mubr.f32.mxu0 %v73_v40 }
  0x47   :  { %285 = vmatmul.mubr.f32.gmra.mxu1 %v96_v41 }
  0x48   :  { %289 = vmatprep.mubr.f32.mxu1 %v99_v42 }
  0x49   :  { %225 = vmatmul.mubr.f32.gmra.mxu0 %v72_v43 }
  0x4a   :  { %229 = vmatprep.mubr.f32.mxu0 %v75_v44 }
  0x4b   :  { %290 = vmatmul.mubr.f32.gmra.mxu1 %v98_v45 }
  0x4c   :  { %294 = vmatprep.mubr.f32.mxu1 %v101_v46 }
  0x4d   :  { %230 = vmatmul.mubr.f32.gmra.mxu0 %v74_v47 }
  0x4e   :  { %234 = vmatprep.mubr.f32.mxu0 %v77_v48 }
  0x4f   :  { %295 = vmatmul.mubr.f32.gmra.mxu1 %v100_v49 }
  0x50   :  { %299 = vmatprep.mubr.f32.mxu1 %v103_v50 }
  0x51   :  { %235 = vmatmul.mubr.f32.gmra.mxu0 %v76_v51 }
  0x52   :  { %239 = vmatprep.mubr.f32.mxu0 %v79_v52 }
  0x53   :  { %300 = vmatmul.mubr.f32.gmra.mxu1 %v102_v53 }
  0x54   :  { %304 = vmatprep.mubr.f32.mxu1 %v105_v54 }
  0x55   :  { %240 = vmatmul.mubr.f32.gmra.mxu0 %v78_v55 }
  0x56   :  { %244 = vmatprep.mubr.f32.mxu0 %v81_v56 }
  0x57   :  { %305 = vmatmul.mubr.f32.gmra.mxu1 %v104_v57 }
  0x58   :  { %309 = vmatprep.mubr.f32.mxu1 %v107_v58 }
  0x59   :  { %245 = vmatmul.mubr.f32.gmra.mxu0 %v80_v59 }
  0x5a   :  { %249 = vmatprep.mubr.f32.mxu0 %v83_v60 }
  0x5b   :  { %310 = vmatmul.mubr.f32.gmra.mxu1 %v106_v61 }
  0x5c   :  { %314 = vmatprep.mubr.f32.mxu1 %v109_v62 }
  0x5d   :  { %250 = vmatmul.mubr.f32.gmra.mxu0 %v82_v63 }
  0x5e   :  { %254 = vmatprep.mubr.f32.mxu0 %v85_v0 }
  0x5f   :  { %315 = vmatmul.mubr.f32.gmra.mxu1 %v108_v1 }
  0x60   :  { %319 = vmatprep.mubr.f32.mxu1 %v111_v2 }
  0x61   :  { %255 = vmatmul.mubr.f32.gmra.mxu0 %v84_v3 }
  0x62   :  { %259 = vmatprep.mubr.f32.mxu0 %v87_v4 }
  0x63   :  { %320 = vmatmul.mubr.f32.gmra.mxu1 %v110_v5 }
  0x64   :  { %324 = vmatprep.mubr.f32.mxu1 %v113_v6 }
  0x65   :  { %260 = vmatmul.mubr.f32.gmra.mxu0 %v86_v7 }
  0x66   :  { %264 = vmatprep.mubr.f32.mxu0 %v89_v8 }
  0x67   :  { %325 = vmatmul.mubr.f32.gmra.mxu1 %v112_v9 }
  0x68   :  { %329 = vmatprep.mubr.f32.mxu1 %v115_v10 }
  0x69   :  { %265 = vmatmul.mubr.f32.gmra.mxu0 %v88_v11 }
  0x6a   :  { %269 = vmatprep.mubr.f32.mxu0 %v91_v12 }
  0x6b   :  { %330 = vmatmul.mubr.f32.gmra.mxu1 %v114_v13 }
  0x6c   :  { %334 = vmatprep.mubr.f32.mxu1 %v117_v14 }
  0x6d   :  { %270 = vmatmul.mubr.f32.gmra.mxu0 %v90_v15 }
  0x6e   :  { %274 = vmatprep.mubr.f32.mxu0 %v93_v16 }
  0x6f   :  { %335 = vmatmul.mubr.f32.gmra.mxu1 %v116_v17 }
  0x71   :  { %275 = vmatmul.mubr.f32.gmra.mxu0 %v92_v18 }
 0x101   :  { %v216_v20 = vpop.f32.mrf.mxu0 }
 0x102   :  { %v425_v21 = vadd.f32 %v904_v19, %v216_v20 }
 0x103   :  { %v218_v22 = vpop.f32.mrf.mxu0  ;;  %v281_v23 = vpop.f32.mrf.mxu1 }
 0x104   :  { %v450_v24 = vmax.f32 %v425_v21, 0.0  ;;  %v438_v25 = vadd.f32 %v904_v19, %v281_v23 }
 0x105   :  { %v221_v26 = vpop.f32.mrf.mxu0  ;;  %v283_v27 = vpop.f32.mrf.mxu1 }
 0x106   :  { %475 = vst [vmem:[%s1009_s3] sm:$0xff] %v450_v24  ;;  %v463_v28 = vmax.f32 %v438_v25, 0.0  ;;  %v426_v29 = vadd.f32 %v904_v19, %v221_v26 }
 0x107   :  { %v223_v30 = vpop.f32.mrf.mxu0  ;;  %v286_v31 = vpop.f32.mrf.mxu1 }
 0x108   :  { %488 = vst [vmem:[%s1009_s3 + $0x68] sm:$0xff] %v463_v28  ;;  %v451_v32 = vmax.f32 %v426_v29, 0.0  ;;  %v439_v33 = vadd.f32 %v904_v19, %v286_v31 }
 0x109   :  { %v226_v34 = vpop.f32.mrf.mxu0  ;;  %v288_v35 = vpop.f32.mrf.mxu1 }
 0x10a   :  { %476 = vst [vmem:[%s1009_s3 + $0x8] sm:$0xff] %v451_v32  ;;  %v464_v36 = vmax.f32 %v439_v33, 0.0  ;;  %v427_v37 = vadd.f32 %v904_v19, %v226_v34 }
 0x10b   :  { %v228_v38 = vpop.f32.mrf.mxu0  ;;  %v291_v39 = vpop.f32.mrf.mxu1 }
 0x10c   :  { %489 = vst [vmem:[%s1009_s3 + $0x70] sm:$0xff] %v464_v36  ;;  %v452_v40 = vmax.f32 %v427_v37, 0.0  ;;  %v440_v41 = vadd.f32 %v904_v19, %v291_v39 }
 0x10d   :  { %v231_v42 = vpop.f32.mrf.mxu0  ;;  %v293_v43 = vpop.f32.mrf.mxu1 }
 0x10e   :  { %477 = vst [vmem:[%s1009_s3 + $0x10] sm:$0xff] %v452_v40  ;;  %v465_v44 = vmax.f32 %v440_v41, 0.0  ;;  %v428_v45 = vadd.f32 %v904_v19, %v231_v42 }
 0x10f   :  { %v233_v46 = vpop.f32.mrf.mxu0  ;;  %v296_v47 = vpop.f32.mrf.mxu1 }
 0x110   :  { %490 = vst [vmem:[%s1009_s3 + $0x78] sm:$0xff] %v465_v44  ;;  %v453_v48 = vmax.f32 %v428_v45, 0.0  ;;  %v441_v49 = vadd.f32 %v904_v19, %v296_v47 }
 0x111   :  { %v236_v50 = vpop.f32.mrf.mxu0  ;;  %v298_v51 = vpop.f32.mrf.mxu1 }
 0x112   :  { %478 = vst [vmem:[%s1009_s3 + $0x18] sm:$0xff] %v453_v48  ;;  %v466_v52 = vmax.f32 %v441_v49, 0.0  ;;  %v429_v53 = vadd.f32 %v904_v19, %v236_v50 }
 0x113   :  { %v238_v54 = vpop.f32.mrf.mxu0  ;;  %v301_v55 = vpop.f32.mrf.mxu1 }
 0x114   :  { %491 = vst [vmem:[%s1009_s3 + $0x80] sm:$0xff] %v466_v52  ;;  %v454_v56 = vmax.f32 %v429_v53, 0.0  ;;  %v442_v57 = vadd.f32 %v904_v19, %v301_v55 }
 0x115   :  { %v241_v58 = vpop.f32.mrf.mxu0  ;;  %v303_v59 = vpop.f32.mrf.mxu1 }
 0x116   :  { %479 = vst [vmem:[%s1009_s3 + $0x20] sm:$0xff] %v454_v56  ;;  %v467_v60 = vmax.f32 %v442_v57, 0.0  ;;  %v430_v61 = vadd.f32 %v904_v19, %v241_v58 }
 0x117   :  { %v243_v62 = vpop.f32.mrf.mxu0  ;;  %v306_v63 = vpop.f32.mrf.mxu1 }
 0x118   :  { %492 = vst [vmem:[%s1009_s3 + $0x88] sm:$0xff] %v467_v60  ;;  %v455_v0 = vmax.f32 %v430_v61, 0.0  ;;  %v443_v1 = vadd.f32 %v904_v19, %v306_v63 }
 0x119   :  { %v246_v2 = vpop.f32.mrf.mxu0  ;;  %v308_v3 = vpop.f32.mrf.mxu1 }
 0x11a   :  { %480 = vst [vmem:[%s1009_s3 + $0x28] sm:$0xff] %v455_v0  ;;  %v468_v4 = vmax.f32 %v443_v1, 0.0  ;;  %v431_v5 = vadd.f32 %v904_v19, %v246_v2 }
 0x11b   :  { %v248_v6 = vpop.f32.mrf.mxu0  ;;  %v311_v7 = vpop.f32.mrf.mxu1 }
 0x11c   :  { %493 = vst [vmem:[%s1009_s3 + $0x90] sm:$0xff] %v468_v4  ;;  %v456_v8 = vmax.f32 %v431_v5, 0.0  ;;  %v444_v9 = vadd.f32 %v904_v19, %v311_v7 }
 0x11d   :  { %v251_v10 = vpop.f32.mrf.mxu0  ;;  %v313_v11 = vpop.f32.mrf.mxu1 }
 0x11e   :  { %481 = vst [vmem:[%s1009_s3 + $0x30] sm:$0xff] %v456_v8  ;;  %v469_v12 = vmax.f32 %v444_v9, 0.0  ;;  %v432_v13 = vadd.f32 %v904_v19, %v251_v10 }
 0x11f   :  { %v253_v14 = vpop.f32.mrf.mxu0  ;;  %v316_v15 = vpop.f32.mrf.mxu1 }
 0x120   :  { %494 = vst [vmem:[%s1009_s3 + $0x98] sm:$0xff] %v469_v12  ;;  %v457_v16 = vmax.f32 %v432_v13, 0.0  ;;  %v445_v17 = vadd.f32 %v904_v19, %v316_v15 }
 0x121   :  { %v256_v18 = vpop.f32.mrf.mxu0  ;;  %v318_v20 = vpop.f32.mrf.mxu1 }
 0x122   :  { %482 = vst [vmem:[%s1009_s3 + $0x38] sm:$0xff] %v457_v16  ;;  %v470_v21 = vmax.f32 %v445_v17, 0.0  ;;  %v433_v22 = vadd.f32 %v904_v19, %v256_v18 }
 0x123   :  { %v258_v23 = vpop.f32.mrf.mxu0  ;;  %v321_v24 = vpop.f32.mrf.mxu1 }
 0x124   :  { %495 = vst [vmem:[%s1009_s3 + $0xa0] sm:$0xff] %v470_v21  ;;  %v458_v25 = vmax.f32 %v433_v22, 0.0  ;;  %v446_v26 = vadd.f32 %v904_v19, %v321_v24 }
 0x125   :  { %v261_v27 = vpop.f32.mrf.mxu0  ;;  %v323_v28 = vpop.f32.mrf.mxu1 }
 0x126   :  { %483 = vst [vmem:[%s1009_s3 + $0x40] sm:$0xff] %v458_v25  ;;  %v471_v29 = vmax.f32 %v446_v26, 0.0  ;;  %v434_v30 = vadd.f32 %v904_v19, %v261_v27 }
 0x127   :  { %v263_v31 = vpop.f32.mrf.mxu0  ;;  %v326_v32 = vpop.f32.mrf.mxu1 }
 0x128   :  { %496 = vst [vmem:[%s1009_s3 + $0xa8] sm:$0xff] %v471_v29  ;;  %v459_v33 = vmax.f32 %v434_v30, 0.0  ;;  %v447_v34 = vadd.f32 %v904_v19, %v326_v32 }
 0x129   :  { %v266_v35 = vpop.f32.mrf.mxu0  ;;  %v328_v36 = vpop.f32.mrf.mxu1 }
 0x12a   :  { %484 = vst [vmem:[%s1009_s3 + $0x48] sm:$0xff] %v459_v33  ;;  %v472_v37 = vmax.f32 %v447_v34, 0.0  ;;  %v435_v38 = vadd.f32 %v904_v19, %v266_v35 }
 0x12b   :  { %v268_v39 = vpop.f32.mrf.mxu0  ;;  %v331_v40 = vpop.f32.mrf.mxu1 }
 0x12c   :  { %497 = vst [vmem:[%s1009_s3 + $0xb0] sm:$0xff] %v472_v37  ;;  %v460_v41 = vmax.f32 %v435_v38, 0.0  ;;  %v448_v42 = vadd.f32 %v904_v19, %v331_v40 }
 0x12d   :  { %v271_v43 = vpop.f32.mrf.mxu0  ;;  %v333_v44 = vpop.f32.mrf.mxu1 }
 0x12e   :  { %485 = vst [vmem:[%s1009_s3 + $0x50] sm:$0xff] %v460_v41  ;;  %v473_v45 = vmax.f32 %v448_v42, 0.0  ;;  %v436_v46 = vadd.f32 %v904_v19, %v271_v43 }
 0x12f   :  { %v273_v47 = vpop.f32.mrf.mxu0  ;;  %v336_v48 = vpop.f32.mrf.mxu1 }
 0x130   :  { %498 = vst [vmem:[%s1009_s3 + $0xb8] sm:$0xff] %v473_v45  ;;  %v461_v49 = vmax.f32 %v436_v46, 0.0  ;;  %v449_v50 = vadd.f32 %v904_v19, %v336_v48 }
 0x131   :  { %v276_v51 = vpop.f32.mrf.mxu0  ;;  %v338_v52 = vpop.f32.mrf.mxu1 }
 0x132   :  { %486 = vst [vmem:[%s1009_s3 + $0x58] sm:$0xff] %v461_v49  ;;  %v474_v53 = vmax.f32 %v449_v50, 0.0  ;;  %v437_v54 = vadd.f32 %v904_v19, %v276_v51 }
 0x133   :  { %v278_v55 = vpop.f32.mrf.mxu0 }
 0x134   :  { %499 = vst [vmem:[%s1009_s3 + $0xc0] sm:$0xff] %v474_v53  ;;  %v462_v56 = vmax.f32 %v437_v54, 0.0 }
 0x136   :  { %487 = vst [vmem:[%s1009_s3 + $0x60] sm:$0xff] %v462_v56 }

// kernel: squeeze.1
= control target key start
LH: loop header
LB: loop body
LE: loop exit
PB: predicated region body
PF: predicated region fallthrough
CT: control target
= control target key end

     0   :  { %vm90_vm0 = vcmask 1041409   ;;  %vm150_vm1 = vcmask 31744   ;;  %vm64_vm2 = vcmask 15360   ;;  %vm27_vm3 = vcmask 1042433   ;;  %s3648_s22 = smov 124   ;;  %s111_s25 = smov 6  ;;  %s5990_s0 = inlined_call_operand.vmem [shape: f32[2,32,1,10,10], index: 0, kind: input, shape index: {}]   ;;  %s5991_s1 = inlined_call_operand.vmem [shape: f32[2,3200], index: 1, kind: output, shape index: {}]  }
   0x1   :  { %v3116_v0 = vld [vmem:[%s5990_s0 + $0x1d4] sm:$0x1]   ;;  %v3102_v6 = vld [vmem:[%s5990_s0 + $0x1e7] sm:$0x1]   ;;  %vm32_vm4 = vcmask 1044483   ;;  %vm37_vm5 = vcmask 1046533  }
   0x2   :  { %v3117_v1 = vld [vmem:[%s5990_s0 + $0x3d3] sm:$0x2]   ;;  %v3103_v7 = vld [vmem:[%s5990_s0 + $0x3e6] sm:$0x2]   ;;  %vm41_vm6 = vcmask 1047559   ;;  %s116_s26 = smov 24 }
   0x3   :  { %v3118_v2 = vld [vmem:[%s5990_s0 + $0x1d4] sm:$0x1]   ;;  %v177_v4 = vsel %vm90_vm0, %v3117_v1, %v3116_v0  ;;  %v91_v9 = vsel %vm90_vm0, %v3103_v7, %v3102_v6  ;;  %v3104_v10 = vld [vmem:[%s5990_s0 + $0x1e7] sm:$0x1]   ;;  %v3106_v13 = vld [vmem:[%s5990_s0 + $0xa2] sm:$0x1]  }
   0x4   :  { %v3119_v3 = vld [vmem:[%s5990_s0 + $0x3d3] sm:$0x2]   ;;  %v3105_v11 = vld [vmem:[%s5990_s0 + $0x3e6] sm:$0x2]   ;;  %v3107_v15 = vld [vmem:[%s5990_s0 + $0x43e] ss:$-412 sm:%s111_s25]  }
   0x5   :  { %v183_v5 = vsel %vm90_vm0, %v3119_v3, %v3118_v2  ;;  %v97_v12 = vsel %vm90_vm0, %v3105_v11, %v3104_v10  ;;  %v3108_v16 = vld [vmem:[%s5990_s0 + $0x7c8] ss:$-406 sm:%s116_s26]   ;;  %s121_s2 = smov 96  ;;  %s132_s3 = smov 6  ;;  %vm154_vm7 = vcmask 48128   ;;  %v114_v17 = vsel %vm27_vm3, %v3107_v15, %v3106_v13 }
   0x6   :  { %v185_v8 = vsel %vm150_vm1, %v183_v5, %v177_v4  ;;  %v99_v14 = vsel %vm64_vm2, %v97_v12, %v91_v9  ;;  %s3649_s4 = smov 126   ;;  %v3109_v18 = vld [vmem:[%s5990_s0 + $0x1388] ss:$-824 sm:%s121_s2]   ;;  %s137_s9 = smov 24  ;;  %v119_v20 = vsel %vm32_vm4, %v3108_v16, %v114_v17  ;;  %v3111_v21 = vld [vmem:[%s5990_s0 + $0x106] sm:$0x1]  }
   0x7   :  { %186 = vrot.lane.b32.xlu1 %v185_v8, %s3648_s22  ;;  %100 = vrot.lane.b32.xlu0 %v99_v14, %s3649_s4  ;;  %v3110_v19 = vld [vmem:[%s5990_s0 + $0x231] sm:$0x80]   ;;  %s142_s10 = smov 96  ;;  %v3115_v23 = vld [vmem:[%s5990_s0 + $0x29b] sm:$0x80]   ;;  %v124_v24 = vsel %vm37_vm5, %v3109_v18, %v119_v20  ;;  %s25_s21 = smov 6 }
   0x8   :  { %v3112_v22 = vld [vmem:[%s5990_s0 + $0x49c] ss:$-406 sm:%s132_s3]   ;;  %s30_s23 = smov 24  ;;  %v128_v28 = vsel %vm41_vm6, %v3110_v19, %v124_v24  ;;  %v3092_v30 = vld [vmem:[%s5990_s0 + $0x51] sm:$0x1]   ;;  %s35_s28 = smov 96 }
   0x9   :  { %v135_v25 = vsel %vm27_vm3, %v3112_v22, %v3111_v21  ;;  %v3113_v26 = vld [vmem:[%s5990_s0 + $0xd18] ss:$-824 sm:%s137_s9]   ;;  %v3093_v31 = vld [vmem:[%s5990_s0 + $0x3ed] ss:$-412 sm:%s25_s21]   ;;  %s46_s29 = smov 6  ;;  %s51_s6 = smov 24 }
   0xa   :  { %v3114_v27 = vld [vmem:[%s5990_s0 + $0xa26] ss:$-406 sm:%s142_s10]   ;;  %v140_v29 = vsel %vm32_vm4, %v3113_v26, %v135_v25  ;;  %v28_v33 = vsel %vm27_vm3, %v3093_v31, %v3092_v30  ;;  %v3094_v34 = vld [vmem:[%s5990_s0 + $0x789] ss:$-412 sm:%s30_s23]   ;;  %s56_s7 = smov 96  ;;  %s197_s18 = smov 6 }
   0xb   :  { %v145_v32 = vsel %vm37_vm5, %v3114_v27, %v140_v29  ;;  %v3095_v35 = vld [vmem:[%s5990_s0 + $0xb07] ss:$-406 sm:%s35_s28]   ;;  %v33_v37 = vsel %vm32_vm4, %v3094_v34, %v28_v33  ;;  %v3097_v39 = vld [vmem:[%s5990_s0 + $0xb5] sm:$0x1]   ;;  %v3130_v49 = vld [vmem:[%s5990_s0 + $0x1c1] sm:$0x1]  }
   0xc   :  { %v149_v36 = vsel %vm41_vm6, %v3115_v23, %v145_v32  ;;  %v3096_v38 = vld [vmem:[%s5990_s0 + $0x37c] sm:$0x80]   ;;  %v3098_v40 = vld [vmem:[%s5990_s0 + $0x451] ss:$-412 sm:%s46_s29]   ;;  %v38_v42 = vsel %vm37_vm5, %v3095_v35, %v33_v37  ;;  %v3120_v55 = vld [vmem:[%s5990_s0 + $0xf3] sm:$0x1]  }
   0xd   :  { %v151_v41 = vsel %vm150_vm1, %v149_v36, %v128_v28  ;;  %v49_v43 = vsel %vm27_vm3, %v3098_v40, %v3097_v39  ;;  %v3099_v44 = vld [vmem:[%s5990_s0 + $0x7db] ss:$-406 sm:%s51_s6]   ;;  %v42_v46 = vsel %vm41_vm6, %v3096_v38, %v38_v42  ;;  %v3101_v48 = vld [vmem:[%s5990_s0 + $0x24a] sm:$0x80]   ;;  %s202_s5 = smov 24  ;;  %s207_s6 = smov 96 }
   0xe   :  { %v3100_v45 = vld [vmem:[%s5990_s0 + $0x137d] ss:$-818 sm:%s56_s7]   ;;  %152 = vrot.lane.b32.xlu1 %v151_v41, %s3648_s22  ;;  %v54_v47 = vsel %vm32_vm4, %v3099_v44, %v49_v43  ;;  %v3131_v50 = vld [vmem:[%s5990_s0 + $0x3c0] sm:$0x2]   ;;  %s218_s13 = smov 6  ;;  %s223_s14 = smov 24 }
   0xf   :  { %v59_v51 = vsel %vm37_vm5, %v3100_v45, %v54_v47  ;;  %v263_v52 = vsel %vm90_vm0, %v3131_v50, %v3130_v49  ;;  %v3132_v53 = vld [vmem:[%s5990_s0 + $0x1c1] sm:$0x1]   ;;  %v3121_v58 = vld [vmem:[%s5990_s0 + $0x48f] ss:$-412 sm:%s197_s18]   ;;  %v3124_v59 = vld [vmem:[%s5990_s0 + $0x282] sm:$0x80]  }
  0x10   :  { %v3133_v54 = vld [vmem:[%s5990_s0 + $0x3c0] sm:$0x2]   ;;  %v63_v56 = vsel %vm41_vm6, %v3101_v48, %v59_v51  ;;  %v200_v62 = vsel %vm27_vm3, %v3121_v58, %v3120_v55  ;;  %v3125_v2 = vld [vmem:[%s5990_s0 + $0x157] sm:$0x1]   ;;  %s228_s17 = smov 96  ;;  %vm68_vm8 = vcmask 64512  }
  0x11   :  { %v269_v57 = vsel %vm90_vm0, %v3133_v54, %v3132_v53  ;;  %v65_v60 = vsel %vm64_vm2, %v63_v56, %v42_v46  ;;  %v3122_v63 = vld [vmem:[%s5990_s0 + $0xced] ss:$-818 sm:%s202_s5]   ;;  %s283_s24 = smov 6  ;;  %v3144_v9 = vld [vmem:[%s5990_s0 + $0x1a8] sm:$0x1]   ;;  %s288_s11 = smov 24 }
  0x12   :  { %v271_v61 = vsel %vm154_vm7, %v269_v57, %v263_v52  ;;  %v3123_v0 = vld [vmem:[%s5990_s0 + $0xa31] ss:$-412 sm:%s207_s6]   ;;  %66 = vrot.lane.b32.xlu0 %v65_v60, %s3649_s4  ;;  %s3650_s4 = smov 122   ;;  %v205_v1 = vsel %vm32_vm4, %v3122_v63, %v200_v62  ;;  %v3129_v3 = vld [vmem:[%s5990_s0 + $0x2ec] sm:$0x80]   ;;  %s293_s12 = smov 96 }
  0x13   :  { %272 = vrot.lane.b32.xlu1 %v271_v61, %s3650_s4  ;;  %v210_v4 = vsel %vm37_vm5, %v3123_v0, %v205_v1  ;;  %v3126_v5 = vld [vmem:[%s5990_s0 + $0x689] ss:$-818 sm:%s218_s13]   ;;  %v3145_v10 = vld [vmem:[%s5990_s0 + $0x3a7] sm:$0x2]   ;;  %s304_s22 = smov 6  ;;  %s309_s19 = smov 24 }
  0x14   :  { %v3127_v6 = vld [vmem:[%s5990_s0 + $0x6f9] ss:$-412 sm:%s223_s14]   ;;  %v221_v7 = vsel %vm27_vm3, %v3126_v5, %v3125_v2  ;;  %v214_v11 = vsel %vm41_vm6, %v3124_v59, %v210_v4  ;;  %v348_v13 = vsel %vm90_vm0, %v3145_v10, %v3144_v9  ;;  %v3146_v14 = vld [vmem:[%s5990_s0 + $0x1a8] sm:$0x1]   ;;  %v3134_v16 = vld [vmem:[%s5990_s0 + $0x144] sm:$0x1]  }
  0x15   :  { %v3128_v8 = vld [vmem:[%s5990_s0 + $0xa77] ss:$-406 sm:%s228_s17]   ;;  %v226_v12 = vsel %vm32_vm4, %v3127_v6, %v221_v7  ;;  %v3147_v15 = vld [vmem:[%s5990_s0 + $0x3a7] sm:$0x2]   ;;  %v3138_v20 = vld [vmem:[%s5990_s0 + $0x2d9] sm:$0x80]  }
  0x16   :  { %v231_v17 = vsel %vm37_vm5, %v3128_v8, %v226_v12  ;;  %v354_v18 = vsel %vm90_vm0, %v3147_v15, %v3146_v14  ;;  %v3135_v19 = vld [vmem:[%s5990_s0 + $0x676] ss:$-818 sm:%s283_s24]   ;;  %s3651_s20 = smov 120   ;;  %s314_s26 = smov 96  ;;  %v3153_v37 = vld [vmem:[%s5990_s0 + $0x1f9] sm:$0x1]  }
  0x17   :  { %v235_v21 = vsel %vm41_vm6, %v3129_v3, %v231_v17  ;;  %v356_v22 = vsel %vm68_vm8, %v354_v18, %v348_v13  ;;  %v286_v23 = vsel %vm27_vm3, %v3135_v19, %v3134_v16  ;;  %v3136_v24 = vld [vmem:[%s5990_s0 + $0x6e6] ss:$-412 sm:%s288_s11]   ;;  %v3143_v33 = vld [vmem:[%s5990_s0 + $0x33d] sm:$0x80]   ;;  %s368_s30 = smov 6  ;;  %s373_s2 = smov 24 }
  0x18   :  { %v3137_v25 = vld [vmem:[%s5990_s0 + $0xa64] ss:$-406 sm:%s293_s12]   ;;  %v237_v26 = vsel %vm154_vm7, %v235_v21, %v214_v11  ;;  %357 = vrot.lane.b32.xlu1 %v356_v22, %s3651_s20  ;;  %v291_v27 = vsel %vm32_vm4, %v3136_v24, %v286_v23  ;;  %v3139_v28 = vld [vmem:[%s5990_s0 + $0x12] sm:$0x1]   ;;  %s378_s14 = smov 96  ;;  %s3652_s15 = smov 118  }
  0x19   :  { %v3140_v29 = vld [vmem:[%s5990_s0 + $0x3ae] ss:$-412 sm:%s304_s22]   ;;  %238 = vrot.lane.b32.xlu0 %v237_v26, %s3650_s4  ;;  %v296_v30 = vsel %vm37_vm5, %v3137_v25, %v291_v27  ;;  %v3154_v38 = vld [vmem:[%s5990_s0 + $0x3f8] sm:$0x2]   ;;  %s416_s21 = smov 24  ;;  %s454_s8 = smov 6 }
  0x1a   :  { %v307_v31 = vsel %vm27_vm3, %v3140_v29, %v3139_v28  ;;  %v3141_v32 = vld [vmem:[%s5990_s0 + $0x738] ss:$-406 sm:%s309_s19]   ;;  %v300_v34 = vsel %vm41_vm6, %v3138_v20, %v296_v30  ;;  %v402_v40 = vsel %vm90_vm0, %v3154_v38, %v3153_v37  ;;  %v3148_v41 = vld [vmem:[%s5990_s0 + $0x63] sm:$0x1]   ;;  %v3152_v46 = vld [vmem:[%s5990_s0 + $0x38e] sm:$0x80]  }
  0x1b   :  { %v312_v35 = vsel %vm32_vm4, %v3141_v32, %v307_v31  ;;  %v3142_v36 = vld [vmem:[%s5990_s0 + $0xaec] ss:$-412 sm:%s314_s26]   ;;  %v3149_v42 = vld [vmem:[%s5990_s0 + $0x3ff] ss:$-412 sm:%s368_s30]   ;;  %s411_s19 = smov 6  ;;  %s459_s9 = smov 24 }
  0x1c   :  { %v317_v39 = vsel %vm37_vm5, %v3142_v36, %v312_v35  ;;  %403 = vrot.lane.b32.xlu1 %v402_v40, %s3652_s15  ;;  %v371_v44 = vsel %vm27_vm3, %v3149_v42, %v3148_v41  ;;  %v3150_v45 = vld [vmem:[%s5990_s0 + $0x789] ss:$-406 sm:%s373_s2]   ;;  %v3160_v50 = vld [vmem:[%s5990_s0 + $0x1e6] sm:$0x1]   ;;  %s421_s2 = smov 96  ;;  %s3653_s10 = smov 116  }
  0x1d   :  { %v321_v43 = vsel %vm41_vm6, %v3143_v33, %v317_v39  ;;  %v376_v48 = vsel %vm32_vm4, %v3150_v45, %v371_v44  ;;  %v3151_v49 = vld [vmem:[%s5990_s0 + $0xb3d] ss:$-412 sm:%s378_s14]   ;;  %v3161_v51 = vld [vmem:[%s5990_s0 + $0x3e5] sm:$0x2]   ;;  %v3155_v54 = vld [vmem:[%s5990_s0 + $0xb4] sm:$0x1]  }
  0x1e   :  { %v323_v47 = vsel %vm68_vm8, %v321_v43, %v300_v34  ;;  %v381_v52 = vsel %vm37_vm5, %v3151_v49, %v376_v48  ;;  %v445_v53 = vsel %vm90_vm0, %v3161_v51, %v3160_v50  ;;  %v3156_v55 = vld [vmem:[%s5990_s0 + $0x450] ss:$-412 sm:%s411_s19]   ;;  %v3167_v62 = vld [vmem:[%s5990_s0 + $0x1d3] sm:$0x1]   ;;  %v3162_v2 = vld [vmem:[%s5990_s0 + $0x105] sm:$0x1]  }
  0x1f   :  { %324 = vrot.lane.b32.xlu0 %v323_v47, %s3651_s20  ;;  %v385_v56 = vsel %vm41_vm6, %v3152_v46, %v381_v52  ;;  %v414_v57 = vsel %vm27_vm3, %v3156_v55, %v3155_v54  ;;  %v3157_v58 = vld [vmem:[%s5990_s0 + $0x7da] ss:$-406 sm:%s416_s21]   ;;  %v3159_v61 = vld [vmem:[%s5990_s0 + $0x249] sm:$0x80]   ;;  %s464_s23 = smov 96  ;;  %s497_s4 = smov 6 }
  0x20   :  { %v3158_v59 = vld [vmem:[%s5990_s0 + $0x137c] ss:$-818 sm:%s421_s2]   ;;  %446 = vrot.lane.b32.xlu1 %v445_v53, %s3653_s10  ;;  %v419_v60 = vsel %vm32_vm4, %v3157_v58, %v414_v57  ;;  %v3168_v63 = vld [vmem:[%s5990_s0 + $0x3d2] sm:$0x2]   ;;  %s502_s27 = smov 24  ;;  %s3654_s5 = smov 114  }
  0x21   :  { %v424_v0 = vsel %vm37_vm5, %v3158_v59, %v419_v60  ;;  %v488_v1 = vsel %vm90_vm0, %v3168_v63, %v3167_v62  ;;  %v3163_v3 = vld [vmem:[%s5990_s0 + $0x4a1] ss:$-412 sm:%s454_s8]   ;;  %v3174_v10 = vld [vmem:[%s5990_s0 + $0x1c0] sm:$0x1]   ;;  %v3169_v13 = vld [vmem:[%s5990_s0 + $0x156] sm:$0x1]  }
  0x22   :  { %v457_v4 = vsel %vm27_vm3, %v3163_v3, %v3162_v2  ;;  %v3164_v5 = vld [vmem:[%s5990_s0 + $0xcff] ss:$-818 sm:%s459_s9]   ;;  %v428_v7 = vsel %vm41_vm6, %v3159_v61, %v424_v0  ;;  %v3175_v11 = vld [vmem:[%s5990_s0 + $0x3bf] sm:$0x2]   ;;  %s507_s11 = smov 96  ;;  %s540_s17 = smov 6 }
  0x23   :  { %386 = vrot.lane.b32.xlu0 %v385_v56, %s3652_s15  ;;  %v3166_v6 = vld [vmem:[%s5990_s0 + $0x29a] sm:$0x80]   ;;  %v462_v8 = vsel %vm32_vm4, %v3164_v5, %v457_v4  ;;  %v3170_v14 = vld [vmem:[%s5990_s0 + $0x688] ss:$-818 sm:%s497_s4]   ;;  %v531_v15 = vsel %vm90_vm0, %v3175_v11, %v3174_v10  ;;  %s545_s18 = smov 24  ;;  %s550_s26 = smov 96 }
  0x24   :  { %v3165_v9 = vld [vmem:[%s5990_s0 + $0xa25] ss:$-406 sm:%s464_s23]   ;;  %489 = vrot.lane.b32.xlu1 %v488_v1, %s3654_s5  ;;  %v500_v16 = vsel %vm27_vm3, %v3170_v14, %v3169_v13  ;;  %v3181_v20 = vld [vmem:[%s5990_s0 + $0x1a7] sm:$0x1]   ;;  %s3655_s4 = smov 112   ;;  %s582_s30 = smov 6 }
  0x25   :  { %v467_v12 = vsel %vm37_vm5, %v3165_v9, %v462_v8  ;;  %v3171_v17 = vld [vmem:[%s5990_s0 + $0x6f8] ss:$-412 sm:%s502_s27]   ;;  %v3182_v21 = vld [vmem:[%s5990_s0 + $0x3a6] sm:$0x2]   ;;  %v3176_v23 = vld [vmem:[%s5990_s0 + $0x11] sm:$0x1]  }
  0x26   :  { %v3172_v18 = vld [vmem:[%s5990_s0 + $0xa76] ss:$-406 sm:%s507_s11]   ;;  %v505_v19 = vsel %vm32_vm4, %v3171_v17, %v500_v16  ;;  %v471_v22 = vsel %vm41_vm6, %v3166_v6, %v467_v12  ;;  %v3177_v24 = vld [vmem:[%s5990_s0 + $0x3ad] ss:$-412 sm:%s540_s17]   ;;  %s587_s2 = smov 24  ;;  %v573_v29 = vsel %vm90_vm0, %v3182_v21, %v3181_v20  ;;  %s592_s16 = smov 96 }
  0x27   :  { %429 = vrot.lane.b32.xlu0 %v428_v7, %s3653_s10  ;;  %v510_v25 = vsel %vm37_vm5, %v3172_v18, %v505_v19  ;;  %v3173_v26 = vld [vmem:[%s5990_s0 + $0x2eb] sm:$0x80]   ;;  %v543_v27 = vsel %vm27_vm3, %v3177_v24, %v3176_v23  ;;  %v3178_v28 = vld [vmem:[%s5990_s0 + $0x749] ss:$-412 sm:%s545_s18]   ;;  %s625_s10 = smov 6  ;;  %s630_s22 = smov 24 }
  0x28   :  { %532 = vrot.lane.b32.xlu1 %v531_v15, %s3655_s4  ;;  %v548_v30 = vsel %vm32_vm4, %v3178_v28, %v543_v27  ;;  %v3179_v31 = vld [vmem:[%s5990_s0 + $0xac7] ss:$-406 sm:%s550_s26]   ;;  %v3188_v32 = vld [vmem:[%s5990_s0 + $0x1f8] sm:$0x1]   ;;  %v514_v36 = vsel %vm41_vm6, %v3173_v26, %v510_v25  ;;  %s3656_s19 = smov 110   ;;  %s635_s6 = smov 96 }
  0x29   :  { %v3189_v33 = vld [vmem:[%s5990_s0 + $0x3f7] sm:$0x2]   ;;  %v3183_v34 = vld [vmem:[%s5990_s0 + $0x62] sm:$0x1]   ;;  %v3185_v38 = vld [vmem:[%s5990_s0 + $0x788] ss:$-406 sm:%s587_s2]   ;;  %v553_v39 = vsel %vm37_vm5, %v3179_v31, %v548_v30 }
  0x2a   :  { %v3184_v35 = vld [vmem:[%s5990_s0 + $0x3fe] ss:$-412 sm:%s582_s30]   ;;  %v3180_v40 = vld [vmem:[%s5990_s0 + $0x33c] sm:$0x80]   ;;  %v616_v42 = vsel %vm90_vm0, %v3189_v33, %v3188_v32  ;;  %v3195_v44 = vld [vmem:[%s5990_s0 + $0x1e5] sm:$0x1]  }
  0x2b   :  { %472 = vrot.lane.b32.xlu0 %v471_v22, %s3654_s5  ;;  %v585_v37 = vsel %vm27_vm3, %v3184_v35, %v3183_v34  ;;  %v3186_v41 = vld [vmem:[%s5990_s0 + $0xb3c] ss:$-412 sm:%s592_s16]   ;;  %v3190_v45 = vld [vmem:[%s5990_s0 + $0xb3] sm:$0x1]   ;;  %s668_s7 = smov 6  ;;  %v557_v50 = vsel %vm41_vm6, %v3180_v40, %v553_v39  ;;  %s673_s11 = smov 24 }
  0x2c   :  { %574 = vrot.lane.b32.xlu1 %v573_v29, %s3656_s19  ;;  %v590_v43 = vsel %vm32_vm4, %v3185_v38, %v585_v37  ;;  %v3191_v46 = vld [vmem:[%s5990_s0 + $0x44f] ss:$-412 sm:%s625_s10]   ;;  %v3196_v47 = vld [vmem:[%s5990_s0 + $0x3e4] sm:$0x2]   ;;  %s3657_s5 = smov 108   ;;  %s711_s21 = smov 6 }
  0x2d   :  { %v628_v48 = vsel %vm27_vm3, %v3191_v46, %v3190_v45  ;;  %v3192_v49 = vld [vmem:[%s5990_s0 + $0x7d9] ss:$-406 sm:%s630_s22]   ;;  %v3187_v51 = vld [vmem:[%s5990_s0 + $0x38d] sm:$0x80]   ;;  %v595_v52 = vsel %vm37_vm5, %v3186_v41, %v590_v43  ;;  %v3197_v53 = vld [vmem:[%s5990_s0 + $0x104] sm:$0x1]   ;;  %v659_v55 = vsel %vm90_vm0, %v3196_v47, %v3195_v44 }
  0x2e   :  { %v3198_v54 = vld [vmem:[%s5990_s0 + $0x4a0] ss:$-412 sm:%s668_s7]   ;;  %v633_v56 = vsel %vm32_vm4, %v3192_v49, %v628_v48  ;;  %v3193_v57 = vld [vmem:[%s5990_s0 + $0x1399] ss:$-824 sm:%s635_s6]   ;;  %s678_s25 = smov 96  ;;  %v599_v62 = vsel %vm41_vm6, %v3187_v51, %v595_v52  ;;  %s716_s29 = smov 24 }
  0x2f   :  { %515 = vrot.lane.b32.xlu0 %v514_v36, %s3655_s4  ;;  %v3202_v58 = vld [vmem:[%s5990_s0 + $0x1d2] sm:$0x1]   ;;  %v671_v60 = vsel %vm27_vm3, %v3198_v54, %v3197_v53  ;;  %v3204_v63 = vld [vmem:[%s5990_s0 + $0x155] sm:$0x1]   ;;  %s3658_s4 = smov 106   ;;  %v638_v1 = vsel %vm37_vm5, %v3193_v57, %v633_v56  ;;  %s754_s3 = smov 6 }
  0x30   :  { %617 = vrot.lane.b32.xlu1 %v616_v42, %s3657_s5  ;;  %v3203_v59 = vld [vmem:[%s5990_s0 + $0x3d1] sm:$0x2]   ;;  %v3205_v0 = vld [vmem:[%s5990_s0 + $0x687] ss:$-818 sm:%s711_s21]   ;;  %s721_s14 = smov 96  ;;  %s759_s22 = smov 24 }
  0x31   :  { %v3199_v61 = vld [vmem:[%s5990_s0 + $0xcfe] ss:$-818 sm:%s673_s11]   ;;  %v3194_v2 = vld [vmem:[%s5990_s0 + $0x242] sm:$0x80]   ;;  %v702_v3 = vsel %vm90_vm0, %v3203_v59, %v3202_v58  ;;  %v3209_v6 = vld [vmem:[%s5990_s0 + $0x1b9] sm:$0x1]   ;;  %v714_v8 = vsel %vm27_vm3, %v3205_v0, %v3204_v63 }
  0x32   :  { %v676_v4 = vsel %vm32_vm4, %v3199_v61, %v671_v60  ;;  %v3200_v5 = vld [vmem:[%s5990_s0 + $0xa24] ss:$-406 sm:%s678_s25]   ;;  %v3210_v7 = vld [vmem:[%s5990_s0 + $0x3b8] sm:$0x2]   ;;  %v642_v10 = vsel %vm41_vm6, %v3194_v2, %v638_v1  ;;  %v3211_v11 = vld [vmem:[%s5990_s0 + $0x10] sm:$0x1]  }
  0x33   :  { %558 = vrot.lane.b32.xlu0 %v557_v50, %s3656_s19  ;;  %v3206_v9 = vld [vmem:[%s5990_s0 + $0x6f7] ss:$-412 sm:%s716_s29]   ;;  %s3659_s21 = smov 104   ;;  %v681_v13 = vsel %vm37_vm5, %v3200_v5, %v676_v4  ;;  %v3201_v14 = vld [vmem:[%s5990_s0 + $0x299] sm:$0x80]   ;;  %s796_s15 = smov 6  ;;  %v745_v15 = vsel %vm90_vm0, %v3210_v7, %v3209_v6 }
  0x34   :  { %660 = vrot.lane.b32.xlu1 %v659_v55, %s3658_s4  ;;  %v3212_v12 = vld [vmem:[%s5990_s0 + $0x3ac] ss:$-412 sm:%s754_s3]   ;;  %v719_v16 = vsel %vm32_vm4, %v3206_v9, %v714_v8  ;;  %v3216_v18 = vld [vmem:[%s5990_s0 + $0x1a6] sm:$0x1]   ;;  %s764_s30 = smov 96  ;;  %v685_v22 = vsel %vm41_vm6, %v3201_v14, %v681_v13  ;;  %s801_s8 = smov 24 }
  0x35   :  { %v3207_v17 = vld [vmem:[%s5990_s0 + $0xa75] ss:$-406 sm:%s721_s14]   ;;  %v3217_v19 = vld [vmem:[%s5990_s0 + $0x3a5] sm:$0x2]   ;;  %v757_v20 = vsel %vm27_vm3, %v3212_v12, %v3211_v11  ;;  %v3218_v23 = vld [vmem:[%s5990_s0 + $0x61] sm:$0x1]  }
  0x36   :  { %v3213_v21 = vld [vmem:[%s5990_s0 + $0x748] ss:$-412 sm:%s759_s22]   ;;  %v3219_v24 = vld [vmem:[%s5990_s0 + $0x3fd] ss:$-412 sm:%s796_s15]   ;;  %s3660_s9 = smov 102   ;;  %v724_v25 = vsel %vm37_vm5, %v3207_v17, %v719_v16  ;;  %s839_s12 = smov 6  ;;  %v787_v27 = vsel %vm90_vm0, %v3217_v19, %v3216_v18 }
  0x37   :  { %600 = vrot.lane.b32.xlu0 %v599_v62, %s3657_s5  ;;  %v3208_v26 = vld [vmem:[%s5990_s0 + $0x2ea] sm:$0x80]   ;;  %v762_v28 = vsel %vm32_vm4, %v3213_v21, %v757_v20  ;;  %v3214_v29 = vld [vmem:[%s5990_s0 + $0xac6] ss:$-406 sm:%s764_s30]   ;;  %v799_v32 = vsel %vm27_vm3, %v3219_v24, %v3218_v23  ;;  %s806_s19 = smov 96  ;;  %s844_s26 = smov 24 }
  0x38   :  { %703 = vrot.lane.b32.xlu1 %v702_v3, %s3659_s21  ;;  %v3223_v30 = vld [vmem:[%s5990_s0 + $0x1f7] sm:$0x1]   ;;  %v3220_v33 = vld [vmem:[%s5990_s0 + $0x799] ss:$-412 sm:%s801_s8]   ;;  %v728_v34 = vsel %vm41_vm6, %v3208_v26, %v724_v25  ;;  %s3661_s27 = smov 100   ;;  %v767_v37 = vsel %vm37_vm5, %v3214_v29, %v762_v28  ;;  %s882_s29 = smov 6 }
  0x39   :  { %v3224_v31 = vld [vmem:[%s5990_s0 + $0x3f6] sm:$0x2]   ;;  %v3225_v35 = vld [vmem:[%s5990_s0 + $0xb2] sm:$0x1]   ;;  %v3215_v38 = vld [vmem:[%s5990_s0 + $0x33b] sm:$0x80]   ;;  %v804_v40 = vsel %vm32_vm4, %v3220_v33, %v799_v32 }
  0x3a   :  { %v3226_v36 = vld [vmem:[%s5990_s0 + $0x44e] ss:$-412 sm:%s839_s12]   ;;  %v830_v39 = vsel %vm90_vm0, %v3224_v31, %v3223_v30  ;;  %v3221_v41 = vld [vmem:[%s5990_s0 + $0xb17] ss:$-406 sm:%s806_s19]   ;;  %s849_s11 = smov 96  ;;  %v771_v46 = vsel %vm41_vm6, %v3215_v38, %v767_v37  ;;  %s887_s16 = smov 24 }
  0x3b   :  { %643 = vrot.lane.b32.xlu0 %v642_v10, %s3658_s4  ;;  %v3230_v42 = vld [vmem:[%s5990_s0 + $0x1e4] sm:$0x1]   ;;  %v842_v44 = vsel %vm27_vm3, %v3226_v36, %v3225_v35  ;;  %v3227_v45 = vld [vmem:[%s5990_s0 + $0x7d8] ss:$-406 sm:%s844_s26]   ;;  %s3662_s17 = smov 98   ;;  %v809_v49 = vsel %vm37_vm5, %v3221_v41, %v804_v40  ;;  %s925_s22 = smov 6 }
  0x3c   :  { %746 = vrot.lane.b32.xlu1 %v745_v15, %s3660_s9  ;;  %v3231_v43 = vld [vmem:[%s5990_s0 + $0x3e3] sm:$0x2]   ;;  %v3232_v47 = vld [vmem:[%s5990_s0 + $0x103] sm:$0x1]   ;;  %v3222_v50 = vld [vmem:[%s5990_s0 + $0x38c] sm:$0x80]   ;;  %v847_v52 = vsel %vm32_vm4, %v3227_v45, %v842_v44 }
  0x3d   :  { %v3233_v48 = vld [vmem:[%s5990_s0 + $0x49f] ss:$-412 sm:%s882_s29]   ;;  %v873_v51 = vsel %vm90_vm0, %v3231_v43, %v3230_v42  ;;  %v3228_v53 = vld [vmem:[%s5990_s0 + $0x1398] ss:$-824 sm:%s849_s11]   ;;  %s892_s20 = smov 96  ;;  %v813_v58 = vsel %vm41_vm6, %v3222_v50, %v809_v49  ;;  %s930_s2 = smov 24 }
  0x3e   :  { %v3237_v54 = vld [vmem:[%s5990_s0 + $0x1d1] sm:$0x1]   ;;  %v885_v56 = vsel %vm27_vm3, %v3233_v48, %v3232_v47  ;;  %v3239_v59 = vld [vmem:[%s5990_s0 + $0x154] sm:$0x1]   ;;  %s3663_s3 = smov 96   ;;  %v852_v61 = vsel %vm37_vm5, %v3228_v53, %v847_v52  ;;  %s968_s8 = smov 6 }
  0x3f   :  { %686 = vrot.lane.b32.xlu0 %v685_v22, %s3659_s21  ;;  %v3238_v55 = vld [vmem:[%s5990_s0 + $0x3d0] sm:$0x2]   ;;  %v3240_v60 = vld [vmem:[%s5990_s0 + $0x686] ss:$-818 sm:%s925_s22]   ;;  %s935_s18 = smov 96  ;;  %s973_s23 = smov 24 }
  0x40   :  { %788 = vrot.lane.b32.xlu1 %v787_v27, %s3661_s27  ;;  %v3234_v57 = vld [vmem:[%s5990_s0 + $0xcfd] ss:$-818 sm:%s887_s16]   ;;  %v3229_v62 = vld [vmem:[%s5990_s0 + $0x241] sm:$0x80]   ;;  %v916_v63 = vsel %vm90_vm0, %v3238_v55, %v3237_v54  ;;  %v928_v4 = vsel %vm27_vm3, %v3240_v60, %v3239_v59  ;;  %s3664_s15 = smov 94   ;;  %s1010_s26 = smov 6 }
  0x41   :  { %v890_v0 = vsel %vm32_vm4, %v3234_v57, %v885_v56  ;;  %v3235_v1 = vld [vmem:[%s5990_s0 + $0xa41] ss:$-412 sm:%s892_s20]   ;;  %v3244_v2 = vld [vmem:[%s5990_s0 + $0x1b8] sm:$0x1]   ;;  %v856_v6 = vsel %vm41_vm6, %v3229_v62, %v852_v61  ;;  %s978_s6 = smov 96  ;;  %s1015_s5 = smov 24 }
  0x42   :  { %v3245_v3 = vld [vmem:[%s5990_s0 + $0x3b7] sm:$0x2]   ;;  %v3241_v5 = vld [vmem:[%s5990_s0 + $0x6f6] ss:$-412 sm:%s930_s2]   ;;  %v3246_v7 = vld [vmem:[%s5990_s0 + $0x9] sm:$0x1]   ;;  %v895_v9 = vsel %vm37_vm5, %v3235_v1, %v890_v0 }
  0x43   :  { %729 = vrot.lane.b32.xlu0 %v728_v34, %s3660_s9  ;;  %v3247_v8 = vld [vmem:[%s5990_s0 + $0x39f] ss:$-406 sm:%s968_s8]   ;;  %v3236_v10 = vld [vmem:[%s5990_s0 + $0x292] sm:$0x80]   ;;  %v959_v11 = vsel %vm90_vm0, %v3245_v3, %v3244_v2  ;;  %v933_v12 = vsel %vm32_vm4, %v3241_v5, %v928_v4  ;;  %s3665_s12 = smov 92   ;;  %s1053_s16 = smov 6 }
  0x44   :  { %831 = vrot.lane.b32.xlu1 %v830_v39, %s3662_s17  ;;  %v3242_v13 = vld [vmem:[%s5990_s0 + $0xa74] ss:$-406 sm:%s935_s18]   ;;  %v3251_v14 = vld [vmem:[%s5990_s0 + $0x1a5] sm:$0x1]   ;;  %v971_v16 = vsel %vm27_vm3, %v3247_v8, %v3246_v7  ;;  %v899_v18 = vsel %vm41_vm6, %v3236_v10, %v895_v9  ;;  %s1020_s24 = smov 96  ;;  %s1058_s28 = smov 24 }
  0x45   :  { %v3252_v15 = vld [vmem:[%s5990_s0 + $0x3a4] sm:$0x2]   ;;  %v3248_v17 = vld [vmem:[%s5990_s0 + $0x747] ss:$-412 sm:%s973_s23]   ;;  %v3253_v19 = vld [vmem:[%s5990_s0 + $0x60] sm:$0x1]   ;;  %v938_v21 = vsel %vm37_vm5, %v3242_v13, %v933_v12 }
  0x46   :  { %v3254_v20 = vld [vmem:[%s5990_s0 + $0x3fc] ss:$-412 sm:%s1010_s26]   ;;  %v1001_v23 = vsel %vm90_vm0, %v3252_v15, %v3251_v14  ;;  %v976_v24 = vsel %vm32_vm4, %v3248_v17, %v971_v16  ;;  %v3249_v25 = vld [vmem:[%s5990_s0 + $0xac5] ss:$-406 sm:%s978_s6]   ;;  %s3666_s29 = smov 90   ;;  %s1096_s2 = smov 6 }
  0x47   :  { %772 = vrot.lane.b32.xlu0 %v771_v46, %s3661_s27  ;;  %v3243_v22 = vld [vmem:[%s5990_s0 + $0x2e9] sm:$0x80]   ;;  %v3258_v26 = vld [vmem:[%s5990_s0 + $0x1f6] sm:$0x1]   ;;  %v1013_v28 = vsel %vm27_vm3, %v3254_v20, %v3253_v19  ;;  %v3260_v31 = vld [vmem:[%s5990_s0 + $0xb1] sm:$0x1]   ;;  %v981_v33 = vsel %vm37_vm5, %v3249_v25, %v976_v24 }
  0x48   :  { %874 = vrot.lane.b32.xlu1 %v873_v51, %s3663_s3  ;;  %v3259_v27 = vld [vmem:[%s5990_s0 + $0x3f5] sm:$0x2]   ;;  %v3255_v29 = vld [vmem:[%s5990_s0 + $0x798] ss:$-412 sm:%s1015_s5]   ;;  %v942_v30 = vsel %vm41_vm6, %v3243_v22, %v938_v21  ;;  %s1063_s13 = smov 96  ;;  %s1101_s10 = smov 24 }
  0x49   :  { %v3261_v32 = vld [vmem:[%s5990_s0 + $0x44d] ss:$-412 sm:%s1053_s16]   ;;  %v1044_v35 = vsel %vm90_vm0, %v3259_v27, %v3258_v26  ;;  %v1018_v36 = vsel %vm32_vm4, %v3255_v29, %v1013_v28  ;;  %v3256_v37 = vld [vmem:[%s5990_s0 + $0xb16] ss:$-406 sm:%s1020_s24]   ;;  %s3667_s22 = smov 88   ;;  %s1139_s23 = smov 6 }
  0x4a   :  { %v3250_v34 = vld [vmem:[%s5990_s0 + $0x33a] sm:$0x80]   ;;  %v3265_v38 = vld [vmem:[%s5990_s0 + $0x1e3] sm:$0x1]   ;;  %v1056_v40 = vsel %vm27_vm3, %v3261_v32, %v3260_v31  ;;  %v3267_v43 = vld [vmem:[%s5990_s0 + $0x102] sm:$0x1]   ;;  %v1023_v45 = vsel %vm37_vm5, %v3256_v37, %v1018_v36 }
  0x4b   :  { %814 = vrot.lane.b32.xlu0 %v813_v58, %s3662_s17  ;;  %v3266_v39 = vld [vmem:[%s5990_s0 + $0x3e2] sm:$0x2]   ;;  %v3262_v41 = vld [vmem:[%s5990_s0 + $0x7e9] ss:$-412 sm:%s1058_s28]   ;;  %v985_v42 = vsel %vm41_vm6, %v3250_v34, %v981_v33  ;;  %s1106_s4 = smov 96  ;;  %s1144_s7 = smov 24 }
  0x4c   :  { %917 = vrot.lane.b32.xlu1 %v916_v63, %s3664_s15  ;;  %v3268_v44 = vld [vmem:[%s5990_s0 + $0x49e] ss:$-412 sm:%s1096_s2]   ;;  %v1087_v47 = vsel %vm90_vm0, %v3266_v39, %v3265_v38  ;;  %v1061_v48 = vsel %vm32_vm4, %v3262_v41, %v1056_v40  ;;  %v3272_v50 = vld [vmem:[%s5990_s0 + $0x1d0] sm:$0x1]   ;;  %s3668_s8 = smov 86   ;;  %s1182_s5 = smov 6 }
  0x4d   :  { %v3257_v46 = vld [vmem:[%s5990_s0 + $0x38b] sm:$0x80]   ;;  %v3263_v49 = vld [vmem:[%s5990_s0 + $0x1373] ss:$-818 sm:%s1063_s13]   ;;  %v3273_v51 = vld [vmem:[%s5990_s0 + $0x3cf] sm:$0x2]   ;;  %v1099_v52 = vsel %vm27_vm3, %v3268_v44, %v3267_v43 }
  0x4e   :  { %v3269_v53 = vld [vmem:[%s5990_s0 + $0xcfc] ss:$-818 sm:%s1101_s10]   ;;  %v1027_v54 = vsel %vm41_vm6, %v3257_v46, %v1023_v45  ;;  %v3274_v55 = vld [vmem:[%s5990_s0 + $0x153] sm:$0x1]   ;;  %v1066_v57 = vsel %vm37_vm5, %v3263_v49, %v1061_v48  ;;  %v3264_v58 = vld [vmem:[%s5990_s0 + $0x240] sm:$0x80]   ;;  %v1130_v59 = vsel %vm90_vm0, %v3273_v51, %v3272_v50 }
  0x4f   :  { %857 = vrot.lane.b32.xlu0 %v856_v6, %s3663_s3  ;;  %v3275_v56 = vld [vmem:[%s5990_s0 + $0x685] ss:$-818 sm:%s1139_s23]   ;;  %v1104_v60 = vsel %vm32_vm4, %v3269_v53, %v1099_v52  ;;  %v3279_v62 = vld [vmem:[%s5990_s0 + $0x1b7] sm:$0x1]   ;;  %s1149_s21 = smov 96  ;;  %v1070_v2 = vsel %vm41_vm6, %v3264_v58, %v1066_v57  ;;  %s1187_s25 = smov 24 }
  0x50   :  { %960 = vrot.lane.b32.xlu1 %v959_v11, %s3665_s12  ;;  %v3270_v61 = vld [vmem:[%s5990_s0 + $0xa40] ss:$-412 sm:%s1106_s4]   ;;  %v3280_v63 = vld [vmem:[%s5990_s0 + $0x3b6] sm:$0x2]   ;;  %v1142_v0 = vsel %vm27_vm3, %v3275_v56, %v3274_v55  ;;  %s3669_s26 = smov 84   ;;  %s1224_s28 = smov 6 }
  0x51   :  { %v3276_v1 = vld [vmem:[%s5990_s0 + $0x6f5] ss:$-412 sm:%s1144_s7]   ;;  %v3281_v3 = vld [vmem:[%s5990_s0 + $0x8] sm:$0x1]   ;;  %v1109_v5 = vsel %vm37_vm5, %v3270_v61, %v1104_v60  ;;  %v3271_v6 = vld [vmem:[%s5990_s0 + $0x291] sm:$0x80]   ;;  %v1173_v7 = vsel %vm90_vm0, %v3280_v63, %v3279_v62 }
  0x52   :  { %v3282_v4 = vld [vmem:[%s5990_s0 + $0x39e] ss:$-406 sm:%s1182_s5]   ;;  %v1147_v8 = vsel %vm32_vm4, %v3276_v1, %v1142_v0  ;;  %v3277_v9 = vld [vmem:[%s5990_s0 + $0xa91] ss:$-412 sm:%s1149_s21]   ;;  %s1192_s9 = smov 96  ;;  %v1113_v14 = vsel %vm41_vm6, %v3271_v6, %v1109_v5  ;;  %s1229_s14 = smov 24 }
  0x53   :  { %900 = vrot.lane.b32.xlu0 %v899_v18, %s3664_s15  ;;  %v3286_v10 = vld [vmem:[%s5990_s0 + $0x1a4] sm:$0x1]   ;;  %v1185_v12 = vsel %vm27_vm3, %v3282_v4, %v3281_v3  ;;  %v3283_v13 = vld [vmem:[%s5990_s0 + $0x746] ss:$-412 sm:%s1187_s25]   ;;  %s3670_s16 = smov 82   ;;  %v1152_v17 = vsel %vm37_vm5, %v3277_v9, %v1147_v8  ;;  %s1267_s10 = smov 6 }
  0x54   :  { %1002 = vrot.lane.b32.xlu1 %v1001_v23, %s3666_s29  ;;  %v3287_v11 = vld [vmem:[%s5990_s0 + $0x3a3] sm:$0x2]   ;;  %v3288_v15 = vld [vmem:[%s5990_s0 + $0x59] sm:$0x1]   ;;  %v3278_v18 = vld [vmem:[%s5990_s0 + $0x2e2] sm:$0x80]   ;;  %v1190_v20 = vsel %vm32_vm4, %v3283_v13, %v1185_v12 }
  0x55   :  { %v3289_v16 = vld [vmem:[%s5990_s0 + $0x3ef] ss:$-406 sm:%s1224_s28]   ;;  %v1215_v19 = vsel %vm90_vm0, %v3287_v11, %v3286_v10  ;;  %v3284_v21 = vld [vmem:[%s5990_s0 + $0xac4] ss:$-406 sm:%s1192_s9]   ;;  %s1234_s27 = smov 96  ;;  %v1156_v26 = vsel %vm41_vm6, %v3278_v18, %v1152_v17  ;;  %s1272_s30 = smov 24 }
  0x56   :  { %v3293_v22 = vld [vmem:[%s5990_s0 + $0x1f5] sm:$0x1]   ;;  %v1227_v24 = vsel %vm27_vm3, %v3289_v16, %v3288_v15  ;;  %v3290_v25 = vld [vmem:[%s5990_s0 + $0x797] ss:$-412 sm:%s1229_s14]   ;;  %v3295_v27 = vld [vmem:[%s5990_s0 + $0xb0] sm:$0x1]   ;;  %v1195_v29 = vsel %vm37_vm5, %v3284_v21, %v1190_v20 }
  0x57   :  { %943 = vrot.lane.b32.xlu0 %v942_v30, %s3665_s12  ;;  %v3294_v23 = vld [vmem:[%s5990_s0 + $0x3f4] sm:$0x2]   ;;  %v3296_v28 = vld [vmem:[%s5990_s0 + $0x44c] ss:$-412 sm:%s1267_s10]   ;;  %s3671_s2 = smov 80   ;;  %s1310_s7 = smov 6  ;;  %v1232_v32 = vsel %vm32_vm4, %v3290_v25, %v1227_v24 }
  0x58   :  { %1045 = vrot.lane.b32.xlu1 %v1044_v35, %s3667_s22  ;;  %v3285_v30 = vld [vmem:[%s5990_s0 + $0x339] sm:$0x80]   ;;  %v1258_v31 = vsel %vm90_vm0, %v3294_v23, %v3293_v22  ;;  %v3291_v33 = vld [vmem:[%s5990_s0 + $0xb15] ss:$-406 sm:%s1234_s27]   ;;  %s1277_s12 = smov 96  ;;  %v1270_v37 = vsel %vm27_vm3, %v3296_v28, %v3295_v27  ;;  %s1353_s24 = smov 6 }
  0x59   :  { %v3300_v34 = vld [vmem:[%s5990_s0 + $0x1e2] sm:$0x1]   ;;  %v3292_v35 = vld [vmem:[%s5990_s0 + $0x38a] sm:$0x80]   ;;  %v3297_v38 = vld [vmem:[%s5990_s0 + $0x7e8] ss:$-412 sm:%s1272_s30]   ;;  %v1199_v39 = vsel %vm41_vm6, %v3285_v30, %v1195_v29 }
  0x5a   :  { %v3301_v36 = vld [vmem:[%s5990_s0 + $0x3e1] sm:$0x2]   ;;  %v3302_v40 = vld [vmem:[%s5990_s0 + $0x101] sm:$0x1]   ;;  %s3672_s25 = smov 78   ;;  %v1275_v46 = vsel %vm32_vm4, %v3297_v38, %v1270_v37  ;;  %s1320_s6 = smov 96 }
  0x5b   :  { %986 = vrot.lane.b32.xlu0 %v985_v42, %s3666_s29  ;;  %v3303_v41 = vld [vmem:[%s5990_s0 + $0x49d] ss:$-412 sm:%s1310_s7]   ;;  %v1237_v42 = vsel %vm37_vm5, %v3291_v33, %v1232_v32  ;;  %v1301_v45 = vsel %vm90_vm0, %v3301_v36, %v3300_v34  ;;  %vm3_vm9 = vcmask 80896   ;;  %v3309_v50 = vld [vmem:[%s5990_s0 + $0x152] sm:$0x1]   ;;  %s6_s11 = smov 3 }
  0x5c   :  { %1088 = vrot.lane.b32.xlu1 %v1087_v47, %s3668_s8  ;;  %v3298_v43 = vld [vmem:[%s5990_s0 + $0x1372] ss:$-818 sm:%s1277_s12]   ;;  %v3307_v44 = vld [vmem:[%s5990_s0 + $0x1c9] sm:$0x1]   ;;  %v1313_v49 = vsel %vm27_vm3, %v3303_v41, %v3302_v40  ;;  %s17_s5 = smov 3  ;;  %v1241_v52 = vsel %vm41_vm6, %v3292_v35, %v1237_v42  ;;  %s1358_s12 = smov 24 }
  0x5d   :  { %v3308_v47 = vld [vmem:[%s5990_s0 + $0x3c8] sm:$0x2]   ;;  %v3310_v51 = vld [vmem:[%s5990_s0 + $0x684] ss:$-818 sm:%s1353_s24]   ;;  %s3673_s18 = smov 76   ;;  %v1280_v55 = vsel %vm37_vm5, %v3298_v43, %v1275_v46  ;;  %s1396_s21 = smov 6 }
  0x5e   :  { %v3089_v53 = vld [vmem:[%s5990_s0 + $0x132] ss:$100 sm:%s6_s11]   ;;  %v1344_v57 = vsel %vm90_vm0, %v3308_v47, %v3307_v44  ;;  %v1356_v62 = vsel %vm27_vm3, %v3310_v51, %v3309_v50  ;;  %v3311_v63 = vld [vmem:[%s5990_s0 + $0x6f4] ss:$-412 sm:%s1358_s12]   ;;  %s1363_s28 = smov 96  ;;  %s1438_s9 = smov 6 }
  0x5f   :  { %1028 = vrot.lane.b32.xlu0 %v1027_v54, %s3667_s22  ;;  %s1315_s22 = smov 24  ;;  %v3091_v54 = vld [vmem:[%s5990_s0 + $0x332] ss:$100 sm:%s17_s5]   ;;  %10 = vst.msk [vmem:[#allocation0 + $0x78] ss:$40 sm:$0x3] %vm3_vm9, %v3089_v53   ;;  %v1361_v6 = vsel %vm32_vm4, %v3311_v63, %v1356_v62 }
  0x60   :  { %1131 = vrot.lane.b32.xlu1 %v1130_v59, %s3669_s26  ;;  %v3304_v48 = vld [vmem:[%s5990_s0 + $0xcfb] ss:$-818 sm:%s1315_s22]   ;;  %v3299_v56 = vld [vmem:[%s5990_s0 + $0x23f] sm:$0x80]   ;;  %vm163_vm10 = vcmask 1048544   ;;  %s1406_s10 = smov 96 }
  0x61   :  { %21 = vst.msk [vmem:[#allocation0 + $0x79] ss:$40 sm:$0x3] %vm3_vm9, %v3091_v54   ;;  %v1318_v58 = vsel %vm32_vm4, %v3304_v48, %v1313_v49  ;;  %v3305_v59 = vld [vmem:[%s5990_s0 + $0xa3f] ss:$-412 sm:%s1320_s6]   ;;  %v1284_v0 = vsel %vm41_vm6, %v3299_v56, %v1280_v55  ;;  %s1401_s6 = smov 24 }
  0x62   :  { %v3314_v60 = vld [vmem:[%s5990_s0 + $0x1b6] sm:$0x1]   ;;  %v3316_v1 = vld [vmem:[%s5990_s0 + $0x7] sm:$0x1]   ;;  %v1323_v3 = vsel %vm37_vm5, %v3305_v59, %v1318_v58  ;;  %v3306_v4 = vld [vmem:[%s5990_s0 + $0x290] sm:$0x80]  }
  0x63   :  { %1071 = vrot.lane.b32.xlu0 %v1070_v2, %s3668_s8  ;;  %v3315_v61 = vld [vmem:[%s5990_s0 + $0x3b5] sm:$0x2]   ;;  %v3317_v2 = vld [vmem:[%s5990_s0 + $0x39d] ss:$-406 sm:%s1396_s21]   ;;  %v1327_v12 = vsel %vm41_vm6, %v3306_v4, %v1323_v3  ;;  %vm77_vm11 = vcmask 1048560   ;;  %s1443_s15 = smov 24 }
  0x64   :  { %1174 = vrot.lane.b32.xlu1 %v1173_v7, %s3670_s16  ;;  %v1387_v5 = vsel %vm90_vm0, %v3315_v61, %v3314_v60  ;;  %v3312_v7 = vld [vmem:[%s5990_s0 + $0xa90] ss:$-412 sm:%s1363_s28]   ;;  %v3321_v8 = vld [vmem:[%s5990_s0 + $0x1a3] sm:$0x1]   ;;  %v1399_v10 = vsel %vm27_vm3, %v3317_v2, %v3316_v1  ;;  %s3675_s24 = smov 72   ;;  %s1481_s27 = smov 6 }
  0x65   :  { %v3322_v9 = vld [vmem:[%s5990_s0 + $0x3a2] sm:$0x2]   ;;  %v3318_v11 = vld [vmem:[%s5990_s0 + $0x745] ss:$-412 sm:%s1401_s6]   ;;  %v1366_v16 = vsel %vm37_vm5, %v3312_v7, %v1361_v6  ;;  %v3313_v17 = vld [vmem:[%s5990_s0 + $0x2e1] sm:$0x80]  }
  0x66   :  { %v3324_v15 = vld [vmem:[%s5990_s0 + $0x3ee] ss:$-406 sm:%s1438_s9]   ;;  %v1429_v18 = vsel %vm90_vm0, %v3322_v9, %v3321_v8  ;;  %v3319_v20 = vld [vmem:[%s5990_s0 + $0xae1] ss:$-412 sm:%s1406_s10]   ;;  %s1448_s7 = smov 96  ;;  %s1486_s12 = smov 24 }
  0x67   :  { %1114 = vrot.lane.b32.xlu0 %v1113_v14, %s3669_s26  ;;  %v3323_v14 = vld [vmem:[%s5990_s0 + $0x58] sm:$0x1]   ;;  %v3328_v22 = vld [vmem:[%s5990_s0 + $0x1f4] sm:$0x1]   ;;  %v3330_v27 = vld [vmem:[%s5990_s0 + $0xa9] sm:$0x1]  }
  0x68   :  { %1216 = vrot.lane.b32.xlu1 %v1215_v19, %s3671_s2  ;;  %v1404_v19 = vsel %vm32_vm4, %v3318_v11, %v1399_v10  ;;  %v3329_v23 = vld [vmem:[%s5990_s0 + $0x3f3] sm:$0x2]   ;;  %v1441_v24 = vsel %vm27_vm3, %v3324_v15, %v3323_v14  ;;  %v3325_v25 = vld [vmem:[%s5990_s0 + $0x796] ss:$-412 sm:%s1443_s15]   ;;  %s3676_s13 = smov 70   ;;  %s1524_s17 = smov 6 }
  0x69   :  { %v3331_v28 = vld [vmem:[%s5990_s0 + $0x43f] ss:$-406 sm:%s1481_s27]   ;;  %v1409_v29 = vsel %vm37_vm5, %v3319_v20, %v1404_v19  ;;  %v3320_v30 = vld [vmem:[%s5990_s0 + $0x332] sm:$0x80]   ;;  %v1446_v32 = vsel %vm32_vm4, %v3325_v25, %v1441_v24  ;;  %v3335_v34 = vld [vmem:[%s5990_s0 + $0x1e1] sm:$0x1]  }
  0x6a   :  { %v3326_v33 = vld [vmem:[%s5990_s0 + $0xb14] ss:$-406 sm:%s1448_s7]   ;;  %v3336_v36 = vld [vmem:[%s5990_s0 + $0x3e0] sm:$0x2]   ;;  %v1484_v37 = vsel %vm27_vm3, %v3331_v28, %v3330_v27  ;;  %s1491_s27 = smov 96  ;;  %s1529_s30 = smov 24 }
  0x6b   :  { %1157 = vrot.lane.b32.xlu0 %v1156_v26, %s3670_s16  ;;  %v1370_v26 = vsel %vm41_vm6, %v3313_v17, %v1366_v16  ;;  %v3327_v35 = vld [vmem:[%s5990_s0 + $0x389] sm:$0x80]   ;;  %v3332_v38 = vld [vmem:[%s5990_s0 + $0x7e7] ss:$-412 sm:%s1486_s12]   ;;  %s1567_s3 = smov 6  ;;  %s3677_s6 = smov 68   ;;  %v1451_v42 = vsel %vm37_vm5, %v3326_v33, %v1446_v32  ;;  %v1515_v46 = vsel %vm90_vm0, %v3336_v36, %v3335_v34 }
  0x6c   :  { %1259 = vrot.lane.b32.xlu1 %v1258_v31, %s3672_s25  ;;  %v1472_v31 = vsel %vm90_vm0, %v3329_v23, %v3328_v22  ;;  %v3337_v40 = vld [vmem:[%s5990_s0 + $0x100] sm:$0x1]   ;;  %v1489_v47 = vsel %vm32_vm4, %v3332_v38, %v1484_v37  ;;  %v3333_v48 = vld [vmem:[%s5990_s0 + $0x1371] ss:$-818 sm:%s1491_s27]   ;;  %vm249_vm12 = vcmask 1048528   ;;  %s1534_s10 = smov 96  ;;  %v1455_v53 = vsel %vm41_vm6, %v3327_v35, %v1451_v42 }
  0x6d   :  { %v3338_v41 = vld [vmem:[%s5990_s0 + $0x49c] ss:$-412 sm:%s1524_s17]   ;;  %v3344_v54 = vld [vmem:[%s5990_s0 + $0x151] sm:$0x1]   ;;  %s4707_s15 = smov 24  ;;  %s1610_s27 = smov 6 }
  0x6e   :  { %v2_v44 = vld [vmem:[%s5990_s0] ss:$100 sm:$0x7]   ;;  %v1527_v51 = vsel %vm27_vm3, %v3338_v41, %v3337_v40  ;;  %v3345_v55 = vld [vmem:[%s5990_s0 + $0x689] ss:$-824 sm:%s1567_s3]   ;;  %s1577_s7 = smov 96 }
  0x6f   :  { %1200 = vrot.lane.b32.xlu0 %v1199_v39, %s3671_s2  ;;  %s3674_s2 = smov 74   ;;  %v1413_v39 = vsel %vm41_vm6, %v3320_v30, %v1409_v29  ;;  %v3342_v49 = vld [vmem:[%s5990_s0 + $0x1c8] sm:$0x1]   ;;  %4 = vst.msk [vmem:[#allocation0] ss:$40 sm:$0x7] %vm3_vm9, %v2_v44   ;;  %v1570_v1 = vsel %vm27_vm3, %v3345_v55, %v3344_v54 }
  0x70   :  { %1302 = vrot.lane.b32.xlu1 %v1301_v45, %s3673_s18  ;;  %v3090_v45 = vld [vmem:[%s5990_s0 + $0x200] ss:$100 sm:$0x7]   ;;  %v3334_v58 = vld [vmem:[%s5990_s0 + $0x23e] sm:$0x80]   ;;  %s1615_s12 = smov 24 }
  0x71   :  { %15 = vst.msk [vmem:[#allocation0 + $0x1] ss:$40 sm:$0x7] %vm3_vm9, %v3090_v45   ;;  %v3343_v50 = vld [vmem:[%s5990_s0 + $0x3c7] sm:$0x2]   ;;  %s3679_s14 = smov 64  }
  0x72   :  { %v1558_v60 = vsel %vm90_vm0, %v3343_v50, %v3342_v49  ;;  %v3340_v62 = vld [vmem:[%s5990_s0 + $0xa3e] ss:$-412 sm:%s1534_s10]   ;;  %v3349_v63 = vld [vmem:[%s5990_s0 + $0x1b5] sm:$0x1]   ;;  %vm335_vm13 = vcmask 1048512   ;;  %s1652_s17 = smov 6 }
  0x73   :  { %1242 = vrot.lane.b32.xlu0 %v1241_v52, %s3672_s25  ;;  %v3339_v52 = vld [vmem:[%s5990_s0 + $0xcfa] ss:$-818 sm:%s1529_s30]   ;;  %v3351_v4 = vld [vmem:[%s5990_s0 + $0x6] sm:$0x1]   ;;  %s1620_s25 = smov 96  ;;  %s1657_s29 = smov 24 }
  0x74   :  { %1345 = vrot.lane.b32.xlu1 %v1344_v57, %s3674_s2  ;;  %v1494_v57 = vsel %vm37_vm5, %v3333_v48, %v1489_v47  ;;  %v1532_v61 = vsel %vm32_vm4, %v3339_v52, %v1527_v51  ;;  %v3346_v2 = vld [vmem:[%s5990_s0 + $0x6db] ss:$-406 sm:%s4707_s15]   ;;  %v3341_v7 = vld [vmem:[%s5990_s0 + $0x28f] sm:$0x80]   ;;  %s3680_s4 = smov 62   ;;  %vm388_vm14 = vcmask 1048496  }
  0x75   :  { %v1498_v3 = vsel %vm41_vm6, %v3334_v58, %v1494_v57  ;;  %v1537_v6 = vsel %vm37_vm5, %v3340_v62, %v1532_v61  ;;  %v1575_v9 = vsel %vm32_vm4, %v3346_v2, %v1570_v1  ;;  %v3347_v10 = vld [vmem:[%s5990_s0 + $0xa8f] ss:$-412 sm:%s1577_s7]   ;;  %v3356_v11 = vld [vmem:[%s5990_s0 + $0x1a2] sm:$0x1]   ;;  %s1700_s22 = smov 24  ;;  %s3681_s21 = smov 60  }
  0x76   :  { %v3353_v15 = vld [vmem:[%s5990_s0 + $0x744] ss:$-412 sm:%s1615_s12]   ;;  %v1541_v17 = vsel %vm41_vm6, %v3341_v7, %v1537_v6  ;;  %v3359_v19 = vld [vmem:[%s5990_s0 + $0x3ed] ss:$-406 sm:%s1652_s17]   ;;  %v1580_v20 = vsel %vm37_vm5, %v3347_v10, %v1575_v9  ;;  %vm431_vm15 = vcmask 1032096   ;;  %s1738_s15 = smov 6 }
  0x77   :  { %1285 = vrot.lane.b32.xlu0 %v1284_v0, %s3673_s18  ;;  %v3350_v0 = vld [vmem:[%s5990_s0 + $0x3b4] sm:$0x2]   ;;  %v3354_v24 = vld [vmem:[%s5990_s0 + $0xae0] ss:$-412 sm:%s1620_s25]   ;;  %s1705_s30 = smov 96  ;;  %s1743_s8 = smov 24 }
  0x78   :  { %1388 = vrot.lane.b32.xlu1 %v1387_v5, %s3675_s24  ;;  %v3352_v5 = vld [vmem:[%s5990_s0 + $0x39c] ss:$-406 sm:%s1610_s27]   ;;  %v1601_v8 = vsel %vm90_vm0, %v3350_v0, %v3349_v63  ;;  %v3363_v25 = vld [vmem:[%s5990_s0 + $0x1f3] sm:$0x1]   ;;  %s3682_s9 = smov 58   ;;  %s1781_s12 = smov 6 }
  0x79   :  { %v187_v13 = vpop.permute.xlu1 %186   ;;  %v101_v21 = vpop.permute.xlu0 %100   ;;  %v1613_v14 = vsel %vm27_vm3, %v3352_v5, %v3351_v4  ;;  %v3364_v27 = vld [vmem:[%s5990_s0 + $0x3f2] sm:$0x2]   ;;  %v3360_v29 = vld [vmem:[%s5990_s0 + $0x795] ss:$-412 sm:%s1657_s29]   ;;  %v3355_v35 = vld [vmem:[%s5990_s0 + $0x331] sm:$0x80]  }
  0x7a   :  { %193 = vst.msk [vmem:[#allocation0 + $0xb0] sm:$0x3] %vm163_vm10, %v187_v13   ;;  %v1618_v23 = vsel %vm32_vm4, %v3353_v15, %v1613_v14  ;;  %v1686_v36 = vsel %vm90_vm0, %v3364_v27, %v3363_v25  ;;  %v3371_v41 = vld [vmem:[%s5990_s0 + $0x3df] sm:$0x2]   ;;  %v3372_v45 = vld [vmem:[%s5990_s0 + $0xf9] sm:$0x1]  }
  0x7b   :  { %1328 = vrot.lane.b32.xlu0 %v1327_v12, %s3674_s2  ;;  %104 = vst.msk [vmem:[#allocation0 + $0xc0] sm:$0x3] %vm68_vm8, %v101_v21   ;;  %v1623_v34 = vsel %vm37_vm5, %v3354_v24, %v1618_v23  ;;  %v3362_v49 = vld [vmem:[%s5990_s0 + $0x382] sm:$0x80]   ;;  %v3368_v52 = vld [vmem:[%s5990_s0 + $0x1370] ss:$-818 sm:%s1705_s30]  }
  0x7c   :  { %107 = vst.msk [vmem:[#allocation0 + $0xb8] sm:$0x3] %vm77_vm11, %v101_v21   ;;  %1430 = vrot.lane.b32.xlu1 %v1429_v18, %s3676_s13  ;;  %v3358_v18 = vld [vmem:[%s5990_s0 + $0x57] sm:$0x1]   ;;  %v3348_v21 = vld [vmem:[%s5990_s0 + $0x2e0] sm:$0x80]   ;;  %v1627_v44 = vsel %vm41_vm6, %v3355_v35, %v1623_v34 }
  0x7d   :  { %190 = vst.msk [vmem:[#allocation0 + $0xb8] sm:$0x3] %vm154_vm7, %v187_v13   ;;  %v3357_v13 = vld [vmem:[%s5990_s0 + $0x3a1] sm:$0x2]   ;;  %v1655_v28 = vsel %vm27_vm3, %v3359_v19, %v3358_v18  ;;  %v1584_v30 = vsel %vm41_vm6, %v3348_v21, %v1580_v20  ;;  %v3378_v55 = vld [vmem:[%s5990_s0 + $0x3c6] sm:$0x2]  }
  0x7e   :  { %v1643_v22 = vsel %vm90_vm0, %v3357_v13, %v3356_v11  ;;  %v1660_v37 = vsel %vm32_vm4, %v3360_v29, %v1655_v28  ;;  %v3374_v57 = vld [vmem:[%s5990_s0 + $0xcf9] ss:$-818 sm:%s1743_s8]   ;;  %s1748_s19 = smov 96  ;;  %s1786_s26 = smov 24  ;;  %v3369_v63 = vld [vmem:[%s5990_s0 + $0x23d] sm:$0x80]  }
  0x7f   :  { %1371 = vrot.lane.b32.xlu0 %v1370_v26, %s3675_s24  ;;  %s3678_s24 = smov 66   ;;  %s3683_s27 = smov 56   ;;  %v3375_v2 = vld [vmem:[%s5990_s0 + $0xa3d] ss:$-412 sm:%s1748_s19]   ;;  %v3385_v5 = vld [vmem:[%s5990_s0 + $0x3b3] sm:$0x2]  }
  0x80   :  { %1473 = vrot.lane.b32.xlu1 %v1472_v31, %s3677_s6  ;;  %v153_v43 = vpop.permute.xlu1 %152   ;;  %v3365_v31 = vld [vmem:[%s5990_s0 + $0xa8] sm:$0x1]   ;;  %s1824_s29 = smov 6  ;;  %v3381_v7 = vld [vmem:[%s5990_s0 + $0x6da] ss:$-406 sm:%s1786_s26]   ;;  %s1791_s11 = smov 96 }
  0x81   :  { %165 = vst.msk [vmem:[#allocation0 + $0x60] sm:$0x3] %vm163_vm10, %v153_v43   ;;  %167 = vst.msk [vmem:[#allocation0 + $0x86] sm:$0xc] %vm163_vm10, %v153_v43   ;;  %v3386_v9 = vld [vmem:[%s5990_s0 + $0x5] sm:$0x1]  }
  0x82   :  { %169 = vst.msk [vmem:[#allocation0 + $0xc] sm:$0x30] %vm163_vm10, %v153_v43   ;;  %171 = vst.msk [vmem:[#allocation0 + $0x32] sm:$0xc0] %vm163_vm10, %v153_v43   ;;  %v3387_v10 = vld [vmem:[%s5990_s0 + $0x3a1] ss:$-412 sm:%s1824_s29]  }
  0x83   :  { %1414 = vrot.lane.b32.xlu0 %v1413_v39, %s3676_s13  ;;  %s1662_s13 = smov 96  ;;  %v3370_v39 = vld [vmem:[%s5990_s0 + $0x1e0] sm:$0x1]   ;;  %s1829_s16 = smov 24  ;;  %v3376_v13 = vld [vmem:[%s5990_s0 + $0x28e] sm:$0x80]   ;;  %v1827_v20 = vsel %vm27_vm3, %v3387_v10, %v3386_v9 }
  0x84   :  { %v67_v56 = vpop.permute.xlu0 %66   ;;  %1516 = vrot.lane.b32.xlu1 %v1515_v46, %s3678_s24  ;;  %v3361_v38 = vld [vmem:[%s5990_s0 + $0xb31] ss:$-412 sm:%s1662_s13]   ;;  %v1729_v50 = vsel %vm90_vm0, %v3371_v41, %v3370_v39  ;;  %s3684_s17 = smov 54   ;;  %s1834_s20 = smov 96  ;;  %v3393_v23 = vld [vmem:[%s5990_s0 + $0x56] sm:$0x1]  }
  0x85   :  { %v273_v59 = vpop.permute.xlu1 %272   ;;  %70 = vst.msk [vmem:[#allocation0 + $0x20] sm:$0x3] %vm68_vm8, %v67_v56   ;;  %72 = vst.msk [vmem:[#allocation0 + $0x46] sm:$0xc] %vm68_vm8, %v67_v56   ;;  %v3373_v46 = vld [vmem:[%s5990_s0 + $0x48f] ss:$-406 sm:%s1738_s15]   ;;  %v1665_v48 = vsel %vm37_vm5, %v3361_v38, %v1660_v37 }
  0x86   :  { %74 = vst.msk [vmem:[#allocation0 + $0x6c] sm:$0x30] %vm68_vm8, %v67_v56   ;;  %76 = vst.msk [vmem:[#allocation0 + $0x92] sm:$0xc0] %vm68_vm8, %v67_v56   ;;  %v1669_v58 = vsel %vm41_vm6, %v3362_v49, %v1665_v48  ;;  %v3392_v19 = vld [vmem:[%s5990_s0 + $0x3a0] sm:$0x2]  }
  0x87   :  { %79 = vst.msk [vmem:[#allocation0 + $0x40] sm:$0x3] %vm77_vm11, %v67_v56   ;;  %81 = vst.msk [vmem:[#allocation0 + $0x66] sm:$0xc] %vm77_vm11, %v67_v56   ;;  %1456 = vrot.lane.b32.xlu0 %v1455_v53, %s3677_s6  ;;  %s1695_s6 = smov 6  ;;  %s1871_s3 = smov 24 }
  0x88   :  { %83 = vst.msk [vmem:[#allocation0 + $0x8c] sm:$0x30] %vm77_vm11, %v67_v56   ;;  %85 = vst.msk [vmem:[#allocation0 + $0x12] sm:$0xc0] %vm77_vm11, %v67_v56   ;;  %1559 = vrot.lane.b32.xlu1 %v1558_v60, %s3679_s14  ;;  %v3366_v32 = vld [vmem:[%s5990_s0 + $0x43e] ss:$-406 sm:%s1695_s6]   ;;  %v1741_v56 = vsel %vm27_vm3, %v3373_v46, %v3372_v45 }
  0x89   :  { %276 = vst.msk [vmem:[#allocation0 + $0xb0] sm:$0x3] %vm150_vm1, %v273_v59   ;;  %v1698_v42 = vsel %vm27_vm3, %v3366_v32, %v3365_v31  ;;  %v3377_v53 = vld [vmem:[%s5990_s0 + $0x1c7] sm:$0x1]   ;;  %v3380_v60 = vld [vmem:[%s5990_s0 + $0x688] ss:$-824 sm:%s1781_s12]   ;;  %v1746_v1 = vsel %vm32_vm4, %v3374_v57, %v1741_v56 }
  0x8a   :  { %279 = vst.msk [vmem:[#allocation0 + $0xa8] sm:$0x3] %vm249_vm12, %v273_v59   ;;  %v358_v12 = vpop.permute.xlu1 %357   ;;  %v3379_v59 = vld [vmem:[%s5990_s0 + $0x150] sm:$0x1]   ;;  %v1772_v0 = vsel %vm90_vm0, %v3378_v55, %v3377_v53  ;;  %v3388_v21 = vld [vmem:[%s5990_s0 + $0x72b] ss:$-406 sm:%s1829_s16]  }
  0x8b   :  { %156 = vst.msk [vmem:[#allocation0 + $0x40] sm:$0x3] %vm154_vm7, %v153_v43   ;;  %158 = vst.msk [vmem:[#allocation0 + $0x66] sm:$0xc] %vm154_vm7, %v153_v43   ;;  %1499 = vrot.lane.b32.xlu0 %v1498_v3, %s3678_s24  ;;  %v239_v16 = vpop.permute.xlu0 %238   ;;  %v3384_v3 = vld [vmem:[%s5990_s0 + $0x1b4] sm:$0x1]   ;;  %v1784_v6 = vsel %vm27_vm3, %v3380_v60, %v3379_v59  ;;  %v1832_v29 = vsel %vm32_vm4, %v3388_v21, %v1827_v20 }
  0x8c   :  { %160 = vst.msk [vmem:[#allocation0 + $0x8c] sm:$0x30] %vm154_vm7, %v153_v43   ;;  %162 = vst.msk [vmem:[#allocation0 + $0x12] sm:$0xc0] %vm154_vm7, %v153_v43   ;;  %1602 = vrot.lane.b32.xlu1 %v1601_v8, %s3680_s4  ;;  %v3367_v43 = vld [vmem:[%s5990_s0 + $0x7e6] ss:$-412 sm:%s1700_s22]   ;;  %v1815_v14 = vsel %vm90_vm0, %v3385_v5, %v3384_v3  ;;  %v1789_v15 = vsel %vm32_vm4, %v3381_v7, %v1784_v6 }
  0x8d   :  { %361 = vst.msk [vmem:[#allocation0 + $0xa8] sm:$0x3] %vm64_vm2, %v358_v12   ;;  %v1703_v51 = vsel %vm32_vm4, %v3367_v43, %v1698_v42  ;;  %vm560_vm7 = vcmask 982896   ;;  %s1866_s22 = smov 6  ;;  %s3685_s6 = smov 52   ;;  %vm602_vm8 = vcmask 966496  }
  0x8e   :  { %364 = vst.msk [vmem:[#allocation0 + $0xa0] sm:$0x3] %vm335_vm13, %v358_v12   ;;  %v404_v26 = vpop.permute.xlu1 %403   ;;  %v1708_v62 = vsel %vm37_vm5, %v3368_v52, %v1703_v51  ;;  %v1751_v12 = vsel %vm37_vm5, %v3375_v2, %v1746_v1  ;;  %v3394_v24 = vld [vmem:[%s5990_s0 + $0x3ec] ss:$-406 sm:%s1866_s22]   ;;  %v3383_v27 = vld [vmem:[%s5990_s0 + $0x2df] sm:$0x80]  }
  0x8f   :  { %242 = vst.msk [vmem:[#allocation0 + $0x60] sm:$0x3] %vm150_vm1, %v239_v16   ;;  %244 = vst.msk [vmem:[#allocation0 + $0x86] sm:$0xc] %vm150_vm1, %v239_v16   ;;  %1542 = vrot.lane.b32.xlu0 %v1541_v17, %s3679_s14  ;;  %v1712_v8 = vsel %vm41_vm6, %v3369_v63, %v1708_v62  ;;  %v3391_v17 = vld [vmem:[%s5990_s0 + $0x1a1] sm:$0x1]   ;;  %v1869_v34 = vsel %vm27_vm3, %v3394_v24, %v3393_v23 }
  0x90   :  { %246 = vst.msk [vmem:[#allocation0 + $0xc] sm:$0x30] %vm150_vm1, %v239_v16   ;;  %248 = vst.msk [vmem:[#allocation0 + $0x32] sm:$0xc0] %vm150_vm1, %v239_v16   ;;  %1644 = vrot.lane.b32.xlu1 %v1643_v22, %s3681_s21  ;;  %vm474_vm1 = vcmask 1015696   ;;  %v1755_v22 = vsel %vm41_vm6, %v3376_v13, %v1751_v12  ;;  %s1909_s8 = smov 6  ;;  %v1857_v28 = vsel %vm90_vm0, %v3392_v19, %v3391_v17 }
  0x91   :  { %251 = vst.msk [vmem:[#allocation0 + $0x80] sm:$0x3] %vm249_vm12, %v239_v16   ;;  %253 = vst.msk [vmem:[#allocation0 + $0x6] sm:$0xc] %vm249_vm12, %v239_v16   ;;  %v325_v33 = vpop.permute.xlu0 %324   ;;  %v3398_v31 = vld [vmem:[%s5990_s0 + $0x1f2] sm:$0x1]  }
  0x92   :  { %255 = vst.msk [vmem:[#allocation0 + $0x2c] sm:$0x30] %vm249_vm12, %v239_v16   ;;  %257 = vst.msk [vmem:[#allocation0 + $0x52] sm:$0xc0] %vm249_vm12, %v239_v16   ;;  %v447_v40 = vpop.permute.xlu1 %446   ;;  %v3382_v16 = vld [vmem:[%s5990_s0 + $0xa8e] ss:$-412 sm:%s1791_s11]  }
  0x93   :  { %407 = vst.msk [vmem:[#allocation0 + $0xc0] sm:$0x3] %vm388_vm14, %v404_v26   ;;  %1585 = vrot.lane.b32.xlu0 %v1584_v30, %s3680_s4  ;;  %v1794_v26 = vsel %vm37_vm5, %v3382_v16, %v1789_v15  ;;  %v3389_v30 = vld [vmem:[%s5990_s0 + $0xadf] ss:$-412 sm:%s1834_s20]   ;;  %s1876_s18 = smov 96  ;;  %s1914_s23 = smov 24 }
  0x94   :  { %328 = vst.msk [vmem:[#allocation0 + $0x80] sm:$0x3] %vm64_vm2, %v325_v33   ;;  %330 = vst.msk [vmem:[#allocation0 + $0x6] sm:$0xc] %vm64_vm2, %v325_v33   ;;  %1687 = vrot.lane.b32.xlu1 %v1686_v36, %s3682_s9  ;;  %v3395_v35 = vld [vmem:[%s5990_s0 + $0x794] ss:$-412 sm:%s1871_s3]   ;;  %v1798_v36 = vsel %vm41_vm6, %v3383_v27, %v1794_v26 }
  0x95   :  { %332 = vst.msk [vmem:[#allocation0 + $0x2c] sm:$0x30] %vm64_vm2, %v325_v33   ;;  %334 = vst.msk [vmem:[#allocation0 + $0x52] sm:$0xc0] %vm64_vm2, %v325_v33   ;;  %v387_v47 = vpop.permute.xlu0 %386   ;;  %vm517_vm2 = vcmask 999296   ;;  %s3686_s15 = smov 50   ;;  %v1874_v43 = vsel %vm32_vm4, %v3395_v35, %v1869_v34 }
  0x96   :  { %342 = vst.msk [vmem:[#allocation0 + $0x72] sm:$0xc0] %vm335_vm13, %v325_v33   ;;  %336 = vst.msk [vmem:[#allocation0] sm:$0x3] %vm335_vm13, %v325_v33   ;;  %v490_v54 = vpop.permute.xlu1 %489   ;;  %v3400_v37 = vld [vmem:[%s5990_s0 + $0xa7] sm:$0x1]  }
  0x97   :  { %338 = vst.msk [vmem:[#allocation0 + $0x26] sm:$0xc] %vm335_vm13, %v325_v33   ;;  %340 = vst.msk [vmem:[#allocation0 + $0x4c] sm:$0x30] %vm335_vm13, %v325_v33   ;;  %1628 = vrot.lane.b32.xlu0 %v1627_v44, %s3681_s21  ;;  %v3399_v33 = vld [vmem:[%s5990_s0 + $0x3f1] sm:$0x2]  }
  0x98   :  { %450 = vst.msk [vmem:[#allocation0 + $0xb8] sm:$0x3] %vm431_vm15, %v447_v40   ;;  %1730 = vrot.lane.b32.xlu1 %v1729_v50, %s3683_s27  ;;  %v3401_v38 = vld [vmem:[%s5990_s0 + $0x43d] ss:$-406 sm:%s1909_s8]   ;;  %v1837_v40 = vsel %vm37_vm5, %v3389_v30, %v1832_v29  ;;  %v3390_v41 = vld [vmem:[%s5990_s0 + $0x330] sm:$0x80]   ;;  %v1900_v42 = vsel %vm90_vm0, %v3399_v33, %v3398_v31 }
  0x99   :  { %390 = vst.msk [vmem:[#allocation0 + $0x20] sm:$0x3] %vm388_vm14, %v387_v47   ;;  %392 = vst.msk [vmem:[#allocation0 + $0x46] sm:$0xc] %vm388_vm14, %v387_v47   ;;  %v430_v61 = vpop.permute.xlu0 %429   ;;  %vm645_vm9 = vcmask 950096   ;;  %s1952_s26 = smov 6  ;;  %v1912_v48 = vsel %vm27_vm3, %v3401_v38, %v3400_v37  ;;  %v1841_v50 = vsel %vm41_vm6, %v3390_v41, %v1837_v40 }
  0x9a   :  { %394 = vst.msk [vmem:[#allocation0 + $0x6c] sm:$0x30] %vm388_vm14, %v387_v47   ;;  %396 = vst.msk [vmem:[#allocation0 + $0x92] sm:$0xc0] %vm388_vm14, %v387_v47   ;;  %v533_v4 = vpop.permute.xlu1 %532   ;;  %v3396_v44 = vld [vmem:[%s5990_s0 + $0xb30] ss:$-412 sm:%s1876_s18]  }
  0x9b   :  { %493 = vst.msk [vmem:[#allocation0 + $0xb0] sm:$0x3] %vm474_vm1, %v490_v54   ;;  %1670 = vrot.lane.b32.xlu0 %v1669_v58, %s3682_s9  ;;  %v3405_v45 = vld [vmem:[%s5990_s0 + $0x1d9] sm:$0x1]   ;;  %s1919_s2 = smov 96  ;;  %s1957_s5 = smov 24  ;;  %v1879_v54 = vsel %vm37_vm5, %v3396_v44, %v1874_v43 }
  0x9c   :  { %433 = vst.msk [vmem:[#allocation0 + $0x40] sm:$0x3] %vm431_vm15, %v430_v61   ;;  %435 = vst.msk [vmem:[#allocation0 + $0x66] sm:$0xc] %vm431_vm15, %v430_v61   ;;  %1773 = vrot.lane.b32.xlu1 %v1772_v0, %s3684_s17  ;;  %v3406_v47 = vld [vmem:[%s5990_s0 + $0x3d8] sm:$0x2]  }
  0x9d   :  { %437 = vst.msk [vmem:[#allocation0 + $0x8c] sm:$0x30] %vm431_vm15, %v430_v61   ;;  %439 = vst.msk [vmem:[#allocation0 + $0x12] sm:$0xc0] %vm431_vm15, %v430_v61   ;;  %v473_v11 = vpop.permute.xlu0 %472   ;;  %v3402_v49 = vld [vmem:[%s5990_s0 + $0x7e5] ss:$-412 sm:%s1914_s23]   ;;  %v1943_v56 = vsel %vm90_vm0, %v3406_v47, %v3405_v45 }
  0x9e   :  { %536 = vst.msk [vmem:[#allocation0 + $0xa8] sm:$0x3] %vm517_vm2, %v533_v4   ;;  %v575_v18 = vpop.permute.xlu1 %574   ;;  %v3407_v51 = vld [vmem:[%s5990_s0 + $0xf8] sm:$0x1]   ;;  %s3687_s12 = smov 48   ;;  %vm688_vm10 = vcmask 933696   ;;  %v1917_v57 = vsel %vm32_vm4, %v3402_v49, %v1912_v48 }
  0x9f   :  { %476 = vst.msk [vmem:[#allocation0 + $0x60] sm:$0x3] %vm474_vm1, %v473_v11   ;;  %478 = vst.msk [vmem:[#allocation0 + $0x86] sm:$0xc] %vm474_vm1, %v473_v11   ;;  %1713 = vrot.lane.b32.xlu0 %v1712_v8, %s3683_s27  ;;  %v3408_v52 = vld [vmem:[%s5990_s0 + $0x48e] ss:$-406 sm:%s1952_s26]  }
  0xa0   :  { %480 = vst.msk [vmem:[#allocation0 + $0xc] sm:$0x30] %vm474_vm1, %v473_v11   ;;  %482 = vst.msk [vmem:[#allocation0 + $0x32] sm:$0xc0] %vm474_vm1, %v473_v11   ;;  %1816 = vrot.lane.b32.xlu1 %v1815_v14, %s3685_s6  ;;  %v3397_v55 = vld [vmem:[%s5990_s0 + $0x381] sm:$0x80]   ;;  %v1955_v62 = vsel %vm27_vm3, %v3408_v52, %v3407_v51 }
  0xa1   :  { %578 = vst.msk [vmem:[#allocation0 + $0xa0] sm:$0x3] %vm560_vm7, %v575_v18   ;;  %v516_v25 = vpop.permute.xlu0 %515   ;;  %s1995_s16 = smov 6  ;;  %v3403_v58 = vld [vmem:[%s5990_s0 + $0x136f] ss:$-818 sm:%s1919_s2]   ;;  %s1962_s24 = smov 96  ;;  %v1883_v0 = vsel %vm41_vm6, %v3397_v55, %v1879_v54 }
  0xa2   :  { %519 = vst.msk [vmem:[#allocation0 + $0x80] sm:$0x3] %vm517_vm2, %v516_v25   ;;  %521 = vst.msk [vmem:[#allocation0 + $0x6] sm:$0xc] %vm517_vm2, %v516_v25   ;;  %v618_v32 = vpop.permute.xlu1 %617   ;;  %v3412_v59 = vld [vmem:[%s5990_s0 + $0x1c6] sm:$0x1]   ;;  %v1922_v4 = vsel %vm37_vm5, %v3403_v58, %v1917_v57 }
  0xa3   :  { %523 = vst.msk [vmem:[#allocation0 + $0x2c] sm:$0x30] %vm517_vm2, %v516_v25   ;;  %525 = vst.msk [vmem:[#allocation0 + $0x52] sm:$0xc0] %vm517_vm2, %v516_v25   ;;  %1756 = vrot.lane.b32.xlu0 %v1755_v22, %s3684_s17  ;;  %v3413_v61 = vld [vmem:[%s5990_s0 + $0x3c5] sm:$0x2]  }
  0xa4   :  { %621 = vst.msk [vmem:[#allocation0 + $0xc0] sm:$0x3] %vm602_vm8, %v618_v32   ;;  %1858 = vrot.lane.b32.xlu1 %v1857_v28, %s3686_s15  ;;  %v3409_v63 = vld [vmem:[%s5990_s0 + $0xcf8] ss:$-818 sm:%s1957_s5]   ;;  %v3414_v1 = vld [vmem:[%s5990_s0 + $0x149] sm:$0x1]   ;;  %v1986_v6 = vsel %vm90_vm0, %v3413_v61, %v3412_v59 }
  0xa5   :  { %v559_v39 = vpop.permute.xlu0 %558   ;;  %v3415_v2 = vld [vmem:[%s5990_s0 + $0x67b] ss:$-818 sm:%s1995_s16]   ;;  %s2000_s28 = smov 24  ;;  %s3688_s29 = smov 46   ;;  %v3404_v5 = vld [vmem:[%s5990_s0 + $0x23c] sm:$0x80]   ;;  %v1960_v7 = vsel %vm32_vm4, %v3409_v63, %v1955_v62 }
  0xa6   :  { %561 = vst.msk [vmem:[#allocation0] sm:$0x3] %vm560_vm7, %v559_v39   ;;  %563 = vst.msk [vmem:[#allocation0 + $0x26] sm:$0xc] %vm560_vm7, %v559_v39   ;;  %v661_v46 = vpop.permute.xlu1 %660   ;;  %vm731_vm11 = vcmask 917296   ;;  %s2038_s3 = smov 6  ;;  %v1998_v12 = vsel %vm27_vm3, %v3415_v2, %v3414_v1  ;;  %v1926_v14 = vsel %vm41_vm6, %v3404_v5, %v1922_v4 }
  0xa7   :  { %565 = vst.msk [vmem:[#allocation0 + $0x4c] sm:$0x30] %vm560_vm7, %v559_v39   ;;  %567 = vst.msk [vmem:[#allocation0 + $0x72] sm:$0xc0] %vm560_vm7, %v559_v39   ;;  %1799 = vrot.lane.b32.xlu0 %v1798_v36, %s3685_s6  ;;  %v3410_v8 = vld [vmem:[%s5990_s0 + $0xa3c] ss:$-412 sm:%s1962_s24]  }
  0xa8   :  { %664 = vst.msk [vmem:[#allocation0 + $0xb8] sm:$0x3] %vm645_vm9, %v661_v46   ;;  %1901 = vrot.lane.b32.xlu1 %v1900_v42, %s3687_s12  ;;  %v3419_v9 = vld [vmem:[%s5990_s0 + $0x1b3] sm:$0x1]   ;;  %v3416_v13 = vld [vmem:[%s5990_s0 + $0x6d9] ss:$-406 sm:%s2000_s28]   ;;  %v1965_v18 = vsel %vm37_vm5, %v3410_v8, %v1960_v7 }
  0xa9   :  { %v601_v53 = vpop.permute.xlu0 %600   ;;  %v3420_v11 = vld [vmem:[%s5990_s0 + $0x3b2] sm:$0x2]   ;;  %s2005_s14 = smov 96  ;;  %v3421_v15 = vld [vmem:[%s5990_s0 + $0x4] sm:$0x1]   ;;  %s2043_s10 = smov 24  ;;  %v2003_v21 = vsel %vm32_vm4, %v3416_v13, %v1998_v12 }
  0xaa   :  { %604 = vst.msk [vmem:[#allocation0 + $0x20] sm:$0x3] %vm602_vm8, %v601_v53   ;;  %606 = vst.msk [vmem:[#allocation0 + $0x46] sm:$0xc] %vm602_vm8, %v601_v53   ;;  %v704_v60 = vpop.permute.xlu1 %703   ;;  %v3422_v16 = vld [vmem:[%s5990_s0 + $0x3a0] ss:$-412 sm:%s2038_s3]   ;;  %v2029_v20 = vsel %vm90_vm0, %v3420_v11, %v3419_v9 }
  0xab   :  { %608 = vst.msk [vmem:[#allocation0 + $0x6c] sm:$0x30] %vm602_vm8, %v601_v53   ;;  %610 = vst.msk [vmem:[#allocation0 + $0x92] sm:$0xc0] %vm602_vm8, %v601_v53   ;;  %1842 = vrot.lane.b32.xlu0 %v1841_v50, %s3686_s15  ;;  %s3689_s22 = smov 44   ;;  %vm774_vm12 = vcmask 900896   ;;  %v2041_v26 = vsel %vm27_vm3, %v3422_v16, %v3421_v15 }
  0xac   :  { %707 = vst.msk [vmem:[#allocation0 + $0xb0] sm:$0x3] %vm688_vm10, %v704_v60   ;;  %1944 = vrot.lane.b32.xlu1 %v1943_v56, %s3688_s29  ;;  %v3411_v19 = vld [vmem:[%s5990_s0 + $0x28d] sm:$0x80]   ;;  %s2080_s23 = smov 6  ;;  %s2048_s4 = smov 96 }
  0xad   :  { %v644_v3 = vpop.permute.xlu0 %643   ;;  %v3417_v22 = vld [vmem:[%s5990_s0 + $0xa8d] ss:$-412 sm:%s2005_s14]   ;;  %v3426_v23 = vld [vmem:[%s5990_s0 + $0x1a0] sm:$0x1]   ;;  %v1969_v28 = vsel %vm41_vm6, %v3411_v19, %v1965_v18  ;;  %s2085_s7 = smov 24  ;;  %s3690_s8 = smov 42  }
  0xae   :  { %647 = vst.msk [vmem:[#allocation0 + $0x40] sm:$0x3] %vm645_vm9, %v644_v3   ;;  %649 = vst.msk [vmem:[#allocation0 + $0x66] sm:$0xc] %vm645_vm9, %v644_v3   ;;  %v747_v10 = vpop.permute.xlu1 %746   ;;  %v3427_v25 = vld [vmem:[%s5990_s0 + $0x39f] sm:$0x2]   ;;  %v2008_v32 = vsel %vm37_vm5, %v3417_v22, %v2003_v21 }
  0xaf   :  { %651 = vst.msk [vmem:[#allocation0 + $0x8c] sm:$0x30] %vm645_vm9, %v644_v3   ;;  %653 = vst.msk [vmem:[#allocation0 + $0x12] sm:$0xc0] %vm645_vm9, %v644_v3   ;;  %1884 = vrot.lane.b32.xlu0 %v1883_v0, %s3687_s12  ;;  %v3423_v27 = vld [vmem:[%s5990_s0 + $0x72a] ss:$-406 sm:%s2043_s10]   ;;  %v2071_v34 = vsel %vm90_vm0, %v3427_v25, %v3426_v23 }
  0xb0   :  { %750 = vst.msk [vmem:[#allocation0 + $0xa8] sm:$0x3] %vm731_vm11, %v747_v10   ;;  %1987 = vrot.lane.b32.xlu1 %v1986_v6, %s3689_s22  ;;  %v3428_v29 = vld [vmem:[%s5990_s0 + $0x55] sm:$0x1]   ;;  %v3418_v33 = vld [vmem:[%s5990_s0 + $0x2de] sm:$0x80]   ;;  %v2046_v35 = vsel %vm32_vm4, %v3423_v27, %v2041_v26 }
  0xb1   :  { %v687_v17 = vpop.permute.xlu0 %686   ;;  %v3429_v30 = vld [vmem:[%s5990_s0 + $0x3f1] ss:$-412 sm:%s2080_s23]   ;;  %vm816_vm13 = vcmask 884496   ;;  %s2123_s5 = smov 6  ;;  %v3424_v36 = vld [vmem:[%s5990_s0 + $0xade] ss:$-412 sm:%s2048_s4]   ;;  %v2012_v42 = vsel %vm41_vm6, %v3418_v33, %v2008_v32 }
  0xb2   :  { %690 = vst.msk [vmem:[#allocation0 + $0x60] sm:$0x3] %vm688_vm10, %v687_v17   ;;  %692 = vst.msk [vmem:[#allocation0 + $0x86] sm:$0xc] %vm688_vm10, %v687_v17   ;;  %v789_v24 = vpop.permute.xlu1 %788   ;;  %v3433_v37 = vld [vmem:[%s5990_s0 + $0x1f1] sm:$0x1]   ;;  %v2083_v40 = vsel %vm27_vm3, %v3429_v30, %v3428_v29  ;;  %v2051_v46 = vsel %vm37_vm5, %v3424_v36, %v2046_v35 }
  0xb3   :  { %694 = vst.msk [vmem:[#allocation0 + $0xc] sm:$0x30] %vm688_vm10, %v687_v17   ;;  %696 = vst.msk [vmem:[#allocation0 + $0x32] sm:$0xc0] %vm688_vm10, %v687_v17   ;;  %1927 = vrot.lane.b32.xlu0 %v1926_v14, %s3688_s29  ;;  %v3434_v39 = vld [vmem:[%s5990_s0 + $0x3f0] sm:$0x2]  }
  0xb4   :  { %792 = vst.msk [vmem:[#allocation0 + $0xa0] sm:$0x3] %vm774_vm12, %v789_v24   ;;  %2030 = vrot.lane.b32.xlu1 %v2029_v20, %s3690_s8  ;;  %v3430_v41 = vld [vmem:[%s5990_s0 + $0x77b] ss:$-406 sm:%s2085_s7]   ;;  %s2090_s21 = smov 96  ;;  %s2128_s25 = smov 24  ;;  %v2114_v48 = vsel %vm90_vm0, %v3434_v39, %v3433_v37 }
  0xb5   :  { %v730_v31 = vpop.permute.xlu0 %729   ;;  %v3435_v43 = vld [vmem:[%s5990_s0 + $0xa6] sm:$0x1]   ;;  %s3691_s26 = smov 40   ;;  %v3425_v47 = vld [vmem:[%s5990_s0 + $0x32f] sm:$0x80]   ;;  %vm859_vm14 = vcmask 868096   ;;  %v2088_v49 = vsel %vm32_vm4, %v3430_v41, %v2083_v40 }
  0xb6   :  { %733 = vst.msk [vmem:[#allocation0 + $0x80] sm:$0x3] %vm731_vm11, %v730_v31   ;;  %735 = vst.msk [vmem:[#allocation0 + $0x6] sm:$0xc] %vm731_vm11, %v730_v31   ;;  %v832_v38 = vpop.permute.xlu1 %831   ;;  %v3436_v44 = vld [vmem:[%s5990_s0 + $0x43c] ss:$-406 sm:%s2123_s5]   ;;  %v2055_v56 = vsel %vm41_vm6, %v3425_v47, %v2051_v46 }
  0xb7   :  { %737 = vst.msk [vmem:[#allocation0 + $0x2c] sm:$0x30] %vm731_vm11, %v730_v31   ;;  %739 = vst.msk [vmem:[#allocation0 + $0x52] sm:$0xc0] %vm731_vm11, %v730_v31   ;;  %1970 = vrot.lane.b32.xlu0 %v1969_v28, %s3689_s22  ;;  %s2166_s28 = smov 6  ;;  %v2126_v54 = vsel %vm27_vm3, %v3436_v44, %v3435_v43  ;;  %s2133_s9 = smov 96 }
  0xb8   :  { %835 = vst.msk [vmem:[#allocation0 + $0xc0] sm:$0x3] %vm816_vm13, %v832_v38   ;;  %2072 = vrot.lane.b32.xlu1 %v2071_v34, %s3691_s26  ;;  %v3431_v50 = vld [vmem:[%s5990_s0 + $0xb2f] ss:$-412 sm:%s2090_s21]   ;;  %v3440_v51 = vld [vmem:[%s5990_s0 + $0x1d8] sm:$0x1]  }
  0xb9   :  { %v773_v45 = vpop.permute.xlu0 %772   ;;  %v3441_v53 = vld [vmem:[%s5990_s0 + $0x3d7] sm:$0x2]   ;;  %v3442_v57 = vld [vmem:[%s5990_s0 + $0xf7] sm:$0x1]   ;;  %s2171_s13 = smov 24  ;;  %s3692_s16 = smov 38   ;;  %v2093_v60 = vsel %vm37_vm5, %v3431_v50, %v2088_v49 }
  0xba   :  { %775 = vst.msk [vmem:[#allocation0] sm:$0x3] %vm774_vm12, %v773_v45   ;;  %777 = vst.msk [vmem:[#allocation0 + $0x26] sm:$0xc] %vm774_vm12, %v773_v45   ;;  %v875_v52 = vpop.permute.xlu1 %874   ;;  %v3437_v55 = vld [vmem:[%s5990_s0 + $0x7e4] ss:$-412 sm:%s2128_s25]   ;;  %v2157_v62 = vsel %vm90_vm0, %v3441_v53, %v3440_v51 }
  0xbb   :  { %779 = vst.msk [vmem:[#allocation0 + $0x4c] sm:$0x30] %vm774_vm12, %v773_v45   ;;  %781 = vst.msk [vmem:[#allocation0 + $0x72] sm:$0xc0] %vm774_vm12, %v773_v45   ;;  %2013 = vrot.lane.b32.xlu0 %v2012_v42, %s3690_s8  ;;  %v3443_v58 = vld [vmem:[%s5990_s0 + $0x48d] ss:$-406 sm:%s2166_s28]   ;;  %v2131_v63 = vsel %vm32_vm4, %v3437_v55, %v2126_v54 }
  0xbc   :  { %878 = vst.msk [vmem:[#allocation0 + $0xb8] sm:$0x3] %vm859_vm14, %v875_v52   ;;  %2115 = vrot.lane.b32.xlu1 %v2114_v48, %s3692_s16  ;;  %v3432_v61 = vld [vmem:[%s5990_s0 + $0x380] sm:$0x80]   ;;  %vm902_vm15 = vcmask 851696   ;;  %s2209_s10 = smov 6  ;;  %v2169_v4 = vsel %vm27_vm3, %v3443_v58, %v3442_v57 }
  0xbd   :  { %v815_v59 = vpop.permute.xlu0 %814   ;;  %v3438_v0 = vld [vmem:[%s5990_s0 + $0x136e] ss:$-818 sm:%s2133_s9]   ;;  %v3447_v1 = vld [vmem:[%s5990_s0 + $0x1c5] sm:$0x1]   ;;  %s2176_s27 = smov 96  ;;  %v2097_v6 = vsel %vm41_vm6, %v3432_v61, %v2093_v60  ;;  %s2214_s30 = smov 24 }
  0xbe   :  { %818 = vst.msk [vmem:[#allocation0 + $0x20] sm:$0x3] %vm816_vm13, %v815_v59   ;;  %820 = vst.msk [vmem:[#allocation0 + $0x46] sm:$0xc] %vm816_vm13, %v815_v59   ;;  %v918_v2 = vpop.permute.xlu1 %917   ;;  %v3448_v3 = vld [vmem:[%s5990_s0 + $0x3c4] sm:$0x2]   ;;  %v2136_v10 = vsel %vm37_vm5, %v3438_v0, %v2131_v63 }
  0xbf   :  { %822 = vst.msk [vmem:[#allocation0 + $0x6c] sm:$0x30] %vm816_vm13, %v815_v59   ;;  %824 = vst.msk [vmem:[#allocation0 + $0x92] sm:$0xc0] %vm816_vm13, %v815_v59   ;;  %2056 = vrot.lane.b32.xlu0 %v2055_v56, %s3691_s26  ;;  %v3444_v5 = vld [vmem:[%s5990_s0 + $0xd09] ss:$-824 sm:%s2171_s13]   ;;  %v2200_v12 = vsel %vm90_vm0, %v3448_v3, %v3447_v1 }
  0xc0   :  { %921 = vst.msk [vmem:[#allocation0 + $0xb0] sm:$0x3] %vm902_vm15, %v918_v2   ;;  %v3449_v7 = vld [vmem:[%s5990_s0 + $0x148] sm:$0x1]   ;;  %s3693_s3 = smov 36   ;;  %vm945_vm1 = vcmask 835296   ;;  %v2174_v13 = vsel %vm32_vm4, %v3444_v5, %v2169_v4 }
  0xc1   :  { %v3450_v8 = vld [vmem:[%s5990_s0 + $0x67a] ss:$-818 sm:%s2209_s10]   ;;  %v858_v9 = vpop.permute.xlu0 %857   ;;  %2158 = vrot.lane.b32.xlu1 %v2157_v62, %s3693_s3  ;;  %v3439_v11 = vld [vmem:[%s5990_s0 + $0x23b] sm:$0x80]   ;;  %s2252_s7 = smov 6  ;;  %s2219_s17 = smov 96 }
  0xc2   :  { %861 = vst.msk [vmem:[#allocation0 + $0x40] sm:$0x3] %vm859_vm14, %v858_v9   ;;  %863 = vst.msk [vmem:[#allocation0 + $0x66] sm:$0xc] %vm859_vm14, %v858_v9   ;;  %v3445_v14 = vld [vmem:[%s5990_s0 + $0xa17] ss:$-406 sm:%s2176_s27]   ;;  %v961_v16 = vpop.permute.xlu1 %960   ;;  %v2212_v18 = vsel %vm27_vm3, %v3450_v8, %v3449_v7  ;;  %v2140_v20 = vsel %vm41_vm6, %v3439_v11, %v2136_v10 }
  0xc3   :  { %865 = vst.msk [vmem:[#allocation0 + $0x8c] sm:$0x30] %vm859_vm14, %v858_v9   ;;  %867 = vst.msk [vmem:[#allocation0 + $0x12] sm:$0xc0] %vm859_vm14, %v858_v9   ;;  %v3454_v15 = vld [vmem:[%s5990_s0 + $0x1b2] sm:$0x1]   ;;  %2098 = vrot.lane.b32.xlu0 %v2097_v6, %s3692_s16  ;;  %v2179_v24 = vsel %vm37_vm5, %v3445_v14, %v2174_v13 }
  0xc4   :  { %v3455_v17 = vld [vmem:[%s5990_s0 + $0x3b1] sm:$0x2]   ;;  %v3451_v19 = vld [vmem:[%s5990_s0 + $0x6d8] ss:$-406 sm:%s2214_s30]   ;;  %964 = vst.msk [vmem:[#allocation0 + $0xa8] sm:$0x3] %vm945_vm1, %v961_v16  }
  0xc5   :  { %v3456_v21 = vld [vmem:[%s5990_s0 + $0x3] sm:$0x1]   ;;  %s2257_s19 = smov 24  ;;  %v901_v23 = vpop.permute.xlu0 %900   ;;  %s3694_s23 = smov 34   ;;  %v3446_v25 = vld [vmem:[%s5990_s0 + $0x28c] sm:$0x80]   ;;  %v2243_v26 = vsel %vm90_vm0, %v3455_v17, %v3454_v15  ;;  %v2217_v27 = vsel %vm32_vm4, %v3451_v19, %v2212_v18 }
  0xc6   :  { %v3457_v22 = vld [vmem:[%s5990_s0 + $0x39f] ss:$-412 sm:%s2252_s7]   ;;  %2201 = vrot.lane.b32.xlu1 %v2200_v12, %s3694_s23  ;;  %vm988_vm2 = vcmask 818896   ;;  %s2294_s25 = smov 6  ;;  %904 = vst.msk [vmem:[#allocation0 + $0x60] sm:$0x3] %vm902_vm15, %v901_v23   ;;  %v1003_v30 = vpop.permute.xlu1 %1002   ;;  %v2183_v34 = vsel %vm41_vm6, %v3446_v25, %v2179_v24 }
  0xc7   :  { %906 = vst.msk [vmem:[#allocation0 + $0x86] sm:$0xc] %vm902_vm15, %v901_v23   ;;  %908 = vst.msk [vmem:[#allocation0 + $0xc] sm:$0x30] %vm902_vm15, %v901_v23   ;;  %v3452_v28 = vld [vmem:[%s5990_s0 + $0xa8c] ss:$-412 sm:%s2219_s17]   ;;  %2141 = vrot.lane.b32.xlu0 %v2140_v20, %s3693_s3  ;;  %v2255_v32 = vsel %vm27_vm3, %v3457_v22, %v3456_v21 }
  0xc8   :  { %910 = vst.msk [vmem:[#allocation0 + $0x32] sm:$0xc0] %vm902_vm15, %v901_v23   ;;  %v3461_v29 = vld [vmem:[%s5990_s0 + $0x199] sm:$0x1]   ;;  %v3458_v33 = vld [vmem:[%s5990_s0 + $0x729] ss:$-406 sm:%s2257_s19]   ;;  %v2222_v38 = vsel %vm37_vm5, %v3452_v28, %v2217_v27 }
  0xc9   :  { %v3462_v31 = vld [vmem:[%s5990_s0 + $0x398] sm:$0x2]   ;;  %s2262_s6 = smov 96  ;;  %1006 = vst.msk [vmem:[#allocation0 + $0xa0] sm:$0x3] %vm988_vm2, %v1003_v30   ;;  %s2299_s11 = smov 24  ;;  %v944_v37 = vpop.permute.xlu0 %943   ;;  %v2260_v41 = vsel %vm32_vm4, %v3458_v33, %v2255_v32 }
  0xca   :  { %v3463_v35 = vld [vmem:[%s5990_s0 + $0x54] sm:$0x1]   ;;  %s3695_s5 = smov 32   ;;  %v3453_v39 = vld [vmem:[%s5990_s0 + $0x2dd] sm:$0x80]   ;;  %vm1030_vm7 = vcmask 802496   ;;  %v2285_v40 = vsel %vm90_vm0, %v3462_v31, %v3461_v29  ;;  %v1046_v44 = vpop.permute.xlu1 %1045  }
  0xcb   :  { %v3464_v36 = vld [vmem:[%s5990_s0 + $0x3f0] ss:$-412 sm:%s2294_s25]   ;;  %2244 = vrot.lane.b32.xlu1 %v2243_v26, %s3695_s5  ;;  %s2337_s13 = smov 6  ;;  %947 = vst.msk [vmem:[#allocation0 + $0x80] sm:$0x3] %vm945_vm1, %v944_v37   ;;  %2184 = vrot.lane.b32.xlu0 %v2183_v34, %s3694_s23  ;;  %s2304_s15 = smov 96  ;;  %v2226_v48 = vsel %vm41_vm6, %v3453_v39, %v2222_v38 }
  0xcc   :  { %949 = vst.msk [vmem:[#allocation0 + $0x6] sm:$0xc] %vm945_vm1, %v944_v37   ;;  %951 = vst.msk [vmem:[#allocation0 + $0x2c] sm:$0x30] %vm945_vm1, %v944_v37   ;;  %v3459_v42 = vld [vmem:[%s5990_s0 + $0xadd] ss:$-412 sm:%s2262_s6]   ;;  %v2297_v46 = vsel %vm27_vm3, %v3464_v36, %v3463_v35 }
  0xcd   :  { %953 = vst.msk [vmem:[#allocation0 + $0x52] sm:$0xc0] %vm945_vm1, %v944_v37   ;;  %v3468_v43 = vld [vmem:[%s5990_s0 + $0x1f0] sm:$0x1]   ;;  %v3465_v47 = vld [vmem:[%s5990_s0 + $0x77a] ss:$-406 sm:%s2299_s11]   ;;  %v987_v51 = vpop.permute.xlu0 %986   ;;  %v2265_v52 = vsel %vm37_vm5, %v3459_v42, %v2260_v41 }
  0xce   :  { %v3469_v45 = vld [vmem:[%s5990_s0 + $0x3ef] sm:$0x2]   ;;  %1049 = vst.msk [vmem:[#allocation0 + $0xc0] sm:$0x3] %vm1030_vm7, %v1046_v44   ;;  %v3470_v49 = vld [vmem:[%s5990_s0 + $0xa5] sm:$0x1]   ;;  %v2302_v55 = vsel %vm32_vm4, %v3465_v47, %v2297_v46  ;;  %v1089_v58 = vpop.permute.xlu1 %1088  }
  0xcf   :  { %v3471_v50 = vld [vmem:[%s5990_s0 + $0x441] ss:$-412 sm:%s2337_s13]   ;;  %s2342_s20 = smov 24  ;;  %s3696_s28 = smov 30   ;;  %vm1073_vm8 = vcmask 786096   ;;  %v2328_v54 = vsel %vm90_vm0, %v3469_v45, %v3468_v43  ;;  %2227 = vrot.lane.b32.xlu0 %v2226_v48, %s3695_s5  ;;  %vm1116_vm9 = vcmask 769696  }
  0xd0   :  { %2286 = vrot.lane.b32.xlu1 %v2285_v40, %s3696_s28  ;;  %v3460_v53 = vld [vmem:[%s5990_s0 + $0x32e] sm:$0x80]   ;;  %s2380_s30 = smov 6  ;;  %989 = vst.msk [vmem:[#allocation0] sm:$0x3] %vm988_vm2, %v987_v51   ;;  %v2340_v60 = vsel %vm27_vm3, %v3471_v50, %v3470_v49  ;;  %s2347_s12 = smov 96 }
  0xd1   :  { %991 = vst.msk [vmem:[#allocation0 + $0x26] sm:$0xc] %vm988_vm2, %v987_v51   ;;  %993 = vst.msk [vmem:[#allocation0 + $0x4c] sm:$0x30] %vm988_vm2, %v987_v51   ;;  %v3466_v56 = vld [vmem:[%s5990_s0 + $0xb2e] ss:$-412 sm:%s2304_s15]   ;;  %v2269_v62 = vsel %vm41_vm6, %v3460_v53, %v2265_v52  ;;  %v1029_v1 = vpop.permute.xlu0 %1028  }
  0xd2   :  { %995 = vst.msk [vmem:[#allocation0 + $0x72] sm:$0xc0] %vm988_vm2, %v987_v51   ;;  %v3475_v57 = vld [vmem:[%s5990_s0 + $0x1d7] sm:$0x1]   ;;  %v3472_v61 = vld [vmem:[%s5990_s0 + $0x7cb] ss:$-406 sm:%s2342_s20]   ;;  %v2307_v2 = vsel %vm37_vm5, %v3466_v56, %v2302_v55  ;;  %v1132_v8 = vpop.permute.xlu1 %1131  }
  0xd3   :  { %v3476_v59 = vld [vmem:[%s5990_s0 + $0x3d6] sm:$0x2]   ;;  %1092 = vst.msk [vmem:[#allocation0 + $0xb8] sm:$0x3] %vm1073_vm8, %v1089_v58   ;;  %v3477_v63 = vld [vmem:[%s5990_s0 + $0xf6] sm:$0x1]   ;;  %v2345_v5 = vsel %vm32_vm4, %v3472_v61, %v2340_v60  ;;  %2270 = vrot.lane.b32.xlu0 %v2269_v62, %s3696_s28 }
  0xd4   :  { %v3478_v0 = vld [vmem:[%s5990_s0 + $0x48c] ss:$-406 sm:%s2380_s30]   ;;  %s2385_s18 = smov 24  ;;  %s3697_s10 = smov 28   ;;  %v3467_v3 = vld [vmem:[%s5990_s0 + $0x37f] sm:$0x80]   ;;  %v2371_v4 = vsel %vm90_vm0, %v3476_v59, %v3475_v57 }
  0xd5   :  { %2329 = vrot.lane.b32.xlu1 %v2328_v54, %s3697_s10  ;;  %s2423_s19 = smov 6  ;;  %1032 = vst.msk [vmem:[#allocation0 + $0x20] sm:$0x3] %vm1030_vm7, %v1029_v1   ;;  %1034 = vst.msk [vmem:[#allocation0 + $0x46] sm:$0xc] %vm1030_vm7, %v1029_v1   ;;  %v2383_v10 = vsel %vm27_vm3, %v3478_v0, %v3477_v63  ;;  %s2390_s29 = smov 96  ;;  %v2311_v12 = vsel %vm41_vm6, %v3467_v3, %v2307_v2  ;;  %v1072_v15 = vpop.permute.xlu0 %1071  }
  0xd6   :  { %1036 = vst.msk [vmem:[#allocation0 + $0x6c] sm:$0x30] %vm1030_vm7, %v1029_v1   ;;  %1038 = vst.msk [vmem:[#allocation0 + $0x92] sm:$0xc0] %vm1030_vm7, %v1029_v1   ;;  %v3473_v6 = vld [vmem:[%s5990_s0 + $0x136d] ss:$-818 sm:%s2347_s12]   ;;  %v1175_v22 = vpop.permute.xlu1 %1174  }
  0xd7   :  { %v3482_v7 = vld [vmem:[%s5990_s0 + $0x1c4] sm:$0x1]   ;;  %v3479_v11 = vld [vmem:[%s5990_s0 + $0xd08] ss:$-824 sm:%s2385_s18]   ;;  %1135 = vst.msk [vmem:[#allocation0 + $0xb0] sm:$0x3] %vm1116_vm9, %v1132_v8   ;;  %v2350_v16 = vsel %vm37_vm5, %v3473_v6, %v2345_v5  ;;  %2312 = vrot.lane.b32.xlu0 %v2311_v12, %s3697_s10 }
  0xd8   :  { %v3483_v9 = vld [vmem:[%s5990_s0 + $0x3c3] sm:$0x2]   ;;  %v3484_v13 = vld [vmem:[%s5990_s0 + $0x147] sm:$0x1]   ;;  %s2428_s2 = smov 24  ;;  %s3698_s7 = smov 26   ;;  %v2388_v19 = vsel %vm32_vm4, %v3479_v11, %v2383_v10 }
  0xd9   :  { %v3485_v14 = vld [vmem:[%s5990_s0 + $0x679] ss:$-818 sm:%s2423_s19]   ;;  %2372 = vrot.lane.b32.xlu1 %v2371_v4, %s3698_s7  ;;  %v3474_v17 = vld [vmem:[%s5990_s0 + $0x23a] sm:$0x80]   ;;  %vm1159_vm10 = vcmask 753296   ;;  %s2466_s11 = smov 6  ;;  %v2414_v18 = vsel %vm90_vm0, %v3483_v9, %v3482_v7  ;;  %v1115_v29 = vpop.permute.xlu0 %1114  }
  0xda   :  { %1075 = vst.msk [vmem:[#allocation0 + $0x40] sm:$0x3] %vm1073_vm8, %v1072_v15   ;;  %1077 = vst.msk [vmem:[#allocation0 + $0x66] sm:$0xc] %vm1073_vm8, %v1072_v15   ;;  %v3480_v20 = vld [vmem:[%s5990_s0 + $0xa16] ss:$-406 sm:%s2390_s29]   ;;  %v2426_v24 = vsel %vm27_vm3, %v3485_v14, %v3484_v13  ;;  %v2354_v26 = vsel %vm41_vm6, %v3474_v17, %v2350_v16  ;;  %v1217_v36 = vpop.permute.xlu1 %1216  }
  0xdb   :  { %1079 = vst.msk [vmem:[#allocation0 + $0x8c] sm:$0x30] %vm1073_vm8, %v1072_v15   ;;  %1081 = vst.msk [vmem:[#allocation0 + $0x12] sm:$0xc0] %vm1073_vm8, %v1072_v15   ;;  %v3489_v21 = vld [vmem:[%s5990_s0 + $0x1b1] sm:$0x1]   ;;  %v2393_v30 = vsel %vm37_vm5, %v3480_v20, %v2388_v19  ;;  %2355 = vrot.lane.b32.xlu0 %v2354_v26, %s3698_s7 }
  0xdc   :  { %v3490_v23 = vld [vmem:[%s5990_s0 + $0x3b0] sm:$0x2]   ;;  %s2433_s22 = smov 96  ;;  %1178 = vst.msk [vmem:[#allocation0 + $0xa8] sm:$0x3] %vm1159_vm10, %v1175_v22   ;;  %s2471_s24 = smov 24 }
  0xdd   :  { %v3486_v25 = vld [vmem:[%s5990_s0 + $0x6e9] ss:$-412 sm:%s2428_s2]   ;;  %v3491_v27 = vld [vmem:[%s5990_s0 + $0x2] sm:$0x1]   ;;  %s3699_s25 = smov 24   ;;  %vm1202_vm11 = vcmask 736896   ;;  %v2457_v32 = vsel %vm90_vm0, %v3490_v23, %v3489_v21  ;;  %v1158_v43 = vpop.permute.xlu0 %1157  }
  0xde   :  { %v3492_v28 = vld [vmem:[%s5990_s0 + $0x39e] ss:$-412 sm:%s2466_s11]   ;;  %2415 = vrot.lane.b32.xlu1 %v2414_v18, %s3699_s25  ;;  %s2508_s20 = smov 6  ;;  %1118 = vst.msk [vmem:[#allocation0 + $0x60] sm:$0x3] %vm1116_vm9, %v1115_v29   ;;  %v2431_v33 = vsel %vm32_vm4, %v3486_v25, %v2426_v24  ;;  %s2476_s8 = smov 96  ;;  %v1260_v50 = vpop.permute.xlu1 %1259  }
  0xdf   :  { %v3481_v31 = vld [vmem:[%s5990_s0 + $0x28b] sm:$0x80]   ;;  %1120 = vst.msk [vmem:[#allocation0 + $0x86] sm:$0xc] %vm1116_vm9, %v1115_v29   ;;  %1122 = vst.msk [vmem:[#allocation0 + $0xc] sm:$0x30] %vm1116_vm9, %v1115_v29   ;;  %v2469_v38 = vsel %vm27_vm3, %v3492_v28, %v3491_v27 }
  0xe0   :  { %1124 = vst.msk [vmem:[#allocation0 + $0x32] sm:$0xc0] %vm1116_vm9, %v1115_v29   ;;  %v3487_v34 = vld [vmem:[%s5990_s0 + $0xa67] ss:$-406 sm:%s2433_s22]   ;;  %v3496_v35 = vld [vmem:[%s5990_s0 + $0x198] sm:$0x1]   ;;  %v2397_v40 = vsel %vm41_vm6, %v3481_v31, %v2393_v30 }
  0xe1   :  { %v3497_v37 = vld [vmem:[%s5990_s0 + $0x397] sm:$0x2]   ;;  %v3493_v39 = vld [vmem:[%s5990_s0 + $0x728] ss:$-406 sm:%s2471_s24]   ;;  %1220 = vst.msk [vmem:[#allocation0 + $0xa0] sm:$0x3] %vm1202_vm11, %v1217_v36   ;;  %v2436_v44 = vsel %vm37_vm5, %v3487_v34, %v2431_v33  ;;  %2398 = vrot.lane.b32.xlu0 %v2397_v40, %s3699_s25  ;;  %v1201_v57 = vpop.permute.xlu0 %1200  }
  0xe2   :  { %v3498_v41 = vld [vmem:[%s5990_s0 + $0x53] sm:$0x1]   ;;  %s2513_s14 = smov 24  ;;  %s3700_s13 = smov 22   ;;  %v3488_v45 = vld [vmem:[%s5990_s0 + $0x2dc] sm:$0x80]   ;;  %v2499_v46 = vsel %vm90_vm0, %v3497_v37, %v3496_v35  ;;  %v2474_v47 = vsel %vm32_vm4, %v3493_v39, %v2469_v38  ;;  %v1303_v0 = vpop.permute.xlu1 %1302  }
  0xe3   :  { %v3499_v42 = vld [vmem:[%s5990_s0 + $0x3ef] ss:$-412 sm:%s2508_s20]   ;;  %2458 = vrot.lane.b32.xlu1 %v2457_v32, %s3700_s13  ;;  %vm1244_vm12 = vcmask 720496   ;;  %s2551_s18 = smov 6  ;;  %1161 = vst.msk [vmem:[#allocation0 + $0x80] sm:$0x3] %vm1159_vm10, %v1158_v43   ;;  %v2440_v54 = vsel %vm41_vm6, %v3488_v45, %v2436_v44 }
  0xe4   :  { %1163 = vst.msk [vmem:[#allocation0 + $0x6] sm:$0xc] %vm1159_vm10, %v1158_v43   ;;  %1165 = vst.msk [vmem:[#allocation0 + $0x2c] sm:$0x30] %vm1159_vm10, %v1158_v43   ;;  %v3494_v48 = vld [vmem:[%s5990_s0 + $0xadc] ss:$-412 sm:%s2476_s8]   ;;  %v2511_v52 = vsel %vm27_vm3, %v3499_v42, %v3498_v41 }
  0xe5   :  { %1167 = vst.msk [vmem:[#allocation0 + $0x52] sm:$0xc0] %vm1159_vm10, %v1158_v43   ;;  %v3503_v49 = vld [vmem:[%s5990_s0 + $0x1e9] sm:$0x1]   ;;  %v3500_v53 = vld [vmem:[%s5990_s0 + $0x779] ss:$-406 sm:%s2513_s14]   ;;  %v2479_v58 = vsel %vm37_vm5, %v3494_v48, %v2474_v47  ;;  %2441 = vrot.lane.b32.xlu0 %v2440_v54, %s3700_s13  ;;  %v1243_v7 = vpop.permute.xlu0 %1242  }
  0xe6   :  { %v3504_v51 = vld [vmem:[%s5990_s0 + $0x3e8] sm:$0x2]   ;;  %s2518_s26 = smov 96  ;;  %1263 = vst.msk [vmem:[#allocation0 + $0xc0] sm:$0x3] %vm1244_vm12, %v1260_v50   ;;  %s2556_s4 = smov 24  ;;  %v2516_v61 = vsel %vm32_vm4, %v3500_v53, %v2511_v52  ;;  %v1346_v14 = vpop.permute.xlu1 %1345  }
  0xe7   :  { %v3505_v55 = vld [vmem:[%s5990_s0 + $0xa4] sm:$0x1]   ;;  %s3701_s30 = smov 20   ;;  %v3495_v59 = vld [vmem:[%s5990_s0 + $0x32d] sm:$0x80]   ;;  %vm1287_vm13 = vcmask 704096   ;;  %v2542_v60 = vsel %vm90_vm0, %v3504_v51, %v3503_v49 }
  0xe8   :  { %v3506_v56 = vld [vmem:[%s5990_s0 + $0x440] ss:$-412 sm:%s2551_s18]   ;;  %2500 = vrot.lane.b32.xlu1 %v2499_v46, %s3701_s30  ;;  %s2594_s2 = smov 6  ;;  %1203 = vst.msk [vmem:[#allocation0] sm:$0x3] %vm1202_vm11, %v1201_v57   ;;  %s2561_s16 = smov 96  ;;  %v2483_v4 = vsel %vm41_vm6, %v3495_v59, %v2479_v58 }
  0xe9   :  { %1205 = vst.msk [vmem:[#allocation0 + $0x26] sm:$0xc] %vm1202_vm11, %v1201_v57   ;;  %1207 = vst.msk [vmem:[#allocation0 + $0x4c] sm:$0x30] %vm1202_vm11, %v1201_v57   ;;  %v3501_v62 = vld [vmem:[%s5990_s0 + $0xb2d] ss:$-412 sm:%s2518_s26]   ;;  %v2554_v2 = vsel %vm27_vm3, %v3506_v56, %v3505_v55  ;;  %2484 = vrot.lane.b32.xlu0 %v2483_v4, %s3701_s30  ;;  %v1286_v21 = vpop.permute.xlu0 %1285  }
  0xea   :  { %1209 = vst.msk [vmem:[#allocation0 + $0x72] sm:$0xc0] %vm1202_vm11, %v1201_v57   ;;  %v3510_v63 = vld [vmem:[%s5990_s0 + $0x1d6] sm:$0x1]   ;;  %v3507_v3 = vld [vmem:[%s5990_s0 + $0x7ca] ss:$-406 sm:%s2556_s4]   ;;  %v2521_v8 = vsel %vm37_vm5, %v3501_v62, %v2516_v61  ;;  %v1389_v28 = vpop.permute.xlu1 %1388  }
  0xeb   :  { %v3511_v1 = vld [vmem:[%s5990_s0 + $0x3d5] sm:$0x2]   ;;  %1306 = vst.msk [vmem:[#allocation0 + $0xb8] sm:$0x3] %vm1287_vm13, %v1303_v0   ;;  %v3512_v5 = vld [vmem:[%s5990_s0 + $0xf5] sm:$0x1]   ;;  %v2559_v11 = vsel %vm32_vm4, %v3507_v3, %v2554_v2 }
  0xec   :  { %v3513_v6 = vld [vmem:[%s5990_s0 + $0x491] ss:$-412 sm:%s2594_s2]   ;;  %s2599_s21 = smov 24  ;;  %s3702_s19 = smov 18   ;;  %vm1330_vm14 = vcmask 687696   ;;  %v2585_v10 = vsel %vm90_vm0, %v3511_v1, %v3510_v63  ;;  %vm1373_vm15 = vcmask 671296  }
  0xed   :  { %2543 = vrot.lane.b32.xlu1 %v2542_v60, %s3702_s19  ;;  %v3502_v9 = vld [vmem:[%s5990_s0 + $0x37e] sm:$0x80]   ;;  %s2637_s24 = smov 6  ;;  %1246 = vst.msk [vmem:[#allocation0 + $0x20] sm:$0x3] %vm1244_vm12, %v1243_v7   ;;  %v2597_v16 = vsel %vm27_vm3, %v3513_v6, %v3512_v5  ;;  %s2604_s3 = smov 96  ;;  %v1329_v35 = vpop.permute.xlu0 %1328  }
  0xee   :  { %1248 = vst.msk [vmem:[#allocation0 + $0x46] sm:$0xc] %vm1244_vm12, %v1243_v7   ;;  %1250 = vst.msk [vmem:[#allocation0 + $0x6c] sm:$0x30] %vm1244_vm12, %v1243_v7   ;;  %v3508_v12 = vld [vmem:[%s5990_s0 + $0x136c] ss:$-818 sm:%s2561_s16]   ;;  %v2525_v18 = vsel %vm41_vm6, %v3502_v9, %v2521_v8  ;;  %v1431_v42 = vpop.permute.xlu1 %1430  }
  0xef   :  { %1252 = vst.msk [vmem:[#allocation0 + $0x92] sm:$0xc0] %vm1244_vm12, %v1243_v7   ;;  %v3517_v13 = vld [vmem:[%s5990_s0 + $0x1c3] sm:$0x1]   ;;  %v3519_v19 = vld [vmem:[%s5990_s0 + $0x146] sm:$0x1]   ;;  %v2564_v22 = vsel %vm37_vm5, %v3508_v12, %v2559_v11  ;;  %2526 = vrot.lane.b32.xlu0 %v2525_v18, %s3702_s19 }
  0xf0   :  { %v3518_v15 = vld [vmem:[%s5990_s0 + $0x3c2] sm:$0x2]   ;;  %1349 = vst.msk [vmem:[#allocation0 + $0xb0] sm:$0x3] %vm1330_vm14, %v1346_v14   ;;  %v3520_v20 = vld [vmem:[%s5990_s0 + $0x678] ss:$-818 sm:%s2637_s24]  }
  0xf1   :  { %v3514_v17 = vld [vmem:[%s5990_s0 + $0xcef] ss:$-818 sm:%s2599_s21]   ;;  %s2642_s9 = smov 24  ;;  %s3703_s11 = smov 16   ;;  %v3509_v23 = vld [vmem:[%s5990_s0 + $0x239] sm:$0x80]   ;;  %v2628_v24 = vsel %vm90_vm0, %v3518_v15, %v3517_v13  ;;  %v2640_v30 = vsel %vm27_vm3, %v3520_v20, %v3519_v19  ;;  %v1372_v49 = vpop.permute.xlu0 %1371  }
  0xf2   :  { %2586 = vrot.lane.b32.xlu1 %v2585_v10, %s3703_s11  ;;  %s2680_s14 = smov 6  ;;  %1289 = vst.msk [vmem:[#allocation0 + $0x40] sm:$0x3] %vm1287_vm13, %v1286_v21   ;;  %1291 = vst.msk [vmem:[#allocation0 + $0x66] sm:$0xc] %vm1287_vm13, %v1286_v21   ;;  %v2602_v25 = vsel %vm32_vm4, %v3514_v17, %v2597_v16  ;;  %s2647_s23 = smov 96  ;;  %v2568_v32 = vsel %vm41_vm6, %v3509_v23, %v2564_v22  ;;  %v1474_v56 = vpop.permute.xlu1 %1473  }
  0xf3   :  { %1293 = vst.msk [vmem:[#allocation0 + $0x8c] sm:$0x30] %vm1287_vm13, %v1286_v21   ;;  %1295 = vst.msk [vmem:[#allocation0 + $0x12] sm:$0xc0] %vm1287_vm13, %v1286_v21   ;;  %v3515_v26 = vld [vmem:[%s5990_s0 + $0xa15] ss:$-406 sm:%s2604_s3]   ;;  %2569 = vrot.lane.b32.xlu0 %v2568_v32, %s3703_s11 }
  0xf4   :  { %v3524_v27 = vld [vmem:[%s5990_s0 + $0x1b0] sm:$0x1]   ;;  %1392 = vst.msk [vmem:[#allocation0 + $0xa8] sm:$0x3] %vm1373_vm15, %v1389_v28   ;;  %v3526_v33 = vld [vmem:[%s5990_s0 + $0x1] sm:$0x1]   ;;  %v2607_v36 = vsel %vm37_vm5, %v3515_v26, %v2602_v25 }
  0xf5   :  { %v3525_v29 = vld [vmem:[%s5990_s0 + $0x3af] sm:$0x2]   ;;  %v3527_v34 = vld [vmem:[%s5990_s0 + $0x39d] ss:$-412 sm:%s2680_s14]   ;;  %s2685_s27 = smov 24  ;;  %s3704_s20 = smov 14   ;;  %v1415_v63 = vpop.permute.xlu0 %1414  }
  0xf6   :  { %v3521_v31 = vld [vmem:[%s5990_s0 + $0x6e8] ss:$-412 sm:%s2642_s9]   ;;  %2629 = vrot.lane.b32.xlu1 %v2628_v24, %s3704_s20  ;;  %v3516_v37 = vld [vmem:[%s5990_s0 + $0x28a] sm:$0x80]   ;;  %vm1416_vm1 = vcmask 654896   ;;  %s2722_s4 = smov 6  ;;  %v2671_v38 = vsel %vm90_vm0, %v3525_v29, %v3524_v27  ;;  %v2683_v44 = vsel %vm27_vm3, %v3527_v34, %v3526_v33  ;;  %v1517_v6 = vpop.permute.xlu1 %1516  }
  0xf7   :  { %1332 = vst.msk [vmem:[#allocation0 + $0x60] sm:$0x3] %vm1330_vm14, %v1329_v35   ;;  %1334 = vst.msk [vmem:[#allocation0 + $0x86] sm:$0xc] %vm1330_vm14, %v1329_v35   ;;  %v2645_v39 = vsel %vm32_vm4, %v3521_v31, %v2640_v30  ;;  %v3522_v40 = vld [vmem:[%s5990_s0 + $0xa66] ss:$-406 sm:%s2647_s23]   ;;  %v2611_v46 = vsel %vm41_vm6, %v3516_v37, %v2607_v36 }
  0xf8   :  { %1336 = vst.msk [vmem:[#allocation0 + $0xc] sm:$0x30] %vm1330_vm14, %v1329_v35   ;;  %1338 = vst.msk [vmem:[#allocation0 + $0x32] sm:$0xc0] %vm1330_vm14, %v1329_v35   ;;  %v3531_v41 = vld [vmem:[%s5990_s0 + $0x197] sm:$0x1]   ;;  %v2650_v50 = vsel %vm37_vm5, %v3522_v40, %v2645_v39  ;;  %2612 = vrot.lane.b32.xlu0 %v2611_v46, %s3704_s20 }
  0xf9   :  { %v3532_v43 = vld [vmem:[%s5990_s0 + $0x396] sm:$0x2]   ;;  %v3528_v45 = vld [vmem:[%s5990_s0 + $0x739] ss:$-412 sm:%s2685_s27]   ;;  %s2690_s5 = smov 96  ;;  %s2727_s17 = smov 24  ;;  %v1457_v13 = vpop.permute.xlu0 %1456  }
  0xfa   :  { %1434 = vst.msk [vmem:[#allocation0 + $0xa0] sm:$0x3] %vm1416_vm1, %v1431_v42   ;;  %v3533_v47 = vld [vmem:[%s5990_s0 + $0x52] sm:$0x1]   ;;  %s3705_s18 = smov 12   ;;  %vm1458_vm2 = vcmask 638496   ;;  %v2713_v52 = vsel %vm90_vm0, %v3532_v43, %v3531_v41  ;;  %v2688_v53 = vsel %vm32_vm4, %v3528_v45, %v2683_v44  ;;  %v1560_v20 = vpop.permute.xlu1 %1559  }
  0xfb   :  { %v3534_v48 = vld [vmem:[%s5990_s0 + $0x3ee] ss:$-412 sm:%s2722_s4]   ;;  %2672 = vrot.lane.b32.xlu1 %v2671_v38, %s3705_s18  ;;  %s2765_s21 = smov 6  ;;  %1375 = vst.msk [vmem:[#allocation0 + $0x80] sm:$0x3] %vm1373_vm15, %v1372_v49   ;;  %s2732_s28 = smov 96 }
  0xfc   :  { %v3523_v51 = vld [vmem:[%s5990_s0 + $0x2db] sm:$0x80]   ;;  %1377 = vst.msk [vmem:[#allocation0 + $0x6] sm:$0xc] %vm1373_vm15, %v1372_v49   ;;  %1379 = vst.msk [vmem:[#allocation0 + $0x2c] sm:$0x30] %vm1373_vm15, %v1372_v49   ;;  %v2725_v58 = vsel %vm27_vm3, %v3534_v48, %v3533_v47 }
  0xfd   :  { %1381 = vst.msk [vmem:[#allocation0 + $0x52] sm:$0xc0] %vm1373_vm15, %v1372_v49   ;;  %v3529_v54 = vld [vmem:[%s5990_s0 + $0xab7] ss:$-406 sm:%s2690_s5]   ;;  %v3538_v55 = vld [vmem:[%s5990_s0 + $0x1e8] sm:$0x1]   ;;  %v2654_v60 = vsel %vm41_vm6, %v3523_v51, %v2650_v50  ;;  %v1500_v27 = vpop.permute.xlu0 %1499  }
  0xfe   :  { %v3539_v57 = vld [vmem:[%s5990_s0 + $0x3e7] sm:$0x2]   ;;  %v3535_v59 = vld [vmem:[%s5990_s0 + $0x778] ss:$-406 sm:%s2727_s17]   ;;  %1477 = vst.msk [vmem:[#allocation0 + $0xc0] sm:$0x3] %vm1458_vm2, %v1474_v56   ;;  %v2693_v0 = vsel %vm37_vm5, %v3529_v54, %v2688_v53  ;;  %2655 = vrot.lane.b32.xlu0 %v2654_v60, %s3705_s18  ;;  %v1603_v34 = vpop.permute.xlu1 %1602  }
  0xff   :  { %v3540_v61 = vld [vmem:[%s5990_s0 + $0xa3] sm:$0x1]   ;;  %s2770_s6 = smov 24  ;;  %s3706_s2 = smov 10   ;;  %v3530_v1 = vld [vmem:[%s5990_s0 + $0x32c] sm:$0x80]   ;;  %v2756_v2 = vsel %vm90_vm0, %v3539_v57, %v3538_v55  ;;  %v2730_v3 = vsel %vm32_vm4, %v3535_v59, %v2725_v58 }
 0x100   :  { %v3541_v62 = vld [vmem:[%s5990_s0 + $0x43f] ss:$-412 sm:%s2765_s21]   ;;  %2714 = vrot.lane.b32.xlu1 %v2713_v52, %s3706_s2  ;;  %vm1501_vm7 = vcmask 622096   ;;  %s2808_s9 = smov 6  ;;  %1417 = vst.msk [vmem:[#allocation0] sm:$0x3] %vm1416_vm1, %v1415_v63   ;;  %v2697_v10 = vsel %vm41_vm6, %v3530_v1, %v2693_v0 }
 0x101   :  { %1419 = vst.msk [vmem:[#allocation0 + $0x26] sm:$0xc] %vm1416_vm1, %v1415_v63   ;;  %1421 = vst.msk [vmem:[#allocation0 + $0x4c] sm:$0x30] %vm1416_vm1, %v1415_v63   ;;  %v3536_v4 = vld [vmem:[%s5990_s0 + $0xb2c] ss:$-412 sm:%s2732_s28]   ;;  %v2768_v8 = vsel %vm27_vm3, %v3541_v62, %v3540_v61  ;;  %v1543_v39 = vpop.permute.xlu0 %1542  }
 0x102   :  { %1423 = vst.msk [vmem:[#allocation0 + $0x72] sm:$0xc0] %vm1416_vm1, %v1415_v63   ;;  %v3545_v5 = vld [vmem:[%s5990_s0 + $0x1d5] sm:$0x1]   ;;  %v3542_v9 = vld [vmem:[%s5990_s0 + $0x7c9] ss:$-406 sm:%s2770_s6]   ;;  %v2735_v14 = vsel %vm37_vm5, %v3536_v4, %v2730_v3  ;;  %2698 = vrot.lane.b32.xlu0 %v2697_v10, %s3706_s2  ;;  %v1645_v45 = vpop.permute.xlu1 %1644  }
 0x103   :  { %v3546_v7 = vld [vmem:[%s5990_s0 + $0x3d4] sm:$0x2]   ;;  %s2775_s10 = smov 96  ;;  %1520 = vst.msk [vmem:[#allocation0 + $0xb8] sm:$0x3] %vm1501_vm7, %v1517_v6   ;;  %s2813_s15 = smov 24  ;;  %v2773_v17 = vsel %vm32_vm4, %v3542_v9, %v2768_v8 }
 0x104   :  { %v3547_v11 = vld [vmem:[%s5990_s0 + $0xf4] sm:$0x1]   ;;  %s3707_s24 = smov 8   ;;  %v3537_v15 = vld [vmem:[%s5990_s0 + $0x37d] sm:$0x80]   ;;  %vm1544_vm8 = vcmask 605696   ;;  %v2799_v16 = vsel %vm90_vm0, %v3546_v7, %v3545_v5 }
 0x105   :  { %v3548_v12 = vld [vmem:[%s5990_s0 + $0x490] ss:$-412 sm:%s2808_s9]   ;;  %2757 = vrot.lane.b32.xlu1 %v2756_v2, %s3707_s24  ;;  %s2851_s27 = smov 6  ;;  %1460 = vst.msk [vmem:[#allocation0 + $0x20] sm:$0x3] %vm1458_vm2, %v1457_v13   ;;  %s2818_s7 = smov 96  ;;  %v2739_v24 = vsel %vm41_vm6, %v3537_v15, %v2735_v14  ;;  %v1586_v47 = vpop.permute.xlu0 %1585  }
 0x106   :  { %1462 = vst.msk [vmem:[#allocation0 + $0x46] sm:$0xc] %vm1458_vm2, %v1457_v13   ;;  %1464 = vst.msk [vmem:[#allocation0 + $0x6c] sm:$0x30] %vm1458_vm2, %v1457_v13   ;;  %v3543_v18 = vld [vmem:[%s5990_s0 + $0x1389] ss:$-824 sm:%s2775_s10]   ;;  %v2811_v22 = vsel %vm27_vm3, %v3548_v12, %v3547_v11  ;;  %2740 = vrot.lane.b32.xlu0 %v2739_v24, %s3707_s24  ;;  %v1688_v50 = vpop.permute.xlu1 %1687  }
 0x107   :  { %1466 = vst.msk [vmem:[#allocation0 + $0x92] sm:$0xc0] %vm1458_vm2, %v1457_v13   ;;  %v3552_v19 = vld [vmem:[%s5990_s0 + $0x1c2] sm:$0x1]   ;;  %v3554_v25 = vld [vmem:[%s5990_s0 + $0x145] sm:$0x1]   ;;  %v2778_v28 = vsel %vm37_vm5, %v3543_v18, %v2773_v17 }
 0x108   :  { %v3553_v21 = vld [vmem:[%s5990_s0 + $0x3c1] sm:$0x2]   ;;  %1563 = vst.msk [vmem:[#allocation0 + $0xb0] sm:$0x3] %vm1544_vm8, %v1560_v20   ;;  %v3555_v26 = vld [vmem:[%s5990_s0 + $0x677] ss:$-818 sm:%s2851_s27]  }
 0x109   :  { %v3549_v23 = vld [vmem:[%s5990_s0 + $0xcee] ss:$-818 sm:%s2813_s15]   ;;  %s2856_s12 = smov 24  ;;  %s3708_s14 = smov 6   ;;  %v3544_v29 = vld [vmem:[%s5990_s0 + $0x232] sm:$0x80]   ;;  %v2842_v30 = vsel %vm90_vm0, %v3553_v21, %v3552_v19  ;;  %v2854_v36 = vsel %vm27_vm3, %v3555_v26, %v3554_v25  ;;  %v1629_v52 = vpop.permute.xlu0 %1628  }
 0x10a   :  { %2800 = vrot.lane.b32.xlu1 %v2799_v16, %s3708_s14  ;;  %vm1587_vm9 = vcmask 589296   ;;  %1503 = vst.msk [vmem:[#allocation0 + $0x40] sm:$0x3] %vm1501_vm7, %v1500_v27   ;;  %1505 = vst.msk [vmem:[#allocation0 + $0x66] sm:$0xc] %vm1501_vm7, %v1500_v27   ;;  %v2816_v31 = vsel %vm32_vm4, %v3549_v23, %v2811_v22  ;;  %s2861_s24 = smov 96  ;;  %v2782_v38 = vsel %vm41_vm6, %v3544_v29, %v2778_v28  ;;  %v1731_v53 = vpop.permute.xlu1 %1730  }
 0x10b   :  { %1507 = vst.msk [vmem:[#allocation0 + $0x8c] sm:$0x30] %vm1501_vm7, %v1500_v27   ;;  %1509 = vst.msk [vmem:[#allocation0 + $0x12] sm:$0xc0] %vm1501_vm7, %v1500_v27   ;;  %v3550_v32 = vld [vmem:[%s5990_s0 + $0xa14] ss:$-406 sm:%s2818_s7]   ;;  %2783 = vrot.lane.b32.xlu0 %v2782_v38, %s3708_s14 }
 0x10c   :  { %v3559_v33 = vld [vmem:[%s5990_s0 + $0x1a9] sm:$0x1]   ;;  %v3556_v37 = vld [vmem:[%s5990_s0 + $0x6e7] ss:$-412 sm:%s2856_s12]   ;;  %1606 = vst.msk [vmem:[#allocation0 + $0xa8] sm:$0x3] %vm1587_vm9, %v1603_v34   ;;  %v2821_v40 = vsel %vm37_vm5, %v3550_v32, %v2816_v31 }
 0x10d   :  { %v3560_v35 = vld [vmem:[%s5990_s0 + $0x3a8] sm:$0x2]   ;;  %s3709_s25 = smov 4   ;;  %v3551_v41 = vld [vmem:[%s5990_s0 + $0x289] sm:$0x80]   ;;  %vm1630_vm3 = vcmask 572896   ;;  %v2859_v43 = vsel %vm32_vm4, %v3556_v37, %v2854_v36  ;;  %v1671_v54 = vpop.permute.xlu0 %1670  }
 0x10e   :  { %2843 = vrot.lane.b32.xlu1 %v2842_v30, %s3709_s25  ;;  %1546 = vst.msk [vmem:[#allocation0 + $0x60] sm:$0x3] %vm1544_vm8, %v1543_v39   ;;  %1548 = vst.msk [vmem:[#allocation0 + $0x86] sm:$0xc] %vm1544_vm8, %v1543_v39   ;;  %v2885_v42 = vsel %vm90_vm0, %v3560_v35, %v3559_v33  ;;  %v3557_v44 = vld [vmem:[%s5990_s0 + $0xa65] ss:$-406 sm:%s2861_s24]   ;;  %v2825_v46 = vsel %vm41_vm6, %v3551_v41, %v2821_v40  ;;  %v1774_v55 = vpop.permute.xlu1 %1773  }
 0x10f   :  { %1550 = vst.msk [vmem:[#allocation0 + $0xc] sm:$0x30] %vm1544_vm8, %v1543_v39   ;;  %1552 = vst.msk [vmem:[#allocation0 + $0x32] sm:$0xc0] %vm1544_vm8, %v1543_v39   ;;  %s3710_s29 = smov 2   ;;  %v2864_v48 = vsel %vm37_vm5, %v3557_v44, %v2859_v43  ;;  %vm1672_vm0 = vcmask 556496   ;;  %2826 = vrot.lane.b32.xlu0 %v2825_v46, %s3709_s25 }
 0x110   :  { %1648 = vst.msk [vmem:[#allocation0 + $0xa0] sm:$0x3] %vm1630_vm3, %v1645_v45   ;;  %v3558_v49 = vld [vmem:[%s5990_s0 + $0x2da] sm:$0x80]   ;;  %vm1715_vm4 = vcmask 540096   ;;  %vm1758_vm5 = vcmask 523696  }
 0x111   :  { %1589 = vst.msk [vmem:[#allocation0 + $0x80] sm:$0x3] %vm1587_vm9, %v1586_v47   ;;  %1591 = vst.msk [vmem:[#allocation0 + $0x6] sm:$0xc] %vm1587_vm9, %v1586_v47   ;;  %v2868_v51 = vsel %vm41_vm6, %v3558_v49, %v2864_v48  ;;  %v1714_v56 = vpop.permute.xlu0 %1713   ;;  %vm1801_vm6 = vcmask 507296   ;;  %vm1844_vm10 = vcmask 490896  }
 0x112   :  { %2886 = vrot.lane.b32.xlu1 %v2885_v42, %s3710_s29  ;;  %1593 = vst.msk [vmem:[#allocation0 + $0x2c] sm:$0x30] %vm1587_vm9, %v1586_v47   ;;  %1595 = vst.msk [vmem:[#allocation0 + $0x52] sm:$0xc0] %vm1587_vm9, %v1586_v47   ;;  %v1817_v57 = vpop.permute.xlu1 %1816   ;;  %vm1886_vm11 = vcmask 474496   ;;  %vm1929_vm12 = vcmask 458096  }
 0x113   :  { %1691 = vst.msk [vmem:[#allocation0 + $0xc0] sm:$0x3] %vm1672_vm0, %v1688_v50   ;;  %2869 = vrot.lane.b32.xlu0 %v2868_v51, %s3710_s29  ;;  %1674 = vst.msk [vmem:[#allocation0 + $0x20] sm:$0x3] %vm1672_vm0, %v1671_v54   ;;  %vm1972_vm13 = vcmask 441696   ;;  %vm2015_vm14 = vcmask 425296  }
 0x114   :  { %1631 = vst.msk [vmem:[#allocation0] sm:$0x3] %vm1630_vm3, %v1629_v52   ;;  %1633 = vst.msk [vmem:[#allocation0 + $0x26] sm:$0xc] %vm1630_vm3, %v1629_v52   ;;  %vm2058_vm15 = vcmask 408896   ;;  %vm2100_vm1 = vcmask 392496  }
 0x115   :  { %1635 = vst.msk [vmem:[#allocation0 + $0x4c] sm:$0x30] %vm1630_vm3, %v1629_v52   ;;  %1637 = vst.msk [vmem:[#allocation0 + $0x72] sm:$0xc0] %vm1630_vm3, %v1629_v52   ;;  %v1757_v58 = vpop.permute.xlu0 %1756   ;;  %vm2143_vm2 = vcmask 376096   ;;  %vm2186_vm7 = vcmask 359696  }
 0x116   :  { %1734 = vst.msk [vmem:[#allocation0 + $0xb8] sm:$0x3] %vm1715_vm4, %v1731_v53   ;;  %1717 = vst.msk [vmem:[#allocation0 + $0x40] sm:$0x3] %vm1715_vm4, %v1714_v56   ;;  %v1859_v59 = vpop.permute.xlu1 %1858   ;;  %vm2229_vm8 = vcmask 343296   ;;  %vm2272_vm9 = vcmask 326896  }
 0x117   :  { %1676 = vst.msk [vmem:[#allocation0 + $0x46] sm:$0xc] %vm1672_vm0, %v1671_v54   ;;  %1678 = vst.msk [vmem:[#allocation0 + $0x6c] sm:$0x30] %vm1672_vm0, %v1671_v54   ;;  %vm2314_vm3 = vcmask 310496  }
 0x118   :  { %1680 = vst.msk [vmem:[#allocation0 + $0x92] sm:$0xc0] %vm1672_vm0, %v1671_v54   ;;  %vm2357_vm0 = vcmask 294096  }
 0x119   :  { %1777 = vst.msk [vmem:[#allocation0 + $0xb0] sm:$0x3] %vm1758_vm5, %v1774_v55   ;;  %1760 = vst.msk [vmem:[#allocation0 + $0x60] sm:$0x3] %vm1758_vm5, %v1757_v58   ;;  %v1800_v60 = vpop.permute.xlu0 %1799  }
 0x11a   :  { %1719 = vst.msk [vmem:[#allocation0 + $0x66] sm:$0xc] %vm1715_vm4, %v1714_v56   ;;  %1721 = vst.msk [vmem:[#allocation0 + $0x8c] sm:$0x30] %vm1715_vm4, %v1714_v56   ;;  %v1902_v61 = vpop.permute.xlu1 %1901  }
 0x11b   :  { %1723 = vst.msk [vmem:[#allocation0 + $0x12] sm:$0xc0] %vm1715_vm4, %v1714_v56   ;;  %vm2400_vm4 = vcmask 277696  }
 0x11c   :  { %1820 = vst.msk [vmem:[#allocation0 + $0xa8] sm:$0x3] %vm1801_vm6, %v1817_v57   ;;  %1803 = vst.msk [vmem:[#allocation0 + $0x80] sm:$0x3] %vm1801_vm6, %v1800_v60  }
 0x11d   :  { %1762 = vst.msk [vmem:[#allocation0 + $0x86] sm:$0xc] %vm1758_vm5, %v1757_v58   ;;  %1764 = vst.msk [vmem:[#allocation0 + $0xc] sm:$0x30] %vm1758_vm5, %v1757_v58   ;;  %v1843_v62 = vpop.permute.xlu0 %1842  }
 0x11e   :  { %1766 = vst.msk [vmem:[#allocation0 + $0x32] sm:$0xc0] %vm1758_vm5, %v1757_v58   ;;  %v1945_v63 = vpop.permute.xlu1 %1944   ;;  %vm2443_vm5 = vcmask 261296  }
 0x11f   :  { %1862 = vst.msk [vmem:[#allocation0 + $0xa0] sm:$0x3] %vm1844_vm10, %v1859_v59   ;;  %1845 = vst.msk [vmem:[#allocation0] sm:$0x3] %vm1844_vm10, %v1843_v62  }
 0x120   :  { %1805 = vst.msk [vmem:[#allocation0 + $0x6] sm:$0xc] %vm1801_vm6, %v1800_v60   ;;  %1807 = vst.msk [vmem:[#allocation0 + $0x2c] sm:$0x30] %vm1801_vm6, %v1800_v60  }
 0x121   :  { %1809 = vst.msk [vmem:[#allocation0 + $0x52] sm:$0xc0] %vm1801_vm6, %v1800_v60   ;;  %v1885_v0 = vpop.permute.xlu0 %1884   ;;  %vm2486_vm6 = vcmask 244896  }
 0x122   :  { %1905 = vst.msk [vmem:[#allocation0 + $0xc0] sm:$0x3] %vm1886_vm11, %v1902_v61   ;;  %1888 = vst.msk [vmem:[#allocation0 + $0x20] sm:$0x3] %vm1886_vm11, %v1885_v0   ;;  %v1988_v1 = vpop.permute.xlu1 %1987  }
 0x123   :  { %1847 = vst.msk [vmem:[#allocation0 + $0x26] sm:$0xc] %vm1844_vm10, %v1843_v62   ;;  %1849 = vst.msk [vmem:[#allocation0 + $0x4c] sm:$0x30] %vm1844_vm10, %v1843_v62  }
 0x124   :  { %1851 = vst.msk [vmem:[#allocation0 + $0x72] sm:$0xc0] %vm1844_vm10, %v1843_v62   ;;  %vm2528_vm10 = vcmask 228496  }
 0x125   :  { %1948 = vst.msk [vmem:[#allocation0 + $0xb8] sm:$0x3] %vm1929_vm12, %v1945_v63   ;;  %v1928_v2 = vpop.permute.xlu0 %1927  }
 0x126   :  { %1890 = vst.msk [vmem:[#allocation0 + $0x46] sm:$0xc] %vm1886_vm11, %v1885_v0   ;;  %1892 = vst.msk [vmem:[#allocation0 + $0x6c] sm:$0x30] %vm1886_vm11, %v1885_v0   ;;  %v2031_v3 = vpop.permute.xlu1 %2030  }
 0x127   :  { %1894 = vst.msk [vmem:[#allocation0 + $0x92] sm:$0xc0] %vm1886_vm11, %v1885_v0   ;;  %vm2571_vm11 = vcmask 212096  }
 0x128   :  { %1991 = vst.msk [vmem:[#allocation0 + $0xb0] sm:$0x3] %vm1972_vm13, %v1988_v1  }
 0x129   :  { %1931 = vst.msk [vmem:[#allocation0 + $0x40] sm:$0x3] %vm1929_vm12, %v1928_v2   ;;  %1933 = vst.msk [vmem:[#allocation0 + $0x66] sm:$0xc] %vm1929_vm12, %v1928_v2   ;;  %v1971_v4 = vpop.permute.xlu0 %1970  }
 0x12a   :  { %1935 = vst.msk [vmem:[#allocation0 + $0x8c] sm:$0x30] %vm1929_vm12, %v1928_v2   ;;  %1937 = vst.msk [vmem:[#allocation0 + $0x12] sm:$0xc0] %vm1929_vm12, %v1928_v2   ;;  %v2073_v5 = vpop.permute.xlu1 %2072   ;;  %vm2614_vm12 = vcmask 195696  }
 0x12b   :  { %2034 = vst.msk [vmem:[#allocation0 + $0xa8] sm:$0x3] %vm2015_vm14, %v2031_v3  }
 0x12c   :  { %1974 = vst.msk [vmem:[#allocation0 + $0x60] sm:$0x3] %vm1972_vm13, %v1971_v4   ;;  %1976 = vst.msk [vmem:[#allocation0 + $0x86] sm:$0xc] %vm1972_vm13, %v1971_v4  }
 0x12d   :  { %1978 = vst.msk [vmem:[#allocation0 + $0xc] sm:$0x30] %vm1972_vm13, %v1971_v4   ;;  %1980 = vst.msk [vmem:[#allocation0 + $0x32] sm:$0xc0] %vm1972_vm13, %v1971_v4   ;;  %v2014_v6 = vpop.permute.xlu0 %2013   ;;  %vm2657_vm13 = vcmask 179296  }
 0x12e   :  { %2076 = vst.msk [vmem:[#allocation0 + $0xa0] sm:$0x3] %vm2058_vm15, %v2073_v5   ;;  %v2116_v7 = vpop.permute.xlu1 %2115  }
 0x12f   :  { %2017 = vst.msk [vmem:[#allocation0 + $0x80] sm:$0x3] %vm2015_vm14, %v2014_v6   ;;  %2019 = vst.msk [vmem:[#allocation0 + $0x6] sm:$0xc] %vm2015_vm14, %v2014_v6  }
 0x130   :  { %2021 = vst.msk [vmem:[#allocation0 + $0x2c] sm:$0x30] %vm2015_vm14, %v2014_v6   ;;  %2023 = vst.msk [vmem:[#allocation0 + $0x52] sm:$0xc0] %vm2015_vm14, %v2014_v6   ;;  %vm2700_vm14 = vcmask 162896  }
 0x131   :  { %2119 = vst.msk [vmem:[#allocation0 + $0xc0] sm:$0x3] %vm2100_vm1, %v2116_v7   ;;  %v2057_v8 = vpop.permute.xlu0 %2056  }
 0x132   :  { %2059 = vst.msk [vmem:[#allocation0] sm:$0x3] %vm2058_vm15, %v2057_v8   ;;  %2061 = vst.msk [vmem:[#allocation0 + $0x26] sm:$0xc] %vm2058_vm15, %v2057_v8  }
 0x133   :  { %2063 = vst.msk [vmem:[#allocation0 + $0x4c] sm:$0x30] %vm2058_vm15, %v2057_v8   ;;  %2065 = vst.msk [vmem:[#allocation0 + $0x72] sm:$0xc0] %vm2058_vm15, %v2057_v8   ;;  %v2159_v9 = vpop.permute.xlu1 %2158   ;;  %vm2742_vm15 = vcmask 146496  }
 0x134   :  { %2162 = vst.msk [vmem:[#allocation0 + $0xb8] sm:$0x3] %vm2143_vm2, %v2159_v9  }
 0x135   :  { %v2099_v10 = vpop.permute.xlu0 %2098  }
 0x136   :  { %2102 = vst.msk [vmem:[#allocation0 + $0x20] sm:$0x3] %vm2100_vm1, %v2099_v10   ;;  %2104 = vst.msk [vmem:[#allocation0 + $0x46] sm:$0xc] %vm2100_vm1, %v2099_v10  }
 0x137   :  { %2106 = vst.msk [vmem:[#allocation0 + $0x6c] sm:$0x30] %vm2100_vm1, %v2099_v10   ;;  %2108 = vst.msk [vmem:[#allocation0 + $0x92] sm:$0xc0] %vm2100_vm1, %v2099_v10   ;;  %vm2785_vm1 = vcmask 130096  }
 0x138   :  { %v2202_v11 = vpop.permute.xlu1 %2201  }
 0x139   :  { %2205 = vst.msk [vmem:[#allocation0 + $0xb0] sm:$0x3] %vm2186_vm7, %v2202_v11   ;;  %v2142_v12 = vpop.permute.xlu0 %2141  }
 0x13a   :  { %2145 = vst.msk [vmem:[#allocation0 + $0x40] sm:$0x3] %vm2143_vm2, %v2142_v12   ;;  %2147 = vst.msk [vmem:[#allocation0 + $0x66] sm:$0xc] %vm2143_vm2, %v2142_v12  }
 0x13b   :  { %2149 = vst.msk [vmem:[#allocation0 + $0x8c] sm:$0x30] %vm2143_vm2, %v2142_v12   ;;  %2151 = vst.msk [vmem:[#allocation0 + $0x12] sm:$0xc0] %vm2143_vm2, %v2142_v12   ;;  %vm2828_vm2 = vcmask 113696  }
 0x13d   :  { %v2245_v13 = vpop.permute.xlu1 %2244   ;;  %v2185_v14 = vpop.permute.xlu0 %2184  }
 0x13e   :  { %2248 = vst.msk [vmem:[#allocation0 + $0xa8] sm:$0x3] %vm2229_vm8, %v2245_v13  }
 0x13f   :  { %2188 = vst.msk [vmem:[#allocation0 + $0x60] sm:$0x3] %vm2186_vm7, %v2185_v14   ;;  %2190 = vst.msk [vmem:[#allocation0 + $0x86] sm:$0xc] %vm2186_vm7, %v2185_v14  }
 0x140   :  { %2192 = vst.msk [vmem:[#allocation0 + $0xc] sm:$0x30] %vm2186_vm7, %v2185_v14   ;;  %2194 = vst.msk [vmem:[#allocation0 + $0x32] sm:$0xc0] %vm2186_vm7, %v2185_v14   ;;  %vm2871_vm7 = vcmask 97296  }
 0x141   :  { %v2228_v16 = vpop.permute.xlu0 %2227  }
 0x142   :  { %v2287_v15 = vpop.permute.xlu1 %2286   ;;  %2231 = vst.msk [vmem:[#allocation0 + $0x80] sm:$0x3] %vm2229_vm8, %v2228_v16   ;;  %2233 = vst.msk [vmem:[#allocation0 + $0x6] sm:$0xc] %vm2229_vm8, %v2228_v16  }
 0x143   :  { %2290 = vst.msk [vmem:[#allocation0 + $0xa0] sm:$0x3] %vm2272_vm9, %v2287_v15  }
 0x144   :  { %2235 = vst.msk [vmem:[#allocation0 + $0x2c] sm:$0x30] %vm2229_vm8, %v2228_v16   ;;  %2237 = vst.msk [vmem:[#allocation0 + $0x52] sm:$0xc0] %vm2229_vm8, %v2228_v16  }
 0x145   :  { %v2271_v18 = vpop.permute.xlu0 %2270  }
 0x146   :  { %2273 = vst.msk [vmem:[#allocation0] sm:$0x3] %vm2272_vm9, %v2271_v18   ;;  %2275 = vst.msk [vmem:[#allocation0 + $0x26] sm:$0xc] %vm2272_vm9, %v2271_v18  }
 0x147   :  { %v2330_v17 = vpop.permute.xlu1 %2329   ;;  %2277 = vst.msk [vmem:[#allocation0 + $0x4c] sm:$0x30] %vm2272_vm9, %v2271_v18   ;;  %2279 = vst.msk [vmem:[#allocation0 + $0x72] sm:$0xc0] %vm2272_vm9, %v2271_v18  }
 0x148   :  { %2333 = vst.msk [vmem:[#allocation0 + $0xc0] sm:$0x3] %vm2314_vm3, %v2330_v17  }
 0x149   :  { %v2313_v20 = vpop.permute.xlu0 %2312  }
 0x14a   :  { %2316 = vst.msk [vmem:[#allocation0 + $0x20] sm:$0x3] %vm2314_vm3, %v2313_v20   ;;  %2318 = vst.msk [vmem:[#allocation0 + $0x46] sm:$0xc] %vm2314_vm3, %v2313_v20  }
 0x14b   :  { %v2373_v19 = vpop.permute.xlu1 %2372   ;;  %2320 = vst.msk [vmem:[#allocation0 + $0x6c] sm:$0x30] %vm2314_vm3, %v2313_v20   ;;  %2322 = vst.msk [vmem:[#allocation0 + $0x92] sm:$0xc0] %vm2314_vm3, %v2313_v20  }
 0x14c   :  { %2376 = vst.msk [vmem:[#allocation0 + $0xb8] sm:$0x3] %vm2357_vm0, %v2373_v19  }
 0x14d   :  { %v2356_v22 = vpop.permute.xlu0 %2355  }
 0x14e   :  { %2359 = vst.msk [vmem:[#allocation0 + $0x40] sm:$0x3] %vm2357_vm0, %v2356_v22   ;;  %2361 = vst.msk [vmem:[#allocation0 + $0x66] sm:$0xc] %vm2357_vm0, %v2356_v22  }
 0x14f   :  { %2363 = vst.msk [vmem:[#allocation0 + $0x8c] sm:$0x30] %vm2357_vm0, %v2356_v22   ;;  %2365 = vst.msk [vmem:[#allocation0 + $0x12] sm:$0xc0] %vm2357_vm0, %v2356_v22  }
 0x150   :  { %v2416_v21 = vpop.permute.xlu1 %2415  }
 0x151   :  { %2419 = vst.msk [vmem:[#allocation0 + $0xb0] sm:$0x3] %vm2400_vm4, %v2416_v21  }
 0x153   :  { %v2399_v24 = vpop.permute.xlu0 %2398  }
 0x154   :  { %2402 = vst.msk [vmem:[#allocation0 + $0x60] sm:$0x3] %vm2400_vm4, %v2399_v24   ;;  %2404 = vst.msk [vmem:[#allocation0 + $0x86] sm:$0xc] %vm2400_vm4, %v2399_v24  }
 0x155   :  { %v2459_v23 = vpop.permute.xlu1 %2458   ;;  %2406 = vst.msk [vmem:[#allocation0 + $0xc] sm:$0x30] %vm2400_vm4, %v2399_v24   ;;  %2408 = vst.msk [vmem:[#allocation0 + $0x32] sm:$0xc0] %vm2400_vm4, %v2399_v24  }
 0x156   :  { %2462 = vst.msk [vmem:[#allocation0 + $0xa8] sm:$0x3] %vm2443_vm5, %v2459_v23  }
 0x157   :  { %v2442_v26 = vpop.permute.xlu0 %2441  }
 0x158   :  { %2445 = vst.msk [vmem:[#allocation0 + $0x80] sm:$0x3] %vm2443_vm5, %v2442_v26   ;;  %2447 = vst.msk [vmem:[#allocation0 + $0x6] sm:$0xc] %vm2443_vm5, %v2442_v26  }
 0x159   :  { %2449 = vst.msk [vmem:[#allocation0 + $0x2c] sm:$0x30] %vm2443_vm5, %v2442_v26   ;;  %2451 = vst.msk [vmem:[#allocation0 + $0x52] sm:$0xc0] %vm2443_vm5, %v2442_v26  }
 0x15a   :  { %v2501_v25 = vpop.permute.xlu1 %2500  }
 0x15b   :  { %2504 = vst.msk [vmem:[#allocation0 + $0xa0] sm:$0x3] %vm2486_vm6, %v2501_v25   ;;  %v2485_v28 = vpop.permute.xlu0 %2484  }
 0x15c   :  { %2487 = vst.msk [vmem:[#allocation0] sm:$0x3] %vm2486_vm6, %v2485_v28   ;;  %2489 = vst.msk [vmem:[#allocation0 + $0x26] sm:$0xc] %vm2486_vm6, %v2485_v28  }
 0x15d   :  { %2491 = vst.msk [vmem:[#allocation0 + $0x4c] sm:$0x30] %vm2486_vm6, %v2485_v28   ;;  %2493 = vst.msk [vmem:[#allocation0 + $0x72] sm:$0xc0] %vm2486_vm6, %v2485_v28  }
 0x15f   :  { %v2544_v27 = vpop.permute.xlu1 %2543  }
 0x160   :  { %2547 = vst.msk [vmem:[#allocation0 + $0xc0] sm:$0x3] %vm2528_vm10, %v2544_v27  }
 0x161   :  { %v2527_v30 = vpop.permute.xlu0 %2526  }
 0x162   :  { %2530 = vst.msk [vmem:[#allocation0 + $0x20] sm:$0x3] %vm2528_vm10, %v2527_v30   ;;  %2532 = vst.msk [vmem:[#allocation0 + $0x46] sm:$0xc] %vm2528_vm10, %v2527_v30  }
 0x163   :  { %2534 = vst.msk [vmem:[#allocation0 + $0x6c] sm:$0x30] %vm2528_vm10, %v2527_v30   ;;  %2536 = vst.msk [vmem:[#allocation0 + $0x92] sm:$0xc0] %vm2528_vm10, %v2527_v30  }
 0x164   :  { %v2587_v29 = vpop.permute.xlu1 %2586  }
 0x165   :  { %2590 = vst.msk [vmem:[#allocation0 + $0xb8] sm:$0x3] %vm2571_vm11, %v2587_v29   ;;  %v2570_v32 = vpop.permute.xlu0 %2569  }
 0x166   :  { %2573 = vst.msk [vmem:[#allocation0 + $0x40] sm:$0x3] %vm2571_vm11, %v2570_v32   ;;  %2575 = vst.msk [vmem:[#allocation0 + $0x66] sm:$0xc] %vm2571_vm11, %v2570_v32  }
 0x167   :  { %2577 = vst.msk [vmem:[#allocation0 + $0x8c] sm:$0x30] %vm2571_vm11, %v2570_v32   ;;  %2579 = vst.msk [vmem:[#allocation0 + $0x12] sm:$0xc0] %vm2571_vm11, %v2570_v32  }
 0x168   :  { %v2630_v31 = vpop.permute.xlu1 %2629  }
 0x169   :  { %2633 = vst.msk [vmem:[#allocation0 + $0xb0] sm:$0x3] %vm2614_vm12, %v2630_v31  }
 0x16a   :  { %v2613_v34 = vpop.permute.xlu0 %2612  }
 0x16b   :  { %2616 = vst.msk [vmem:[#allocation0 + $0x60] sm:$0x3] %vm2614_vm12, %v2613_v34   ;;  %2618 = vst.msk [vmem:[#allocation0 + $0x86] sm:$0xc] %vm2614_vm12, %v2613_v34  }
 0x16c   :  { %2620 = vst.msk [vmem:[#allocation0 + $0xc] sm:$0x30] %vm2614_vm12, %v2613_v34   ;;  %2622 = vst.msk [vmem:[#allocation0 + $0x32] sm:$0xc0] %vm2614_vm12, %v2613_v34  }
 0x16d   :  { %v2673_v33 = vpop.permute.xlu1 %2672  }
 0x16e   :  { %2676 = vst.msk [vmem:[#allocation0 + $0xa8] sm:$0x3] %vm2657_vm13, %v2673_v33  }
 0x170   :  { %v2656_v36 = vpop.permute.xlu0 %2655  }
 0x171   :  { %2659 = vst.msk [vmem:[#allocation0 + $0x80] sm:$0x3] %vm2657_vm13, %v2656_v36   ;;  %2661 = vst.msk [vmem:[#allocation0 + $0x6] sm:$0xc] %vm2657_vm13, %v2656_v36  }
 0x172   :  { %v2715_v35 = vpop.permute.xlu1 %2714   ;;  %2663 = vst.msk [vmem:[#allocation0 + $0x2c] sm:$0x30] %vm2657_vm13, %v2656_v36   ;;  %2665 = vst.msk [vmem:[#allocation0 + $0x52] sm:$0xc0] %vm2657_vm13, %v2656_v36  }
 0x173   :  { %2718 = vst.msk [vmem:[#allocation0 + $0xa0] sm:$0x3] %vm2700_vm14, %v2715_v35  }
 0x174   :  { %v2699_v38 = vpop.permute.xlu0 %2698  }
 0x175   :  { %2701 = vst.msk [vmem:[#allocation0] sm:$0x3] %vm2700_vm14, %v2699_v38   ;;  %2703 = vst.msk [vmem:[#allocation0 + $0x26] sm:$0xc] %vm2700_vm14, %v2699_v38  }
 0x176   :  { %2705 = vst.msk [vmem:[#allocation0 + $0x4c] sm:$0x30] %vm2700_vm14, %v2699_v38   ;;  %2707 = vst.msk [vmem:[#allocation0 + $0x72] sm:$0xc0] %vm2700_vm14, %v2699_v38  }
 0x177   :  { %v2758_v37 = vpop.permute.xlu1 %2757  }
 0x178   :  { %2761 = vst.msk [vmem:[#allocation0 + $0xc0] sm:$0x3] %vm2742_vm15, %v2758_v37   ;;  %v2741_v41 = vpop.permute.xlu0 %2740  }
 0x179   :  { %2744 = vst.msk [vmem:[#allocation0 + $0x20] sm:$0x3] %vm2742_vm15, %v2741_v41   ;;  %2746 = vst.msk [vmem:[#allocation0 + $0x46] sm:$0xc] %vm2742_vm15, %v2741_v41  }
 0x17a   :  { %v3032_v39 = vld [vmem:[#allocation0 + $0xa0] sm:$0x3]  ;;  %2748 = vst.msk [vmem:[#allocation0 + $0x6c] sm:$0x30] %vm2742_vm15, %v2741_v41   ;;  %2750 = vst.msk [vmem:[#allocation0 + $0x92] sm:$0xc0] %vm2742_vm15, %v2741_v41  }
 0x17b   :  { %3580 = vst [vmem:[%s5991_s1 + $0x28] sm:$0x3] %v3032_v39 }
 0x17c   :  { %v2801_v40 = vpop.permute.xlu1 %2800   ;;  %v2895_v44 = vld [vmem:[#allocation0] sm:$0x3]  ;;  %v2927_v45 = vld [vmem:[#allocation0 + $0x28] sm:$0x3] }
 0x17d   :  { %2804 = vst.msk [vmem:[#allocation0 + $0xb8] sm:$0x3] %vm2785_vm1, %v2801_v40   ;;  %v2962_v46 = vld [vmem:[#allocation0 + $0x50] sm:$0x3]  ;;  %v2784_v47 = vpop.permute.xlu0 %2783   ;;  %2898 = vst [vmem:[%s5991_s1] sm:$0x3] %v2895_v44 }
 0x17e   :  { %3565 = vst [vmem:[%s5991_s1 + $0xa] sm:$0x3] %v2927_v45  ;;  %3570 = vst [vmem:[%s5991_s1 + $0x14] sm:$0x3] %v2962_v46  ;;  %v2997_v48 = vld [vmem:[#allocation0 + $0x78] sm:$0x3] }
 0x17f   :  { %v3060_v42 = vld [vmem:[#allocation0 + $0xc0] sm:$0x3]  ;;  %2787 = vst.msk [vmem:[#allocation0 + $0x40] sm:$0x3] %vm2785_vm1, %v2784_v47   ;;  %2789 = vst.msk [vmem:[#allocation0 + $0x66] sm:$0xc] %vm2785_vm1, %v2784_v47  }
 0x180   :  { %v2844_v43 = vpop.permute.xlu1 %2843   ;;  %3584 = vst [vmem:[%s5991_s1 + $0x30] sm:$0x3] %v3060_v42  ;;  %2791 = vst.msk [vmem:[#allocation0 + $0x8c] sm:$0x30] %vm2785_vm1, %v2784_v47   ;;  %v2920_v51 = vld [vmem:[#allocation0 + $0x20] sm:$0x3] }
 0x181   :  { %2847 = vst.msk [vmem:[#allocation0 + $0xb0] sm:$0x3] %vm2828_vm2, %v2844_v43   ;;  %3575 = vst [vmem:[%s5991_s1 + $0x1e] sm:$0x3] %v2997_v48  ;;  %v2955_v52 = vld [vmem:[#allocation0 + $0x48] sm:$0x3]  ;;  %v2827_v54 = vpop.permute.xlu0 %2826  }
 0x182   :  { %2793 = vst.msk [vmem:[#allocation0 + $0x12] sm:$0xc0] %vm2785_vm1, %v2784_v47   ;;  %v2990_v53 = vld [vmem:[#allocation0 + $0x70] sm:$0x3]  ;;  %3564 = vst [vmem:[%s5991_s1 + $0x8] sm:$0x3] %v2920_v51 }
 0x183   :  { %3569 = vst [vmem:[%s5991_s1 + $0x12] sm:$0x3] %v2955_v52  ;;  %3574 = vst [vmem:[%s5991_s1 + $0x1c] sm:$0x3] %v2990_v53  ;;  %v3025_v55 = vld [vmem:[#allocation0 + $0x98] sm:$0x3] }
 0x184   :  { %v3053_v49 = vld [vmem:[#allocation0 + $0xb8] sm:$0x3]  ;;  %v2887_v50 = vpop.permute.xlu1 %2886   ;;  %2830 = vst.msk [vmem:[#allocation0 + $0x60] sm:$0x3] %vm2828_vm2, %v2827_v54   ;;  %2832 = vst.msk [vmem:[#allocation0 + $0x86] sm:$0xc] %vm2828_vm2, %v2827_v54  }
 0x185   :  { %3583 = vst [vmem:[%s5991_s1 + $0x2e] sm:$0x3] %v3053_v49  ;;  %2890 = vst.msk [vmem:[#allocation0 + $0xa8] sm:$0x3] %vm2871_vm7, %v2887_v50   ;;  %v2870_v60 = vpop.permute.xlu0 %2869  }
 0x186   :  { %2834 = vst.msk [vmem:[#allocation0 + $0xc] sm:$0x30] %vm2828_vm2, %v2827_v54   ;;  %2836 = vst.msk [vmem:[#allocation0 + $0x32] sm:$0xc0] %vm2828_vm2, %v2827_v54   ;;  %v2948_v58 = vld [vmem:[#allocation0 + $0x40] sm:$0x3] }
 0x187   :  { %3579 = vst [vmem:[%s5991_s1 + $0x26] sm:$0x3] %v3025_v55  ;;  %v2983_v59 = vld [vmem:[#allocation0 + $0x68] sm:$0x3]  ;;  %3568 = vst [vmem:[%s5991_s1 + $0x10] sm:$0x3] %v2948_v58 }
 0x188   :  { %v3046_v56 = vld [vmem:[#allocation0 + $0xb0] sm:$0x3]  ;;  %3573 = vst [vmem:[%s5991_s1 + $0x1a] sm:$0x3] %v2983_v59  ;;  %2873 = vst.msk [vmem:[#allocation0 + $0x80] sm:$0x3] %vm2871_vm7, %v2870_v60  }
 0x189   :  { %3582 = vst [vmem:[%s5991_s1 + $0x2c] sm:$0x3] %v3046_v56  ;;  %v2913_v57 = vld [vmem:[#allocation0 + $0x18] sm:$0x3]  ;;  %v3018_v61 = vld [vmem:[#allocation0 + $0x90] sm:$0x3] }
 0x18a   :  { %3563 = vst [vmem:[%s5991_s1 + $0x6] sm:$0x3] %v2913_v57  ;;  %2875 = vst.msk [vmem:[#allocation0 + $0x6] sm:$0xc] %vm2871_vm7, %v2870_v60  }
 0x18b   :  { %2877 = vst.msk [vmem:[#allocation0 + $0x2c] sm:$0x30] %vm2871_vm7, %v2870_v60   ;;  %2879 = vst.msk [vmem:[#allocation0 + $0x52] sm:$0xc0] %vm2871_vm7, %v2870_v60   ;;  %v2976_v1 = vld [vmem:[#allocation0 + $0x60] sm:$0x3] }
 0x18c   :  { %3578 = vst [vmem:[%s5991_s1 + $0x24] sm:$0x3] %v3018_v61  ;;  %v3039_v62 = vld [vmem:[#allocation0 + $0xa8] sm:$0x3]  ;;  %3572 = vst [vmem:[%s5991_s1 + $0x18] sm:$0x3] %v2976_v1 }
 0x18d   :  { %3581 = vst [vmem:[%s5991_s1 + $0x2a] sm:$0x3] %v3039_v62  ;;  %v2906_v63 = vld [vmem:[#allocation0 + $0x10] sm:$0x3]  ;;  %v2941_v0 = vld [vmem:[#allocation0 + $0x38] sm:$0x3] }
 0x18e   :  { %3562 = vst [vmem:[%s5991_s1 + $0x4] sm:$0x3] %v2906_v63  ;;  %3567 = vst [vmem:[%s5991_s1 + $0xe] sm:$0x3] %v2941_v0  ;;  %v3011_v2 = vld [vmem:[#allocation0 + $0x88] sm:$0x3] }
 0x18f   :  { %3577 = vst [vmem:[%s5991_s1 + $0x22] sm:$0x3] %v3011_v2  ;;  %v3004_v6 = vld [vmem:[#allocation0 + $0x80] sm:$0x3] }
 0x190   :  { %3576 = vst [vmem:[%s5991_s1 + $0x20] sm:$0x3] %v3004_v6 }
 0x191   :  { %v2900_v3 = vld [vmem:[#allocation0 + $0x8] sm:$0x3] }
 0x192   :  { %v2934_v4 = vld [vmem:[#allocation0 + $0x30] sm:$0x3]  ;;  %v2969_v5 = vld [vmem:[#allocation0 + $0x58] sm:$0x3]  ;;  %3561 = vst [vmem:[%s5991_s1 + $0x2] sm:$0x3] %v2900_v3 }
 0x193   :  { %3566 = vst [vmem:[%s5991_s1 + $0xc] sm:$0x3] %v2934_v4  ;;  %3571 = vst [vmem:[%s5991_s1 + $0x16] sm:$0x3] %v2969_v5 }

// kernel: forward_pallas.12
= control target key start
LH: loop header
LB: loop body
LE: loop exit
PB: predicated region body
PF: predicated region fallthrough
CT: control target
= control target key end

     0   :  { %s611_s12 = smov 0   ;;  %s613_s13 = smov 0   ;;  %s694_s0 = inlined_call_operand.vmem [shape: f32[8,3328], index: 0, kind: input, shape index: {}]   ;;  %s695_s1 = inlined_call_operand.vmem [shape: f32[3328,128], index: 1, kind: input, shape index: {}]   ;;  %s696_s2 = inlined_call_operand.vmem [shape: f32[1,128], index: 2, kind: input, shape index: {}]   ;;  %s697_s3 = inlined_call_operand.vmem [shape: f32[8,128], index: 3, kind: output, shape index: {}]  }
   0x1   :  { %s615_s14 = smov 0  }
   0x2 LB: > { %s25_s15 = sadd.s32 1, %s584_s13  ;;  %p495_p0 = scmp.ge.s32.totalorder %s588_s14, 1  ;;  %s588_s14 = sphi %s615_s14, %s13_s14   ;;  %s584_s13 = sphi %s613_s13, %s699_s13   ;;  %s580_s12 = sphi %s611_s12, %s698_s12  }
   0x3   : > { %p26_p1 = scmp.ge.s32.totalorder %s25_s15, 13  ;;  %p189_p2 = scmp.lt.s32.totalorder %s588_s14, 14 }
   0x5   : > { %s701_s15 = smov (%p26_p1, %s25_s15), 0  ;;  %p190_p3 = pnand %p495_p0, %p189_p2 }
   0x6   : > { %s496_s16 = sshll.u32 (!%p190_p3), %s580_s12, 1  ;;  %s498_s17 = sshll.u32 (!%p190_p3), %s580_s12, 5 }
   0x7   : > { %193 = sbr.rel (%p190_p3) target bundleno = 267 (0x10b), region = 32  ;;  %p233_p4 = scmp.lt.s32.totalorder (!%p190_p3), %s496_s16, 25 }
   0x8   : > { %p241_p5 = scmp.lt.s32.totalorder (!%p190_p3), %s498_s17, 415  ;;  %p500_p6 = scmp.ne.s32.totalorder (!%p190_p3), %s580_s12, 0 }
   0xc   : > { %s703_s16 = smov (!%p233_p4, %s496_s16), 25  ;;  %s705_s17 = smov (!%p241_p5, %s498_s17), 415 }
   0xd   : > { %s497_s18 = sshll.u32 %s703_s16, 3  ;;  %s499_s22 = sshll.u32 %s705_s17, 3 }
   0xe   : > { %s636_s21 = scalar_lea.vmem %s694_s0, %s497_s18  ;;  %s641_s25 = scalar_lea.vmem %s695_s1, %s499_s22 }
   0xf   : > { %262 = sbr.rel (%p500_p6) target bundleno = 22 (0x16), region = 36 }
  0x14   : > { %v590_v0 = vmov 0.0  }
  0x15   : > { %263 = vst [vmem:[#allocation2] sm:$0xff] %v590_v0 }
  0x16 PF: > { %v298_v1 = vld [vmem:[%s641_s25 + $0xf8] sm:$0xff]  ;;  %v297_v3 = vld [vmem:[%s641_s25 + $0xf0] sm:$0xff]  ;;  %v296_v5 = vld [vmem:[%s641_s25 + $0xe8] sm:$0xff]  ;;  %p501_p7 = scmp.ne.s32.totalorder %s580_s12, 12 }
  0x17   : > { %v282_v2 = vld [vmem:[%s641_s25 + $0x78] sm:$0xff]  ;;  %506 = vmatprep.subr.mxu0 %v298_v1  ;;  %v281_v4 = vld [vmem:[%s641_s25 + $0x70] sm:$0xff]  ;;  %v280_v6 = vld [vmem:[%s641_s25 + $0x68] sm:$0xff] }
  0x18   : > { %507 = vmatpush3.msra.mxu0 %v282_v2  ;;  %v295_v7 = vld [vmem:[%s641_s25 + $0xe0] sm:$0xff]  ;;  %v294_v9 = vld [vmem:[%s641_s25 + $0xd8] sm:$0xff]  ;;  %v293_v11 = vld [vmem:[%s641_s25 + $0xd0] sm:$0xff] }
  0x19   : > { %508 = vmatprep.subr.mxu0 %v297_v3  ;;  %v279_v8 = vld [vmem:[%s641_s25 + $0x60] sm:$0xff]  ;;  %v278_v10 = vld [vmem:[%s641_s25 + $0x58] sm:$0xff]  ;;  %v277_v12 = vld [vmem:[%s641_s25 + $0x50] sm:$0xff] }
  0x1a   : > { %509 = vmatpush3.msra.mxu0 %v281_v4  ;;  %v292_v13 = vld [vmem:[%s641_s25 + $0xc8] sm:$0xff]  ;;  %v291_v16 = vld [vmem:[%s641_s25 + $0xc0] sm:$0xff]  ;;  %v290_v18 = vld [vmem:[%s641_s25 + $0xb8] sm:$0xff] }
  0x1b   : > { %510 = vmatprep.subr.mxu0 %v296_v5  ;;  %v266_v14 = vld [vmem:[%s636_s21 + $0x8] sm:$0xff]  ;;  %v275_v17 = vld [vmem:[%s641_s25 + $0x40] sm:$0xff]  ;;  %v274_v19 = vld [vmem:[%s641_s25 + $0x38] sm:$0xff] }
  0x1c   : > { %511 = vmatpush3.msra.mxu0 %v280_v6  ;;  %v276_v15 = vld [vmem:[%s641_s25 + $0x48] sm:$0xff]  ;;  %363 = vmatprep.mubr.f32.mxu0 %v266_v14  ;;  %v289_v20 = vld [vmem:[%s641_s25 + $0xb0] sm:$0xff]  ;;  %v287_v24 = vld [vmem:[%s641_s25 + $0xa0] sm:$0xff] }
  0x1d   : > { %512 = vmatprep.subr.mxu0 %v295_v7  ;;  %v273_v21 = vld [vmem:[%s641_s25 + $0x30] sm:$0xff]  ;;  %v288_v22 = vld [vmem:[%s641_s25 + $0xa8] sm:$0xff]  ;;  %v271_v25 = vld [vmem:[%s641_s25 + $0x20] sm:$0xff] }
  0x1e   : > { %513 = vmatpush3.msra.mxu0 %v279_v8  ;;  %v272_v23 = vld [vmem:[%s641_s25 + $0x28] sm:$0xff]  ;;  %v286_v26 = vld [vmem:[%s641_s25 + $0x98] sm:$0xff]  ;;  %v285_v28 = vld [vmem:[%s641_s25 + $0x90] sm:$0xff] }
  0x1f   : > { %514 = vmatprep.subr.mxu0 %v294_v9  ;;  %v270_v27 = vld [vmem:[%s641_s25 + $0x18] sm:$0xff]  ;;  %v269_v29 = vld [vmem:[%s641_s25 + $0x10] sm:$0xff]  ;;  %v284_v30 = vld [vmem:[%s641_s25 + $0x88] sm:$0xff] }
  0x20   : > { %515 = vmatpush3.msra.mxu0 %v278_v10  ;;  %v268_v31 = vld [vmem:[%s641_s25 + $0x8] sm:$0xff]  ;;  %v283_v32 = vld [vmem:[%s641_s25 + $0x80] sm:$0xff] }
  0x21   : > { %516 = vmatprep.subr.mxu0 %v293_v11  ;;  %v267_v33 = vld [vmem:[%s641_s25] sm:$0xff] }
  0x22   : > { %517 = vmatpush3.msra.mxu0 %v277_v12  ;;  %v265_v34 = vld [vmem:[%s636_s21] sm:$0xff] }
  0x23   : > { %518 = vmatprep.subr.mxu0 %v292_v13  ;;  %v264_v36 = vld [vmem:[#allocation2] sm:$0xff] }
  0x24   : > { %519 = vmatpush3.msra.mxu0 %v276_v15 }
  0x25   : > { %520 = vmatprep.subr.mxu0 %v291_v16 }
  0x26   : > { %521 = vmatpush3.msra.mxu0 %v275_v17 }
  0x27   : > { %522 = vmatprep.subr.mxu0 %v290_v18 }
  0x28   : > { %523 = vmatpush3.msra.mxu0 %v274_v19 }
  0x29   : > { %524 = vmatprep.subr.mxu0 %v289_v20 }
  0x2a   : > { %525 = vmatpush3.msra.mxu0 %v273_v21 }
  0x2b   : > { %526 = vmatprep.subr.mxu0 %v288_v22 }
  0x2c   : > { %527 = vmatpush3.msra.mxu0 %v272_v23 }
  0x2d   : > { %528 = vmatprep.subr.mxu0 %v287_v24 }
  0x2e   : > { %529 = vmatpush3.msra.mxu0 %v271_v25 }
  0x2f   : > { %530 = vmatprep.subr.mxu0 %v286_v26 }
  0x30   : > { %531 = vmatpush3.msra.mxu0 %v270_v27 }
  0x31   : > { %532 = vmatprep.subr.mxu0 %v285_v28 }
  0x32   : > { %533 = vmatpush3.msra.mxu0 %v269_v29 }
  0x33   : > { %534 = vmatprep.subr.mxu0 %v284_v30 }
  0x34   : > { %535 = vmatpush3.msra.mxu0 %v268_v31 }
  0x35   : > { %536 = vmatprep.subr.mxu0 %v283_v32 }
  0x36   : > { %537 = vmatpush3.msra.mxu0 %v267_v33 }
  0x37   : > { %364 = vmatmul.mubr.f32.vlgmr.msra.gmra.mxu0 %v265_v34 }
  0xf7   : > { %v538_v35 = vpop.f32.mrf.mxu0 }
  0xf9   : > { %v539_v37 = vpop.f32.mrf.mxu0 }
  0xfa   : > { %v540_v38 = vadd.f32 %v539_v37, %v538_v35  ;;  %374 = sbr.rel (%p501_p7) target bundleno = 267 (0x10b), region = 40 }
  0xfc   : > { %v369_v39 = vadd.f32 %v540_v38, %v264_v36 }
  0xfe   : > { %370 = vst [vmem:[#allocation2] sm:$0xff] %v369_v39 }
  0xff   : > { %v502_v41 = vld [vmem:[%s696_s2] ss:$0 sm:$0xff] }
 0x105   : > { %v375_v40 = vld [vmem:[#allocation2] sm:$0xff] }
 0x106   : > { %v383_v42 = vadd.f32 %v502_v41, %v375_v40 }
 0x108   : > { %v384_v43 = vmax.f32 %v383_v42, 0.0 }
 0x10a   : > { %385 = vst [vmem:[%s697_s3] sm:$0xff] %v384_v43 }
 0x10b PF: > { %s13_s14 = sadd.s32 1, %s588_s14   ;;  %s698_s12 = smov %s584_s13 }
 0x10c   : > { %p10_p8 = scmp.ge.s32.totalorder %s13_s14, 15   ;;  %s699_s13 = smov %s701_s15 }
 0x10e   :  { %12 = sbr.rel (!%p10_p8) target bundleno = 2 (0x2), region = 76 }

// kernel: forward_pallas.13
= control target key start
LH: loop header
LB: loop body
LE: loop exit
PB: predicated region body
PF: predicated region fallthrough
CT: control target
= control target key end

     0   :  { %v626_v0 = vmov 0.0   ;;  %vm627_vm0 = vmmov 0   ;;  %s968_s3 = inlined_call_operand.vmem [shape: f32[128,128], index: 3, kind: input, shape index: {}]   ;;  %s969_s2 = inlined_call_operand.vmem [shape: f32[128,128], index: 2, kind: input, shape index: {}]   ;;  %s970_s1 = inlined_call_operand.vmem [shape: f32[8,128], index: 1, kind: input, shape index: {}]   ;;  %s971_s0 = inlined_call_operand.vmem [shape: f32[8,128], index: 0, kind: input, shape index: {}]   ;;  %s972_s5 = inlined_call_operand.vmem [shape: f32[128,128], index: 5, kind: input, shape index: {}]   ;;  %s973_s7 = inlined_call_operand.vmem [shape: f32[128,128], index: 7, kind: input, shape index: {}]   ;;  %s974_s4 = inlined_call_operand.vmem [shape: f32[1,128], index: 4, kind: input, shape index: {}]   ;;  %s975_s6 = inlined_call_operand.vmem [shape: f32[1,128], index: 6, kind: input, shape index: {}]   ;;  %s976_s8 = inlined_call_operand.vmem [shape: f32[1,128], index: 8, kind: input, shape index: {}]   ;;  %s977_s9 = inlined_call_operand.vmem [shape: f32[8,128], index: 9, kind: output, shape index: {0}]   ;;  %s978_s10 = inlined_call_operand.vmem [shape: f32[8,128], index: 10, kind: output, shape index: {1}]  }
   0x1   :  { %484 = vmatprep.subr.mxu0 %v626_v0  ;;  %519 = vmatprep.subr.mxu1 %v626_v0  ;;  %v67_v1 = vld [vmem:[%s968_s3 + $0x78] sm:$0xff]  ;;  %v66_v3 = vld [vmem:[%s968_s3 + $0x70] sm:$0xff]  ;;  %v65_v5 = vld [vmem:[%s968_s3 + $0x68] sm:$0xff] }
   0x2   :  { %v50_v2 = vld [vmem:[%s969_s2 + $0x78] sm:$0xff]  ;;  %485 = vmatpush3.msra.mxu0 %v67_v1  ;;  %v49_v4 = vld [vmem:[%s969_s2 + $0x70] sm:$0xff]  ;;  %v48_v6 = vld [vmem:[%s969_s2 + $0x68] sm:$0xff]  ;;  %516 = vmatprep.mubr.msk.f32.mxu0 %vm627_vm0, %v626_v0 }
   0x3   :  { %520 = vmatpush3.msra.mxu1 %v50_v2  ;;  %486 = vmatprep.subr.mxu0 %v626_v0  ;;  %v64_v7 = vld [vmem:[%s968_s3 + $0x60] sm:$0xff]  ;;  %v63_v9 = vld [vmem:[%s968_s3 + $0x58] sm:$0xff]  ;;  %v62_v11 = vld [vmem:[%s968_s3 + $0x50] sm:$0xff] }
   0x4   :  { %521 = vmatprep.subr.mxu1 %v626_v0  ;;  %487 = vmatpush3.msra.mxu0 %v66_v3  ;;  %v47_v8 = vld [vmem:[%s969_s2 + $0x60] sm:$0xff]  ;;  %v46_v10 = vld [vmem:[%s969_s2 + $0x58] sm:$0xff]  ;;  %v45_v12 = vld [vmem:[%s969_s2 + $0x50] sm:$0xff] }
   0x5   :  { %522 = vmatpush3.msra.mxu1 %v49_v4  ;;  %488 = vmatprep.subr.mxu0 %v626_v0  ;;  %v61_v13 = vld [vmem:[%s968_s3 + $0x48] sm:$0xff]  ;;  %v60_v15 = vld [vmem:[%s968_s3 + $0x40] sm:$0xff]  ;;  %v59_v17 = vld [vmem:[%s968_s3 + $0x38] sm:$0xff] }
   0x6   :  { %523 = vmatprep.subr.mxu1 %v626_v0  ;;  %489 = vmatpush3.msra.mxu0 %v65_v5  ;;  %v44_v14 = vld [vmem:[%s969_s2 + $0x48] sm:$0xff]  ;;  %v43_v16 = vld [vmem:[%s969_s2 + $0x40] sm:$0xff]  ;;  %v42_v18 = vld [vmem:[%s969_s2 + $0x38] sm:$0xff] }
   0x7   :  { %524 = vmatpush3.msra.mxu1 %v48_v6  ;;  %490 = vmatprep.subr.mxu0 %v626_v0  ;;  %v58_v19 = vld [vmem:[%s968_s3 + $0x30] sm:$0xff]  ;;  %v57_v21 = vld [vmem:[%s968_s3 + $0x28] sm:$0xff]  ;;  %v56_v23 = vld [vmem:[%s968_s3 + $0x20] sm:$0xff] }
   0x8   :  { %525 = vmatprep.subr.mxu1 %v626_v0  ;;  %491 = vmatpush3.msra.mxu0 %v64_v7  ;;  %v41_v20 = vld [vmem:[%s969_s2 + $0x30] sm:$0xff]  ;;  %v40_v22 = vld [vmem:[%s969_s2 + $0x28] sm:$0xff]  ;;  %v39_v24 = vld [vmem:[%s969_s2 + $0x20] sm:$0xff] }
   0x9   :  { %526 = vmatpush3.msra.mxu1 %v47_v8  ;;  %492 = vmatprep.subr.mxu0 %v626_v0  ;;  %v55_v25 = vld [vmem:[%s968_s3 + $0x18] sm:$0xff]  ;;  %v54_v27 = vld [vmem:[%s968_s3 + $0x10] sm:$0xff]  ;;  %v53_v29 = vld [vmem:[%s968_s3 + $0x8] sm:$0xff] }
   0xa   :  { %527 = vmatprep.subr.mxu1 %v626_v0  ;;  %493 = vmatpush3.msra.mxu0 %v63_v9  ;;  %v38_v26 = vld [vmem:[%s969_s2 + $0x18] sm:$0xff]  ;;  %v37_v28 = vld [vmem:[%s969_s2 + $0x10] sm:$0xff]  ;;  %v36_v30 = vld [vmem:[%s969_s2 + $0x8] sm:$0xff] }
   0xb   :  { %528 = vmatpush3.msra.mxu1 %v46_v10  ;;  %494 = vmatprep.subr.mxu0 %v626_v0  ;;  %v52_v31 = vld [vmem:[%s968_s3] sm:$0xff]  ;;  %v232_v35 = vld [vmem:[%s972_s5 + $0x78] sm:$0xff]  ;;  %v231_v37 = vld [vmem:[%s972_s5 + $0x70] sm:$0xff] }
   0xc   :  { %529 = vmatprep.subr.mxu1 %v626_v0  ;;  %495 = vmatpush3.msra.mxu0 %v62_v11  ;;  %v35_v32 = vld [vmem:[%s969_s2] sm:$0xff]  ;;  %v326_v36 = vld [vmem:[%s973_s7 + $0x78] sm:$0xff]  ;;  %v325_v38 = vld [vmem:[%s973_s7 + $0x70] sm:$0xff] }
   0xd   :  { %530 = vmatpush3.msra.mxu1 %v45_v12  ;;  %496 = vmatprep.subr.mxu0 %v626_v0  ;;  %v51_v33 = vld [vmem:[%s970_s1] sm:$0xff]  ;;  %v230_v39 = vld [vmem:[%s972_s5 + $0x68] sm:$0xff]  ;;  %v228_v43 = vld [vmem:[%s972_s5 + $0x58] sm:$0xff] }
   0xe   :  { %531 = vmatprep.subr.mxu1 %v626_v0  ;;  %497 = vmatpush3.msra.mxu0 %v61_v13  ;;  %v34_v34 = vld [vmem:[%s971_s0] sm:$0xff]  ;;  %v324_v40 = vld [vmem:[%s973_s7 + $0x68] sm:$0xff]  ;;  %v322_v44 = vld [vmem:[%s973_s7 + $0x58] sm:$0xff] }
   0xf   :  { %532 = vmatpush3.msra.mxu1 %v44_v14  ;;  %498 = vmatprep.subr.mxu0 %v626_v0  ;;  %v229_v41 = vld [vmem:[%s972_s5 + $0x60] sm:$0xff]  ;;  %v227_v45 = vld [vmem:[%s972_s5 + $0x50] sm:$0xff]  ;;  %v226_v47 = vld [vmem:[%s972_s5 + $0x48] sm:$0xff] }
  0x10   :  { %533 = vmatprep.subr.mxu1 %v626_v0  ;;  %499 = vmatpush3.msra.mxu0 %v60_v15  ;;  %v323_v42 = vld [vmem:[%s973_s7 + $0x60] sm:$0xff]  ;;  %v321_v46 = vld [vmem:[%s973_s7 + $0x50] sm:$0xff]  ;;  %v320_v48 = vld [vmem:[%s973_s7 + $0x48] sm:$0xff] }
  0x11   :  { %534 = vmatpush3.msra.mxu1 %v43_v16  ;;  %500 = vmatprep.subr.mxu0 %v626_v0  ;;  %v225_v49 = vld [vmem:[%s972_s5 + $0x40] sm:$0xff]  ;;  %v224_v51 = vld [vmem:[%s972_s5 + $0x38] sm:$0xff]  ;;  %v223_v53 = vld [vmem:[%s972_s5 + $0x30] sm:$0xff] }
  0x12   :  { %535 = vmatprep.subr.mxu1 %v626_v0  ;;  %501 = vmatpush3.msra.mxu0 %v59_v17  ;;  %v319_v50 = vld [vmem:[%s973_s7 + $0x40] sm:$0xff]  ;;  %v318_v52 = vld [vmem:[%s973_s7 + $0x38] sm:$0xff]  ;;  %v317_v54 = vld [vmem:[%s973_s7 + $0x30] sm:$0xff] }
  0x13   :  { %536 = vmatpush3.msra.mxu1 %v42_v18  ;;  %502 = vmatprep.subr.mxu0 %v626_v0  ;;  %v222_v55 = vld [vmem:[%s972_s5 + $0x28] sm:$0xff]  ;;  %v221_v57 = vld [vmem:[%s972_s5 + $0x20] sm:$0xff]  ;;  %v220_v59 = vld [vmem:[%s972_s5 + $0x18] sm:$0xff] }
  0x14   :  { %537 = vmatprep.subr.mxu1 %v626_v0  ;;  %503 = vmatpush3.msra.mxu0 %v58_v19  ;;  %v316_v56 = vld [vmem:[%s973_s7 + $0x28] sm:$0xff]  ;;  %v315_v58 = vld [vmem:[%s973_s7 + $0x20] sm:$0xff]  ;;  %v314_v60 = vld [vmem:[%s973_s7 + $0x18] sm:$0xff] }
  0x15   :  { %538 = vmatpush3.msra.mxu1 %v41_v20  ;;  %504 = vmatprep.subr.mxu0 %v626_v0  ;;  %v219_v61 = vld [vmem:[%s972_s5 + $0x10] sm:$0xff]  ;;  %v218_v63 = vld [vmem:[%s972_s5 + $0x8] sm:$0xff]  ;;  %v217_v2 = vld [vmem:[%s972_s5] sm:$0xff] }
  0x16   :  { %539 = vmatprep.subr.mxu1 %v626_v0  ;;  %505 = vmatpush3.msra.mxu0 %v57_v21  ;;  %v313_v62 = vld [vmem:[%s973_s7 + $0x10] sm:$0xff]  ;;  %v312_v1 = vld [vmem:[%s973_s7 + $0x8] sm:$0xff]  ;;  %v311_v3 = vld [vmem:[%s973_s7] sm:$0xff] }
  0x17   :  { %540 = vmatpush3.msra.mxu1 %v40_v22  ;;  %506 = vmatprep.subr.mxu0 %v626_v0  ;;  %v413_v6 = vld [vmem:[%s974_s4] ss:$0 sm:$0xff] }
  0x18   :  { %541 = vmatprep.subr.mxu1 %v626_v0  ;;  %507 = vmatpush3.msra.mxu0 %v56_v23  ;;  %v414_v11 = vld [vmem:[%s975_s6] ss:$0 sm:$0xff] }
  0x19   :  { %542 = vmatpush3.msra.mxu1 %v39_v24  ;;  %508 = vmatprep.subr.mxu0 %v626_v0  ;;  %v415_v12 = vld [vmem:[%s976_s8] ss:$0 sm:$0xff] }
  0x1a   :  { %543 = vmatprep.subr.mxu1 %v626_v0  ;;  %509 = vmatpush3.msra.mxu0 %v55_v25 }
  0x1b   :  { %544 = vmatpush3.msra.mxu1 %v38_v26  ;;  %510 = vmatprep.subr.mxu0 %v626_v0 }
  0x1c   :  { %545 = vmatprep.subr.mxu1 %v626_v0  ;;  %511 = vmatpush3.msra.mxu0 %v54_v27 }
  0x1d   :  { %546 = vmatpush3.msra.mxu1 %v37_v28  ;;  %512 = vmatprep.subr.mxu0 %v626_v0 }
  0x1e   :  { %547 = vmatprep.subr.mxu1 %v626_v0  ;;  %513 = vmatpush3.msra.mxu0 %v53_v29 }
  0x1f   :  { %548 = vmatpush3.msra.mxu1 %v36_v30  ;;  %514 = vmatprep.subr.mxu0 %v626_v0 }
  0x20   :  { %549 = vmatprep.subr.mxu1 %v626_v0  ;;  %515 = vmatpush3.msra.mxu0 %v52_v31 }
  0x21   :  { %550 = vmatpush3.msra.mxu1 %v35_v32  ;;  %551 = vmatprep.mubr.msk.f32.mxu1 %vm627_vm0, %v626_v0 }
  0x22   :  { %517 = vmatmul.mubr.f32.vlgmr.msra.gmra.mxu0 %v51_v33  ;;  %552 = vmatmul.mubr.f32.vlgmr.msra.gmra.mxu1 %v34_v34 }
  0x23   :  { %554 = vmatprep.subr.mxu0 %v626_v0  ;;  %589 = vmatprep.subr.mxu1 %v626_v0 }
  0x24   :  { %555 = vmatpush3.msra.mxu0 %v232_v35  ;;  %590 = vmatpush3.msra.mxu1 %v326_v36 }
  0x25   :  { %556 = vmatprep.subr.mxu0 %v626_v0  ;;  %591 = vmatprep.subr.mxu1 %v626_v0 }
  0x26   :  { %557 = vmatpush3.msra.mxu0 %v231_v37  ;;  %592 = vmatpush3.msra.mxu1 %v325_v38 }
  0x27   :  { %558 = vmatprep.subr.mxu0 %v626_v0  ;;  %593 = vmatprep.subr.mxu1 %v626_v0 }
  0x28   :  { %559 = vmatpush3.msra.mxu0 %v230_v39  ;;  %594 = vmatpush3.msra.mxu1 %v324_v40 }
  0x29   :  { %560 = vmatprep.subr.mxu0 %v626_v0  ;;  %595 = vmatprep.subr.mxu1 %v626_v0 }
  0x2a   :  { %561 = vmatpush3.msra.mxu0 %v229_v41  ;;  %596 = vmatpush3.msra.mxu1 %v323_v42 }
  0x2b   :  { %562 = vmatprep.subr.mxu0 %v626_v0  ;;  %597 = vmatprep.subr.mxu1 %v626_v0 }
  0x2c   :  { %563 = vmatpush3.msra.mxu0 %v228_v43  ;;  %598 = vmatpush3.msra.mxu1 %v322_v44 }
  0x2d   :  { %564 = vmatprep.subr.mxu0 %v626_v0  ;;  %599 = vmatprep.subr.mxu1 %v626_v0 }
  0x2e   :  { %565 = vmatpush3.msra.mxu0 %v227_v45  ;;  %600 = vmatpush3.msra.mxu1 %v321_v46 }
  0x2f   :  { %566 = vmatprep.subr.mxu0 %v626_v0  ;;  %601 = vmatprep.subr.mxu1 %v626_v0 }
  0x30   :  { %567 = vmatpush3.msra.mxu0 %v226_v47  ;;  %602 = vmatpush3.msra.mxu1 %v320_v48 }
  0x31   :  { %568 = vmatprep.subr.mxu0 %v626_v0  ;;  %603 = vmatprep.subr.mxu1 %v626_v0 }
  0x32   :  { %569 = vmatpush3.msra.mxu0 %v225_v49  ;;  %604 = vmatpush3.msra.mxu1 %v319_v50 }
  0x33   :  { %570 = vmatprep.subr.mxu0 %v626_v0  ;;  %605 = vmatprep.subr.mxu1 %v626_v0 }
  0x34   :  { %571 = vmatpush3.msra.mxu0 %v224_v51  ;;  %606 = vmatpush3.msra.mxu1 %v318_v52 }
  0x35   :  { %572 = vmatprep.subr.mxu0 %v626_v0  ;;  %607 = vmatprep.subr.mxu1 %v626_v0 }
  0x36   :  { %573 = vmatpush3.msra.mxu0 %v223_v53  ;;  %608 = vmatpush3.msra.mxu1 %v317_v54 }
  0x37   :  { %574 = vmatprep.subr.mxu0 %v626_v0  ;;  %609 = vmatprep.subr.mxu1 %v626_v0 }
  0x38   :  { %575 = vmatpush3.msra.mxu0 %v222_v55  ;;  %610 = vmatpush3.msra.mxu1 %v316_v56 }
  0x39   :  { %576 = vmatprep.subr.mxu0 %v626_v0  ;;  %611 = vmatprep.subr.mxu1 %v626_v0 }
  0x3a   :  { %577 = vmatpush3.msra.mxu0 %v221_v57  ;;  %612 = vmatpush3.msra.mxu1 %v315_v58 }
  0x3b   :  { %578 = vmatprep.subr.mxu0 %v626_v0  ;;  %613 = vmatprep.subr.mxu1 %v626_v0 }
  0x3c   :  { %586 = vmatprep.mubr.msk.f32.mxu0 %vm627_vm0, %v626_v0  ;;  %621 = vmatprep.mubr.msk.f32.mxu1 %vm627_vm0, %v626_v0 }
  0x3d   :  { %579 = vmatpush3.msra.mxu0 %v220_v59  ;;  %614 = vmatpush3.msra.mxu1 %v314_v60 }
  0x3e   :  { %580 = vmatprep.subr.mxu0 %v626_v0  ;;  %615 = vmatprep.subr.mxu1 %v626_v0 }
  0x3f   :  { %581 = vmatpush3.msra.mxu0 %v219_v61  ;;  %616 = vmatpush3.msra.mxu1 %v313_v62 }
  0x40   :  { %582 = vmatprep.subr.mxu0 %v626_v0  ;;  %617 = vmatprep.subr.mxu1 %v626_v0 }
  0x41   :  { %583 = vmatpush3.msra.mxu0 %v218_v63  ;;  %618 = vmatpush3.msra.mxu1 %v312_v1 }
  0x42   :  { %584 = vmatprep.subr.mxu0 %v626_v0  ;;  %619 = vmatprep.subr.mxu1 %v626_v0 }
  0x43   :  { %585 = vmatpush3.msra.mxu0 %v217_v2  ;;  %620 = vmatpush3.msra.mxu1 %v311_v3 }
  0xe2   :  { %v134_v4 = vpop.f32.mrf.mxu0  ;;  %v204_v5 = vpop.f32.mrf.mxu1 }
  0xe3   :  { %v205_v7 = vadd.f32 %v204_v5, %v134_v4 }
  0xe4   :  { %v518_v8 = vpop.f32.mrf.mxu0  ;;  %v553_v9 = vpop.f32.mrf.mxu1 }
  0xe5   :  { %v215_v0 = vadd.f32 %v413_v6, %v205_v7 }
  0xe7   :  { %v216_v10 = vmax.f32 %v215_v0, 0.0 }
  0xe9   :  { %587 = vmatmul.mubr.f32.vlgmr.msra.gmra.mxu0 %v216_v10  ;;  %622 = vmatmul.mubr.f32.vlgmr.msra.gmra.mxu1 %v216_v10 }
 0x1a9   :  { %v306_v13 = vpop.f32.mrf.mxu0  ;;  %v400_v14 = vpop.f32.mrf.mxu1 }
 0x1aa   :  { %v307_v15 = vadd.f32 %v414_v11, %v306_v13  ;;  %v401_v16 = vadd.f32 %v415_v12, %v400_v14 }
 0x1ab   :  { %v588_v17 = vpop.f32.mrf.mxu0  ;;  %v623_v18 = vpop.f32.mrf.mxu1 }
 0x1ac   :  { %310 = vst [vmem:[%s977_s9] sm:$0xff] %v307_v15  ;;  %404 = vst [vmem:[%s978_s10] sm:$0xff] %v401_v16 }

</bundles_post_ra>
